<compile_context>
chip_gen: v5e
topology: v5e:2x2
jax: 0.10.0
libtpu: 0.0.40
codegen_flags: <defaults>
</compile_context>

<pallas_src>
import functools

import jax
import jax.numpy as jnp
from jax.experimental import pallas as pl
from jax.experimental.pallas import tpu as pltpu

HIDDEN = 512
NUM_LSTM_LAYERS = 4
NUM_CLASSES = 41
T_CHUNK = 64                        # max LSTM time chunk per grid step
_VMEM_LIMIT = 48 * 1024 * 1024      # explicit scoped-VMEM budget (v5e/v6e/v7x safe)


def _round_up(x, m):
    return (x + m - 1) // m * m


# ---------------------------------------------------------------------------
# Pallas kernels
# ---------------------------------------------------------------------------

def _mm_affine_kernel(x_ref, w_ref, scale_ref, shift_ref, o_ref, acc_ref, *, relu):
    """One (m, n) output tile; k (reduction) is the innermost grid axis."""
    k = pl.program_id(2)

    @pl.when(k == 0)
    def _():
        acc_ref[...] = jnp.zeros_like(acc_ref)

    acc_ref[...] += jnp.dot(x_ref[...], w_ref[...],
                            preferred_element_type=jnp.float32)

    @pl.when(k == pl.num_programs(2) - 1)
    def _():
        y = acc_ref[...] * scale_ref[...] + shift_ref[...]
        if relu:
            y = jnp.maximum(y, 0.0)
        o_ref[...] = y.astype(o_ref.dtype)


def matmul_affine(x, wpack, *, n_out, relu=False, out_dtype=jnp.bfloat16):
    """y = act((x @ w) * scale + shift)  -- bf16 MXU matmul, f32 accumulation.

    x: (M, K).  wpack: pre-padded bf16 'w' (Kp, Np) plus f32 'scale'/'shift'
    (1, Np), prepared once in prepare_params().  Returns (M, n_out).
    """
    w, scale, shift = wpack['w'], wpack['scale'], wpack['shift']
    M, K = x.shape
    Kp, Np = w.shape

    if M <= 256:
        tm = _round_up(max(M, 8), 16)
        Mp = tm
    else:
        tm = 256
        Mp = _round_up(M, 256)
    tn = 256 if Np % 256 == 0 else 128
    tk = 256 if Kp % 256 == 0 else 128

    if (Mp, Kp) != (M, K):
        x = jnp.pad(x, ((0, Mp - M), (0, Kp - K)))
    if x.dtype != jnp.bfloat16:
        x = x.astype(jnp.bfloat16)

    out = pl.pallas_call(
        functools.partial(_mm_affine_kernel, relu=relu),
        out_shape=jax.ShapeDtypeStruct((Mp, Np), out_dtype),
        grid_spec=pltpu.PrefetchScalarGridSpec(
            num_scalar_prefetch=0,
            grid=(Mp // tm, Np // tn, Kp // tk),
            in_specs=[
                pl.BlockSpec((tm, tk), lambda m, n, k: (m, k)),
                pl.BlockSpec((tk, tn), lambda m, n, k: (k, n)),
                pl.BlockSpec((1, tn), lambda m, n, k: (0, n)),
                pl.BlockSpec((1, tn), lambda m, n, k: (0, n)),
            ],
            out_specs=pl.BlockSpec((tm, tn), lambda m, n, k: (m, n)),
            scratch_shapes=[pltpu.VMEM((tm, tn), jnp.float32)],
        ),
        compiler_params=pltpu.CompilerParams(
            dimension_semantics=("parallel", "parallel", "arbitrary"),
            vmem_limit_bytes=_VMEM_LIMIT),
    )(x, w, scale, shift)
    return out[:M, :n_out]


def _bilstm_kernel(gxf_ref, gxr_ref, whf_ref, whr_ref, len_ref,
                   outf_ref, outr_ref,
                   hf_ref, cf_ref, hr_ref, cr_ref):
    """One bidirectional LSTM layer, one time chunk per grid step.

    Forward direction walks chunks in ascending order; the reverse direction's
    gx/out index_maps walk the chunk axis backwards and the inner loop runs
    back-to-front, so both directions share one serial grid sweep while their
    h/c states persist in scratch.  pack_padded/pad_packed semantics: state
    updates are masked with (t < length) and outputs past the length are zero.
    """
    s = pl.program_id(0)
    n_chunks = pl.num_programs(0)
    t_chunk = gxf_ref.shape[0]
    H = whf_ref.shape[0]

    @pl.when(s == 0)
    def _():
        hf_ref[...] = jnp.zeros_like(hf_ref)
        cf_ref[...] = jnp.zeros_like(cf_ref)
        hr_ref[...] = jnp.zeros_like(hr_ref)
        cr_ref[...] = jnp.zeros_like(cr_ref)

    lens = len_ref[...]                                   # (B, 1) int32

    def cell(gates, h_ref, c_ref):
        i_g = jax.nn.sigmoid(gates[:, 0:H])
        f_g = jax.nn.sigmoid(gates[:, H:2 * H])
        g_g = jnp.tanh(gates[:, 2 * H:3 * H])
        o_g = jax.nn.sigmoid(gates[:, 3 * H:4 * H])
        c_new = f_g * c_ref[...] + i_g * g_g
        h_new = o_g * jnp.tanh(c_new)
        return h_new, c_new

    @pl.loop(0, t_chunk)
    def _(u):
        # ---- forward direction: global time t_f = s*t_chunk + u
        t_f = s * t_chunk + u
        g_f = gxf_ref[u].astype(jnp.float32) + jnp.dot(
            hf_ref[...].astype(jnp.bfloat16), whf_ref[...],
            preferred_element_type=jnp.float32)
        h_new, c_new = cell(g_f, hf_ref, cf_ref)
        m_f = lens > t_f
        hf_ref[...] = jnp.where(m_f, h_new, hf_ref[...])
        cf_ref[...] = jnp.where(m_f, c_new, cf_ref[...])
        outf_ref[u] = jnp.where(m_f, h_new, jnp.zeros_like(h_new))

        # ---- reverse direction: this grid step holds chunk (n_chunks-1-s),
        # processed back-to-front at global time t_r.
        u_r = t_chunk - 1 - u
        t_r = (n_chunks - 1 - s) * t_chunk + u_r
        g_r = gxr_ref[u_r].astype(jnp.float32) + jnp.dot(
            hr_ref[...].astype(jnp.bfloat16), whr_ref[...],
            preferred_element_type=jnp.float32)
        h_new_r, c_new_r = cell(g_r, hr_ref, cr_ref)
        m_r = lens > t_r
        hr_ref[...] = jnp.where(m_r, h_new_r, hr_ref[...])
        cr_ref[...] = jnp.where(m_r, c_new_r, cr_ref[...])
        outr_ref[u_r] = jnp.where(m_r, h_new_r, jnp.zeros_like(h_new_r))


def lstm_recurrence(gx_f, gx_r, whh_f, whh_r, len_arr, t_chunk):
    """gx_*: (Tp, B, 4H) bf16 (time-major), whh_*: (H, 4H) bf16."""
    Tp, B, H4 = gx_f.shape
    H = H4 // 4
    assert Tp % t_chunk == 0
    nT = Tp // t_chunk
    out_sd = jax.ShapeDtypeStruct((Tp, B, H), jnp.float32)
    out_f, out_r = pl.pallas_call(
        _bilstm_kernel,
        out_shape=(out_sd, out_sd),
        grid_spec=pltpu.PrefetchScalarGridSpec(
            num_scalar_prefetch=0,
            grid=(nT,),
            in_specs=[
                pl.BlockSpec((t_chunk, B, H4), lambda s: (s, 0, 0)),
                pl.BlockSpec((t_chunk, B, H4), lambda s: (nT - 1 - s, 0, 0)),
                pl.BlockSpec((H, H4), lambda s: (0, 0)),
                pl.BlockSpec((H, H4), lambda s: (0, 0)),
                pl.BlockSpec((B, 1), lambda s: (0, 0)),
            ],
            out_specs=(
                pl.BlockSpec((t_chunk, B, H), lambda s: (s, 0, 0)),
                pl.BlockSpec((t_chunk, B, H), lambda s: (nT - 1 - s, 0, 0)),
            ),
            scratch_shapes=[pltpu.VMEM((B, H), jnp.float32) for _ in range(4)],
        ),
        compiler_params=pltpu.CompilerParams(
            dimension_semantics=("arbitrary",),
            vmem_limit_bytes=_VMEM_LIMIT),
    )(gx_f, gx_r, whh_f, whh_r, len_arr)
    return out_f, out_r


# ---------------------------------------------------------------------------
# Model building blocks (thin glue around the kernels)
# ---------------------------------------------------------------------------

def conv_bn_relu(x_tbc, wpack, *, n_out, ksz, stride, pad):
    """Conv1d + folded BatchNorm (eval) + ReLU on time-major (T, B, Cin)."""
    if pad:
        x_tbc = jnp.pad(x_tbc, ((pad, pad), (0, 0), (0, 0)))
    T, B, C = x_tbc.shape
    t_out = (T - ksz) // stride + 1
    taps = [x_tbc[k: k + stride * (t_out - 1) + 1: stride] for k in range(ksz)]
    patches = jnp.concatenate(taps, axis=-1).reshape(t_out * B, ksz * C)
    out = matmul_affine(patches, wpack, n_out=n_out, relu=True)
    return out.reshape(t_out, B, n_out)


def bilstm_layer(x_tbi, lp, len_arr, t_chunk):
    Tp, B, I = x_tbi.shape
    rows = x_tbi.reshape(Tp * B, I)
    gx_f = matmul_affine(rows, lp['gx_f'], n_out=4 * HIDDEN).reshape(Tp, B, 4 * HIDDEN)
    gx_r = matmul_affine(rows, lp['gx_r'], n_out=4 * HIDDEN).reshape(Tp, B, 4 * HIDDEN)
    out_f, out_r = lstm_recurrence(gx_f, gx_r, lp['whh_f'], lp['whh_r'],
                                   len_arr, t_chunk)
    return jnp.concatenate([out_f, out_r], axis=-1)       # (Tp, B, 2H)


# ---------------------------------------------------------------------------
# Deterministic parameter init (shapes from the PyTorch module) + packing
# ---------------------------------------------------------------------------

def _normal(key, shape, scale):
    return jax.random.normal(key, shape, jnp.float32) * scale


def init_bn(key, c):
    k1, k2, k3, k4 = jax.random.split(key, 4)
    return dict(gamma=1.0 + 0.1 * jax.random.normal(k1, (c,), jnp.float32),
                beta=0.05 * jax.random.normal(k2, (c,), jnp.float32),
                mean=0.05 * jax.random.normal(k3, (c,), jnp.float32),
                var=0.9 + 0.2 * jax.random.uniform(k4, (c,), jnp.float32))


def init_conv(key, cout, cin, ksz):
    k1, k2 = jax.random.split(key)
    sc = (cin * ksz) ** -0.5
    return _normal(k1, (cout, cin, ksz), sc), _normal(k2, (cout,), 0.02)


def init_lstm_dir(key, input_size, hidden):
    k = jax.random.split(key, 4)
    sc = hidden ** -0.5
    return dict(w_ih=_normal(k[0], (4 * hidden, input_size), sc),
                w_hh=_normal(k[1], (4 * hidden, hidden), sc),
                b_ih=_normal(k[2], (4 * hidden,), sc),
                b_hh=_normal(k[3], (4 * hidden,), sc))


def init_linear(key, din, dout):
    k1, k2 = jax.random.split(key)
    sc = din ** -0.5
    return dict(w=_normal(k1, (dout, din), sc), b=_normal(k2, (dout,), sc))


def init_model(key):
    ks = jax.random.split(key, 4 + 2 * NUM_LSTM_LAYERS + 2)
    raw = dict(conv1=dict(conv=init_conv(ks[0], 128, 13, 5), bn=init_bn(ks[1], 128)),
               conv2=dict(conv=init_conv(ks[2], 256, 128, 3), bn=init_bn(ks[3], 256)),
               lstm=[])
    for l in range(NUM_LSTM_LAYERS):
        i_sz = 256 if l == 0 else 2 * HIDDEN
        raw['lstm'].append([init_lstm_dir(ks[4 + 2 * l], i_sz, HIDDEN),
                            init_lstm_dir(ks[5 + 2 * l], i_sz, HIDDEN)])
    raw['lin1'] = init_linear(ks[4 + 2 * NUM_LSTM_LAYERS], 2 * HIDDEN, 2048)
    raw['lin2'] = init_linear(ks[5 + 2 * NUM_LSTM_LAYERS], 2048, NUM_CLASSES)
    return raw


def _pack_matmul(w_kn, scale_n, shift_n):
    K, N = w_kn.shape
    Kp, Np = _round_up(K, 128), _round_up(N, 128)
    w = jnp.pad(w_kn.astype(jnp.float32),
                ((0, Kp - K), (0, Np - N))).astype(jnp.bfloat16)
    scale = jnp.pad(scale_n.astype(jnp.float32).reshape(1, N),
                    ((0, 0), (0, Np - N)))
    shift = jnp.pad(shift_n.astype(jnp.float32).reshape(1, N),
                    ((0, 0), (0, Np - N)))
    return dict(w=w, scale=scale, shift=shift)


def _pack_conv_bn(conv, bn):
    w, b = conv
    cout, cin, ksz = w.shape
    s = bn['gamma'] / jnp.sqrt(bn['var'] + 1e-5)
    shift = bn['beta'] - bn['mean'] * s + b * s
    w_flat = jnp.transpose(w, (2, 1, 0)).reshape(ksz * cin, cout)
    return _pack_matmul(w_flat, s, shift)


def prepare_params(raw):
    """One-time weight preprocessing: BN fold, transpose, pad, bf16 cast."""
    prep = dict(conv1=_pack_conv_bn(raw['conv1']['conv'], raw['conv1']['bn']),
                conv2=_pack_conv_bn(raw['conv2']['conv'], raw['conv2']['bn']),
                lstm=[])
    for fwd, rev in raw['lstm']:
        layer = {}
        for tag, p in (('f', fwd), ('r', rev)):
            bias = p['b_ih'] + p['b_hh']
            layer['gx_' + tag] = _pack_matmul(p['w_ih'].T, jnp.ones_like(bias), bias)
            layer['whh_' + tag] = p['w_hh'].T.astype(jnp.bfloat16)   # (H, 4H)
        prep['lstm'].append(layer)
    prep['mlp1'] = _pack_matmul(raw['lin1']['w'].T,
                                jnp.ones((2048,), jnp.float32), raw['lin1']['b'])
    prep['mlp2'] = _pack_matmul(raw['lin2']['w'].T,
                                jnp.ones((NUM_CLASSES,), jnp.float32), raw['lin2']['b'])
    return jax.block_until_ready(prep)


# ---------------------------------------------------------------------------
# Full forward (eval mode)
# ---------------------------------------------------------------------------

def _pick_t_chunk(t_len, batch):
    return min(t_len, T_CHUNK, max(8, 512 // max(batch, 1)))


@functools.partial(jax.jit, static_argnums=(2,))
def _forward_impl(prep, x, lens):
    # x: (B, T, 13) batch-first, like the PyTorch call site.
    B, T, _ = x.shape
    xt = jnp.transpose(x, (1, 0, 2))                      # time-major (T, B, 13)

    # --- embedding: Conv1d + BN + ReLU x2 (Dropout is an eval-mode no-op)
    h = conv_bn_relu(xt, prep['conv1'], n_out=128, ksz=5, stride=2, pad=0)
    h = conv_bn_relu(h, prep['conv2'], n_out=256, ksz=3, stride=1, pad=1)
    t1 = h.shape[0]

    len_arr = jnp.asarray(lens, jnp.int32).reshape(B, 1)

    # pad time to a multiple of the LSTM chunk (padded steps are length-masked)
    t_chunk = _pick_t_chunk(t1, B)
    tp = _round_up(t1, t_chunk)
    if tp != t1:
        h = jnp.pad(h, ((0, tp - t1), (0, 0), (0, 0)))

    # --- 4-layer bidirectional LSTM (packed-sequence semantics via masking)
    for lp in prep['lstm']:
        h = bilstm_layer(h, lp, len_arr, t_chunk)         # (tp, B, 1024)

    # --- pad_packed_sequence(batch_first=True): pad to max(lengths)
    l_max = max(lens)
    h = h[:l_max]                                         # (l_max, B, 1024)

    # --- classification MLP (Dropout is an eval-mode no-op)
    rows = h.reshape(l_max * B, 2 * HIDDEN)
    y = matmul_affine(rows, prep['mlp1'], n_out=2048, relu=True)
    y = matmul_affine(y, prep['mlp2'], n_out=NUM_CLASSES, relu=False,
                      out_dtype=jnp.float32)
    return y.reshape(l_max, B, NUM_CLASSES).transpose(1, 0, 2)   # (B, l_max, 41)


def network_forward(prep, x, len_x):
    """Eval-mode forward of `Network`; returns (logits, lengths_list)."""
    # TODO(synk): train-mode Dropout (stochastic masking) is not modelled; this
    # is the eval forward where Dropout is the identity.
    B, T, _ = x.shape
    t1 = (T - 5) // 2 + 1                                 # Conv1d(k=5, s=2) length
    lens = [min(int(l), t1) for l in len_x]               # torch.clamp(len_x, max=T')
    out = _forward_impl(prep, x, tuple(lens))
    return out, lens


if __name__ == "__main__":
    key = jax.random.PRNGKey(0)
    pkey, xkey = jax.random.split(key)
    params = prepare_params(init_model(pkey))

    B, T, F = 2, 16, 13
    x = jax.random.normal(xkey, (B, T, F), jnp.float32)
    len_x = [16, 4]                    # second sequence shorter than T' = 6

    out, out_lens = network_forward(params, x, len_x)
    out = jax.block_until_ready(out)

    assert out.shape == (B, 6, NUM_CLASSES), out.shape
    assert out_lens == [6, 4], out_lens
    assert bool(jnp.all(jnp.isfinite(out)))
    # pad_packed semantics: LSTM outputs past a sequence's length are zero, so
    # classifier rows there depend only on biases and must be identical.
    assert bool(jnp.allclose(out[1, 4], out[1, 5], atol=1e-5))
    print("KERNEL_OK")
</pallas_src>

<mosaic_0001>
module attributes {stable_mosaic.version = 11 : i64} {
  func.func @_mm_affine_kernel(%arg0: i32, %arg1: i32, %arg2: i32, %arg3: memref<16x128xbf16, #tpu.memory_space<vmem>>, %arg4: memref<128x128xbf16, #tpu.memory_space<vmem>>, %arg5: memref<1x128xf32, #tpu.memory_space<vmem>>, %arg6: memref<1x128xf32, #tpu.memory_space<vmem>>, %arg7: memref<16x128xbf16, #tpu.memory_space<vmem>>, %arg8: memref<16x128xf32, #tpu.memory_space<vmem>>) attributes {dimension_semantics = [#tpu.dimension_semantics<parallel>, #tpu.dimension_semantics<parallel>, #tpu.dimension_semantics<arbitrary>], iteration_bounds = array<i64: 1, 1, 1>, scalar_prefetch = 0 : i64, scratch_operands = 1 : i64, tpu.core_type = #tpu.core_type<tc>, window_params = [{transform_indices = @transform_0, window_bounds = array<i64: 16, 128>}, {transform_indices = @transform_1, window_bounds = array<i64: 128, 128>}, {transform_indices = @transform_2, window_bounds = array<i64: 1, 128>}, {transform_indices = @transform_3, window_bounds = array<i64: 1, 128>}, {transform_indices = @transform_4, window_bounds = array<i64: 16, 128>}]} {
    %c0_i32 = arith.constant 0 : i32
    %0 = arith.cmpi eq, %arg2, %c0_i32 : i32
    %1 = arith.extui %0 : i1 to i32
    %c0_i32_0 = arith.constant 0 : i32
    %2 = arith.cmpi ne, %1, %c0_i32_0 : i32
    scf.if %2 {
      %cst_10 = arith.constant 0.000000e+00 : f32
      %12 = vector.broadcast %cst_10 : f32 to vector<16x128xf32>
      %c0_11 = arith.constant 0 : index
      %c0_12 = arith.constant 0 : index
      %13 = vector.load %arg8[%c0_11, %c0_12] : memref<16x128xf32, #tpu.memory_space<vmem>>, vector<16x128xf32>
      tpu.vector_store %arg8[%c0_11, %c0_12], %12 {strides = array<i32>} : memref<16x128xf32, #tpu.memory_space<vmem>>, vector<16x128xf32>,
    } else {
    }
    %c0 = arith.constant 0 : index
    %c0_1 = arith.constant 0 : index
    %3 = vector.load %arg8[%c0, %c0_1] : memref<16x128xf32, #tpu.memory_space<vmem>>, vector<16x128xf32>
    %c0_2 = arith.constant 0 : index
    %c0_3 = arith.constant 0 : index
    %4 = vector.load %arg3[%c0_2, %c0_3] : memref<16x128xbf16, #tpu.memory_space<vmem>>, vector<16x128xbf16>
    %c0_4 = arith.constant 0 : index
    %c0_5 = arith.constant 0 : index
    %5 = vector.load %arg4[%c0_4, %c0_5] : memref<128x128xbf16, #tpu.memory_space<vmem>>, vector<128x128xbf16>
    %cst = arith.constant dense<0.000000e+00> : vector<16x128xf32>
    %6 = tpu.matmul %4, %5, %cst {dimension_numbers = #tpu.dot_dimension_numbers<[1], [0], [0], [1], [0, 0, 1, 1], [], []>} : vector<16x128xbf16>, vector<128x128xbf16>, vector<16x128xf32> -> vector<16x128xf32>
    %7 = arith.addf %3, %6 : vector<16x128xf32>
    %c0_6 = arith.constant 0 : index
    %c0_7 = arith.constant 0 : index
    %8 = vector.load %arg8[%c0_6, %c0_7] : memref<16x128xf32, #tpu.memory_space<vmem>>, vector<16x128xf32>
    tpu.vector_store %arg8[%c0_6, %c0_7], %7 {strides = array<i32>} : memref<16x128xf32, #tpu.memory_space<vmem>>, vector<16x128xf32>,
    %c0_i32_8 = arith.constant 0 : i32
    %9 = arith.cmpi eq, %arg2, %c0_i32_8 : i32
    %10 = arith.extui %9 : i1 to i32
    %c0_i32_9 = arith.constant 0 : i32
    %11 = arith.cmpi ne, %10, %c0_i32_9 : i32
    scf.if %11 {
      %c0_10 = arith.constant 0 : index
      %c0_11 = arith.constant 0 : index
      %12 = vector.load %arg8[%c0_10, %c0_11] : memref<16x128xf32, #tpu.memory_space<vmem>>, vector<16x128xf32>
      %c0_12 = arith.constant 0 : index
      %c0_13 = arith.constant 0 : index
      %13 = vector.load %arg5[%c0_12, %c0_13] : memref<1x128xf32, #tpu.memory_space<vmem>>, vector<1x128xf32>
      %14 = vector.broadcast %13 : vector<1x128xf32> to vector<16x128xf32>
      %15 = arith.mulf %12, %14 : vector<16x128xf32>
      %c0_14 = arith.constant 0 : index
      %c0_15 = arith.constant 0 : index
      %16 = vector.load %arg6[%c0_14, %c0_15] : memref<1x128xf32, #tpu.memory_space<vmem>>, vector<1x128xf32>
      %17 = vector.broadcast %16 : vector<1x128xf32> to vector<16x128xf32>
      %18 = arith.addf %15, %17 : vector<16x128xf32>
      %cst_16 = arith.constant 0.000000e+00 : f32
      %19 = vector.broadcast %cst_16 : f32 to vector<16x128xf32>
      %20 = arith.maximumf %18, %19 : vector<16x128xf32>
      %21 = arith.truncf %20 : vector<16x128xf32> to vector<16x128xbf16>
      %c0_17 = arith.constant 0 : index
      %c0_18 = arith.constant 0 : index
      %22 = vector.load %arg7[%c0_17, %c0_18] : memref<16x128xbf16, #tpu.memory_space<vmem>>, vector<16x128xbf16>
      tpu.vector_store %arg7[%c0_17, %c0_18], %21 {strides = array<i32>} : memref<16x128xbf16, #tpu.memory_space<vmem>>, vector<16x128xbf16>,
    } else {
    }
    return
  }
  func.func @transform_0(%arg0: i32, %arg1: i32, %arg2: i32) -> (i32, i32) {
    %c0_i32 = arith.constant 0 : i32
    return %arg0, %arg2 : i32, i32
  }
  func.func @transform_1(%arg0: i32, %arg1: i32, %arg2: i32) -> (i32, i32) {
    %c0_i32 = arith.constant 0 : i32
    return %arg2, %arg1 : i32, i32
  }
  func.func @transform_2(%arg0: i32, %arg1: i32, %arg2: i32) -> (i32, i32) {
    %c0_i32 = arith.constant 0 : i32
    %c0_i32_0 = arith.constant 0 : i32
    return %c0_i32, %arg1 : i32, i32
  }
  func.func @transform_3(%arg0: i32, %arg1: i32, %arg2: i32) -> (i32, i32) {
    %c0_i32 = arith.constant 0 : i32
    %c0_i32_0 = arith.constant 0 : i32
    return %c0_i32, %arg1 : i32, i32
  }
  func.func @transform_4(%arg0: i32, %arg1: i32, %arg2: i32) -> (i32, i32) {
    %c0_i32 = arith.constant 0 : i32
    return %arg0, %arg1 : i32, i32
  }
}

module attributes {stable_mosaic.version = 11 : i64} {
  func.func @_mm_affine_kernel(%arg0: i32, %arg1: i32, %arg2: i32, %arg3: memref<16x128xbf16, #tpu.memory_space<vmem>>, %arg4: memref<128x256xbf16, #tpu.memory_space<vmem>>, %arg5: memref<1x256xf32, #tpu.memory_space<vmem>>, %arg6: memref<1x256xf32, #tpu.memory_space<vmem>>, %arg7: memref<16x256xbf16, #tpu.memory_space<vmem>>, %arg8: memref<16x256xf32, #tpu.memory_space<vmem>>) attributes {dimension_semantics = [#tpu.dimension_semantics<parallel>, #tpu.dimension_semantics<parallel>, #tpu.dimension_semantics<arbitrary>], iteration_bounds = array<i64: 1, 1, 3>, scalar_prefetch = 0 : i64, scratch_operands = 1 : i64, tpu.core_type = #tpu.core_type<tc>, window_params = [{transform_indices = @transform_0, window_bounds = array<i64: 16, 128>}, {transform_indices = @transform_1, window_bounds = array<i64: 128, 256>}, {transform_indices = @transform_2, window_bounds = array<i64: 1, 256>}, {transform_indices = @transform_3, window_bounds = array<i64: 1, 256>}, {transform_indices = @transform_4, window_bounds = array<i64: 16, 256>}]} {
    %c0_i32 = arith.constant 0 : i32
    %0 = arith.cmpi eq, %arg2, %c0_i32 : i32
    %1 = arith.extui %0 : i1 to i32
    %c0_i32_0 = arith.constant 0 : i32
    %2 = arith.cmpi ne, %1, %c0_i32_0 : i32
    scf.if %2 {
      %cst_9 = arith.constant 0.000000e+00 : f32
      %12 = vector.broadcast %cst_9 : f32 to vector<16x256xf32>
      %c0_10 = arith.constant 0 : index
      %c0_11 = arith.constant 0 : index
      %13 = vector.load %arg8[%c0_10, %c0_11] : memref<16x256xf32, #tpu.memory_space<vmem>>, vector<16x256xf32>
      tpu.vector_store %arg8[%c0_10, %c0_11], %12 {strides = array<i32>} : memref<16x256xf32, #tpu.memory_space<vmem>>, vector<16x256xf32>,
    } else {
    }
    %c0 = arith.constant 0 : index
    %c0_1 = arith.constant 0 : index
    %3 = vector.load %arg8[%c0, %c0_1] : memref<16x256xf32, #tpu.memory_space<vmem>>, vector<16x256xf32>
    %c0_2 = arith.constant 0 : index
    %c0_3 = arith.constant 0 : index
    %4 = vector.load %arg3[%c0_2, %c0_3] : memref<16x128xbf16, #tpu.memory_space<vmem>>, vector<16x128xbf16>
    %c0_4 = arith.constant 0 : index
    %c0_5 = arith.constant 0 : index
    %5 = vector.load %arg4[%c0_4, %c0_5] : memref<128x256xbf16, #tpu.memory_space<vmem>>, vector<128x256xbf16>
    %cst = arith.constant dense<0.000000e+00> : vector<16x256xf32>
    %6 = tpu.matmul %4, %5, %cst {dimension_numbers = #tpu.dot_dimension_numbers<[1], [0], [0], [1], [0, 0, 1, 1], [], []>} : vector<16x128xbf16>, vector<128x256xbf16>, vector<16x256xf32> -> vector<16x256xf32>
    %7 = arith.addf %3, %6 : vector<16x256xf32>
    %c0_6 = arith.constant 0 : index
    %c0_7 = arith.constant 0 : index
    %8 = vector.load %arg8[%c0_6, %c0_7] : memref<16x256xf32, #tpu.memory_space<vmem>>, vector<16x256xf32>
    tpu.vector_store %arg8[%c0_6, %c0_7], %7 {strides = array<i32>} : memref<16x256xf32, #tpu.memory_space<vmem>>, vector<16x256xf32>,
    %c2_i32 = arith.constant 2 : i32
    %9 = arith.cmpi eq, %arg2, %c2_i32 : i32
    %10 = arith.extui %9 : i1 to i32
    %c0_i32_8 = arith.constant 0 : i32
    %11 = arith.cmpi ne, %10, %c0_i32_8 : i32
    scf.if %11 {
      %c0_9 = arith.constant 0 : index
      %c0_10 = arith.constant 0 : index
      %12 = vector.load %arg8[%c0_9, %c0_10] : memref<16x256xf32, #tpu.memory_space<vmem>>, vector<16x256xf32>
      %c0_11 = arith.constant 0 : index
      %c0_12 = arith.constant 0 : index
      %13 = vector.load %arg5[%c0_11, %c0_12] : memref<1x256xf32, #tpu.memory_space<vmem>>, vector<1x256xf32>
      %14 = vector.broadcast %13 : vector<1x256xf32> to vector<16x256xf32>
      %15 = arith.mulf %12, %14 : vector<16x256xf32>
      %c0_13 = arith.constant 0 : index
      %c0_14 = arith.constant 0 : index
      %16 = vector.load %arg6[%c0_13, %c0_14] : memref<1x256xf32, #tpu.memory_space<vmem>>, vector<1x256xf32>
      %17 = vector.broadcast %16 : vector<1x256xf32> to vector<16x256xf32>
      %18 = arith.addf %15, %17 : vector<16x256xf32>
      %cst_15 = arith.constant 0.000000e+00 : f32
      %19 = vector.broadcast %cst_15 : f32 to vector<16x256xf32>
      %20 = arith.maximumf %18, %19 : vector<16x256xf32>
      %21 = arith.truncf %20 : vector<16x256xf32> to vector<16x256xbf16>
      %c0_16 = arith.constant 0 : index
      %c0_17 = arith.constant 0 : index
      %22 = vector.load %arg7[%c0_16, %c0_17] : memref<16x256xbf16, #tpu.memory_space<vmem>>, vector<16x256xbf16>
      tpu.vector_store %arg7[%c0_16, %c0_17], %21 {strides = array<i32>} : memref<16x256xbf16, #tpu.memory_space<vmem>>, vector<16x256xbf16>,
    } else {
    }
    return
  }
  func.func @transform_0(%arg0: i32, %arg1: i32, %arg2: i32) -> (i32, i32) {
    %c0_i32 = arith.constant 0 : i32
    return %arg0, %arg2 : i32, i32
  }
  func.func @transform_1(%arg0: i32, %arg1: i32, %arg2: i32) -> (i32, i32) {
    %c0_i32 = arith.constant 0 : i32
    return %arg2, %arg1 : i32, i32
  }
  func.func @transform_2(%arg0: i32, %arg1: i32, %arg2: i32) -> (i32, i32) {
    %c0_i32 = arith.constant 0 : i32
    %c0_i32_0 = arith.constant 0 : i32
    return %c0_i32, %arg1 : i32, i32
  }
  func.func @transform_3(%arg0: i32, %arg1: i32, %arg2: i32) -> (i32, i32) {
    %c0_i32 = arith.constant 0 : i32
    %c0_i32_0 = arith.constant 0 : i32
    return %c0_i32, %arg1 : i32, i32
  }
  func.func @transform_4(%arg0: i32, %arg1: i32, %arg2: i32) -> (i32, i32) {
    %c0_i32 = arith.constant 0 : i32
    return %arg0, %arg1 : i32, i32
  }
}

module attributes {stable_mosaic.version = 11 : i64} {
  func.func @_bilstm_kernel(%arg0: i32, %arg1: memref<6x2x2048xbf16, #tpu.memory_space<vmem>>, %arg2: memref<6x2x2048xbf16, #tpu.memory_space<vmem>>, %arg3: memref<512x2048xbf16, #tpu.memory_space<vmem>>, %arg4: memref<512x2048xbf16, #tpu.memory_space<vmem>>, %arg5: memref<2x1xi32, #tpu.memory_space<vmem>>, %arg6: memref<6x2x512xf32, #tpu.memory_space<vmem>>, %arg7: memref<6x2x512xf32, #tpu.memory_space<vmem>>, %arg8: memref<2x512xf32, #tpu.memory_space<vmem>>, %arg9: memref<2x512xf32, #tpu.memory_space<vmem>>, %arg10: memref<2x512xf32, #tpu.memory_space<vmem>>, %arg11: memref<2x512xf32, #tpu.memory_space<vmem>>) attributes {dimension_semantics = [#tpu.dimension_semantics<arbitrary>], iteration_bounds = array<i64: 1>, scalar_prefetch = 0 : i64, scratch_operands = 4 : i64, tpu.core_type = #tpu.core_type<tc>, window_params = [{transform_indices = @transform_0, window_bounds = array<i64: 6, 2, 2048>}, {transform_indices = @transform_1, window_bounds = array<i64: 6, 2, 2048>}, {pipeline_mode = #tpu.pipeline_mode<synchronous>, transform_indices = @transform_2, window_bounds = array<i64: 512, 2048>}, {pipeline_mode = #tpu.pipeline_mode<synchronous>, transform_indices = @transform_3, window_bounds = array<i64: 512, 2048>}, {pipeline_mode = #tpu.pipeline_mode<synchronous>, transform_indices = @transform_4, window_bounds = array<i64: 2, 1>}, {transform_indices = @transform_5, window_bounds = array<i64: 6, 2, 512>}, {transform_indices = @transform_6, window_bounds = array<i64: 6, 2, 512>}]} {
    %c0_i32 = arith.constant 0 : i32
    %0 = arith.cmpi eq, %arg0, %c0_i32 : i32
    %1 = arith.extui %0 : i1 to i32
    %c0_i32_0 = arith.constant 0 : i32
    %2 = arith.cmpi ne, %1, %c0_i32_0 : i32
    scf.if %2 {
      %cst = arith.constant 0.000000e+00 : f32
      %5 = vector.broadcast %cst : f32 to vector<2x512xf32>
      %c0_4 = arith.constant 0 : index
      %c0_5 = arith.constant 0 : index
      %6 = vector.load %arg8[%c0_4, %c0_5] : memref<2x512xf32, #tpu.memory_space<vmem>>, vector<2x512xf32>
      tpu.vector_store %arg8[%c0_4, %c0_5], %5 {strides = array<i32>} : memref<2x512xf32, #tpu.memory_space<vmem>>, vector<2x512xf32>,
      %cst_6 = arith.constant 0.000000e+00 : f32
      %7 = vector.broadcast %cst_6 : f32 to vector<2x512xf32>
      %c0_7 = arith.constant 0 : index
      %c0_8 = arith.constant 0 : index
      %8 = vector.load %arg9[%c0_7, %c0_8] : memref<2x512xf32, #tpu.memory_space<vmem>>, vector<2x512xf32>
      tpu.vector_store %arg9[%c0_7, %c0_8], %7 {strides = array<i32>} : memref<2x512xf32, #tpu.memory_space<vmem>>, vector<2x512xf32>,
      %cst_9 = arith.constant 0.000000e+00 : f32
      %9 = vector.broadcast %cst_9 : f32 to vector<2x512xf32>
      %c0_10 = arith.constant 0 : index
      %c0_11 = arith.constant 0 : index
      %10 = vector.load %arg10[%c0_10, %c0_11] : memref<2x512xf32, #tpu.memory_space<vmem>>, vector<2x512xf32>
      tpu.vector_store %arg10[%c0_10, %c0_11], %9 {strides = array<i32>} : memref<2x512xf32, #tpu.memory_space<vmem>>, vector<2x512xf32>,
      %cst_12 = arith.constant 0.000000e+00 : f32
      %11 = vector.broadcast %cst_12 : f32 to vector<2x512xf32>
      %c0_13 = arith.constant 0 : index
      %c0_14 = arith.constant 0 : index
      %12 = vector.load %arg11[%c0_13, %c0_14] : memref<2x512xf32, #tpu.memory_space<vmem>>, vector<2x512xf32>
      tpu.vector_store %arg11[%c0_13, %c0_14], %11 {strides = array<i32>} : memref<2x512xf32, #tpu.memory_space<vmem>>, vector<2x512xf32>,
    } else {
    }
    %c0 = arith.constant 0 : index
    %c0_1 = arith.constant 0 : index
    %3 = vector.load %arg5[%c0, %c0_1] : memref<2x1xi32, #tpu.memory_space<vmem>>, vector<2x1xi32>
    %c0_i32_2 = arith.constant 0 : i32
    %c6_i32 = arith.constant 6 : i32
    %4 = arith.addi %c0_i32_2, %c6_i32 : i32
    %c1_i32 = arith.constant 1 : i32
    scf.for %arg12 = %c0_i32_2 to %4 step %c1_i32  : i32 {
      %c1_i32_4 = arith.constant 1 : i32
      %5 = arith.muli %arg12, %c1_i32_4 : i32
      %c0_i32_5 = arith.constant 0 : i32
      %6 = arith.addi %c0_i32_5, %5 : i32
      %c6_i32_6 = arith.constant 6 : i32
      %7 = arith.muli %arg0, %c6_i32_6 : i32
      %8 = arith.addi %7, %6 : i32
      %9 = arith.index_cast %6 : i32 to index
      %c0_7 = arith.constant 0 : index
      %c0_8 = arith.constant 0 : index
      %10 = vector.load %arg1[%9, %c0_7, %c0_8] : memref<6x2x2048xbf16, #tpu.memory_space<vmem>>, vector<1x2x2048xbf16>
      %11 = vector.shape_cast %10 : vector<1x2x2048xbf16> to vector<2x2048xbf16>
      %12 = arith.extf %11 : vector<2x2048xbf16> to vector<2x2048xf32>
      %c0_9 = arith.constant 0 : index
      %c0_10 = arith.constant 0 : index
      %13 = vector.load %arg8[%c0_9, %c0_10] : memref<2x512xf32, #tpu.memory_space<vmem>>, vector<2x512xf32>
      %14 = arith.truncf %13 : vector<2x512xf32> to vector<2x512xbf16>
      %c0_11 = arith.constant 0 : index
      %c0_12 = arith.constant 0 : index
      %15 = vector.load %arg3[%c0_11, %c0_12] : memref<512x2048xbf16, #tpu.memory_space<vmem>>, vector<512x2048xbf16>
      %cst = arith.constant dense<0.000000e+00> : vector<2x2048xf32>
      %16 = tpu.matmul %14, %15, %cst {dimension_numbers = #tpu.dot_dimension_numbers<[1], [0], [0], [1], [0, 0, 1, 1], [], []>} : vector<2x512xbf16>, vector<512x2048xbf16>, vector<2x2048xf32> -> vector<2x2048xf32>
      %17 = arith.addf %12, %16 : vector<2x2048xf32>
      %18 = vector.extract_strided_slice %17 {offsets = [0, 0], sizes = [2, 512], strides = [1, 1]} : vector<2x2048xf32> to vector<2x512xf32>
      %19 = arith.negf %18 : vector<2x512xf32>
      %20 = math.exp %19 : vector<2x512xf32>
      %cst_13 = arith.constant 1.000000e+00 : f32
      %21 = vector.broadcast %cst_13 : f32 to vector<2x512xf32>
      %22 = arith.addf %21, %20 : vector<2x512xf32>
      %23 = arith.divf %21, %22 : vector<2x512xf32>
      %24 = vector.extract_strided_slice %17 {offsets = [0, 512], sizes = [2, 512], strides = [1, 1]} : vector<2x2048xf32> to vector<2x512xf32>
      %25 = arith.negf %24 : vector<2x512xf32>
      %26 = math.exp %25 : vector<2x512xf32>
      %cst_14 = arith.constant 1.000000e+00 : f32
      %27 = vector.broadcast %cst_14 : f32 to vector<2x512xf32>
      %28 = arith.addf %27, %26 : vector<2x512xf32>
      %29 = arith.divf %27, %28 : vector<2x512xf32>
      %30 = vector.extract_strided_slice %17 {offsets = [0, 1024], sizes = [2, 512], strides = [1, 1]} : vector<2x2048xf32> to vector<2x512xf32>
      %31 = math.tanh %30 : vector<2x512xf32>
      %32 = vector.extract_strided_slice %17 {offsets = [0, 1536], sizes = [2, 512], strides = [1, 1]} : vector<2x2048xf32> to vector<2x512xf32>
      %33 = arith.negf %32 : vector<2x512xf32>
      %34 = math.exp %33 : vector<2x512xf32>
      %cst_15 = arith.constant 1.000000e+00 : f32
      %35 = vector.broadcast %cst_15 : f32 to vector<2x512xf32>
      %36 = arith.addf %35, %34 : vector<2x512xf32>
      %37 = arith.divf %35, %36 : vector<2x512xf32>
      %c0_16 = arith.constant 0 : index
      %c0_17 = arith.constant 0 : index
      %38 = vector.load %arg9[%c0_16, %c0_17] : memref<2x512xf32, #tpu.memory_space<vmem>>, vector<2x512xf32>
      %39 = arith.mulf %29, %38 : vector<2x512xf32>
      %40 = arith.mulf %23, %31 : vector<2x512xf32>
      %41 = arith.addf %39, %40 : vector<2x512xf32>
      %42 = math.tanh %41 : vector<2x512xf32>
      %43 = arith.mulf %37, %42 : vector<2x512xf32>
      %44 = vector.broadcast %8 : i32 to vector<2x1xi32>
      %45 = arith.cmpi sgt, %3, %44 : vector<2x1xi32>
      %c0_18 = arith.constant 0 : index
      %c0_19 = arith.constant 0 : index
      %46 = vector.load %arg8[%c0_18, %c0_19] : memref<2x512xf32, #tpu.memory_space<vmem>>, vector<2x512xf32>
      %47 = vector.shape_cast %45 : vector<2x1xi1> to vector<2x1xi1>
      %48 = vector.broadcast %47 : vector<2x1xi1> to vector<2x512xi1>
      %49 = arith.select %48, %43, %46 : vector<2x512xi1>, vector<2x512xf32>
      %c0_20 = arith.constant 0 : index
      %c0_21 = arith.constant 0 : index
      %50 = vector.load %arg8[%c0_20, %c0_21] : memref<2x512xf32, #tpu.memory_space<vmem>>, vector<2x512xf32>
      tpu.vector_store %arg8[%c0_20, %c0_21], %49 {strides = array<i32>} : memref<2x512xf32, #tpu.memory_space<vmem>>, vector<2x512xf32>,
      %c0_22 = arith.constant 0 : index
      %c0_23 = arith.constant 0 : index
      %51 = vector.load %arg9[%c0_22, %c0_23] : memref<2x512xf32, #tpu.memory_space<vmem>>, vector<2x512xf32>
      %52 = vector.shape_cast %45 : vector<2x1xi1> to vector<2x1xi1>
      %53 = vector.broadcast %52 : vector<2x1xi1> to vector<2x512xi1>
      %54 = arith.select %53, %41, %51 : vector<2x512xi1>, vector<2x512xf32>
      %c0_24 = arith.constant 0 : index
      %c0_25 = arith.constant 0 : index
      %55 = vector.load %arg9[%c0_24, %c0_25] : memref<2x512xf32, #tpu.memory_space<vmem>>, vector<2x512xf32>
      tpu.vector_store %arg9[%c0_24, %c0_25], %54 {strides = array<i32>} : memref<2x512xf32, #tpu.memory_space<vmem>>, vector<2x512xf32>,
      %cst_26 = arith.constant 0.000000e+00 : f32
      %56 = vector.broadcast %cst_26 : f32 to vector<2x512xf32>
      %57 = vector.shape_cast %45 : vector<2x1xi1> to vector<2x1xi1>
      %58 = vector.broadcast %57 : vector<2x1xi1> to vector<2x512xi1>
      %59 = arith.select %58, %43, %56 : vector<2x512xi1>, vector<2x512xf32>
      %60 = arith.index_cast %6 : i32 to index
      %c0_27 = arith.constant 0 : index
      %c0_28 = arith.constant 0 : index
      %61 = vector.load %arg6[%60, %c0_27, %c0_28] : memref<6x2x512xf32, #tpu.memory_space<vmem>>, vector<1x2x512xf32>
      %62 = vector.shape_cast %61 : vector<1x2x512xf32> to vector<2x512xf32>
      %63 = vector.shape_cast %59 : vector<2x512xf32> to vector<1x2x512xf32>
      tpu.vector_store %arg6[%60, %c0_27, %c0_28], %63 {strides = array<i32>} : memref<6x2x512xf32, #tpu.memory_space<vmem>>, vector<1x2x512xf32>,
      %c5_i32 = arith.constant 5 : i32
      %64 = arith.subi %c5_i32, %6 : i32
      %c0_i32_29 = arith.constant 0 : i32
      %65 = arith.subi %c0_i32_29, %arg0 : i32
      %c6_i32_30 = arith.constant 6 : i32
      %66 = arith.muli %65, %c6_i32_30 : i32
      %67 = arith.addi %66, %64 : i32
      %68 = arith.index_cast %64 : i32 to index
      %c0_31 = arith.constant 0 : index
      %c0_32 = arith.constant 0 : index
      %69 = vector.load %arg2[%68, %c0_31, %c0_32] : memref<6x2x2048xbf16, #tpu.memory_space<vmem>>, vector<1x2x2048xbf16>
      %70 = vector.shape_cast %69 : vector<1x2x2048xbf16> to vector<2x2048xbf16>
      %71 = arith.extf %70 : vector<2x2048xbf16> to vector<2x2048xf32>
      %c0_33 = arith.constant 0 : index
      %c0_34 = arith.constant 0 : index
      %72 = vector.load %arg10[%c0_33, %c0_34] : memref<2x512xf32, #tpu.memory_space<vmem>>, vector<2x512xf32>
      %73 = arith.truncf %72 : vector<2x512xf32> to vector<2x512xbf16>
      %c0_35 = arith.constant 0 : index
      %c0_36 = arith.constant 0 : index
      %74 = vector.load %arg4[%c0_35, %c0_36] : memref<512x2048xbf16, #tpu.memory_space<vmem>>, vector<512x2048xbf16>
      %cst_37 = arith.constant dense<0.000000e+00> : vector<2x2048xf32>
      %75 = tpu.matmul %73, %74, %cst_37 {dimension_numbers = #tpu.dot_dimension_numbers<[1], [0], [0], [1], [0, 0, 1, 1], [], []>} : vector<2x512xbf16>, vector<512x2048xbf16>, vector<2x2048xf32> -> vector<2x2048xf32>
      %76 = arith.addf %71, %75 : vector<2x2048xf32>
      %77 = vector.extract_strided_slice %76 {offsets = [0, 0], sizes = [2, 512], strides = [1, 1]} : vector<2x2048xf32> to vector<2x512xf32>
      %78 = arith.negf %77 : vector<2x512xf32>
      %79 = math.exp %78 : vector<2x512xf32>
      %cst_38 = arith.constant 1.000000e+00 : f32
      %80 = vector.broadcast %cst_38 : f32 to vector<2x512xf32>
      %81 = arith.addf %80, %79 : vector<2x512xf32>
      %82 = arith.divf %80, %81 : vector<2x512xf32>
      %83 = vector.extract_strided_slice %76 {offsets = [0, 512], sizes = [2, 512], strides = [1, 1]} : vector<2x2048xf32> to vector<2x512xf32>
      %84 = arith.negf %83 : vector<2x512xf32>
      %85 = math.exp %84 : vector<2x512xf32>
      %cst_39 = arith.constant 1.000000e+00 : f32
      %86 = vector.broadcast %cst_39 : f32 to vector<2x512xf32>
      %87 = arith.addf %86, %85 : vector<2x512xf32>
      %88 = arith.divf %86, %87 : vector<2x512xf32>
      %89 = vector.extract_strided_slice %76 {offsets = [0, 1024], sizes = [2, 512], strides = [1, 1]} : vector<2x2048xf32> to vector<2x512xf32>
      %90 = math.tanh %89 : vector<2x512xf32>
      %91 = vector.extract_strided_slice %76 {offsets = [0, 1536], sizes = [2, 512], strides = [1, 1]} : vector<2x2048xf32> to vector<2x512xf32>
      %92 = arith.negf %91 : vector<2x512xf32>
      %93 = math.exp %92 : vector<2x512xf32>
      %cst_40 = arith.constant 1.000000e+00 : f32
      %94 = vector.broadcast %cst_40 : f32 to vector<2x512xf32>
      %95 = arith.addf %94, %93 : vector<2x512xf32>
      %96 = arith.divf %94, %95 : vector<2x512xf32>
      %c0_41 = arith.constant 0 : index
      %c0_42 = arith.constant 0 : index
      %97 = vector.load %arg11[%c0_41, %c0_42] : memref<2x512xf32, #tpu.memory_space<vmem>>, vector<2x512xf32>
      %98 = arith.mulf %88, %97 : vector<2x512xf32>
      %99 = arith.mulf %82, %90 : vector<2x512xf32>
      %100 = arith.addf %98, %99 : vector<2x512xf32>
      %101 = math.tanh %100 : vector<2x512xf32>
      %102 = arith.mulf %96, %101 : vector<2x512xf32>
      %103 = vector.broadcast %67 : i32 to vector<2x1xi32>
      %104 = arith.cmpi sgt, %3, %103 : vector<2x1xi32>
      %c0_43 = arith.constant 0 : index
      %c0_44 = arith.constant 0 : index
      %105 = vector.load %arg10[%c0_43, %c0_44] : memref<2x512xf32, #tpu.memory_space<vmem>>, vector<2x512xf32>
      %106 = vector.shape_cast %104 : vector<2x1xi1> to vector<2x1xi1>
      %107 = vector.broadcast %106 : vector<2x1xi1> to vector<2x512xi1>
      %108 = arith.select %107, %102, %105 : vector<2x512xi1>, vector<2x512xf32>
      %c0_45 = arith.constant 0 : index
      %c0_46 = arith.constant 0 : index
      %109 = vector.load %arg10[%c0_45, %c0_46] : memref<2x512xf32, #tpu.memory_space<vmem>>, vector<2x512xf32>
      tpu.vector_store %arg10[%c0_45, %c0_46], %108 {strides = array<i32>} : memref<2x512xf32, #tpu.memory_space<vmem>>, vector<2x512xf32>,
      %c0_47 = arith.constant 0 : index
      %c0_48 = arith.constant 0 : index
      %110 = vector.load %arg11[%c0_47, %c0_48] : memref<2x512xf32, #tpu.memory_space<vmem>>, vector<2x512xf32>
      %111 = vector.shape_cast %104 : vector<2x1xi1> to vector<2x1xi1>
      %112 = vector.broadcast %111 : vector<2x1xi1> to vector<2x512xi1>
      %113 = arith.select %112, %100, %110 : vector<2x512xi1>, vector<2x512xf32>
      %c0_49 = arith.constant 0 : index
      %c0_50 = arith.constant 0 : index
      %114 = vector.load %arg11[%c0_49, %c0_50] : memref<2x512xf32, #tpu.memory_space<vmem>>, vector<2x512xf32>
      tpu.vector_store %arg11[%c0_49, %c0_50], %113 {strides = array<i32>} : memref<2x512xf32, #tpu.memory_space<vmem>>, vector<2x512xf32>,
      %cst_51 = arith.constant 0.000000e+00 : f32
      %115 = vector.broadcast %cst_51 : f32 to vector<2x512xf32>
      %116 = vector.shape_cast %104 : vector<2x1xi1> to vector<2x1xi1>
      %117 = vector.broadcast %116 : vector<2x1xi1> to vector<2x512xi1>
      %118 = arith.select %117, %102, %115 : vector<2x512xi1>, vector<2x512xf32>
      %119 = arith.index_cast %64 : i32 to index
      %c0_52 = arith.constant 0 : index
      %c0_53 = arith.constant 0 : index
      %120 = vector.load %arg7[%119, %c0_52, %c0_53] : memref<6x2x512xf32, #tpu.memory_space<vmem>>, vector<1x2x512xf32>
      %121 = vector.shape_cast %120 : vector<1x2x512xf32> to vector<2x512xf32>
      %122 = vector.shape_cast %118 : vector<2x512xf32> to vector<1x2x512xf32>
      tpu.vector_store %arg7[%119, %c0_52, %c0_53], %122 {strides = array<i32>} : memref<6x2x512xf32, #tpu.memory_space<vmem>>, vector<1x2x512xf32>,
    }
    %c6_i32_3 = arith.constant 6 : i32
    return
  }
  func.func @transform_0(%arg0: i32) -> (i32, i32, i32) {
    %c0_i32 = arith.constant 0 : i32
    %c0_i32_0 = arith.constant 0 : i32
    %c0_i32_1 = arith.constant 0 : i32
    return %arg0, %c0_i32, %c0_i32_0 : i32, i32, i32
  }
  func.func @transform_1(%arg0: i32) -> (i32, i32, i32) {
    %c0_i32 = arith.constant 0 : i32
    %0 = arith.subi %c0_i32, %arg0 : i32
    %c0_i32_0 = arith.constant 0 : i32
    %c0_i32_1 = arith.constant 0 : i32
    %c0_i32_2 = arith.constant 0 : i32
    return %0, %c0_i32_0, %c0_i32_1 : i32, i32, i32
  }
  func.func @transform_2(%arg0: i32) -> (i32, i32) {
    %c0_i32 = arith.constant 0 : i32
    %c0_i32_0 = arith.constant 0 : i32
    %c0_i32_1 = arith.constant 0 : i32
    return %c0_i32, %c0_i32_0 : i32, i32
  }
  func.func @transform_3(%arg0: i32) -> (i32, i32) {
    %c0_i32 = arith.constant 0 : i32
    %c0_i32_0 = arith.constant 0 : i32
    %c0_i32_1 = arith.constant 0 : i32
    return %c0_i32, %c0_i32_0 : i32, i32
  }
  func.func @transform_4(%arg0: i32) -> (i32, i32) {
    %c0_i32 = arith.constant 0 : i32
    %c0_i32_0 = arith.constant 0 : i32
    %c0_i32_1 = arith.constant 0 : i32
    return %c0_i32, %c0_i32_0 : i32, i32
  }
  func.func @transform_5(%arg0: i32) -> (i32, i32, i32) {
    %c0_i32 = arith.constant 0 : i32
    %c0_i32_0 = arith.constant 0 : i32
    %c0_i32_1 = arith.constant 0 : i32
    return %arg0, %c0_i32, %c0_i32_0 : i32, i32, i32
  }
  func.func @transform_6(%arg0: i32) -> (i32, i32, i32) {
    %c0_i32 = arith.constant 0 : i32
    %0 = arith.subi %c0_i32, %arg0 : i32
    %c0_i32_0 = arith.constant 0 : i32
    %c0_i32_1 = arith.constant 0 : i32
    %c0_i32_2 = arith.constant 0 : i32
    return %0, %c0_i32_0, %c0_i32_1 : i32, i32, i32
  }
}

module attributes {stable_mosaic.version = 11 : i64} {
  func.func @_mm_affine_kernel(%arg0: i32, %arg1: i32, %arg2: i32, %arg3: memref<16x256xbf16, #tpu.memory_space<vmem>>, %arg4: memref<256x256xbf16, #tpu.memory_space<vmem>>, %arg5: memref<1x256xf32, #tpu.memory_space<vmem>>, %arg6: memref<1x256xf32, #tpu.memory_space<vmem>>, %arg7: memref<16x256xbf16, #tpu.memory_space<vmem>>, %arg8: memref<16x256xf32, #tpu.memory_space<vmem>>) attributes {dimension_semantics = [#tpu.dimension_semantics<parallel>, #tpu.dimension_semantics<parallel>, #tpu.dimension_semantics<arbitrary>], iteration_bounds = array<i64: 1, 8, 1>, scalar_prefetch = 0 : i64, scratch_operands = 1 : i64, tpu.core_type = #tpu.core_type<tc>, window_params = [{transform_indices = @transform_0, window_bounds = array<i64: 16, 256>}, {transform_indices = @transform_1, window_bounds = array<i64: 256, 256>}, {transform_indices = @transform_2, window_bounds = array<i64: 1, 256>}, {transform_indices = @transform_3, window_bounds = array<i64: 1, 256>}, {transform_indices = @transform_4, window_bounds = array<i64: 16, 256>}]} {
    %c0_i32 = arith.constant 0 : i32
    %0 = arith.cmpi eq, %arg2, %c0_i32 : i32
    %1 = arith.extui %0 : i1 to i32
    %c0_i32_0 = arith.constant 0 : i32
    %2 = arith.cmpi ne, %1, %c0_i32_0 : i32
    scf.if %2 {
      %cst_10 = arith.constant 0.000000e+00 : f32
      %12 = vector.broadcast %cst_10 : f32 to vector<16x256xf32>
      %c0_11 = arith.constant 0 : index
      %c0_12 = arith.constant 0 : index
      %13 = vector.load %arg8[%c0_11, %c0_12] : memref<16x256xf32, #tpu.memory_space<vmem>>, vector<16x256xf32>
      tpu.vector_store %arg8[%c0_11, %c0_12], %12 {strides = array<i32>} : memref<16x256xf32, #tpu.memory_space<vmem>>, vector<16x256xf32>,
    } else {
    }
    %c0 = arith.constant 0 : index
    %c0_1 = arith.constant 0 : index
    %3 = vector.load %arg8[%c0, %c0_1] : memref<16x256xf32, #tpu.memory_space<vmem>>, vector<16x256xf32>
    %c0_2 = arith.constant 0 : index
    %c0_3 = arith.constant 0 : index
    %4 = vector.load %arg3[%c0_2, %c0_3] : memref<16x256xbf16, #tpu.memory_space<vmem>>, vector<16x256xbf16>
    %c0_4 = arith.constant 0 : index
    %c0_5 = arith.constant 0 : index
    %5 = vector.load %arg4[%c0_4, %c0_5] : memref<256x256xbf16, #tpu.memory_space<vmem>>, vector<256x256xbf16>
    %cst = arith.constant dense<0.000000e+00> : vector<16x256xf32>
    %6 = tpu.matmul %4, %5, %cst {dimension_numbers = #tpu.dot_dimension_numbers<[1], [0], [0], [1], [0, 0, 1, 1], [], []>} : vector<16x256xbf16>, vector<256x256xbf16>, vector<16x256xf32> -> vector<16x256xf32>
    %7 = arith.addf %3, %6 : vector<16x256xf32>
    %c0_6 = arith.constant 0 : index
    %c0_7 = arith.constant 0 : index
    %8 = vector.load %arg8[%c0_6, %c0_7] : memref<16x256xf32, #tpu.memory_space<vmem>>, vector<16x256xf32>
    tpu.vector_store %arg8[%c0_6, %c0_7], %7 {strides = array<i32>} : memref<16x256xf32, #tpu.memory_space<vmem>>, vector<16x256xf32>,
    %c0_i32_8 = arith.constant 0 : i32
    %9 = arith.cmpi eq, %arg2, %c0_i32_8 : i32
    %10 = arith.extui %9 : i1 to i32
    %c0_i32_9 = arith.constant 0 : i32
    %11 = arith.cmpi ne, %10, %c0_i32_9 : i32
    scf.if %11 {
      %c0_10 = arith.constant 0 : index
      %c0_11 = arith.constant 0 : index
      %12 = vector.load %arg8[%c0_10, %c0_11] : memref<16x256xf32, #tpu.memory_space<vmem>>, vector<16x256xf32>
      %c0_12 = arith.constant 0 : index
      %c0_13 = arith.constant 0 : index
      %13 = vector.load %arg5[%c0_12, %c0_13] : memref<1x256xf32, #tpu.memory_space<vmem>>, vector<1x256xf32>
      %14 = vector.broadcast %13 : vector<1x256xf32> to vector<16x256xf32>
      %15 = arith.mulf %12, %14 : vector<16x256xf32>
      %c0_14 = arith.constant 0 : index
      %c0_15 = arith.constant 0 : index
      %16 = vector.load %arg6[%c0_14, %c0_15] : memref<1x256xf32, #tpu.memory_space<vmem>>, vector<1x256xf32>
      %17 = vector.broadcast %16 : vector<1x256xf32> to vector<16x256xf32>
      %18 = arith.addf %15, %17 : vector<16x256xf32>
      %19 = arith.truncf %18 : vector<16x256xf32> to vector<16x256xbf16>
      %c0_16 = arith.constant 0 : index
      %c0_17 = arith.constant 0 : index
      %20 = vector.load %arg7[%c0_16, %c0_17] : memref<16x256xbf16, #tpu.memory_space<vmem>>, vector<16x256xbf16>
      tpu.vector_store %arg7[%c0_16, %c0_17], %19 {strides = array<i32>} : memref<16x256xbf16, #tpu.memory_space<vmem>>, vector<16x256xbf16>,
    } else {
    }
    return
  }
  func.func @transform_0(%arg0: i32, %arg1: i32, %arg2: i32) -> (i32, i32) {
    %c0_i32 = arith.constant 0 : i32
    return %arg0, %arg2 : i32, i32
  }
  func.func @transform_1(%arg0: i32, %arg1: i32, %arg2: i32) -> (i32, i32) {
    %c0_i32 = arith.constant 0 : i32
    return %arg2, %arg1 : i32, i32
  }
  func.func @transform_2(%arg0: i32, %arg1: i32, %arg2: i32) -> (i32, i32) {
    %c0_i32 = arith.constant 0 : i32
    %c0_i32_0 = arith.constant 0 : i32
    return %c0_i32, %arg1 : i32, i32
  }
  func.func @transform_3(%arg0: i32, %arg1: i32, %arg2: i32) -> (i32, i32) {
    %c0_i32 = arith.constant 0 : i32
    %c0_i32_0 = arith.constant 0 : i32
    return %c0_i32, %arg1 : i32, i32
  }
  func.func @transform_4(%arg0: i32, %arg1: i32, %arg2: i32) -> (i32, i32) {
    %c0_i32 = arith.constant 0 : i32
    return %arg0, %arg1 : i32, i32
  }
}

module attributes {stable_mosaic.version = 11 : i64} {
  func.func @_mm_affine_kernel(%arg0: i32, %arg1: i32, %arg2: i32, %arg3: memref<16x256xbf16, #tpu.memory_space<vmem>>, %arg4: memref<256x256xbf16, #tpu.memory_space<vmem>>, %arg5: memref<1x256xf32, #tpu.memory_space<vmem>>, %arg6: memref<1x256xf32, #tpu.memory_space<vmem>>, %arg7: memref<16x256xbf16, #tpu.memory_space<vmem>>, %arg8: memref<16x256xf32, #tpu.memory_space<vmem>>) attributes {dimension_semantics = [#tpu.dimension_semantics<parallel>, #tpu.dimension_semantics<parallel>, #tpu.dimension_semantics<arbitrary>], iteration_bounds = array<i64: 1, 8, 4>, scalar_prefetch = 0 : i64, scratch_operands = 1 : i64, tpu.core_type = #tpu.core_type<tc>, window_params = [{transform_indices = @transform_0, window_bounds = array<i64: 16, 256>}, {transform_indices = @transform_1, window_bounds = array<i64: 256, 256>}, {transform_indices = @transform_2, window_bounds = array<i64: 1, 256>}, {transform_indices = @transform_3, window_bounds = array<i64: 1, 256>}, {transform_indices = @transform_4, window_bounds = array<i64: 16, 256>}]} {
    %c0_i32 = arith.constant 0 : i32
    %0 = arith.cmpi eq, %arg2, %c0_i32 : i32
    %1 = arith.extui %0 : i1 to i32
    %c0_i32_0 = arith.constant 0 : i32
    %2 = arith.cmpi ne, %1, %c0_i32_0 : i32
    scf.if %2 {
      %cst_9 = arith.constant 0.000000e+00 : f32
      %12 = vector.broadcast %cst_9 : f32 to vector<16x256xf32>
      %c0_10 = arith.constant 0 : index
      %c0_11 = arith.constant 0 : index
      %13 = vector.load %arg8[%c0_10, %c0_11] : memref<16x256xf32, #tpu.memory_space<vmem>>, vector<16x256xf32>
      tpu.vector_store %arg8[%c0_10, %c0_11], %12 {strides = array<i32>} : memref<16x256xf32, #tpu.memory_space<vmem>>, vector<16x256xf32>,
    } else {
    }
    %c0 = arith.constant 0 : index
    %c0_1 = arith.constant 0 : index
    %3 = vector.load %arg8[%c0, %c0_1] : memref<16x256xf32, #tpu.memory_space<vmem>>, vector<16x256xf32>
    %c0_2 = arith.constant 0 : index
    %c0_3 = arith.constant 0 : index
    %4 = vector.load %arg3[%c0_2, %c0_3] : memref<16x256xbf16, #tpu.memory_space<vmem>>, vector<16x256xbf16>
    %c0_4 = arith.constant 0 : index
    %c0_5 = arith.constant 0 : index
    %5 = vector.load %arg4[%c0_4, %c0_5] : memref<256x256xbf16, #tpu.memory_space<vmem>>, vector<256x256xbf16>
    %cst = arith.constant dense<0.000000e+00> : vector<16x256xf32>
    %6 = tpu.matmul %4, %5, %cst {dimension_numbers = #tpu.dot_dimension_numbers<[1], [0], [0], [1], [0, 0, 1, 1], [], []>} : vector<16x256xbf16>, vector<256x256xbf16>, vector<16x256xf32> -> vector<16x256xf32>
    %7 = arith.addf %3, %6 : vector<16x256xf32>
    %c0_6 = arith.constant 0 : index
    %c0_7 = arith.constant 0 : index
    %8 = vector.load %arg8[%c0_6, %c0_7] : memref<16x256xf32, #tpu.memory_space<vmem>>, vector<16x256xf32>
    tpu.vector_store %arg8[%c0_6, %c0_7], %7 {strides = array<i32>} : memref<16x256xf32, #tpu.memory_space<vmem>>, vector<16x256xf32>,
    %c3_i32 = arith.constant 3 : i32
    %9 = arith.cmpi eq, %arg2, %c3_i32 : i32
    %10 = arith.extui %9 : i1 to i32
    %c0_i32_8 = arith.constant 0 : i32
    %11 = arith.cmpi ne, %10, %c0_i32_8 : i32
    scf.if %11 {
      %c0_9 = arith.constant 0 : index
      %c0_10 = arith.constant 0 : index
      %12 = vector.load %arg8[%c0_9, %c0_10] : memref<16x256xf32, #tpu.memory_space<vmem>>, vector<16x256xf32>
      %c0_11 = arith.constant 0 : index
      %c0_12 = arith.constant 0 : index
      %13 = vector.load %arg5[%c0_11, %c0_12] : memref<1x256xf32, #tpu.memory_space<vmem>>, vector<1x256xf32>
      %14 = vector.broadcast %13 : vector<1x256xf32> to vector<16x256xf32>
      %15 = arith.mulf %12, %14 : vector<16x256xf32>
      %c0_13 = arith.constant 0 : index
      %c0_14 = arith.constant 0 : index
      %16 = vector.load %arg6[%c0_13, %c0_14] : memref<1x256xf32, #tpu.memory_space<vmem>>, vector<1x256xf32>
      %17 = vector.broadcast %16 : vector<1x256xf32> to vector<16x256xf32>
      %18 = arith.addf %15, %17 : vector<16x256xf32>
      %19 = arith.truncf %18 : vector<16x256xf32> to vector<16x256xbf16>
      %c0_15 = arith.constant 0 : index
      %c0_16 = arith.constant 0 : index
      %20 = vector.load %arg7[%c0_15, %c0_16] : memref<16x256xbf16, #tpu.memory_space<vmem>>, vector<16x256xbf16>
      tpu.vector_store %arg7[%c0_15, %c0_16], %19 {strides = array<i32>} : memref<16x256xbf16, #tpu.memory_space<vmem>>, vector<16x256xbf16>,
    } else {
    }
    return
  }
  func.func @transform_0(%arg0: i32, %arg1: i32, %arg2: i32) -> (i32, i32) {
    %c0_i32 = arith.constant 0 : i32
    return %arg0, %arg2 : i32, i32
  }
  func.func @transform_1(%arg0: i32, %arg1: i32, %arg2: i32) -> (i32, i32) {
    %c0_i32 = arith.constant 0 : i32
    return %arg2, %arg1 : i32, i32
  }
  func.func @transform_2(%arg0: i32, %arg1: i32, %arg2: i32) -> (i32, i32) {
    %c0_i32 = arith.constant 0 : i32
    %c0_i32_0 = arith.constant 0 : i32
    return %c0_i32, %arg1 : i32, i32
  }
  func.func @transform_3(%arg0: i32, %arg1: i32, %arg2: i32) -> (i32, i32) {
    %c0_i32 = arith.constant 0 : i32
    %c0_i32_0 = arith.constant 0 : i32
    return %c0_i32, %arg1 : i32, i32
  }
  func.func @transform_4(%arg0: i32, %arg1: i32, %arg2: i32) -> (i32, i32) {
    %c0_i32 = arith.constant 0 : i32
    return %arg0, %arg1 : i32, i32
  }
}

module attributes {stable_mosaic.version = 11 : i64} {
  func.func @_mm_affine_kernel(%arg0: i32, %arg1: i32, %arg2: i32, %arg3: memref<16x256xbf16, #tpu.memory_space<vmem>>, %arg4: memref<256x256xbf16, #tpu.memory_space<vmem>>, %arg5: memref<1x256xf32, #tpu.memory_space<vmem>>, %arg6: memref<1x256xf32, #tpu.memory_space<vmem>>, %arg7: memref<16x256xbf16, #tpu.memory_space<vmem>>, %arg8: memref<16x256xf32, #tpu.memory_space<vmem>>) attributes {dimension_semantics = [#tpu.dimension_semantics<parallel>, #tpu.dimension_semantics<parallel>, #tpu.dimension_semantics<arbitrary>], iteration_bounds = array<i64: 1, 8, 4>, scalar_prefetch = 0 : i64, scratch_operands = 1 : i64, tpu.core_type = #tpu.core_type<tc>, window_params = [{transform_indices = @transform_0, window_bounds = array<i64: 16, 256>}, {transform_indices = @transform_1, window_bounds = array<i64: 256, 256>}, {transform_indices = @transform_2, window_bounds = array<i64: 1, 256>}, {transform_indices = @transform_3, window_bounds = array<i64: 1, 256>}, {transform_indices = @transform_4, window_bounds = array<i64: 16, 256>}]} {
    %c0_i32 = arith.constant 0 : i32
    %0 = arith.cmpi eq, %arg2, %c0_i32 : i32
    %1 = arith.extui %0 : i1 to i32
    %c0_i32_0 = arith.constant 0 : i32
    %2 = arith.cmpi ne, %1, %c0_i32_0 : i32
    scf.if %2 {
      %cst_9 = arith.constant 0.000000e+00 : f32
      %12 = vector.broadcast %cst_9 : f32 to vector<16x256xf32>
      %c0_10 = arith.constant 0 : index
      %c0_11 = arith.constant 0 : index
      %13 = vector.load %arg8[%c0_10, %c0_11] : memref<16x256xf32, #tpu.memory_space<vmem>>, vector<16x256xf32>
      tpu.vector_store %arg8[%c0_10, %c0_11], %12 {strides = array<i32>} : memref<16x256xf32, #tpu.memory_space<vmem>>, vector<16x256xf32>,
    } else {
    }
    %c0 = arith.constant 0 : index
    %c0_1 = arith.constant 0 : index
    %3 = vector.load %arg8[%c0, %c0_1] : memref<16x256xf32, #tpu.memory_space<vmem>>, vector<16x256xf32>
    %c0_2 = arith.constant 0 : index
    %c0_3 = arith.constant 0 : index
    %4 = vector.load %arg3[%c0_2, %c0_3] : memref<16x256xbf16, #tpu.memory_space<vmem>>, vector<16x256xbf16>
    %c0_4 = arith.constant 0 : index
    %c0_5 = arith.constant 0 : index
    %5 = vector.load %arg4[%c0_4, %c0_5] : memref<256x256xbf16, #tpu.memory_space<vmem>>, vector<256x256xbf16>
    %cst = arith.constant dense<0.000000e+00> : vector<16x256xf32>
    %6 = tpu.matmul %4, %5, %cst {dimension_numbers = #tpu.dot_dimension_numbers<[1], [0], [0], [1], [0, 0, 1, 1], [], []>} : vector<16x256xbf16>, vector<256x256xbf16>, vector<16x256xf32> -> vector<16x256xf32>
    %7 = arith.addf %3, %6 : vector<16x256xf32>
    %c0_6 = arith.constant 0 : index
    %c0_7 = arith.constant 0 : index
    %8 = vector.load %arg8[%c0_6, %c0_7] : memref<16x256xf32, #tpu.memory_space<vmem>>, vector<16x256xf32>
    tpu.vector_store %arg8[%c0_6, %c0_7], %7 {strides = array<i32>} : memref<16x256xf32, #tpu.memory_space<vmem>>, vector<16x256xf32>,
    %c3_i32 = arith.constant 3 : i32
    %9 = arith.cmpi eq, %arg2, %c3_i32 : i32
    %10 = arith.extui %9 : i1 to i32
    %c0_i32_8 = arith.constant 0 : i32
    %11 = arith.cmpi ne, %10, %c0_i32_8 : i32
    scf.if %11 {
      %c0_9 = arith.constant 0 : index
      %c0_10 = arith.constant 0 : index
      %12 = vector.load %arg8[%c0_9, %c0_10] : memref<16x256xf32, #tpu.memory_space<vmem>>, vector<16x256xf32>
      %c0_11 = arith.constant 0 : index
      %c0_12 = arith.constant 0 : index
      %13 = vector.load %arg5[%c0_11, %c0_12] : memref<1x256xf32, #tpu.memory_space<vmem>>, vector<1x256xf32>
      %14 = vector.broadcast %13 : vector<1x256xf32> to vector<16x256xf32>
      %15 = arith.mulf %12, %14 : vector<16x256xf32>
      %c0_13 = arith.constant 0 : index
      %c0_14 = arith.constant 0 : index
      %16 = vector.load %arg6[%c0_13, %c0_14] : memref<1x256xf32, #tpu.memory_space<vmem>>, vector<1x256xf32>
      %17 = vector.broadcast %16 : vector<1x256xf32> to vector<16x256xf32>
      %18 = arith.addf %15, %17 : vector<16x256xf32>
      %cst_15 = arith.constant 0.000000e+00 : f32
      %19 = vector.broadcast %cst_15 : f32 to vector<16x256xf32>
      %20 = arith.maximumf %18, %19 : vector<16x256xf32>
      %21 = arith.truncf %20 : vector<16x256xf32> to vector<16x256xbf16>
      %c0_16 = arith.constant 0 : index
      %c0_17 = arith.constant 0 : index
      %22 = vector.load %arg7[%c0_16, %c0_17] : memref<16x256xbf16, #tpu.memory_space<vmem>>, vector<16x256xbf16>
      tpu.vector_store %arg7[%c0_16, %c0_17], %21 {strides = array<i32>} : memref<16x256xbf16, #tpu.memory_space<vmem>>, vector<16x256xbf16>,
    } else {
    }
    return
  }
  func.func @transform_0(%arg0: i32, %arg1: i32, %arg2: i32) -> (i32, i32) {
    %c0_i32 = arith.constant 0 : i32
    return %arg0, %arg2 : i32, i32
  }
  func.func @transform_1(%arg0: i32, %arg1: i32, %arg2: i32) -> (i32, i32) {
    %c0_i32 = arith.constant 0 : i32
    return %arg2, %arg1 : i32, i32
  }
  func.func @transform_2(%arg0: i32, %arg1: i32, %arg2: i32) -> (i32, i32) {
    %c0_i32 = arith.constant 0 : i32
    %c0_i32_0 = arith.constant 0 : i32
    return %c0_i32, %arg1 : i32, i32
  }
  func.func @transform_3(%arg0: i32, %arg1: i32, %arg2: i32) -> (i32, i32) {
    %c0_i32 = arith.constant 0 : i32
    %c0_i32_0 = arith.constant 0 : i32
    return %c0_i32, %arg1 : i32, i32
  }
  func.func @transform_4(%arg0: i32, %arg1: i32, %arg2: i32) -> (i32, i32) {
    %c0_i32 = arith.constant 0 : i32
    return %arg0, %arg1 : i32, i32
  }
}

module attributes {stable_mosaic.version = 11 : i64} {
  func.func @_mm_affine_kernel(%arg0: i32, %arg1: i32, %arg2: i32, %arg3: memref<16x256xbf16, #tpu.memory_space<vmem>>, %arg4: memref<256x128xbf16, #tpu.memory_space<vmem>>, %arg5: memref<1x128xf32, #tpu.memory_space<vmem>>, %arg6: memref<1x128xf32, #tpu.memory_space<vmem>>, %arg7: memref<16x128xf32, #tpu.memory_space<vmem>>, %arg8: memref<16x128xf32, #tpu.memory_space<vmem>>) attributes {dimension_semantics = [#tpu.dimension_semantics<parallel>, #tpu.dimension_semantics<parallel>, #tpu.dimension_semantics<arbitrary>], iteration_bounds = array<i64: 1, 1, 8>, scalar_prefetch = 0 : i64, scratch_operands = 1 : i64, tpu.core_type = #tpu.core_type<tc>, window_params = [{transform_indices = @transform_0, window_bounds = array<i64: 16, 256>}, {transform_indices = @transform_1, window_bounds = array<i64: 256, 128>}, {transform_indices = @transform_2, window_bounds = array<i64: 1, 128>}, {transform_indices = @transform_3, window_bounds = array<i64: 1, 128>}, {transform_indices = @transform_4, window_bounds = array<i64: 16, 128>}]} {
    %c0_i32 = arith.constant 0 : i32
    %0 = arith.cmpi eq, %arg2, %c0_i32 : i32
    %1 = arith.extui %0 : i1 to i32
    %c0_i32_0 = arith.constant 0 : i32
    %2 = arith.cmpi ne, %1, %c0_i32_0 : i32
    scf.if %2 {
      %cst_9 = arith.constant 0.000000e+00 : f32
      %12 = vector.broadcast %cst_9 : f32 to vector<16x128xf32>
      %c0_10 = arith.constant 0 : index
      %c0_11 = arith.constant 0 : index
      %13 = vector.load %arg8[%c0_10, %c0_11] : memref<16x128xf32, #tpu.memory_space<vmem>>, vector<16x128xf32>
      tpu.vector_store %arg8[%c0_10, %c0_11], %12 {strides = array<i32>} : memref<16x128xf32, #tpu.memory_space<vmem>>, vector<16x128xf32>,
    } else {
    }
    %c0 = arith.constant 0 : index
    %c0_1 = arith.constant 0 : index
    %3 = vector.load %arg8[%c0, %c0_1] : memref<16x128xf32, #tpu.memory_space<vmem>>, vector<16x128xf32>
    %c0_2 = arith.constant 0 : index
    %c0_3 = arith.constant 0 : index
    %4 = vector.load %arg3[%c0_2, %c0_3] : memref<16x256xbf16, #tpu.memory_space<vmem>>, vector<16x256xbf16>
    %c0_4 = arith.constant 0 : index
    %c0_5 = arith.constant 0 : index
    %5 = vector.load %arg4[%c0_4, %c0_5] : memref<256x128xbf16, #tpu.memory_space<vmem>>, vector<256x128xbf16>
    %cst = arith.constant dense<0.000000e+00> : vector<16x128xf32>
    %6 = tpu.matmul %4, %5, %cst {dimension_numbers = #tpu.dot_dimension_numbers<[1], [0], [0], [1], [0, 0, 1, 1], [], []>} : vector<16x256xbf16>, vector<256x128xbf16>, vector<16x128xf32> -> vector<16x128xf32>
    %7 = arith.addf %3, %6 : vector<16x128xf32>
    %c0_6 = arith.constant 0 : index
    %c0_7 = arith.constant 0 : index
    %8 = vector.load %arg8[%c0_6, %c0_7] : memref<16x128xf32, #tpu.memory_space<vmem>>, vector<16x128xf32>
    tpu.vector_store %arg8[%c0_6, %c0_7], %7 {strides = array<i32>} : memref<16x128xf32, #tpu.memory_space<vmem>>, vector<16x128xf32>,
    %c7_i32 = arith.constant 7 : i32
    %9 = arith.cmpi eq, %arg2, %c7_i32 : i32
    %10 = arith.extui %9 : i1 to i32
    %c0_i32_8 = arith.constant 0 : i32
    %11 = arith.cmpi ne, %10, %c0_i32_8 : i32
    scf.if %11 {
      %c0_9 = arith.constant 0 : index
      %c0_10 = arith.constant 0 : index
      %12 = vector.load %arg8[%c0_9, %c0_10] : memref<16x128xf32, #tpu.memory_space<vmem>>, vector<16x128xf32>
      %c0_11 = arith.constant 0 : index
      %c0_12 = arith.constant 0 : index
      %13 = vector.load %arg5[%c0_11, %c0_12] : memref<1x128xf32, #tpu.memory_space<vmem>>, vector<1x128xf32>
      %14 = vector.broadcast %13 : vector<1x128xf32> to vector<16x128xf32>
      %15 = arith.mulf %12, %14 : vector<16x128xf32>
      %c0_13 = arith.constant 0 : index
      %c0_14 = arith.constant 0 : index
      %16 = vector.load %arg6[%c0_13, %c0_14] : memref<1x128xf32, #tpu.memory_space<vmem>>, vector<1x128xf32>
      %17 = vector.broadcast %16 : vector<1x128xf32> to vector<16x128xf32>
      %18 = arith.addf %15, %17 : vector<16x128xf32>
      %c0_15 = arith.constant 0 : index
      %c0_16 = arith.constant 0 : index
      %19 = vector.load %arg7[%c0_15, %c0_16] : memref<16x128xf32, #tpu.memory_space<vmem>>, vector<16x128xf32>
      tpu.vector_store %arg7[%c0_15, %c0_16], %18 {strides = array<i32>} : memref<16x128xf32, #tpu.memory_space<vmem>>, vector<16x128xf32>,
    } else {
    }
    return
  }
  func.func @transform_0(%arg0: i32, %arg1: i32, %arg2: i32) -> (i32, i32) {
    %c0_i32 = arith.constant 0 : i32
    return %arg0, %arg2 : i32, i32
  }
  func.func @transform_1(%arg0: i32, %arg1: i32, %arg2: i32) -> (i32, i32) {
    %c0_i32 = arith.constant 0 : i32
    return %arg2, %arg1 : i32, i32
  }
  func.func @transform_2(%arg0: i32, %arg1: i32, %arg2: i32) -> (i32, i32) {
    %c0_i32 = arith.constant 0 : i32
    %c0_i32_0 = arith.constant 0 : i32
    return %c0_i32, %arg1 : i32, i32
  }
  func.func @transform_3(%arg0: i32, %arg1: i32, %arg2: i32) -> (i32, i32) {
    %c0_i32 = arith.constant 0 : i32
    %c0_i32_0 = arith.constant 0 : i32
    return %c0_i32, %arg1 : i32, i32
  }
  func.func @transform_4(%arg0: i32, %arg1: i32, %arg2: i32) -> (i32, i32) {
    %c0_i32 = arith.constant 0 : i32
    return %arg0, %arg1 : i32, i32
  }
}

</mosaic_0001>

<bundles_post_ra>
// kernel: _forward_impl.16
= control target key start
LH: loop header
LB: loop body
LE: loop exit
PB: predicated region body
PF: predicated region fallthrough
CT: control target
= control target key end

     0   :  { %9 = vsyncpa [#allocation4], 0  ;;  %s365_s0 = inlined_call_operand.vmem [shape: bf16[16,128], index: 0, kind: input, shape index: {}]   ;;  %s366_s1 = inlined_call_operand.hbm [shape: bf16[128,128], index: 1, kind: input, shape index: {}]   ;;  %s367_s2 = inlined_call_operand.hbm [shape: f32[1,128], index: 2, kind: input, shape index: {}]   ;;  %s368_s3 = inlined_call_operand.hbm [shape: f32[1,128], index: 3, kind: input, shape index: {}]   ;;  %s369_s4 = inlined_call_operand.vmem [shape: bf16[16,128], index: 4, kind: output, shape index: {}]  }
   0x1   :  { %10 = vsyncpa [#allocation6], 0  ;;  %s31_s17 = sshll.u32 %s367_s2, 4  ;;  %s320_s18 = smov [#allocation5]   ;;  %s32_s17 = int_to_ptr.hbm [resolvable:$true] %s31_s17 }
   0x2   :  { %s33_s19 = sshll.u32 %s320_s18, 4  ;;  %s17_s22 = sshll.u32 %s366_s1, 4  ;;  %s34_s19 = int_to_ptr.vmem [resolvable:$true] %s33_s19  ;;  %s18_s22 = int_to_ptr.hbm [resolvable:$true] %s17_s22 }
   0x3   :  { %36 = dma.hbm_to_vmem [thread:$0]  %s32_s17, 16, %s34_s19, [#allocation6]  }
   0x4   :  { %s321_s23 = smov [#allocation3]   ;;  %s322_s25 = smov 64  }
   0x5   :  { %s19_s24 = sshll.u32 %s321_s23, 4  ;;  %s323_s26 = smov 4   ;;  %s20_s24 = int_to_ptr.vmem [resolvable:$true] %s19_s24 }
   0x6   :  { %25 = dma.hbm_to_vmem [thread:$0]  %s18_s22, 1024, %s20_s24, [#allocation4], %s322_s25, %s322_s25, %s323_s26  }
   0x7   :  { %s42_s2 = sshll.u32 %s368_s3, 4  ;;  %s324_s29 = smov [#allocation7]   ;;  %s43_s2 = int_to_ptr.hbm [resolvable:$true] %s42_s2 }
   0x8   :  { %s44_s30 = sshll.u32 %s324_s29, 4  ;;  %s45_s30 = int_to_ptr.vmem [resolvable:$true] %s44_s30 }
   0x9   :  { %47 = dma.hbm_to_vmem [thread:$0]  %s43_s2, 16, %s45_s30, [#allocation6]  }
   0xa   :  { %316 = dma.done.wait [#allocation4], 1024  }
   0xb   :  { %317 = vsyncadd [#allocation4], 4294966272 }
   0xc   :  { %318 = dma.done.wait [#allocation6], 32  }
   0xd   :  { %319 = vsyncadd [#allocation6], 4294967264  ;;  %v231_v0 = vld [vmem:[#allocation3 + $0x38] sm:$0xff]  ;;  %v230_v1 = vld [vmem:[#allocation3 + $0x30] sm:$0xff] }
   0xe   :  { %140 = vmatpush.bf16.msra.mxu0 %v231_v0  ;;  %v229_v2 = vld [vmem:[#allocation3 + $0x28] sm:$0xff]  ;;  %v228_v3 = vld [vmem:[#allocation3 + $0x20] sm:$0xff]  ;;  %v227_v4 = vld [vmem:[#allocation3 + $0x18] sm:$0xff] }
   0xf   :  { %v226_v5 = vld [vmem:[#allocation3 + $0x10] sm:$0xff]  ;;  %v225_v6 = vld [vmem:[#allocation3 + $0x8] sm:$0xff]  ;;  %v224_v7 = vld [vmem:[#allocation3] sm:$0xff] }
  0x10   :  { %v223_v8 = vld [vmem:[%s365_s0] sm:$0xff] }
  0x11   :  { %v242_v10 = vld [vmem:[#allocation5] ss:$0 sm:$0xff]  ;;  %v243_v12 = vld [vmem:[#allocation7] ss:$0 sm:$0xff] }
  0x12   :  { %141 = vmatpush.bf16.msra.mxu0 %v230_v1 }
  0x16   :  { %142 = vmatpush.bf16.msra.mxu0 %v229_v2 }
  0x1a   :  { %143 = vmatpush.bf16.msra.mxu0 %v228_v3 }
  0x1e   :  { %144 = vmatpush.bf16.msra.mxu0 %v227_v4 }
  0x22   :  { %145 = vmatpush.bf16.msra.mxu0 %v226_v5 }
  0x26   :  { %146 = vmatpush.bf16.msra.mxu0 %v225_v6 }
  0x2a   :  { %147 = vmatpush.bf16.msra.mxu0 %v224_v7 }
  0x2d   :  { %148 = vmatmul.bf16.vlgmr.msra.gmra.mxu0 %v223_v8 }
  0xaa   :  { %v149_v9 = vpop.f32.mrf.mxu0 }
  0xab   :  { %v167_v11 = vmul.f32 %v242_v10, %v149_v9 }
  0xad   :  { %v173_v14 = vadd.f32 %v243_v12, %v167_v11 }
  0xaf   :  { %v175_v17 = vmax.f32 %v173_v14, 0.0 }
  0xb2   :  { %v151_v13 = vpop.f32.mrf.mxu0 }
  0xb3   :  { %v168_v15 = vmul.f32 %v242_v10, %v151_v13 }
  0xb5   :  { %v174_v16 = vadd.f32 %v243_v12, %v168_v15 }
  0xb7   :  { %v176_v18 = vmax.f32 %v174_v16, 0.0 }
  0xb9   :  { %v235_v19 = vpack.c.bf16 %v176_v18, %v175_v17 }
  0xbb   :  { %236 = vst [vmem:[%s369_s4] sm:$0xff] %v235_v19  }
  0xbc   :  { %185 = vsyncpa [#allocation4], 1 }
  0xbd   :  { %186 = vsyncpa [#allocation6], 1 }

// kernel: _forward_impl.17
= control target key start
LH: loop header
LB: loop body
LE: loop exit
PB: predicated region body
PF: predicated region fallthrough
CT: control target
= control target key end

     0   :  { %9 = vsyncpa [#allocation5], 0  ;;  %s1225_s0 = inlined_call_operand.vmem [shape: bf16[16,384], index: 0, kind: input, shape index: {}]   ;;  %s1226_s1 = inlined_call_operand.hbm [shape: bf16[384,256], index: 1, kind: input, shape index: {}]   ;;  %s1227_s2 = inlined_call_operand.hbm [shape: f32[1,256], index: 2, kind: input, shape index: {}]   ;;  %s1228_s3 = inlined_call_operand.hbm [shape: f32[1,256], index: 3, kind: input, shape index: {}]   ;;  %s1229_s4 = inlined_call_operand.vmem [shape: bf16[16,256], index: 4, kind: output, shape index: {}]  }
   0x1   :  { %11 = vsyncpa [#allocation5 + $0x1], 0 }
   0x2   :  { %12 = vsyncpa [#allocation7], 0  ;;  %s1064_s15 = smov 0   ;;  %s1066_s16 = smov 0  }
   0x3   :  { %s1068_s17 = smov 0   ;;  %s1070_s18 = smov 0  }
   0x4   :  { %s1072_s19 = smov 0   ;;  %s1074_s20 = smov 0  }
   0x5 LB: > { %s707_s21 = sadd.s32 4294967295, %s1032_s20   ;;  %s30_s22 = sadd.s32 1, %s1028_s19  ;;  %s1032_s20 = sphi %s1074_s20, %s18_s20   ;;  %s1028_s19 = sphi %s1072_s19, %s1238_s19   ;;  %s1024_s18 = sphi %s1070_s18, %s1237_s18   ;;  %s1020_s17 = sphi %s1068_s17, %s1236_s17   ;;  %s1016_s16 = sphi %s1066_s16, %s1235_s16   ;;  %s1012_s15 = sphi %s1064_s15, %s1234_s15  }
   0x6   : > { %p31_p0 = scmp.ge.s32.totalorder %s30_s22, 3  ;;  %s46_s23 = sadd.s32 1, %s1020_s17 }
   0x7   : > { %p53_p1 = scmp.ne.s32.totalorder %s1020_s17, %s1016_s16  ;;  %p54_p2 = scmp.eq.s32.totalorder %s1032_s20, 0 }
   0x8   : > { %s1240_s22 = smov (%p31_p0, %s30_s22), 0  ;;  %p87_p4 = scmp.ne.s32.totalorder %s1016_s16, %s1012_s15 }
   0x9   : > { %p1100_p3 = por %p54_p2, %p53_p1  ;;  %s42_s25 = ssub.s32 %s1028_s19, %s1240_s22 }
   0xa   : > { %p1107_p5 = scmp.eq.s32.totalorder %s707_s21, 0  ;;  %p44_p6 = scmp.eq.s32.totalorder %s42_s25, 0 }
   0xb   : > { %p708_p7 = scmp.ge.s32.totalorder %s1032_s20, 1  ;;  %p178_p9 = scmp.lt.s32.totalorder %s1032_s20, 4 }
   0xc   : > { %p1114_p8 = por %p1107_p5, %p87_p4  ;;  %s192_s6 = sshll.u32 %s1227_s2, 4  ;;  %s193_s6 = int_to_ptr.hbm [resolvable:$true] %s192_s6 }
   0xd   : > { %s1120_s28 = scalar_select %p44_p6, %s1020_s17, %s46_s23  }
   0xe   : > { %p1122_p10 = pnand %p708_p7, %p178_p9  ;;  %s1034_s7 = smov [#allocation6]  }
   0xf   : > { %s194_s8 = sshll.u32 %s1034_s7, 4  ;;  %s206_s11 = sshll.u32 %s1228_s3, 4  ;;  %s195_s8 = int_to_ptr.vmem [resolvable:$true] %s194_s8  ;;  %s207_s11 = int_to_ptr.hbm [resolvable:$true] %s206_s11 }
  0x10   : > { %p826_p11 = pneg %p1122_p10  ;;  %s1035_s12 = smov [#allocation8]  }
  0x11   : > { %s208_s13 = sshll.u32 %s1035_s12, 4  ;;  %p711_p13 = scmp.ge.s32.totalorder %s1032_s20, 3  ;;  %s209_s13 = int_to_ptr.vmem [resolvable:$true] %s208_s13 }
  0x12   : > { %p827_p12 = pnand %p826_p11, %p1107_p5 }
  0x13   : > { %215 = sbr.rel (%p711_p13) target bundleno = 36 (0x24), region = 24 }
  0x14   : > { %829 = dma.hbm_to_vmem [thread:$0]  (!%p827_p12), %s193_s6, 32, %s195_s8, [#allocation7]  }
  0x15   : > { %832 = dma.hbm_to_vmem [thread:$0]  (!%p827_p12), %s207_s11, 32, %s209_s13, [#allocation7]  }
  0x18   : > { %218 = sbr.rel (!%p1100_p3) target bundleno = 30 (0x1e), region = 28  ;;  %s220_s14 = sand.u32 (%p1100_p3), 1, %s1020_s17  }
  0x19   : > { %s713_s15 = sshll.u32 (%p1100_p3), %s1028_s19, 2  ;;  %s712_s21 = sshll.u32 (%p1100_p3), %s220_s14, 3 }
  0x1a   : > { %s227_s30 = scalar_lea.vmem (%p1100_p3), %s1225_s0, %s713_s15  ;;  %s222_s5 = scalar_lea.vmem (%p1100_p3), [#allocation3], %s712_s21 }
  0x1b   : > { %v244_v0 = vld [vmem:[%s227_s30] sm:$0xf] (%p1100_p3)  ;;  %v246_v1 = vld [vmem:[%s227_s30 + $0xc] sm:$0xf] (%p1100_p3) }
  0x1c   : > { %245 = vst [vmem:[%s222_s5] sm:$0xf] (%p1100_p3), %v244_v0 }
  0x1d   : > { %247 = vst [vmem:[%s222_s5 + $0x4] sm:$0xf] %v246_v1 }
  0x1e PF: > { %s276_s6 = sand.u32 1, %s1020_s17   ;;  %s798_s7 = sshll.u32 %s1028_s19, 7 }
  0x1f   : > { %s714_s8 = sshll.u32 %s276_s6, 7  ;;  %s288_s11 = scalar_lea.hbm %s1226_s1, %s798_s7 }
  0x20   : > { %s289_s12 = sshll.u32 %s288_s11, 4  ;;  %s280_s13 = scalar_lea.vmem [#allocation4], %s714_s8  ;;  %s290_s12 = int_to_ptr.hbm [resolvable:$true] %s289_s12 }
  0x21   : > { %s291_s14 = sshll.u32 %s280_s13, 4  ;;  %s277_s15 = scalar_lea.sflag [#allocation5], %s276_s6  ;;  %s292_s14 = int_to_ptr.vmem [resolvable:$true] %s291_s14 }
  0x22   : > { %s1036_s21 = smov 128   ;;  %s1037_s23 = smov 8  }
  0x23   : > { %820 = dma.hbm_to_vmem [thread:$0]  (%p1100_p3), %s290_s12, 2048, %s292_s14, %s277_s15, %s1036_s21, %s1036_s21, %s1037_s23  }
  0x24 PF: > { %303 = sbr.rel (%p1122_p10) target bundleno = 244 (0xf4), region = 73  ;;  %s306_s25 = sand.u32 (!%p1122_p10), 1, %s1016_s16  }
  0x25   : > { %s719_s30 = sshll.u32 (!%p1122_p10), %s306_s25, 3  ;;  %s720_s5 = sshll.u32 (!%p1122_p10), %s306_s25, 7 }
  0x26   : > { %s1154_s7 = scalar_lea.vmem (!%p1122_p10), [#allocation3], %s719_s30  ;;  %s313_s8 = scalar_lea.sflag (!%p1122_p10), [#allocation5], %s306_s25 }
  0x27   : > { %s1156_s9 = scalar_lea.vmem (!%p1122_p10), [#allocation4], %s720_s5 }
  0x29   : > { %1003 = dma.done.wait (%p1114_p8), %s313_s8, 2048  }
  0x2a   : > { %1005 = vsyncadd (%p1114_p8), %s313_s8, 4294965248 }
  0x2b   : > { %1007 = dma.done.wait (%p1107_p5), [#allocation7], 64  }
  0x2c   : > { %1009 = vsyncadd (%p1107_p5), [#allocation7], 4294967232  ;;  %p723_p0 = scmp.ne.s32.totalorder %s1024_s18, 0 }
  0x2e   : > { %381 = sbr.rel (%p723_p0) target bundleno = 56 (0x38), region = 93 }
  0x33   : > { %v1038_v2 = vmov 0.0  }
  0x34   : > { %382 = vst [vmem:[#allocation2 + $0x10] sm:$0xff] %v1038_v2 }
  0x35   : > { %383 = vst [vmem:[#allocation2] sm:$0xff] %v1038_v2 }
  0x36   : > { %384 = vst [vmem:[#allocation2 + $0x18] sm:$0xff] %v1038_v2 }
  0x37   : > { %385 = vst [vmem:[#allocation2 + $0x8] sm:$0xff] %v1038_v2 }
  0x38 PF: > { %v786_v3 = vld [vmem:[%s1156_s9 + $0x70] sm:$0xf]  ;;  %v815_v4 = vld [vmem:[%s1156_s9 + $0x74] sm:$0xf0]  ;;  %v814_v5 = vld [vmem:[%s1156_s9 + $0x74] sm:$0xf] }
  0x39   : > { %v787_v6 = vor.u32 %v815_v4, %v786_v3  ;;  %v788_v7 = vld [vmem:[%s1156_s9 + $0x78] sm:$0xf0]  ;;  %v778_v8 = vld [vmem:[%s1156_s9 + $0x60] sm:$0xf]  ;;  %v813_v9 = vld [vmem:[%s1156_s9 + $0x64] sm:$0xf0] }
  0x3a   : > { %v791_v10 = vor.u32 %v814_v5, %v788_v7  ;;  %v812_v11 = vld [vmem:[%s1156_s9 + $0x64] sm:$0xf]  ;;  %v780_v12 = vld [vmem:[%s1156_s9 + $0x68] sm:$0xf0]  ;;  %v779_v13 = vor.u32 %v813_v9, %v778_v8  ;;  %v770_v15 = vld [vmem:[%s1156_s9 + $0x50] sm:$0xf] }
  0x3b   : > { %494 = vmatpush.bf16.msra.mxu0 %v787_v6  ;;  %v783_v14 = vor.u32 %v812_v11, %v780_v12  ;;  %v811_v16 = vld [vmem:[%s1156_s9 + $0x54] sm:$0xf0]  ;;  %v810_v17 = vld [vmem:[%s1156_s9 + $0x54] sm:$0xf]  ;;  %v772_v18 = vld [vmem:[%s1156_s9 + $0x58] sm:$0xf0] }
  0x3c   : > { %508 = vmatpush.bf16.msra.mxu1 %v791_v10  ;;  %v771_v19 = vor.u32 %v811_v16, %v770_v15  ;;  %v775_v20 = vor.u32 %v810_v17, %v772_v18  ;;  %v762_v21 = vld [vmem:[%s1156_s9 + $0x40] sm:$0xf]  ;;  %v809_v22 = vld [vmem:[%s1156_s9 + $0x44] sm:$0xf0]  ;;  %v808_v23 = vld [vmem:[%s1156_s9 + $0x44] sm:$0xf] }
  0x3d   : > { %v764_v24 = vld [vmem:[%s1156_s9 + $0x48] sm:$0xf0]  ;;  %v763_v25 = vor.u32 %v809_v22, %v762_v21  ;;  %v754_v27 = vld [vmem:[%s1156_s9 + $0x30] sm:$0xf]  ;;  %v807_v28 = vld [vmem:[%s1156_s9 + $0x34] sm:$0xf0] }
  0x3e   : > { %v767_v26 = vor.u32 %v808_v23, %v764_v24  ;;  %v806_v29 = vld [vmem:[%s1156_s9 + $0x34] sm:$0xf]  ;;  %v756_v30 = vld [vmem:[%s1156_s9 + $0x38] sm:$0xf0]  ;;  %v755_v31 = vor.u32 %v807_v28, %v754_v27  ;;  %v746_v33 = vld [vmem:[%s1156_s9 + $0x20] sm:$0xf] }
  0x3f   : > { %495 = vmatpush.bf16.msra.mxu0 %v779_v13  ;;  %v759_v32 = vor.u32 %v806_v29, %v756_v30  ;;  %v805_v34 = vld [vmem:[%s1156_s9 + $0x24] sm:$0xf0]  ;;  %v804_v35 = vld [vmem:[%s1156_s9 + $0x24] sm:$0xf]  ;;  %v748_v36 = vld [vmem:[%s1156_s9 + $0x28] sm:$0xf0] }
  0x40   : > { %509 = vmatpush.bf16.msra.mxu1 %v783_v14  ;;  %v747_v37 = vor.u32 %v805_v34, %v746_v33  ;;  %v751_v38 = vor.u32 %v804_v35, %v748_v36  ;;  %v738_v39 = vld [vmem:[%s1156_s9 + $0x10] sm:$0xf]  ;;  %v803_v40 = vld [vmem:[%s1156_s9 + $0x14] sm:$0xf0]  ;;  %v802_v41 = vld [vmem:[%s1156_s9 + $0x14] sm:$0xf] }
  0x41   : > { %v740_v42 = vld [vmem:[%s1156_s9 + $0x18] sm:$0xf0]  ;;  %v739_v43 = vor.u32 %v803_v40, %v738_v39  ;;  %v730_v45 = vld [vmem:[%s1156_s9] sm:$0xf]  ;;  %v801_v46 = vld [vmem:[%s1156_s9 + $0x4] sm:$0xf0] }
  0x42   : > { %v743_v44 = vor.u32 %v802_v41, %v740_v42  ;;  %v800_v47 = vld [vmem:[%s1156_s9 + $0x4] sm:$0xf]  ;;  %v732_v48 = vld [vmem:[%s1156_s9 + $0x8] sm:$0xf0]  ;;  %v731_v49 = vor.u32 %v801_v46, %v730_v45  ;;  %v799_v51 = vld [vmem:[%s1154_s7] sm:$0xff]  ;;  %p792_p1 = scmp.ne.s32.totalorder %s1024_s18, 2 }
  0x43   : > { %496 = vmatpush.bf16.msra.mxu0 %v771_v19  ;;  %v735_v50 = vor.u32 %v800_v47, %v732_v48  ;;  %v386_v52 = vld [vmem:[#allocation2 + $0x10] sm:$0xff]  ;;  %v387_v53 = vld [vmem:[#allocation2] sm:$0xff]  ;;  %v388_v58 = vld [vmem:[#allocation2 + $0x18] sm:$0xff] }
  0x44   : > { %510 = vmatpush.bf16.msra.mxu1 %v775_v20  ;;  %v389_v59 = vld [vmem:[#allocation2 + $0x8] sm:$0xff] }
  0x47   : > { %497 = vmatpush.bf16.msra.mxu0 %v763_v25 }
  0x48   : > { %511 = vmatpush.bf16.msra.mxu1 %v767_v26 }
  0x4b   : > { %498 = vmatpush.bf16.msra.mxu0 %v755_v31 }
  0x4c   : > { %512 = vmatpush.bf16.msra.mxu1 %v759_v32 }
  0x4f   : > { %499 = vmatpush.bf16.msra.mxu0 %v747_v37 }
  0x50   : > { %513 = vmatpush.bf16.msra.mxu1 %v751_v38 }
  0x53   : > { %500 = vmatpush.bf16.msra.mxu0 %v739_v43 }
  0x54   : > { %514 = vmatpush.bf16.msra.mxu1 %v743_v44 }
  0x57   : > { %501 = vmatpush.bf16.msra.mxu0 %v731_v49 }
  0x58   : > { %515 = vmatpush.bf16.msra.mxu1 %v735_v50 }
  0x5a   : > { %502 = vmatmul.bf16.vlgmr.msra.gmra.mxu0 %v799_v51 }
  0x5b   : > { %516 = vmatmul.bf16.vlgmr.msra.gmra.mxu1 %v799_v51 }
  0xd7   : > { %v503_v54 = vpop.f32.mrf.mxu0 }
  0xd8   : > { %v522_v55 = vadd.f32 %v503_v54, %v386_v52  ;;  %v517_v56 = vpop.f32.mrf.mxu1 }
  0xd9   : > { %v523_v57 = vadd.f32 %v517_v56, %v387_v53 }
  0xda   : > { %526 = vst [vmem:[#allocation2 + $0x10] sm:$0xff] %v522_v55 }
  0xdb   : > { %527 = vst [vmem:[#allocation2] sm:$0xff] %v523_v57 }
  0xdf   : > { %v505_v60 = vpop.f32.mrf.mxu0  ;;  %533 = sbr.rel (%p792_p1) target bundleno = 244 (0xf4), region = 97 }
  0xe0   : > { %v524_v61 = vadd.f32 %v505_v60, %v388_v58  ;;  %v519_v62 = vpop.f32.mrf.mxu1 }
  0xe1   : > { %v525_v63 = vadd.f32 %v519_v62, %v389_v59 }
  0xe2   : > { %528 = vst [vmem:[#allocation2 + $0x18] sm:$0xff] %v524_v61 }
  0xe3   : > { %529 = vst [vmem:[#allocation2 + $0x8] sm:$0xff] %v525_v63 }
  0xe4   : > { %v534_v0 = vld [vmem:[#allocation2 + $0x10] sm:$0xff]  ;;  %v535_v1 = vld [vmem:[#allocation2] sm:$0xff] }
  0xe5   : > { %v538_v2 = vld [vmem:[#allocation6] sm:$0x3]  ;;  %v548_v5 = vld [vmem:[#allocation8] sm:$0x3] }
  0xe6   : > { %v540_v3 = vperm.slane %v538_v2, 0  ;;  %v541_v4 = vperm.slane %v538_v2, 1  ;;  %v550_v8 = vperm.slane %v548_v5, 0  ;;  %v551_v9 = vperm.slane %v548_v5, 1 }
  0xe8   : > { %v544_v10 = vmul.f32 %v540_v3, %v534_v0  ;;  %v545_v11 = vmul.f32 %v541_v4, %v535_v1 }
  0xe9   : > { %v536_v6 = vld [vmem:[#allocation2 + $0x18] sm:$0xff] }
  0xea   : > { %v537_v7 = vld [vmem:[#allocation2 + $0x8] sm:$0xff]  ;;  %v546_v12 = vmul.f32 %v540_v3, %v536_v6  ;;  %v554_v14 = vadd.f32 %v550_v8, %v544_v10  ;;  %v555_v15 = vadd.f32 %v551_v9, %v545_v11 }
  0xeb   : > { %v547_v13 = vmul.f32 %v541_v4, %v537_v7 }
  0xec   : > { %v556_v16 = vadd.f32 %v550_v8, %v546_v12  ;;  %v558_v18 = vmax.f32 %v554_v14, 0.0  ;;  %v559_v19 = vmax.f32 %v555_v15, 0.0 }
  0xed   : > { %v557_v17 = vadd.f32 %v551_v9, %v547_v13 }
  0xee   : > { %v560_v20 = vmax.f32 %v556_v16, 0.0  ;;  %v562_v22 = vpack.c.bf16 %v559_v19, %v558_v18 }
  0xef   : > { %v561_v21 = vmax.f32 %v557_v17, 0.0 }
  0xf0   : > { %564 = vst [vmem:[%s1229_s4] sm:$0xff] %v562_v22 }
  0xf1   : > { %v563_v23 = vpack.c.bf16 %v561_v21, %v560_v20 }
  0xf3   : > { %565 = vst [vmem:[%s1229_s4 + $0x8] sm:$0xff] %v563_v23 }
  0xf4 PF: > { %s18_s20 = sadd.s32 1, %s1032_s20   ;;  %s1234_s15 = smov %s1016_s16 }
  0xf5   : > { %p15_p2 = scmp.ge.s32.totalorder %s18_s20, 5   ;;  %s1235_s16 = smov %s1020_s17 }
  0xf6   : > { %s1236_s17 = smov %s1120_s28  ;;  %s1237_s18 = smov %s1028_s19 }
  0xf7   : > { %s1238_s19 = smov %s1240_s22  ;;  %17 = sbr.rel (!%p15_p2) target bundleno = 5 (0x5), region = 143 }
  0xfc   :  { %599 = vsyncpa [#allocation5], 1 }
  0xfd   :  { %601 = vsyncpa [#allocation5 + $0x1], 1 }
  0xfe   :  { %602 = vsyncpa [#allocation7], 1 }

// kernel: _forward_impl.19
= control target key start
LH: loop header
LB: loop body
LE: loop exit
PB: predicated region body
PF: predicated region fallthrough
CT: control target
= control target key end

     0   :  { %s1524_s0 = inlined_call_operand.vmem [shape: bf16[16,256], index: 0, kind: input, shape index: {}]   ;;  %s1525_s1 = inlined_call_operand.hbm [shape: bf16[256,2048], index: 1, kind: input, shape index: {}]   ;;  %s1526_s2 = inlined_call_operand.hbm [shape: f32[1,2048], index: 2, kind: input, shape index: {}]   ;;  %s1527_s3 = inlined_call_operand.hbm [shape: f32[1,2048], index: 3, kind: input, shape index: {}]   ;;  %s1528_s4 = inlined_call_operand.vmem [shape: bf16[16,2048], index: 4, kind: output, shape index: {}]  }
   0x1   :  { %1530 = sst [smem:[#allocation13_spill]] %s1526_s2 }
   0x2   :  { %9 = vsyncpa [#allocation4], 0 }
   0x3   :  { %11 = vsyncpa [#allocation4 + $0x1], 0 }
   0x4   :  { %12 = vsyncpa [#allocation6], 0 }
   0x5   :  { %14 = vsyncpa [#allocation6 + $0x1], 0  ;;  %s1302_s15 = smov 0   ;;  %s1304_s16 = smov 0  }
   0x6   :  { %s1306_s17 = smov 0   ;;  %s1308_s18 = smov 0  }
   0x7   :  { %s1310_s19 = smov 0   ;;  %s1312_s20 = smov 0  }
   0x8 LB: > { %s1331_s21 = sadd.s32 4294967295, %s1272_s20   ;;  %s35_s22 = sadd.s32 1, %s1268_s19  ;;  %s1272_s20 = sphi %s1312_s20, %s20_s20   ;;  %s1268_s19 = sphi %s1310_s19, %s1545_s19   ;;  %s1264_s18 = sphi %s1308_s18, %s1544_s18   ;;  %s1260_s17 = sphi %s1306_s17, %s1543_s17   ;;  %s1256_s16 = sphi %s1304_s16, %s1542_s16   ;;  %s1252_s15 = sphi %s1302_s15, %s1541_s15  }
   0x9   : > { %p37_p0 = scmp.ge.s32.totalorder %s35_s22, 8  ;;  %s76_s23 = sadd.s32 1, %s1260_s17 }
   0xa   : > { %p83_p1 = scmp.ne.s32.totalorder %s1260_s17, %s1256_s16  ;;  %p84_p2 = scmp.eq.s32.totalorder %s1272_s20, 0 }
   0xb   : > { %s1547_s22 = smov (%p37_p0, %s35_s22), 0  ;;  %p89_p4 = scmp.ne.s32.totalorder %s1256_s16, %s1252_s15 }
   0xc   : > { %1531 = sst [smem:[#allocation11_spill]] %s1547_s22  ;;  %p1340_p3 = por %p84_p2, %p83_p1 }
   0xd   : > { %s72_s25 = ssub.s32 %s1268_s19, %s1547_s22  ;;  %p90_p5 = scmp.eq.s32.totalorder %s1331_s21, 0 }
   0xe   : > { %p74_p6 = scmp.eq.s32.totalorder %s72_s25, 0  ;;  %p167_p7 = scmp.eq.s32.totalorder %s1331_s21, 7 }
   0xf   : > { %p1349_p8 = por %p90_p5, %p89_p4  ;;  %p1076_p10 = scmp.lt.s32.totalorder %s1272_s20, 8 }
  0x10   : > { %s1354_s27 = scalar_select %p74_p6, %s1260_s17, %s76_s23  }
  0x11   : > { %p1356_p9 = por %p167_p7, %p83_p1  ;;  %s1362_s29 = sand.u32 1, %s1260_s17  }
  0x12   : > { %1534 = sst [smem:[#allocation12_spill]] %s1354_s27  ;;  %s233_s30 = sand.u32 1, %s1272_s20  }
  0x13   : > { %s871_s5 = sshll.u32 %s1362_s29, 8  ;;  %p1368_p11 = pnand %p1076_p10, %p1340_p3 }
  0x14   : > { %s212_s7 = scalar_lea.vmem [#allocation3], %s871_s5  ;;  %s874_s9 = sshll.u32 %s1362_s29, 1 }
  0x15   : > { %s223_s8 = sshll.u32 %s212_s7, 4  ;;  %s875_s10 = sshll.u32 %s1268_s19, 1  ;;  %s224_s8 = int_to_ptr.vmem [resolvable:$true] %s223_s8 }
  0x16   : > { %s1537_s2 = sld [smem:[#allocation13_spill]]  ;;  %s237_s15 = scalar_lea.vmem [#allocation5], %s874_s9 }
  0x17   : > { %s245_s23 = sshll.u32 %s237_s15, 4  ;;  %s234_s24 = scalar_lea.sflag [#allocation6], %s233_s30  ;;  %s246_s23 = int_to_ptr.vmem [resolvable:$true] %s245_s23 }
  0x18   : > { %s260_s7 = scalar_lea.hbm %s1527_s3, %s875_s10  ;;  %p878_p12 = scmp.ge.s32.totalorder %s1272_s20, 1 }
  0x19   : > { %p269_p13 = scmp.lt.s32.totalorder %s1272_s20, 9  ;;  %s1024_s22 = sshll.u32 %s1268_s19, 3 }
  0x1a   : > { %s220_s15 = scalar_lea.hbm %s1525_s1, %s1024_s22  ;;  %s209_s30 = scalar_lea.sflag [#allocation4], %s1362_s29 }
  0x1b   : > { %p1385_p0 = pnand %p878_p12, %p269_p13  ;;  %s1276_s27 = smov 8  }
  0x1c   : > { %s241_s13 = scalar_lea.hbm %s1537_s2, %s875_s10  ;;  %s221_s2 = sshll.u32 %s220_s15, 4  ;;  %s222_s2 = int_to_ptr.hbm [resolvable:$true] %s221_s2 }
  0x1d   : > { %s243_s14 = sshll.u32 %s241_s13, 4  ;;  %s262_s10 = sshll.u32 %s260_s7, 4  ;;  %s244_s14 = int_to_ptr.hbm [resolvable:$true] %s243_s14  ;;  %s263_s10 = int_to_ptr.hbm [resolvable:$true] %s262_s10 }
  0x1e   : > { %1072 = dma.hbm_to_vmem [thread:$0]  (!%p1368_p11), %s244_s14, 32, %s246_s23, %s234_s24  }
  0x1f   : > { %s1274_s14 = smov 1024   ;;  %s1275_s23 = smov 128  }
  0x20   : > { %1069 = dma.hbm_to_vmem [thread:$0]  (!%p1368_p11), %s222_s2, 4096, %s224_s8, %s209_s30, %s1274_s14, %s1275_s23, %s1276_s27  }
  0x21   : > { %s256_s25 = scalar_lea.vmem [#allocation7], %s874_s9  ;;  %273 = sbr.rel (%p1385_p0) target bundleno = 236 (0xec), region = 36 }
  0x22   : > { %s264_s5 = sshll.u32 %s256_s25, 4  ;;  %s1400_s22 = sand.u32 (!%p1385_p0), 1, %s1256_s16   ;;  %s265_s5 = int_to_ptr.vmem [resolvable:$true] %s264_s5 }
  0x23   : > { %1075 = dma.hbm_to_vmem [thread:$0]  (!%p1368_p11), %s263_s10, 32, %s265_s5, %s234_s24  }
  0x24   : > { %s879_s29 = sshll.u32 (!%p1385_p0), %s1400_s22, 8  ;;  %s276_s12 = scalar_lea.sflag (!%p1385_p0), [#allocation4], %s1400_s22 }
  0x25   : > { %s1404_s13 = scalar_lea.vmem (!%p1385_p0), [#allocation3], %s879_s29 }
  0x26   : > { %1243 = dma.done.wait (%p1349_p8), %s276_s12, 4096  }
  0x27   : > { %1245 = vsyncadd (%p1349_p8), %s276_s12, 4294963200  ;;  %s285_s2 = sand.u32 1, %s1331_s21   ;;  %s880_s27 = sshll.u32 %s1400_s22, 1 }
  0x28   : > { %s286_s6 = scalar_lea.sflag [#allocation6], %s285_s2  ;;  %s1414_s8 = scalar_lea.vmem [#allocation5], %s880_s27 }
  0x29   : > { %1247 = dma.done.wait (%p1349_p8), %s286_s6, 64  }
  0x2a   : > { %1249 = vsyncadd (%p1349_p8), %s286_s6, 4294967232  ;;  %v949_v0 = vld [vmem:[%s1404_s13 + $0x70] sm:$0xf]  ;;  %v1042_v1 = vld [vmem:[%s1404_s13 + $0x74] sm:$0xf0]  ;;  %s299_s14 = scalar_lea.vmem [#allocation7], %s880_s27 }
  0x2b   : > { %v1013_v2 = vld [vmem:[%s1404_s13 + $0xf0] sm:$0xf]  ;;  %v950_v3 = vor.u32 %v1042_v1, %v949_v0  ;;  %v1058_v4 = vld [vmem:[%s1404_s13 + $0xf4] sm:$0xf0]  ;;  %v1041_v5 = vld [vmem:[%s1404_s13 + $0x74] sm:$0xf] }
  0x2c   : > { %v951_v6 = vld [vmem:[%s1404_s13 + $0x78] sm:$0xf0]  ;;  %v1014_v7 = vor.u32 %v1058_v4, %v1013_v2  ;;  %v1057_v9 = vld [vmem:[%s1404_s13 + $0xf4] sm:$0xf]  ;;  %v941_v11 = vld [vmem:[%s1404_s13 + $0x60] sm:$0xf] }
  0x2d   : > { %v954_v8 = vor.u32 %v1041_v5, %v951_v6  ;;  %v1015_v10 = vld [vmem:[%s1404_s13 + $0xf8] sm:$0xf0]  ;;  %578 = vmatpush.bf16.msra.mxu0 %v950_v3  ;;  %v1040_v13 = vld [vmem:[%s1404_s13 + $0x64] sm:$0xf0]  ;;  %v1005_v14 = vld [vmem:[%s1404_s13 + $0xe0] sm:$0xf] }
  0x2e   : > { %v1018_v12 = vor.u32 %v1057_v9, %v1015_v10  ;;  %v1056_v15 = vld [vmem:[%s1404_s13 + $0xe4] sm:$0xf0]  ;;  %592 = vmatpush.bf16.msra.mxu1 %v1014_v7  ;;  %v942_v16 = vor.u32 %v1040_v13, %v941_v11  ;;  %v1039_v18 = vld [vmem:[%s1404_s13 + $0x64] sm:$0xf]  ;;  %v943_v19 = vld [vmem:[%s1404_s13 + $0x68] sm:$0xf0] }
  0x2f   : > { %606 = vmatpush.bf16.msra.mxu2 %v954_v8  ;;  %v1006_v17 = vor.u32 %v1056_v15, %v1005_v14  ;;  %v1055_v20 = vld [vmem:[%s1404_s13 + $0xe4] sm:$0xf]  ;;  %v946_v21 = vor.u32 %v1039_v18, %v943_v19  ;;  %v1007_v22 = vld [vmem:[%s1404_s13 + $0xe8] sm:$0xf0]  ;;  %v933_v23 = vld [vmem:[%s1404_s13 + $0x50] sm:$0xf] }
  0x30   : > { %620 = vmatpush.bf16.msra.mxu3 %v1018_v12  ;;  %v1038_v24 = vld [vmem:[%s1404_s13 + $0x54] sm:$0xf0]  ;;  %v1010_v25 = vor.u32 %v1055_v20, %v1007_v22  ;;  %v997_v26 = vld [vmem:[%s1404_s13 + $0xd0] sm:$0xf]  ;;  %v1037_v28 = vld [vmem:[%s1404_s13 + $0x54] sm:$0xf] }
  0x31   : > { %v1054_v27 = vld [vmem:[%s1404_s13 + $0xd4] sm:$0xf0]  ;;  %579 = vmatpush.bf16.msra.mxu0 %v942_v16  ;;  %v934_v29 = vor.u32 %v1038_v24, %v933_v23  ;;  %v935_v30 = vld [vmem:[%s1404_s13 + $0x58] sm:$0xf0]  ;;  %v1053_v31 = vld [vmem:[%s1404_s13 + $0xd4] sm:$0xf] }
  0x32   : > { %v999_v32 = vld [vmem:[%s1404_s13 + $0xd8] sm:$0xf0]  ;;  %593 = vmatpush.bf16.msra.mxu1 %v1006_v17  ;;  %v998_v33 = vor.u32 %v1054_v27, %v997_v26  ;;  %v938_v34 = vor.u32 %v1037_v28, %v935_v30  ;;  %v925_v35 = vld [vmem:[%s1404_s13 + $0x40] sm:$0xf]  ;;  %v1036_v36 = vld [vmem:[%s1404_s13 + $0x44] sm:$0xf0] }
  0x33   : > { %607 = vmatpush.bf16.msra.mxu2 %v946_v21  ;;  %v989_v37 = vld [vmem:[%s1404_s13 + $0xc0] sm:$0xf]  ;;  %v1002_v38 = vor.u32 %v1053_v31, %v999_v32  ;;  %v1052_v39 = vld [vmem:[%s1404_s13 + $0xc4] sm:$0xf0]  ;;  %v1035_v40 = vld [vmem:[%s1404_s13 + $0x44] sm:$0xf]  ;;  %v926_v44 = vor.u32 %v1036_v36, %v925_v35 }
  0x34   : > { %621 = vmatpush.bf16.msra.mxu3 %v1010_v25  ;;  %v927_v41 = vld [vmem:[%s1404_s13 + $0x48] sm:$0xf0]  ;;  %v1051_v42 = vld [vmem:[%s1404_s13 + $0xc4] sm:$0xf]  ;;  %v990_v45 = vor.u32 %v1052_v39, %v989_v37  ;;  %v917_v47 = vld [vmem:[%s1404_s13 + $0x30] sm:$0xf] }
  0x35   : > { %v991_v43 = vld [vmem:[%s1404_s13 + $0xc8] sm:$0xf0]  ;;  %580 = vmatpush.bf16.msra.mxu0 %v934_v29  ;;  %v930_v46 = vor.u32 %v1035_v40, %v927_v41  ;;  %v1034_v48 = vld [vmem:[%s1404_s13 + $0x34] sm:$0xf0]  ;;  %v981_v49 = vld [vmem:[%s1404_s13 + $0xb0] sm:$0xf] }
  0x36   : > { %594 = vmatpush.bf16.msra.mxu1 %v998_v33  ;;  %v994_v50 = vor.u32 %v1051_v42, %v991_v43  ;;  %v1050_v51 = vld [vmem:[%s1404_s13 + $0xb4] sm:$0xf0]  ;;  %v1033_v52 = vld [vmem:[%s1404_s13 + $0x34] sm:$0xf]  ;;  %v919_v53 = vld [vmem:[%s1404_s13 + $0x38] sm:$0xf0]  ;;  %v918_v56 = vor.u32 %v1034_v48, %v917_v47 }
  0x37   : > { %608 = vmatpush.bf16.msra.mxu2 %v938_v34  ;;  %v1049_v54 = vld [vmem:[%s1404_s13 + $0xb4] sm:$0xf]  ;;  %v983_v55 = vld [vmem:[%s1404_s13 + $0xb8] sm:$0xf0]  ;;  %v982_v57 = vor.u32 %v1050_v51, %v981_v49  ;;  %v922_v58 = vor.u32 %v1033_v52, %v919_v53  ;;  %v909_v59 = vld [vmem:[%s1404_s13 + $0x20] sm:$0xf] }
  0x38   : > { %622 = vmatpush.bf16.msra.mxu3 %v1002_v38  ;;  %v1032_v60 = vld [vmem:[%s1404_s13 + $0x24] sm:$0xf0]  ;;  %v973_v61 = vld [vmem:[%s1404_s13 + $0xa0] sm:$0xf]  ;;  %v986_v62 = vor.u32 %v1049_v54, %v983_v55  ;;  %v1031_v0 = vld [vmem:[%s1404_s13 + $0x24] sm:$0xf] }
  0x39   : > { %581 = vmatpush.bf16.msra.mxu0 %v926_v44  ;;  %v1048_v63 = vld [vmem:[%s1404_s13 + $0xa4] sm:$0xf0]  ;;  %v911_v1 = vld [vmem:[%s1404_s13 + $0x28] sm:$0xf0]  ;;  %v1047_v2 = vld [vmem:[%s1404_s13 + $0xa4] sm:$0xf]  ;;  %v910_v4 = vor.u32 %v1032_v60, %v909_v59 }
  0x3a   : > { %595 = vmatpush.bf16.msra.mxu1 %v990_v45  ;;  %v975_v3 = vld [vmem:[%s1404_s13 + $0xa8] sm:$0xf0]  ;;  %v974_v5 = vor.u32 %v1048_v63, %v973_v61  ;;  %v914_v6 = vor.u32 %v1031_v0, %v911_v1  ;;  %v901_v7 = vld [vmem:[%s1404_s13 + $0x10] sm:$0xf]  ;;  %v1030_v8 = vld [vmem:[%s1404_s13 + $0x14] sm:$0xf0] }
  0x3b   : > { %609 = vmatpush.bf16.msra.mxu2 %v930_v46  ;;  %v965_v9 = vld [vmem:[%s1404_s13 + $0x90] sm:$0xf]  ;;  %v978_v10 = vor.u32 %v1047_v2, %v975_v3  ;;  %v1046_v11 = vld [vmem:[%s1404_s13 + $0x94] sm:$0xf0]  ;;  %v1029_v12 = vld [vmem:[%s1404_s13 + $0x14] sm:$0xf]  ;;  %v902_v16 = vor.u32 %v1030_v8, %v901_v7 }
  0x3c   : > { %623 = vmatpush.bf16.msra.mxu3 %v994_v50  ;;  %v903_v13 = vld [vmem:[%s1404_s13 + $0x18] sm:$0xf0]  ;;  %v1045_v14 = vld [vmem:[%s1404_s13 + $0x94] sm:$0xf]  ;;  %v966_v17 = vor.u32 %v1046_v11, %v965_v9  ;;  %v893_v19 = vld [vmem:[%s1404_s13] sm:$0xf] }
  0x3d   : > { %582 = vmatpush.bf16.msra.mxu0 %v918_v56  ;;  %v967_v15 = vld [vmem:[%s1404_s13 + $0x98] sm:$0xf0]  ;;  %v906_v18 = vor.u32 %v1029_v12, %v903_v13  ;;  %v1028_v20 = vld [vmem:[%s1404_s13 + $0x4] sm:$0xf0]  ;;  %v957_v21 = vld [vmem:[%s1404_s13 + $0x80] sm:$0xf] }
  0x3e   : > { %596 = vmatpush.bf16.msra.mxu1 %v982_v57  ;;  %v970_v22 = vor.u32 %v1045_v14, %v967_v15  ;;  %v1044_v23 = vld [vmem:[%s1404_s13 + $0x84] sm:$0xf0]  ;;  %v1027_v24 = vld [vmem:[%s1404_s13 + $0x4] sm:$0xf]  ;;  %v895_v25 = vld [vmem:[%s1404_s13 + $0x8] sm:$0xf0]  ;;  %v894_v28 = vor.u32 %v1028_v20, %v893_v19 }
  0x3f   : > { %610 = vmatpush.bf16.msra.mxu2 %v922_v58  ;;  %v1043_v26 = vld [vmem:[%s1404_s13 + $0x84] sm:$0xf]  ;;  %v959_v27 = vld [vmem:[%s1404_s13 + $0x88] sm:$0xf0]  ;;  %v885_v29 = vld [vmem:[%s1524_s0] sm:$0xf]  ;;  %v958_v31 = vor.u32 %v1044_v23, %v957_v21  ;;  %v898_v32 = vor.u32 %v1027_v24, %v895_v25 }
  0x40   : > { %624 = vmatpush.bf16.msra.mxu3 %v986_v62  ;;  %v1026_v30 = vld [vmem:[%s1524_s0 + $0x4] sm:$0xf0]  ;;  %v1025_v33 = vld [vmem:[%s1524_s0 + $0x4] sm:$0xf]  ;;  %v887_v34 = vld [vmem:[%s1524_s0 + $0x8] sm:$0xf0]  ;;  %v962_v35 = vor.u32 %v1043_v26, %v959_v27 }
  0x41   : > { %583 = vmatpush.bf16.msra.mxu0 %v910_v4  ;;  %v886_v36 = vor.u32 %v1026_v30, %v885_v29  ;;  %v890_v37 = vor.u32 %v1025_v33, %v887_v34  ;;  %v649_v39 = vld [vmem:[%s1414_s8] sm:$0x3]  ;;  %v659_v43 = vld [vmem:[%s299_s14] sm:$0x3]  ;;  %s882_s23 = sshll.u32 %s1400_s22, 4  ;;  %s1059_s25 = sshll.u32 (%p1356_p9), %s1264_s18, 3 }
  0x42   : > { %597 = vmatpush.bf16.msra.mxu1 %v974_v5  ;;  %v651_v42 = vperm.slane %v649_v39, 0  ;;  %v661_v45 = vperm.slane %v659_v43, 0  ;;  %v652_v47 = vperm.slane %v649_v39, 1  ;;  %v662_v50 = vperm.slane %v659_v43, 1  ;;  %s343_s10 = scalar_lea.vmem [#allocation8], %s882_s23  ;;  %s685_s29 = scalar_lea.vmem (%p1356_p9), %s1528_s4, %s1059_s25 }
  0x43   : > { %611 = vmatpush.bf16.msra.mxu2 %v914_v6 }
  0x44   : > { %625 = vmatpush.bf16.msra.mxu3 %v978_v10 }
  0x45   : > { %584 = vmatpush.bf16.msra.mxu0 %v902_v16 }
  0x46   : > { %598 = vmatpush.bf16.msra.mxu1 %v966_v17 }
  0x47   : > { %612 = vmatpush.bf16.msra.mxu2 %v906_v18 }
  0x48   : > { %626 = vmatpush.bf16.msra.mxu3 %v970_v22 }
  0x49   : > { %585 = vmatpush.bf16.msra.mxu0 %v894_v28 }
  0x4a   : > { %599 = vmatpush.bf16.msra.mxu1 %v958_v31 }
  0x4b   : > { %613 = vmatpush.bf16.msra.mxu2 %v898_v32 }
  0x4c   : > { %627 = vmatpush.bf16.msra.mxu3 %v962_v35  ;;  %586 = vmatmul.bf16.vlgmr.msra.gmra.mxu0 %v886_v36 }
  0x4d   : > { %600 = vmatmul.bf16.vlgmr.msra.gmra.mxu1 %v890_v37 }
  0x4e   : > { %614 = vmatmul.bf16.vlgmr.msra.gmra.mxu2 %v886_v36 }
  0x4f   : > { %628 = vmatmul.bf16.vlgmr.msra.gmra.mxu3 %v890_v37 }
  0xc9   : > { %v587_v38 = vpop.f32.mrf.mxu0 }
  0xca   : > { %v601_v40 = vpop.f32.mrf.mxu1 }
  0xcb   : > { %v602_v41 = vadd.f32 %v601_v40, %v587_v38 }
  0xcd   : > { %v655_v44 = vmul.f32 %v651_v42, %v602_v41 }
  0xcf   : > { %v665_v53 = vadd.f32 %v661_v45, %v655_v44 }
  0xd1   : > { %v615_v46 = vpop.f32.mrf.mxu2  ;;  %v589_v51 = vpop.f32.mrf.mxu0 }
  0xd2   : > { %v629_v48 = vpop.f32.mrf.mxu3  ;;  %v603_v52 = vpop.f32.mrf.mxu1 }
  0xd3   : > { %v630_v49 = vadd.f32 %v629_v48, %v615_v46  ;;  %v604_v56 = vadd.f32 %v603_v52, %v589_v51 }
  0xd5   : > { %v656_v54 = vmul.f32 %v652_v47, %v630_v49  ;;  %v657_v60 = vmul.f32 %v651_v42, %v604_v56 }
  0xd7   : > { %v666_v55 = vadd.f32 %v662_v50, %v656_v54  ;;  %v667_v63 = vadd.f32 %v661_v45, %v657_v60 }
  0xd9   : > { %v669_v57 = vpack.c.bf16 %v666_v55, %v665_v53  ;;  %v617_v58 = vpop.f32.mrf.mxu2 }
  0xda   : > { %v631_v59 = vpop.f32.mrf.mxu3 }
  0xdb   : > { %671 = vst [vmem:[%s343_s10] sm:$0xff] %v669_v57  ;;  %v632_v61 = vadd.f32 %v631_v59, %v617_v58 }
  0xdd   : > { %v658_v62 = vmul.f32 %v652_v47, %v632_v61 }
  0xdf   : > { %v668_v0 = vadd.f32 %v662_v50, %v658_v62  ;;  %679 = sbr.rel (!%p1356_p9) target bundleno = 236 (0xec), region = 60 }
  0xe1   : > { %v670_v1 = vpack.c.bf16 %v668_v0, %v667_v63 }
  0xe2   : > { %v716_v2 = vld [vmem:[%s343_s10] sm:$0xff] (%p1356_p9) }
  0xe3   : > { %672 = vst [vmem:[%s343_s10 + $0x8] sm:$0xff] %v670_v1 }
  0xe4   : > { %717 = vst [vmem:[%s685_s29] sm:$0xff] %v716_v2 }
  0xea   : > { %v718_v3 = vld [vmem:[%s343_s10 + $0x8] sm:$0xff] }
  0xeb   : > { %719 = vst [vmem:[%s685_s29 + $0x40] sm:$0xff] %v718_v3 }
  0xec PF: > { %s20_s20 = sadd.s32 1, %s1272_s20   ;;  %s1539_s12 = sld [smem:[#allocation12_spill]] }
  0xed   : > { %p17_p1 = scmp.ge.s32.totalorder %s20_s20, 10   ;;  %s1540_s28 = sld [smem:[#allocation11_spill]] }
  0xee   : > { %s1541_s15 = smov %s1256_s16  ;;  %s1542_s16 = smov %s1260_s17 }
  0xef   : > { %s1544_s18 = smov %s1268_s19  ;;  %19 = sbr.rel (!%p17_p1) target bundleno = 8 (0x8), region = 149 }
  0xf2   : > { %s1543_s17 = smov %s1539_s12 }
  0xf3   : > { %s1545_s19 = smov %s1540_s28 }
  0xf4   :  { %735 = vsyncpa [#allocation4], 1 }
  0xf5   :  { %737 = vsyncpa [#allocation4 + $0x1], 1 }
  0xf6   :  { %738 = vsyncpa [#allocation6], 1 }
  0xf7   :  { %740 = vsyncpa [#allocation6 + $0x1], 1 }

// kernel: _forward_impl.22
= control target key start
LH: loop header
LB: loop body
LE: loop exit
PB: predicated region body
PF: predicated region fallthrough
CT: control target
= control target key end

     0   :  { %s1757_s0 = inlined_call_operand.vmem [shape: bf16[16,1024], index: 0, kind: input, shape index: {}]   ;;  %s1758_s1 = inlined_call_operand.hbm [shape: bf16[1024,2048], index: 1, kind: input, shape index: {}]   ;;  %s1759_s2 = inlined_call_operand.hbm [shape: f32[1,2048], index: 2, kind: input, shape index: {}]   ;;  %s1760_s3 = inlined_call_operand.hbm [shape: f32[1,2048], index: 3, kind: input, shape index: {}]   ;;  %s1761_s4 = inlined_call_operand.vmem [shape: bf16[16,2048], index: 4, kind: output, shape index: {}]  }
   0x1   :  { %1769 = sst [smem:[#allocation24_spill]] %s1757_s0 }
   0x2   :  { %1770 = sst [smem:[#allocation25_spill]] %s1758_s1 }
   0x3   :  { %1771 = sst [smem:[#allocation26_spill]] %s1759_s2 }
   0x4   :  { %1772 = sst [smem:[#allocation27_spill]] %s1761_s4 }
   0x5   :  { %9 = vsyncpa [#allocation5], 0 }
   0x6   :  { %11 = vsyncpa [#allocation5 + $0x1], 0 }
   0x7   :  { %12 = vsyncpa [#allocation7], 0 }
   0x8   :  { %14 = vsyncpa [#allocation7 + $0x1], 0  ;;  %s1437_s15 = smov 0   ;;  %s1439_s16 = smov 0  }
   0x9   :  { %s1441_s17 = smov 0   ;;  %s1443_s18 = smov 0  }
   0xa   :  { %s1445_s19 = smov 0   ;;  %s1447_s20 = smov 0  }
   0xb   :  { %s1449_s21 = smov 0   ;;  %s1451_s22 = smov 0  }
   0xc   :  { %s1453_s23 = smov 0   ;;  %s1455_s24 = smov 0  }
   0xd   :  { %s1457_s25 = smov 0   ;;  %s1459_s26 = smov 0  }
   0xe   :  { %s1461_s27 = smov 0  }
   0xf LB: > { %1773 = sst [smem:[#allocation12_spill]] %s1378_s20  ;;  %s1503_s28 = sadd.s32 4294967295, %s1406_s27   ;;  %s1406_s27 = sphi %s1461_s27, %s20_s27   ;;  %s1402_s26 = sphi %s1459_s26, %s1815_s26   ;;  %s1398_s25 = sphi %s1457_s25, %s1807_s25   ;;  %s1394_s24 = sphi %s1455_s24, %s1806_s24   ;;  %s1390_s23 = sphi %s1453_s23, %s1805_s23   ;;  %s1386_s22 = sphi %s1451_s22, %s1804_s22   ;;  %s1382_s21 = sphi %s1449_s21, %s1803_s21   ;;  %s1378_s20 = sphi %s1447_s20, %s1802_s20   ;;  %s1374_s19 = sphi %s1445_s19, %s1814_s19   ;;  %s1370_s18 = sphi %s1443_s18, %s1813_s18   ;;  %s1366_s17 = sphi %s1441_s17, %s1812_s17   ;;  %s1362_s16 = sphi %s1439_s16, %s1811_s16   ;;  %s1358_s15 = sphi %s1437_s15, %s1810_s15  }
  0x10   : > { %1774 = sst [smem:[#allocation13_spill]] %s1386_s22  ;;  %s32_s29 = sadd.s32 1, %s1398_s25 }
  0x11   : > { %1775 = sst [smem:[#allocation14_spill]] %s1390_s23  ;;  %p33_p0 = scmp.ge.s32.totalorder %s32_s29, 4 }
  0x12   : > { %1776 = sst [smem:[#allocation15_spill]] %s1394_s24  ;;  %s35_s30 = sadd.s32 1, %s1402_s26 }
  0x13   : > { %1777 = sst [smem:[#allocation16_spill]] %s1398_s25  ;;  %s48_s5 = sadd.s32 1, %s1386_s22 }
  0x14   : > { %1778 = sst [smem:[#allocation17_spill]] %s1402_s26  ;;  %p55_p1 = scmp.ne.s32.totalorder %s1386_s22, %s1382_s21 }
  0x15   : > { %s1817_s29 = smov (%p33_p0, %s32_s29), 0  ;;  %s1819_s30 = smov (!%p33_p0, %s35_s30), %s1402_s26 }
  0x16   : > { %1779 = sst [smem:[#allocation18_spill]] %s1817_s29  ;;  %s44_s6 = ssub.s32 %s1398_s25, %s1817_s29 }
  0x17   : > { %p56_p2 = scmp.eq.s32.totalorder %s1406_s27, 0  ;;  %p37_p3 = scmp.ge.s32.totalorder %s1819_s30, 8 }
  0x18   : > { %p46_p4 = scmp.eq.s32.totalorder %s44_s6, 0  ;;  %s76_s8 = sadd.s32 1, %s1378_s20 }
  0x19   : > { %p1518_p5 = por %p56_p2, %p55_p1  ;;  %s1821_s30 = smov (%p37_p3, %s1819_s30), 0 }
  0x1a   : > { %1781 = sst [smem:[#allocation19_spill]] %s1821_s30  ;;  %s72_s10 = ssub.s32 %s1402_s26, %s1821_s30 }
  0x1b   : > { %s1526_s9 = scalar_select %p46_p4, %s1386_s22, %s48_s5  }
  0x1c   : > { %p83_p6 = scmp.ne.s32.totalorder %s1378_s20, %s1374_s19  ;;  %s73_s11 = sor.u32 %s72_s10, %s44_s6 }
  0x1d   : > { %1782 = sst [smem:[#allocation20_spill]] %s1526_s9  ;;  %p89_p7 = scmp.ne.s32.totalorder %s1374_s19, %s1370_s18 }
  0x1e   : > { %p74_p8 = scmp.eq.s32.totalorder %s73_s11, 0  ;;  %p1536_p9 = por %p83_p6, %p56_p2 }
  0x1f   : > { %p90_p10 = scmp.eq.s32.totalorder %s1503_s28, 0  ;;  %p100_p11 = scmp.eq.s32.totalorder %s72_s10, 0 }
  0x20   : > { %s1542_s13 = scalar_select %p74_p8, %s1378_s20, %s76_s8  }
  0x21   : > { %p1544_p12 = por %p90_p10, %p89_p7  ;;  %s102_s5 = sadd.s32 1, %s1366_s17 }
  0x22   : > { %1784 = sst [smem:[#allocation21_spill]] %s1542_s13  ;;  %p109_p13 = scmp.ne.s32.totalorder %s1366_s17, %s1362_s16 }
  0x23   : > { %s1550_s29 = scalar_select %p100_p11, %s1366_s17, %s102_s5  }
  0x24   : > { %p115_p0 = scmp.ne.s32.totalorder %s1362_s16, %s1358_s15  ;;  %p167_p1 = scmp.eq.s32.totalorder %s1503_s28, 31 }
  0x25   : > { %1786 = sst [smem:[#allocation22_spill]] %s1550_s29  ;;  %p1559_p3 = por %p109_p13, %p56_p2 }
  0x26   : > { %p1563_p4 = por %p115_p0, %p90_p10  ;;  %p1567_p6 = por %p167_p1, %p109_p13 }
  0x27   : > { %p899_p7 = scmp.ge.s32.totalorder %s1406_s27, 32 }
  0x28   : > { %s1789_s8 = scalar_select %p1567_p6, 1, 0 }
  0x29   : > { %189 = sbr.rel (%p899_p7) target bundleno = 75 (0x4b), region = 16 }
  0x2a   : > { %1790 = sst [smem:[#allocation23_spill]] %s1789_s8 }
  0x2e   : > { %192 = sbr.rel (!%p1518_p5) target bundleno = 58 (0x3a), region = 20  ;;  %s194_s15 = sand.u32 (%p1518_p5), 1, %s1386_s22  }
  0x2f   : > { %s1061_s10 = sshll.u32 (%p1518_p5), %s1398_s25, 3  ;;  %s900_s11 = sshll.u32 (%p1518_p5), %s194_s15, 4 }
  0x30   : > { %s1791_s0 = sld [smem:[#allocation24_spill]] (%p1518_p5)  ;;  %s196_s13 = scalar_lea.vmem (%p1518_p5), [#allocation3], %s900_s11 }
  0x36   : > { %s202_s9 = scalar_lea.vmem %s1791_s0, %s1061_s10 }
  0x37   : > { %v233_v0 = vld [vmem:[%s202_s9] sm:$0xff] }
  0x38   : > { %v235_v1 = vld [vmem:[%s202_s9 + $0x20] sm:$0xff]  ;;  %234 = vst [vmem:[%s196_s13] sm:$0xff] %v233_v0 }
  0x39   : > { %236 = vst [vmem:[%s196_s13 + $0x8] sm:$0xff] %v235_v1 }
  0x3a PF: > { %s1580_s7 = sshll.u32 %s1402_s26, 1  ;;  %s1062_s15 = sshll.u32 %s1398_s25, 9 }
  0x3b   : > { %s253_s22 = sadd.s32 %s1062_s15, %s1580_s7  ;;  %s268_s30 = sand.u32 1, %s1406_s27  }
  0x3c   : > { %s907_s10 = sshll.u32 %s253_s22, 2  ;;  %s1792_s1 = sld [smem:[#allocation25_spill]] }
  0x3d   : > { %s270_s13 = sand.u32 1, %s1366_s17   ;;  %s1793_s2 = sld [smem:[#allocation26_spill]] }
  0x3e   : > { %s908_s29 = sshll.u32 %s270_s13, 1  ;;  %s243_s22 = sand.u32 1, %s1378_s20  }
  0x3f   : > { %s272_s8 = scalar_lea.vmem [#allocation6], %s908_s29  ;;  %s269_s25 = scalar_lea.sflag [#allocation7], %s268_s30 }
  0x40   : > { %s280_s23 = sshll.u32 %s272_s8, 4  ;;  %s1408_s13 = smov 1024   ;;  %s281_s23 = int_to_ptr.vmem [resolvable:$true] %s280_s23 }
  0x41   : > { %s1409_s4 = smov 128   ;;  %s1410_s24 = smov 8  }
  0x42   : > { %s255_s11 = scalar_lea.hbm %s1792_s1, %s907_s10  ;;  %s903_s10 = sshll.u32 %s243_s22, 8 }
  0x43   : > { %s256_s0 = sshll.u32 %s255_s11, 4  ;;  %s276_s26 = scalar_lea.hbm %s1793_s2, %s1580_s7  ;;  %s257_s0 = int_to_ptr.hbm [resolvable:$true] %s256_s0 }
  0x44   : > { %s278_s15 = sshll.u32 %s276_s26, 4  ;;  %s247_s5 = scalar_lea.vmem [#allocation4], %s903_s10  ;;  %s279_s15 = int_to_ptr.hbm [resolvable:$true] %s278_s15 }
  0x45   : > { %1099 = dma.hbm_to_vmem [thread:$0]  (%p1559_p3), %s279_s15, 32, %s281_s23, %s269_s25  }
  0x46   : > { %s258_s9 = sshll.u32 %s247_s5, 4  ;;  %s244_s11 = scalar_lea.sflag [#allocation5], %s243_s22  ;;  %s259_s9 = int_to_ptr.vmem [resolvable:$true] %s258_s9 }
  0x47   : > { %1098 = dma.hbm_to_vmem [thread:$0]  (%p1536_p9), %s257_s0, 4096, %s259_s9, %s244_s11, %s1408_s13, %s1409_s4, %s1410_s24  }
  0x48   : > { %s295_s26 = scalar_lea.hbm %s1760_s3, %s1580_s7  ;;  %s291_s20 = scalar_lea.vmem [#allocation8], %s908_s29 }
  0x49   : > { %s297_s2 = sshll.u32 %s295_s26, 4  ;;  %s299_s30 = sshll.u32 %s291_s20, 4  ;;  %s298_s2 = int_to_ptr.hbm [resolvable:$true] %s297_s2  ;;  %s300_s30 = int_to_ptr.vmem [resolvable:$true] %s299_s30 }
  0x4a   : > { %1100 = dma.hbm_to_vmem [thread:$0]  (%p1559_p3), %s298_s2, 32, %s300_s30, %s269_s25  }
  0x4b PF: > { %p912_p2 = scmp.ge.s32.totalorder %s1406_s27, 1  ;;  %p304_p5 = scmp.lt.s32.totalorder %s1406_s27, 33 }
  0x4d   : > { %p305_p8 = pnand %p912_p2, %p304_p5 }
  0x4e   : > { %s311_s0 = sand.u32 (!%p305_p8), 1, %s1382_s21   ;;  %s317_s1 = sand.u32 (!%p305_p8), 1, %s1374_s19  }
  0x4f   : > { %308 = sbr.rel (%p305_p8) target bundleno = 313 (0x139), region = 70  ;;  %s913_s23 = sshll.u32 (!%p305_p8), %s311_s0, 4 }
  0x50   : > { %s914_s12 = sshll.u32 (!%p305_p8), %s317_s1, 8  ;;  %s1608_s29 = scalar_lea.vmem (!%p305_p8), [#allocation3], %s913_s23 }
  0x51   : > { %s318_s20 = scalar_lea.sflag (!%p305_p8), [#allocation5], %s317_s1  ;;  %s1610_s7 = scalar_lea.vmem (!%p305_p8), [#allocation4], %s914_s12 }
  0x54   : > { %1349 = dma.done.wait (%p1544_p12), %s318_s20, 4096  }
  0x55   : > { %1351 = vsyncadd (%p1544_p12), %s318_s20, 4294963200  ;;  %s327_s2 = sand.u32 1, %s1503_s28   ;;  %s329_s25 = sand.u32 1, %s1362_s16  }
  0x56   : > { %s1618_s18 = sshll.u32 %s329_s25, 1  ;;  %s328_s21 = scalar_lea.sflag [#allocation7], %s327_s2 }
  0x57   : > { %s331_s15 = scalar_lea.vmem [#allocation6], %s1618_s18 }
  0x58   : > { %1353 = dma.done.wait (%p1563_p4), %s328_s21, 64  }
  0x59   : > { %1355 = vsyncadd (%p1563_p4), %s328_s21, 4294967232  ;;  %s917_s22 = sshll.u32 %s329_s25, 4  ;;  %s341_s10 = scalar_lea.vmem [#allocation8], %s1618_s18 }
  0x5a   : > { %s1626_s14 = scalar_lea.vmem [#allocation9], %s917_s22  ;;  %s1794_s5 = sld [smem:[#allocation14_spill]] }
  0x60   : > { %p918_p9 = scmp.ne.s32.totalorder %s1794_s5, 0 }
  0x62   : > { %391 = sbr.rel (%p918_p9) target bundleno = 108 (0x6c), region = 90 }
  0x67   : > { %v1411_v2 = vmov 0.0  }
  0x68   : > { %392 = vst [vmem:[#allocation2 + $0x10] sm:$0xff] %v1411_v2 }
  0x69   : > { %393 = vst [vmem:[#allocation2] sm:$0xff] %v1411_v2 }
  0x6a   : > { %394 = vst [vmem:[#allocation2 + $0x18] sm:$0xff] %v1411_v2 }
  0x6b   : > { %395 = vst [vmem:[#allocation2 + $0x8] sm:$0xff] %v1411_v2 }
  0x6c PF: > { %v985_v3 = vld [vmem:[%s1610_s7 + $0x70] sm:$0xf]  ;;  %v1080_v4 = vld [vmem:[%s1610_s7 + $0x74] sm:$0xf0]  ;;  %v1079_v8 = vld [vmem:[%s1610_s7 + $0x74] sm:$0xf] }
  0x6d   : > { %v1049_v5 = vld [vmem:[%s1610_s7 + $0xf0] sm:$0xf]  ;;  %v986_v6 = vor.u32 %v1080_v4, %v985_v3  ;;  %v1096_v7 = vld [vmem:[%s1610_s7 + $0xf4] sm:$0xf0]  ;;  %v987_v9 = vld [vmem:[%s1610_s7 + $0x78] sm:$0xf0] }
  0x6e   : > { %v1050_v10 = vor.u32 %v1096_v7, %v1049_v5  ;;  %v990_v11 = vor.u32 %v1079_v8, %v987_v9  ;;  %v1095_v12 = vld [vmem:[%s1610_s7 + $0xf4] sm:$0xf]  ;;  %v1051_v13 = vld [vmem:[%s1610_s7 + $0xf8] sm:$0xf0]  ;;  %v977_v14 = vld [vmem:[%s1610_s7 + $0x60] sm:$0xf] }
  0x6f   : > { %604 = vmatpush.bf16.msra.mxu0 %v986_v6  ;;  %v1054_v15 = vor.u32 %v1095_v12, %v1051_v13  ;;  %v1078_v16 = vld [vmem:[%s1610_s7 + $0x64] sm:$0xf0]  ;;  %v1041_v17 = vld [vmem:[%s1610_s7 + $0xe0] sm:$0xf]  ;;  %v1077_v21 = vld [vmem:[%s1610_s7 + $0x64] sm:$0xf] }
  0x70   : > { %v1094_v18 = vld [vmem:[%s1610_s7 + $0xe4] sm:$0xf0]  ;;  %618 = vmatpush.bf16.msra.mxu1 %v1050_v10  ;;  %632 = vmatpush.bf16.msra.mxu2 %v990_v11  ;;  %v978_v19 = vor.u32 %v1078_v16, %v977_v14  ;;  %v979_v22 = vld [vmem:[%s1610_s7 + $0x68] sm:$0xf0]  ;;  %v1093_v23 = vld [vmem:[%s1610_s7 + $0xe4] sm:$0xf] }
  0x71   : > { %v1042_v20 = vor.u32 %v1094_v18, %v1041_v17  ;;  %646 = vmatpush.bf16.msra.mxu3 %v1054_v15  ;;  %v982_v24 = vor.u32 %v1077_v21, %v979_v22  ;;  %v1043_v25 = vld [vmem:[%s1610_s7 + $0xe8] sm:$0xf0]  ;;  %v969_v26 = vld [vmem:[%s1610_s7 + $0x50] sm:$0xf]  ;;  %v1076_v27 = vld [vmem:[%s1610_s7 + $0x54] sm:$0xf0] }
  0x72   : > { %v1046_v28 = vor.u32 %v1093_v23, %v1043_v25  ;;  %v1033_v29 = vld [vmem:[%s1610_s7 + $0xd0] sm:$0xf]  ;;  %v1092_v30 = vld [vmem:[%s1610_s7 + $0xd4] sm:$0xf0]  ;;  %v1075_v31 = vld [vmem:[%s1610_s7 + $0x54] sm:$0xf]  ;;  %v970_v32 = vor.u32 %v1076_v27, %v969_v26 }
  0x73   : > { %605 = vmatpush.bf16.msra.mxu0 %v978_v19  ;;  %v971_v33 = vld [vmem:[%s1610_s7 + $0x58] sm:$0xf0]  ;;  %v1091_v34 = vld [vmem:[%s1610_s7 + $0xd4] sm:$0xf]  ;;  %v1034_v36 = vor.u32 %v1092_v30, %v1033_v29  ;;  %v961_v38 = vld [vmem:[%s1610_s7 + $0x40] sm:$0xf] }
  0x74   : > { %v1035_v35 = vld [vmem:[%s1610_s7 + $0xd8] sm:$0xf0]  ;;  %619 = vmatpush.bf16.msra.mxu1 %v1042_v20  ;;  %633 = vmatpush.bf16.msra.mxu2 %v982_v24  ;;  %v974_v37 = vor.u32 %v1075_v31, %v971_v33  ;;  %v1074_v39 = vld [vmem:[%s1610_s7 + $0x44] sm:$0xf0]  ;;  %v1025_v40 = vld [vmem:[%s1610_s7 + $0xc0] sm:$0xf] }
  0x75   : > { %647 = vmatpush.bf16.msra.mxu3 %v1046_v28  ;;  %v1038_v41 = vor.u32 %v1091_v34, %v1035_v35  ;;  %v1090_v42 = vld [vmem:[%s1610_s7 + $0xc4] sm:$0xf0]  ;;  %v1073_v43 = vld [vmem:[%s1610_s7 + $0x44] sm:$0xf]  ;;  %v963_v44 = vld [vmem:[%s1610_s7 + $0x48] sm:$0xf0]  ;;  %v962_v47 = vor.u32 %v1074_v39, %v961_v38 }
  0x76   : > { %v1089_v45 = vld [vmem:[%s1610_s7 + $0xc4] sm:$0xf]  ;;  %v1027_v46 = vld [vmem:[%s1610_s7 + $0xc8] sm:$0xf0]  ;;  %v1026_v48 = vor.u32 %v1090_v42, %v1025_v40  ;;  %v966_v49 = vor.u32 %v1073_v43, %v963_v44  ;;  %v953_v50 = vld [vmem:[%s1610_s7 + $0x30] sm:$0xf] }
  0x77   : > { %606 = vmatpush.bf16.msra.mxu0 %v970_v32  ;;  %v1072_v51 = vld [vmem:[%s1610_s7 + $0x34] sm:$0xf0]  ;;  %v1017_v52 = vld [vmem:[%s1610_s7 + $0xb0] sm:$0xf]  ;;  %v1030_v53 = vor.u32 %v1089_v45, %v1027_v46  ;;  %v1071_v55 = vld [vmem:[%s1610_s7 + $0x34] sm:$0xf] }
  0x78   : > { %620 = vmatpush.bf16.msra.mxu1 %v1034_v36  ;;  %634 = vmatpush.bf16.msra.mxu2 %v974_v37  ;;  %v1088_v54 = vld [vmem:[%s1610_s7 + $0xb4] sm:$0xf0]  ;;  %v955_v56 = vld [vmem:[%s1610_s7 + $0x38] sm:$0xf0]  ;;  %v1087_v57 = vld [vmem:[%s1610_s7 + $0xb4] sm:$0xf]  ;;  %v954_v59 = vor.u32 %v1072_v51, %v953_v50 }
  0x79   : > { %648 = vmatpush.bf16.msra.mxu3 %v1038_v41  ;;  %v1019_v58 = vld [vmem:[%s1610_s7 + $0xb8] sm:$0xf0]  ;;  %v1018_v60 = vor.u32 %v1088_v54, %v1017_v52  ;;  %v958_v61 = vor.u32 %v1071_v55, %v955_v56  ;;  %v945_v62 = vld [vmem:[%s1610_s7 + $0x20] sm:$0xf]  ;;  %v1070_v63 = vld [vmem:[%s1610_s7 + $0x24] sm:$0xf0] }
  0x7a   : > { %v1009_v0 = vld [vmem:[%s1610_s7 + $0xa0] sm:$0xf]  ;;  %v1022_v1 = vor.u32 %v1087_v57, %v1019_v58  ;;  %v1086_v2 = vld [vmem:[%s1610_s7 + $0xa4] sm:$0xf0]  ;;  %v1069_v3 = vld [vmem:[%s1610_s7 + $0x24] sm:$0xf]  ;;  %v946_v7 = vor.u32 %v1070_v63, %v945_v62 }
  0x7b   : > { %607 = vmatpush.bf16.msra.mxu0 %v962_v47  ;;  %v947_v4 = vld [vmem:[%s1610_s7 + $0x28] sm:$0xf0]  ;;  %v1085_v5 = vld [vmem:[%s1610_s7 + $0xa4] sm:$0xf]  ;;  %v1010_v8 = vor.u32 %v1086_v2, %v1009_v0  ;;  %v937_v10 = vld [vmem:[%s1610_s7 + $0x10] sm:$0xf] }
  0x7c   : > { %621 = vmatpush.bf16.msra.mxu1 %v1026_v48  ;;  %635 = vmatpush.bf16.msra.mxu2 %v966_v49  ;;  %v1011_v6 = vld [vmem:[%s1610_s7 + $0xa8] sm:$0xf0]  ;;  %v950_v9 = vor.u32 %v1069_v3, %v947_v4  ;;  %v1068_v11 = vld [vmem:[%s1610_s7 + $0x14] sm:$0xf0]  ;;  %v1001_v12 = vld [vmem:[%s1610_s7 + $0x90] sm:$0xf] }
  0x7d   : > { %649 = vmatpush.bf16.msra.mxu3 %v1030_v53  ;;  %v1014_v13 = vor.u32 %v1085_v5, %v1011_v6  ;;  %v1084_v14 = vld [vmem:[%s1610_s7 + $0x94] sm:$0xf0]  ;;  %v1067_v15 = vld [vmem:[%s1610_s7 + $0x14] sm:$0xf]  ;;  %v939_v16 = vld [vmem:[%s1610_s7 + $0x18] sm:$0xf0]  ;;  %v938_v19 = vor.u32 %v1068_v11, %v937_v10 }
  0x7e   : > { %v1083_v17 = vld [vmem:[%s1610_s7 + $0x94] sm:$0xf]  ;;  %v1003_v18 = vld [vmem:[%s1610_s7 + $0x98] sm:$0xf0]  ;;  %v1002_v20 = vor.u32 %v1084_v14, %v1001_v12  ;;  %v942_v21 = vor.u32 %v1067_v15, %v939_v16  ;;  %v929_v22 = vld [vmem:[%s1610_s7] sm:$0xf] }
  0x7f   : > { %608 = vmatpush.bf16.msra.mxu0 %v954_v59  ;;  %v1066_v23 = vld [vmem:[%s1610_s7 + $0x4] sm:$0xf0]  ;;  %v993_v24 = vld [vmem:[%s1610_s7 + $0x80] sm:$0xf]  ;;  %v1006_v25 = vor.u32 %v1083_v17, %v1003_v18  ;;  %v1065_v27 = vld [vmem:[%s1610_s7 + $0x4] sm:$0xf] }
  0x80   : > { %622 = vmatpush.bf16.msra.mxu1 %v1018_v60  ;;  %636 = vmatpush.bf16.msra.mxu2 %v958_v61  ;;  %v1082_v26 = vld [vmem:[%s1610_s7 + $0x84] sm:$0xf0]  ;;  %v931_v28 = vld [vmem:[%s1610_s7 + $0x8] sm:$0xf0]  ;;  %v1081_v29 = vld [vmem:[%s1610_s7 + $0x84] sm:$0xf]  ;;  %v930_v31 = vor.u32 %v1066_v23, %v929_v22 }
  0x81   : > { %650 = vmatpush.bf16.msra.mxu3 %v1022_v1  ;;  %v995_v30 = vld [vmem:[%s1610_s7 + $0x88] sm:$0xf0]  ;;  %v921_v32 = vld [vmem:[%s1608_s29] sm:$0xf]  ;;  %v1064_v33 = vld [vmem:[%s1608_s29 + $0x4] sm:$0xf0]  ;;  %v994_v34 = vor.u32 %v1082_v26, %v993_v24  ;;  %v934_v35 = vor.u32 %v1065_v27, %v931_v28 }
  0x82   : > { %v1063_v36 = vld [vmem:[%s1608_s29 + $0x4] sm:$0xf]  ;;  %v923_v37 = vld [vmem:[%s1608_s29 + $0x8] sm:$0xf0]  ;;  %v998_v38 = vor.u32 %v1081_v29, %v995_v30  ;;  %v922_v39 = vor.u32 %v1064_v33, %v921_v32  ;;  %s1795_s28 = sld [smem:[#allocation14_spill]] }
  0x83   : > { %609 = vmatpush.bf16.msra.mxu0 %v946_v7  ;;  %v926_v40 = vor.u32 %v1063_v36, %v923_v37  ;;  %v396_v42 = vld [vmem:[#allocation2 + $0x10] sm:$0xff]  ;;  %v397_v47 = vld [vmem:[#allocation2] sm:$0xff]  ;;  %v398_v51 = vld [vmem:[#allocation2 + $0x18] sm:$0xff] }
  0x84   : > { %623 = vmatpush.bf16.msra.mxu1 %v1010_v8  ;;  %637 = vmatpush.bf16.msra.mxu2 %v950_v9  ;;  %v399_v57 = vld [vmem:[#allocation2 + $0x8] sm:$0xff] }
  0x85   : > { %651 = vmatpush.bf16.msra.mxu3 %v1014_v13 }
  0x87   : > { %610 = vmatpush.bf16.msra.mxu0 %v938_v19 }
  0x88   : > { %624 = vmatpush.bf16.msra.mxu1 %v1002_v20  ;;  %638 = vmatpush.bf16.msra.mxu2 %v942_v21  ;;  %p1055_p10 = scmp.ne.s32.totalorder %s1795_s28, 3 }
  0x89   : > { %652 = vmatpush.bf16.msra.mxu3 %v1006_v25 }
  0x8b   : > { %611 = vmatpush.bf16.msra.mxu0 %v930_v31 }
  0x8c   : > { %625 = vmatpush.bf16.msra.mxu1 %v994_v34  ;;  %639 = vmatpush.bf16.msra.mxu2 %v934_v35 }
  0x8d   : > { %653 = vmatpush.bf16.msra.mxu3 %v998_v38 }
  0x8e   : > { %612 = vmatmul.bf16.vlgmr.msra.gmra.mxu0 %v922_v39 }
  0x8f   : > { %626 = vmatmul.bf16.vlgmr.msra.gmra.mxu1 %v926_v40  ;;  %640 = vmatmul.bf16.vlgmr.msra.gmra.mxu2 %v922_v39 }
  0x90   : > { %654 = vmatmul.bf16.vlgmr.msra.gmra.mxu3 %v926_v40 }
 0x10b   : > { %v613_v41 = vpop.f32.mrf.mxu0 }
 0x10c   : > { %v627_v43 = vpop.f32.mrf.mxu1 }
 0x10d   : > { %v628_v44 = vadd.f32 %v627_v43, %v613_v41 }
 0x10f   : > { %v660_v45 = vadd.f32 %v628_v44, %v396_v42 }
 0x111   : > { %664 = vst [vmem:[#allocation2 + $0x10] sm:$0xff] %v660_v45 }
 0x112   : > { %v641_v46 = vpop.f32.mrf.mxu2 }
 0x113   : > { %v655_v48 = vpop.f32.mrf.mxu3  ;;  %v615_v49 = vpop.f32.mrf.mxu0 }
 0x114   : > { %v656_v50 = vadd.f32 %v655_v48, %v641_v46  ;;  %v629_v52 = vpop.f32.mrf.mxu1 }
 0x115   : > { %v630_v53 = vadd.f32 %v629_v52, %v615_v49 }
 0x116   : > { %v661_v54 = vadd.f32 %v656_v50, %v397_v47 }
 0x117   : > { %v662_v55 = vadd.f32 %v630_v53, %v398_v51 }
 0x118   : > { %665 = vst [vmem:[#allocation2] sm:$0xff] %v661_v54 }
 0x119   : > { %666 = vst [vmem:[#allocation2 + $0x18] sm:$0xff] %v662_v55 }
 0x11a   : > { %v643_v56 = vpop.f32.mrf.mxu2 }
 0x11b   : > { %v657_v58 = vpop.f32.mrf.mxu3 }
 0x11c   : > { %v658_v59 = vadd.f32 %v657_v58, %v643_v56  ;;  %671 = sbr.rel (%p1055_p10) target bundleno = 303 (0x12f), region = 94 }
 0x11e   : > { %v663_v60 = vadd.f32 %v658_v59, %v399_v57 }
 0x120   : > { %667 = vst [vmem:[#allocation2 + $0x8] sm:$0xff] %v663_v60 }
 0x121   : > { %v672_v61 = vld [vmem:[#allocation2 + $0x10] sm:$0xff]  ;;  %v673_v62 = vld [vmem:[#allocation2] sm:$0xff]  ;;  %v674_v3 = vld [vmem:[#allocation2 + $0x18] sm:$0xff] }
 0x122   : > { %v676_v63 = vld [vmem:[%s331_s15] sm:$0x3]  ;;  %v686_v2 = vld [vmem:[%s341_s10] sm:$0x3] }
 0x123   : > { %v678_v0 = vperm.slane %v676_v63, 0  ;;  %v679_v1 = vperm.slane %v676_v63, 1  ;;  %v688_v5 = vperm.slane %v686_v2, 0  ;;  %v689_v6 = vperm.slane %v686_v2, 1 }
 0x125   : > { %v682_v7 = vmul.f32 %v678_v0, %v672_v61  ;;  %v683_v8 = vmul.f32 %v679_v1, %v673_v62  ;;  %v684_v9 = vmul.f32 %v678_v0, %v674_v3 }
 0x127   : > { %v675_v4 = vld [vmem:[#allocation2 + $0x8] sm:$0xff]  ;;  %v692_v11 = vadd.f32 %v688_v5, %v682_v7  ;;  %v693_v12 = vadd.f32 %v689_v6, %v683_v8  ;;  %v694_v13 = vadd.f32 %v688_v5, %v684_v9 }
 0x128   : > { %v685_v10 = vmul.f32 %v679_v1, %v675_v4 }
 0x129   : > { %v696_v15 = vpack.c.bf16 %v693_v12, %v692_v11 }
 0x12a   : > { %v695_v14 = vadd.f32 %v689_v6, %v685_v10 }
 0x12b   : > { %698 = vst [vmem:[%s1626_s14] sm:$0xff] %v696_v15 }
 0x12c   : > { %v697_v16 = vpack.c.bf16 %v695_v14, %v694_v13 }
 0x12e   : > { %699 = vst [vmem:[%s1626_s14 + $0x8] sm:$0xff] %v697_v16 }
 0x12f PF: > { %706 = sbr.rel (!%p1567_p6) target bundleno = 313 (0x139), region = 98  ;;  %s1797_s9 = sld [smem:[#allocation15_spill]] (%p1567_p6) }
 0x130   : > { %s1798_s24 = sld [smem:[#allocation27_spill]] (%p1567_p6) }
 0x132   : > { %v743_v17 = vld [vmem:[%s1626_s14] sm:$0xff] (%p1567_p6) }
 0x135   : > { %s1097_s11 = sshll.u32 %s1797_s9, 3  ;;  %v745_v18 = vld [vmem:[%s1626_s14 + $0x8] sm:$0xff] }
 0x136   : > { %s712_s8 = scalar_lea.vmem %s1798_s24, %s1097_s11 }
 0x137   : > { %744 = vst [vmem:[%s712_s8] sm:$0xff] %v743_v17 }
 0x138   : > { %746 = vst [vmem:[%s712_s8 + $0x40] sm:$0xff] %v745_v18 }
 0x139 PF: > { %s20_s27 = sadd.s32 1, %s1406_s27   ;;  %s1800_s30 = sld [smem:[#allocation22_spill]] }
 0x13a   : > { %p1713_p11 = scmp.ge.s32.totalorder %s20_s27, 34   ;;  %s1801_s0 = sld [smem:[#allocation12_spill]] }
 0x13b   : > { %s1802_s20 = sld [smem:[#allocation21_spill]]  ;;  %s1810_s15 = smov %s1362_s16 }
 0x13c   : > { %s1803_s21 = sld [smem:[#allocation13_spill]]  ;;  %s1811_s16 = smov %s1366_s17 }
 0x13d   : > { %s1804_s22 = sld [smem:[#allocation20_spill]]  ;;  %s1813_s18 = smov %s1374_s19 }
 0x13e   : > { %s1805_s23 = sld [smem:[#allocation16_spill]] }
 0x13f   : > { %s1806_s24 = sld [smem:[#allocation17_spill]]  ;;  %s1812_s17 = smov %s1800_s30 }
 0x140   : > { %s1807_s25 = sld [smem:[#allocation18_spill]]  ;;  %s1814_s19 = smov %s1801_s0 }
 0x141   : > { %s1808_s1 = sld [smem:[#allocation19_spill]] }
 0x143   :  { %19 = sbr.rel (!%p1713_p11) target bundleno = 15 (0xf), region = 192 }
 0x147   : > { %s1815_s26 = smov %s1808_s1 }
 0x148   :  { %762 = vsyncpa [#allocation5], 1 }
 0x149   :  { %764 = vsyncpa [#allocation5 + $0x1], 1 }
 0x14a   :  { %765 = vsyncpa [#allocation7], 1 }
 0x14b   :  { %767 = vsyncpa [#allocation7 + $0x1], 1 }

// kernel: _forward_impl.30
= control target key start
LH: loop header
LB: loop body
LE: loop exit
PB: predicated region body
PF: predicated region fallthrough
CT: control target
= control target key end

     0   :  { %s1574_s0 = inlined_call_operand.vmem [shape: bf16[16,1024], index: 0, kind: input, shape index: {}]   ;;  %s1575_s1 = inlined_call_operand.hbm [shape: bf16[1024,2048], index: 1, kind: input, shape index: {}]   ;;  %s1576_s2 = inlined_call_operand.vmem [shape: f32[1,2048], index: 2, kind: input, shape index: {}]   ;;  %s1577_s3 = inlined_call_operand.vmem [shape: f32[1,2048], index: 3, kind: input, shape index: {}]   ;;  %s1578_s4 = inlined_call_operand.vmem [shape: bf16[16,2048], index: 4, kind: output, shape index: {}]  }
   0x1   :  { %1583 = sst [smem:[#allocation15_spill]] %s1574_s0 }
   0x2   :  { %1584 = sst [smem:[#allocation16_spill]] %s1578_s4 }
   0x3   :  { %9 = vsyncpa [#allocation5], 0 }
   0x4   :  { %11 = vsyncpa [#allocation5 + $0x1], 0  ;;  %s1293_s15 = smov 0   ;;  %s1295_s16 = smov 0  }
   0x5   :  { %s1297_s17 = smov 0   ;;  %s1299_s18 = smov 0  }
   0x6   :  { %s1301_s19 = smov 0   ;;  %s1303_s20 = smov 0  }
   0x7   :  { %s1305_s21 = smov 0   ;;  %s1307_s22 = smov 0  }
   0x8   :  { %s1309_s23 = smov 0   ;;  %s1311_s24 = smov 0  }
   0x9   :  { %s1313_s25 = smov 0   ;;  %s1315_s26 = smov 0  }
   0xa LB: > { %1585 = sst [smem:[#allocation8_spill]] %s1222_s16  ;;  %s836_s27 = sadd.s32 4294967295, %s1262_s26   ;;  %s1262_s26 = sphi %s1315_s26, %s17_s26   ;;  %s1258_s25 = sphi %s1313_s25, %s1611_s25   ;;  %s1254_s24 = sphi %s1311_s24, %s1610_s24   ;;  %s1250_s23 = sphi %s1309_s23, %s1609_s23   ;;  %s1246_s22 = sphi %s1307_s22, %s1608_s22   ;;  %s1242_s21 = sphi %s1305_s21, %s1602_s21   ;;  %s1238_s20 = sphi %s1303_s20, %s1601_s20   ;;  %s1234_s19 = sphi %s1301_s19, %s1607_s19   ;;  %s1230_s18 = sphi %s1299_s18, %s1606_s18   ;;  %s1226_s17 = sphi %s1297_s17, %s1605_s17   ;;  %s1222_s16 = sphi %s1295_s16, %s1599_s16   ;;  %s1218_s15 = sphi %s1293_s15, %s1598_s15  }
   0xb   : > { %1586 = sst [smem:[#allocation9_spill]] %s1242_s21  ;;  %s29_s28 = sadd.s32 1, %s1254_s24 }
   0xc   : > { %p30_p0 = scmp.ge.s32.totalorder %s29_s28, 4  ;;  %s32_s29 = sadd.s32 1, %s1258_s25 }
   0xd   : > { %s45_s30 = sadd.s32 1, %s1242_s21  ;;  %p52_p1 = scmp.ne.s32.totalorder %s1242_s21, %s1238_s20 }
   0xe   : > { %s1613_s28 = smov (%p30_p0, %s29_s28), 0  ;;  %s1615_s29 = smov (!%p30_p0, %s32_s29), %s1258_s25 }
   0xf   : > { %1587 = sst [smem:[#allocation10_spill]] %s1613_s28  ;;  %s41_s5 = ssub.s32 %s1254_s24, %s1613_s28 }
  0x10   : > { %p53_p2 = scmp.eq.s32.totalorder %s1262_s26, 0  ;;  %p34_p3 = scmp.ge.s32.totalorder %s1615_s29, 8 }
  0x11   : > { %p43_p4 = scmp.eq.s32.totalorder %s41_s5, 0  ;;  %s73_s7 = sadd.s32 1, %s1234_s19 }
  0x12   : > { %p1365_p5 = por %p53_p2, %p52_p1  ;;  %s1617_s29 = smov (%p34_p3, %s1615_s29), 0 }
  0x13   : > { %1589 = sst [smem:[#allocation11_spill]] %s1617_s29  ;;  %s69_s9 = ssub.s32 %s1258_s25, %s1617_s29 }
  0x14   : > { %s1373_s8 = scalar_select %p43_p4, %s1242_s21, %s45_s30  }
  0x15   : > { %p80_p6 = scmp.ne.s32.totalorder %s1234_s19, %s1230_s18  ;;  %s70_s10 = sor.u32 %s69_s9, %s41_s5 }
  0x16   : > { %1590 = sst [smem:[#allocation12_spill]] %s1373_s8  ;;  %p86_p7 = scmp.ne.s32.totalorder %s1230_s18, %s1226_s17 }
  0x17   : > { %p71_p8 = scmp.eq.s32.totalorder %s70_s10, 0  ;;  %p1381_p9 = por %p80_p6, %p53_p2 }
  0x18   : > { %p87_p10 = scmp.eq.s32.totalorder %s836_s27, 0  ;;  %p151_p11 = scmp.eq.s32.totalorder %s69_s9, 0 }
  0x19   : > { %s1388_s12 = scalar_select %p71_p8, %s1234_s19, %s73_s7  }
  0x1a   : > { %p1390_p12 = por %p87_p10, %p86_p7  ;;  %s153_s14 = sadd.s32 1, %s1222_s16 }
  0x1b   : > { %1592 = sst [smem:[#allocation13_spill]] %s1388_s12  ;;  %p163_p13 = scmp.ne.s32.totalorder %s1222_s16, %s1218_s15 }
  0x1c   : > { %s1396_s30 = scalar_select %p151_p11, %s1222_s16, %s153_s14  }
  0x1d   : > { %p164_p0 = scmp.eq.s32.totalorder %s836_s27, 31  ;;  %p839_p2 = scmp.ge.s32.totalorder %s1262_s26, 32 }
  0x1e   : > { %1594 = sst [smem:[#allocation14_spill]] %s1396_s30 }
  0x1f   : > { %p1402_p1 = por %p164_p0, %p163_p13  ;;  %186 = sbr.rel (%p839_p2) target bundleno = 56 (0x38), region = 16 }
  0x24   : > { %189 = sbr.rel (!%p1365_p5) target bundleno = 48 (0x30), region = 20  ;;  %s191_s5 = sand.u32 (%p1365_p5), 1, %s1242_s21  }
  0x25   : > { %s997_s7 = sshll.u32 (%p1365_p5), %s1254_s24, 3  ;;  %s840_s9 = sshll.u32 (%p1365_p5), %s191_s5, 4 }
  0x26   : > { %s1596_s0 = sld [smem:[#allocation15_spill]] (%p1365_p5)  ;;  %s193_s27 = scalar_lea.vmem (%p1365_p5), [#allocation3], %s840_s9 }
  0x2c   : > { %s199_s29 = scalar_lea.vmem %s1596_s0, %s997_s7 }
  0x2d   : > { %v230_v0 = vld [vmem:[%s199_s29] sm:$0xff] }
  0x2e   : > { %v232_v1 = vld [vmem:[%s199_s29 + $0x20] sm:$0xff]  ;;  %231 = vst [vmem:[%s193_s27] sm:$0xff] %v230_v0 }
  0x2f   : > { %233 = vst [vmem:[%s193_s27 + $0x8] sm:$0xff] %v232_v1 }
  0x30 PF: > { %s240_s6 = sand.u32 1, %s1234_s19   ;;  %s845_s28 = sshll.u32 %s1258_s25, 1 }
  0x31   : > { %s843_s8 = sshll.u32 %s240_s6, 8  ;;  %s998_s21 = sshll.u32 %s1254_s24, 9 }
  0x32   : > { %s250_s12 = sadd.s32 %s998_s21, %s845_s28  ;;  %s244_s5 = scalar_lea.vmem [#allocation4], %s843_s8 }
  0x33   : > { %s255_s30 = sshll.u32 %s244_s5, 4  ;;  %s847_s16 = sshll.u32 %s250_s12, 2  ;;  %s256_s30 = int_to_ptr.vmem [resolvable:$true] %s255_s30 }
  0x34   : > { %s252_s29 = scalar_lea.hbm %s1575_s1, %s847_s16  ;;  %s241_s14 = scalar_lea.sflag [#allocation5], %s240_s6 }
  0x35   : > { %s253_s9 = sshll.u32 %s252_s29, 4  ;;  %s1264_s27 = smov 1024   ;;  %s254_s9 = int_to_ptr.hbm [resolvable:$true] %s253_s9 }
  0x36   : > { %s1265_s0 = smov 128   ;;  %s1266_s4 = smov 8  }
  0x37   : > { %1034 = dma.hbm_to_vmem [thread:$0]  (%p1381_p9), %s254_s9, 4096, %s256_s30, %s241_s14, %s1264_s27, %s1265_s0, %s1266_s4  }
  0x38 PF: > { %p848_p3 = scmp.ge.s32.totalorder %s1262_s26, 1  ;;  %p279_p4 = scmp.lt.s32.totalorder %s1262_s26, 33 }
  0x3a   : > { %p280_p5 = pnand %p848_p3, %p279_p4 }
  0x3b   : > { %s286_s21 = sand.u32 (!%p280_p5), 1, %s1238_s20   ;;  %s292_s16 = sand.u32 (!%p280_p5), 1, %s1230_s18  }
  0x3c   : > { %283 = sbr.rel (%p280_p5) target bundleno = 288 (0x120), region = 70  ;;  %s849_s28 = sshll.u32 (!%p280_p5), %s286_s21, 4 }
  0x3d   : > { %s850_s8 = sshll.u32 (!%p280_p5), %s292_s16, 8  ;;  %s1426_s12 = scalar_lea.vmem (!%p280_p5), [#allocation3], %s849_s28 }
  0x3e   : > { %s293_s6 = scalar_lea.sflag (!%p280_p5), [#allocation5], %s292_s16  ;;  %s1428_s5 = scalar_lea.vmem (!%p280_p5), [#allocation4], %s850_s8 }
  0x41   : > { %1213 = dma.done.wait (%p1390_p12), %s293_s6, 4096  }
  0x42   : > { %1215 = vsyncadd (%p1390_p12), %s293_s6, 4294963200  ;;  %s330_s0 = sand.u32 1, %s1218_s15   ;;  %s852_s4 = sshll.u32 %s1250_s23, 1 }
  0x43   : > { %s851_s11 = sshll.u32 %s330_s0, 4  ;;  %p338_p6 = scmp.lt.s32.totalorder %s852_s4, 15 }
  0x44   : > { %s1446_s13 = scalar_lea.vmem [#allocation6], %s851_s11  ;;  %p854_p7 = scmp.ne.s32.totalorder %s1246_s22, 0 }
  0x45   : > { %s1619_s4 = smov (!%p338_p6, %s852_s4), 15 }
  0x46   : > { %s340_s7 = scalar_lea.vmem %s1576_s2, %s1619_s4  ;;  %s345_s9 = scalar_lea.vmem %s1577_s3, %s1619_s4 }
  0x47   : > { %352 = sbr.rel (%p854_p7) target bundleno = 81 (0x51), region = 82 }
  0x4c   : > { %v1267_v2 = vmov 0.0  }
  0x4d   : > { %353 = vst [vmem:[#allocation2 + $0x10] sm:$0xff] %v1267_v2 }
  0x4e   : > { %354 = vst [vmem:[#allocation2] sm:$0xff] %v1267_v2 }
  0x4f   : > { %355 = vst [vmem:[#allocation2 + $0x18] sm:$0xff] %v1267_v2 }
  0x50   : > { %356 = vst [vmem:[#allocation2 + $0x8] sm:$0xff] %v1267_v2 }
  0x51 PF: > { %v921_v3 = vld [vmem:[%s1428_s5 + $0x70] sm:$0xf]  ;;  %v1016_v4 = vld [vmem:[%s1428_s5 + $0x74] sm:$0xf0]  ;;  %v1015_v8 = vld [vmem:[%s1428_s5 + $0x74] sm:$0xf] }
  0x52   : > { %v985_v5 = vld [vmem:[%s1428_s5 + $0xf0] sm:$0xf]  ;;  %v922_v6 = vor.u32 %v1016_v4, %v921_v3  ;;  %v1032_v7 = vld [vmem:[%s1428_s5 + $0xf4] sm:$0xf0]  ;;  %v923_v9 = vld [vmem:[%s1428_s5 + $0x78] sm:$0xf0] }
  0x53   : > { %v986_v10 = vor.u32 %v1032_v7, %v985_v5  ;;  %v926_v11 = vor.u32 %v1015_v8, %v923_v9  ;;  %v1031_v12 = vld [vmem:[%s1428_s5 + $0xf4] sm:$0xf]  ;;  %v987_v13 = vld [vmem:[%s1428_s5 + $0xf8] sm:$0xf0]  ;;  %v913_v14 = vld [vmem:[%s1428_s5 + $0x60] sm:$0xf] }
  0x54   : > { %565 = vmatpush.bf16.msra.mxu0 %v922_v6  ;;  %v990_v15 = vor.u32 %v1031_v12, %v987_v13  ;;  %v1014_v16 = vld [vmem:[%s1428_s5 + $0x64] sm:$0xf0]  ;;  %v977_v17 = vld [vmem:[%s1428_s5 + $0xe0] sm:$0xf]  ;;  %v1013_v21 = vld [vmem:[%s1428_s5 + $0x64] sm:$0xf] }
  0x55   : > { %v1030_v18 = vld [vmem:[%s1428_s5 + $0xe4] sm:$0xf0]  ;;  %579 = vmatpush.bf16.msra.mxu1 %v986_v10  ;;  %593 = vmatpush.bf16.msra.mxu2 %v926_v11  ;;  %v914_v19 = vor.u32 %v1014_v16, %v913_v14  ;;  %v915_v22 = vld [vmem:[%s1428_s5 + $0x68] sm:$0xf0]  ;;  %v1029_v23 = vld [vmem:[%s1428_s5 + $0xe4] sm:$0xf] }
  0x56   : > { %v978_v20 = vor.u32 %v1030_v18, %v977_v17  ;;  %607 = vmatpush.bf16.msra.mxu3 %v990_v15  ;;  %v918_v24 = vor.u32 %v1013_v21, %v915_v22  ;;  %v979_v25 = vld [vmem:[%s1428_s5 + $0xe8] sm:$0xf0]  ;;  %v905_v26 = vld [vmem:[%s1428_s5 + $0x50] sm:$0xf]  ;;  %v1012_v27 = vld [vmem:[%s1428_s5 + $0x54] sm:$0xf0] }
  0x57   : > { %v982_v28 = vor.u32 %v1029_v23, %v979_v25  ;;  %v969_v29 = vld [vmem:[%s1428_s5 + $0xd0] sm:$0xf]  ;;  %v1028_v30 = vld [vmem:[%s1428_s5 + $0xd4] sm:$0xf0]  ;;  %v1011_v31 = vld [vmem:[%s1428_s5 + $0x54] sm:$0xf]  ;;  %v906_v32 = vor.u32 %v1012_v27, %v905_v26 }
  0x58   : > { %566 = vmatpush.bf16.msra.mxu0 %v914_v19  ;;  %v907_v33 = vld [vmem:[%s1428_s5 + $0x58] sm:$0xf0]  ;;  %v1027_v34 = vld [vmem:[%s1428_s5 + $0xd4] sm:$0xf]  ;;  %v970_v36 = vor.u32 %v1028_v30, %v969_v29  ;;  %v897_v38 = vld [vmem:[%s1428_s5 + $0x40] sm:$0xf] }
  0x59   : > { %v971_v35 = vld [vmem:[%s1428_s5 + $0xd8] sm:$0xf0]  ;;  %580 = vmatpush.bf16.msra.mxu1 %v978_v20  ;;  %594 = vmatpush.bf16.msra.mxu2 %v918_v24  ;;  %v910_v37 = vor.u32 %v1011_v31, %v907_v33  ;;  %v1010_v39 = vld [vmem:[%s1428_s5 + $0x44] sm:$0xf0]  ;;  %v961_v40 = vld [vmem:[%s1428_s5 + $0xc0] sm:$0xf] }
  0x5a   : > { %608 = vmatpush.bf16.msra.mxu3 %v982_v28  ;;  %v974_v41 = vor.u32 %v1027_v34, %v971_v35  ;;  %v1026_v42 = vld [vmem:[%s1428_s5 + $0xc4] sm:$0xf0]  ;;  %v1009_v43 = vld [vmem:[%s1428_s5 + $0x44] sm:$0xf]  ;;  %v899_v44 = vld [vmem:[%s1428_s5 + $0x48] sm:$0xf0]  ;;  %v898_v47 = vor.u32 %v1010_v39, %v897_v38 }
  0x5b   : > { %v1025_v45 = vld [vmem:[%s1428_s5 + $0xc4] sm:$0xf]  ;;  %v963_v46 = vld [vmem:[%s1428_s5 + $0xc8] sm:$0xf0]  ;;  %v962_v48 = vor.u32 %v1026_v42, %v961_v40  ;;  %v902_v49 = vor.u32 %v1009_v43, %v899_v44  ;;  %v889_v50 = vld [vmem:[%s1428_s5 + $0x30] sm:$0xf] }
  0x5c   : > { %567 = vmatpush.bf16.msra.mxu0 %v906_v32  ;;  %v1008_v51 = vld [vmem:[%s1428_s5 + $0x34] sm:$0xf0]  ;;  %v953_v52 = vld [vmem:[%s1428_s5 + $0xb0] sm:$0xf]  ;;  %v966_v53 = vor.u32 %v1025_v45, %v963_v46  ;;  %v1007_v55 = vld [vmem:[%s1428_s5 + $0x34] sm:$0xf] }
  0x5d   : > { %581 = vmatpush.bf16.msra.mxu1 %v970_v36  ;;  %595 = vmatpush.bf16.msra.mxu2 %v910_v37  ;;  %v1024_v54 = vld [vmem:[%s1428_s5 + $0xb4] sm:$0xf0]  ;;  %v891_v56 = vld [vmem:[%s1428_s5 + $0x38] sm:$0xf0]  ;;  %v1023_v57 = vld [vmem:[%s1428_s5 + $0xb4] sm:$0xf]  ;;  %v890_v59 = vor.u32 %v1008_v51, %v889_v50 }
  0x5e   : > { %609 = vmatpush.bf16.msra.mxu3 %v974_v41  ;;  %v955_v58 = vld [vmem:[%s1428_s5 + $0xb8] sm:$0xf0]  ;;  %v954_v60 = vor.u32 %v1024_v54, %v953_v52  ;;  %v894_v61 = vor.u32 %v1007_v55, %v891_v56  ;;  %v881_v62 = vld [vmem:[%s1428_s5 + $0x20] sm:$0xf]  ;;  %v1006_v63 = vld [vmem:[%s1428_s5 + $0x24] sm:$0xf0] }
  0x5f   : > { %v945_v0 = vld [vmem:[%s1428_s5 + $0xa0] sm:$0xf]  ;;  %v958_v1 = vor.u32 %v1023_v57, %v955_v58  ;;  %v1022_v2 = vld [vmem:[%s1428_s5 + $0xa4] sm:$0xf0]  ;;  %v1005_v3 = vld [vmem:[%s1428_s5 + $0x24] sm:$0xf]  ;;  %v882_v7 = vor.u32 %v1006_v63, %v881_v62 }
  0x60   : > { %568 = vmatpush.bf16.msra.mxu0 %v898_v47  ;;  %v883_v4 = vld [vmem:[%s1428_s5 + $0x28] sm:$0xf0]  ;;  %v1021_v5 = vld [vmem:[%s1428_s5 + $0xa4] sm:$0xf]  ;;  %v946_v8 = vor.u32 %v1022_v2, %v945_v0  ;;  %v873_v10 = vld [vmem:[%s1428_s5 + $0x10] sm:$0xf] }
  0x61   : > { %582 = vmatpush.bf16.msra.mxu1 %v962_v48  ;;  %596 = vmatpush.bf16.msra.mxu2 %v902_v49  ;;  %v947_v6 = vld [vmem:[%s1428_s5 + $0xa8] sm:$0xf0]  ;;  %v886_v9 = vor.u32 %v1005_v3, %v883_v4  ;;  %v1004_v11 = vld [vmem:[%s1428_s5 + $0x14] sm:$0xf0]  ;;  %v937_v12 = vld [vmem:[%s1428_s5 + $0x90] sm:$0xf] }
  0x62   : > { %610 = vmatpush.bf16.msra.mxu3 %v966_v53  ;;  %v950_v13 = vor.u32 %v1021_v5, %v947_v6  ;;  %v1020_v14 = vld [vmem:[%s1428_s5 + $0x94] sm:$0xf0]  ;;  %v1003_v15 = vld [vmem:[%s1428_s5 + $0x14] sm:$0xf]  ;;  %v875_v16 = vld [vmem:[%s1428_s5 + $0x18] sm:$0xf0]  ;;  %v874_v19 = vor.u32 %v1004_v11, %v873_v10 }
  0x63   : > { %v1019_v17 = vld [vmem:[%s1428_s5 + $0x94] sm:$0xf]  ;;  %v939_v18 = vld [vmem:[%s1428_s5 + $0x98] sm:$0xf0]  ;;  %v938_v20 = vor.u32 %v1020_v14, %v937_v12  ;;  %v878_v21 = vor.u32 %v1003_v15, %v875_v16  ;;  %v865_v22 = vld [vmem:[%s1428_s5] sm:$0xf] }
  0x64   : > { %569 = vmatpush.bf16.msra.mxu0 %v890_v59  ;;  %v1002_v23 = vld [vmem:[%s1428_s5 + $0x4] sm:$0xf0]  ;;  %v929_v24 = vld [vmem:[%s1428_s5 + $0x80] sm:$0xf]  ;;  %v942_v25 = vor.u32 %v1019_v17, %v939_v18  ;;  %v1001_v27 = vld [vmem:[%s1428_s5 + $0x4] sm:$0xf] }
  0x65   : > { %583 = vmatpush.bf16.msra.mxu1 %v954_v60  ;;  %597 = vmatpush.bf16.msra.mxu2 %v894_v61  ;;  %v1018_v26 = vld [vmem:[%s1428_s5 + $0x84] sm:$0xf0]  ;;  %v867_v28 = vld [vmem:[%s1428_s5 + $0x8] sm:$0xf0]  ;;  %v1017_v29 = vld [vmem:[%s1428_s5 + $0x84] sm:$0xf]  ;;  %v866_v31 = vor.u32 %v1002_v23, %v865_v22 }
  0x66   : > { %611 = vmatpush.bf16.msra.mxu3 %v958_v1  ;;  %v931_v30 = vld [vmem:[%s1428_s5 + $0x88] sm:$0xf0]  ;;  %v857_v32 = vld [vmem:[%s1426_s12] sm:$0xf]  ;;  %v1000_v33 = vld [vmem:[%s1426_s12 + $0x4] sm:$0xf0]  ;;  %v930_v34 = vor.u32 %v1018_v26, %v929_v24  ;;  %v870_v35 = vor.u32 %v1001_v27, %v867_v28 }
  0x67   : > { %v999_v36 = vld [vmem:[%s1426_s12 + $0x4] sm:$0xf]  ;;  %v859_v37 = vld [vmem:[%s1426_s12 + $0x8] sm:$0xf0]  ;;  %v934_v38 = vor.u32 %v1017_v29, %v931_v30  ;;  %v858_v39 = vor.u32 %v1000_v33, %v857_v32  ;;  %p991_p8 = scmp.ne.s32.totalorder %s1246_s22, 3 }
  0x68   : > { %570 = vmatpush.bf16.msra.mxu0 %v882_v7  ;;  %v862_v40 = vor.u32 %v999_v36, %v859_v37  ;;  %v357_v42 = vld [vmem:[#allocation2 + $0x10] sm:$0xff]  ;;  %v358_v47 = vld [vmem:[#allocation2] sm:$0xff]  ;;  %v359_v51 = vld [vmem:[#allocation2 + $0x18] sm:$0xff] }
  0x69   : > { %584 = vmatpush.bf16.msra.mxu1 %v946_v8  ;;  %598 = vmatpush.bf16.msra.mxu2 %v886_v9  ;;  %v360_v57 = vld [vmem:[#allocation2 + $0x8] sm:$0xff] }
  0x6a   : > { %612 = vmatpush.bf16.msra.mxu3 %v950_v13 }
  0x6c   : > { %571 = vmatpush.bf16.msra.mxu0 %v874_v19 }
  0x6d   : > { %585 = vmatpush.bf16.msra.mxu1 %v938_v20  ;;  %599 = vmatpush.bf16.msra.mxu2 %v878_v21 }
  0x6e   : > { %613 = vmatpush.bf16.msra.mxu3 %v942_v25 }
  0x70   : > { %572 = vmatpush.bf16.msra.mxu0 %v866_v31 }
  0x71   : > { %586 = vmatpush.bf16.msra.mxu1 %v930_v34  ;;  %600 = vmatpush.bf16.msra.mxu2 %v870_v35 }
  0x72   : > { %614 = vmatpush.bf16.msra.mxu3 %v934_v38 }
  0x73   : > { %573 = vmatmul.bf16.vlgmr.msra.gmra.mxu0 %v858_v39 }
  0x74   : > { %587 = vmatmul.bf16.vlgmr.msra.gmra.mxu1 %v862_v40  ;;  %601 = vmatmul.bf16.vlgmr.msra.gmra.mxu2 %v858_v39 }
  0x75   : > { %615 = vmatmul.bf16.vlgmr.msra.gmra.mxu3 %v862_v40 }
  0xf0   : > { %v574_v41 = vpop.f32.mrf.mxu0 }
  0xf1   : > { %v588_v43 = vpop.f32.mrf.mxu1 }
  0xf2   : > { %v589_v44 = vadd.f32 %v588_v43, %v574_v41 }
  0xf4   : > { %v621_v45 = vadd.f32 %v589_v44, %v357_v42 }
  0xf6   : > { %625 = vst [vmem:[#allocation2 + $0x10] sm:$0xff] %v621_v45 }
  0xf7   : > { %v602_v46 = vpop.f32.mrf.mxu2 }
  0xf8   : > { %v616_v48 = vpop.f32.mrf.mxu3  ;;  %v576_v49 = vpop.f32.mrf.mxu0 }
  0xf9   : > { %v617_v50 = vadd.f32 %v616_v48, %v602_v46  ;;  %v590_v52 = vpop.f32.mrf.mxu1 }
  0xfa   : > { %v591_v53 = vadd.f32 %v590_v52, %v576_v49 }
  0xfb   : > { %v622_v54 = vadd.f32 %v617_v50, %v358_v47 }
  0xfc   : > { %v623_v55 = vadd.f32 %v591_v53, %v359_v51 }
  0xfd   : > { %626 = vst [vmem:[#allocation2] sm:$0xff] %v622_v54 }
  0xfe   : > { %627 = vst [vmem:[#allocation2 + $0x18] sm:$0xff] %v623_v55 }
  0xff   : > { %v604_v56 = vpop.f32.mrf.mxu2 }
 0x100   : > { %v618_v58 = vpop.f32.mrf.mxu3 }
 0x101   : > { %v619_v59 = vadd.f32 %v618_v58, %v604_v56  ;;  %632 = sbr.rel (%p991_p8) target bundleno = 278 (0x116), region = 86 }
 0x103   : > { %v624_v60 = vadd.f32 %v619_v59, %v360_v57 }
 0x105   : > { %628 = vst [vmem:[#allocation2 + $0x8] sm:$0xff] %v624_v60 }
 0x106   : > { %v633_v61 = vld [vmem:[#allocation2 + $0x10] sm:$0xff]  ;;  %v634_v62 = vld [vmem:[#allocation2] sm:$0xff]  ;;  %v635_v3 = vld [vmem:[#allocation2 + $0x18] sm:$0xff] }
 0x107   : > { %v637_v63 = vld [vmem:[%s340_s7] sm:$0x3] }
 0x108   : > { %v639_v0 = vperm.slane %v637_v63, 0  ;;  %v640_v1 = vperm.slane %v637_v63, 1  ;;  %v647_v2 = vld [vmem:[%s345_s9] sm:$0x3] }
 0x109   : > { %v649_v5 = vperm.slane %v647_v2, 0  ;;  %v650_v6 = vperm.slane %v647_v2, 1 }
 0x10a   : > { %v643_v7 = vmul.f32 %v639_v0, %v633_v61  ;;  %v644_v8 = vmul.f32 %v640_v1, %v634_v62  ;;  %v645_v9 = vmul.f32 %v639_v0, %v635_v3 }
 0x10c   : > { %v636_v4 = vld [vmem:[#allocation2 + $0x8] sm:$0xff]  ;;  %v653_v11 = vadd.f32 %v649_v5, %v643_v7  ;;  %v654_v12 = vadd.f32 %v650_v6, %v644_v8  ;;  %v655_v13 = vadd.f32 %v649_v5, %v645_v9 }
 0x10d   : > { %v646_v10 = vmul.f32 %v640_v1, %v636_v4 }
 0x10e   : > { %v657_v15 = vmax.f32 %v653_v11, 0.0  ;;  %v658_v16 = vmax.f32 %v654_v12, 0.0  ;;  %v659_v17 = vmax.f32 %v655_v13, 0.0 }
 0x10f   : > { %v656_v14 = vadd.f32 %v650_v6, %v646_v10 }
 0x110   : > { %v661_v19 = vpack.c.bf16 %v658_v16, %v657_v15 }
 0x111   : > { %v660_v18 = vmax.f32 %v656_v14, 0.0 }
 0x112   : > { %663 = vst [vmem:[%s1446_s13] sm:$0xff] %v661_v19 }
 0x113   : > { %v662_v20 = vpack.c.bf16 %v660_v18, %v659_v17 }
 0x115   : > { %664 = vst [vmem:[%s1446_s13 + $0x8] sm:$0xff] %v662_v20 }
 0x116 PF: > { %671 = sbr.rel (!%p1402_p1) target bundleno = 288 (0x120), region = 90  ;;  %s1033_s22 = sshll.u32 (%p1402_p1), %s1250_s23, 3 }
 0x117   : > { %s1597_s8 = sld [smem:[#allocation16_spill]] (%p1402_p1) }
 0x119   : > { %v708_v21 = vld [vmem:[%s1446_s13] sm:$0xff] (%p1402_p1) }
 0x11c   : > { %v710_v22 = vld [vmem:[%s1446_s13 + $0x8] sm:$0xff] }
 0x11d   : > { %s677_s12 = scalar_lea.vmem %s1597_s8, %s1033_s22 }
 0x11e   : > { %709 = vst [vmem:[%s677_s12] sm:$0xff] %v708_v21 }
 0x11f   : > { %711 = vst [vmem:[%s677_s12 + $0x40] sm:$0xff] %v710_v22 }
 0x120 PF: > { %s17_s26 = sadd.s32 1, %s1262_s26   ;;  %s1598_s15 = sld [smem:[#allocation8_spill]] }
 0x121   : > { %p14_p9 = scmp.ge.s32.totalorder %s17_s26, 34   ;;  %s1599_s16 = sld [smem:[#allocation14_spill]] }
 0x122   : > { %s1600_s6 = sld [smem:[#allocation13_spill]]  ;;  %s1605_s17 = smov %s1230_s18 }
 0x123   : > { %s1601_s20 = sld [smem:[#allocation9_spill]]  ;;  %s1606_s18 = smov %s1234_s19 }
 0x124   : > { %s1602_s21 = sld [smem:[#allocation12_spill]]  ;;  %s1608_s22 = smov %s1254_s24 }
 0x125   : > { %s1603_s5 = sld [smem:[#allocation10_spill]]  ;;  %s1609_s23 = smov %s1258_s25 }
 0x126   : > { %s1604_s0 = sld [smem:[#allocation11_spill]] }
 0x128   : > { %s1607_s19 = smov %s1600_s6  ;;  %16 = sbr.rel (!%p14_p9) target bundleno = 10 (0xa), region = 174 }
 0x12b   : > { %s1610_s24 = smov %s1603_s5 }
 0x12c   : > { %s1611_s25 = smov %s1604_s0 }
 0x12d   :  { %727 = vsyncpa [#allocation5], 1 }
 0x12e   :  { %729 = vsyncpa [#allocation5 + $0x1], 1 }

// kernel: _forward_impl.31
= control target key start
LH: loop header
LB: loop body
LE: loop exit
PB: predicated region body
PF: predicated region fallthrough
CT: control target
= control target key end

     0   :  { %s875_s15 = smov 0   ;;  %s877_s16 = smov 0   ;;  %s978_s0 = inlined_call_operand.vmem [shape: bf16[16,2048], index: 0, kind: input, shape index: {}]   ;;  %s979_s1 = inlined_call_operand.vmem [shape: bf16[2048,128], index: 1, kind: input, shape index: {}]   ;;  %s980_s2 = inlined_call_operand.vmem [shape: f32[1,128], index: 2, kind: input, shape index: {}]   ;;  %s981_s3 = inlined_call_operand.vmem [shape: f32[1,128], index: 3, kind: input, shape index: {}]   ;;  %s982_s4 = inlined_call_operand.vmem [shape: f32[16,128], index: 4, kind: output, shape index: {}]  }
   0x1   :  { %s879_s17 = smov 0   ;;  %s881_s18 = smov 0  }
   0x2   :  { %s883_s19 = smov 0  }
   0x3 LB: > { %s26_s20 = sadd.s32 1, %s843_s18  ;;  %p49_p1 = scmp.ne.s32.totalorder %s835_s16, %s831_s15  ;;  %s847_s19 = sphi %s883_s19, %s14_s19   ;;  %s843_s18 = sphi %s881_s18, %s986_s18   ;;  %s839_s17 = sphi %s879_s17, %s985_s17   ;;  %s835_s16 = sphi %s877_s16, %s984_s16   ;;  %s831_s15 = sphi %s875_s15, %s983_s15  }
   0x4   : > { %p27_p0 = scmp.ge.s32.totalorder %s26_s20, 8  ;;  %p50_p2 = scmp.eq.s32.totalorder %s847_s19, 0 }
   0x5   : > { %s42_s22 = sadd.s32 1, %s835_s16  ;;  %p661_p5 = scmp.ge.s32.totalorder %s847_s19, 8 }
   0x6   : > { %s988_s20 = smov (%p27_p0, %s26_s20), 0  ;;  %p51_p3 = por %p50_p2, %p49_p1 }
   0x7   : > { %s38_s21 = ssub.s32 %s843_s18, %s988_s20  ;;  %195 = sbr.rel (%p661_p5) target bundleno = 18 (0x12), region = 24 }
   0x8   : > { %p40_p4 = scmp.eq.s32.totalorder %s38_s21, 0 }
   0xa   : > { %s910_s23 = scalar_select %p40_p4, %s835_s16, %s42_s22  }
   0xc   : > { %198 = sbr.rel (!%p51_p3) target bundleno = 18 (0x12), region = 28  ;;  %s200_s24 = sand.u32 (%p51_p3), 1, %s835_s16  }
   0xd   : > { %s747_s25 = sshll.u32 (%p51_p3), %s843_s18, 3  ;;  %s662_s26 = sshll.u32 (%p51_p3), %s200_s24, 4 }
   0xe   : > { %s208_s29 = scalar_lea.vmem (%p51_p3), %s978_s0, %s747_s25  ;;  %s202_s30 = scalar_lea.vmem (%p51_p3), [#allocation3], %s662_s26 }
   0xf   : > { %v239_v0 = vld [vmem:[%s208_s29] sm:$0xff] (%p51_p3) }
  0x10   : > { %v241_v1 = vld [vmem:[%s208_s29 + $0x40] sm:$0xff] (%p51_p3)  ;;  %240 = vst [vmem:[%s202_s30] sm:$0xff] (%p51_p3), %v239_v0 }
  0x11   : > { %242 = vst [vmem:[%s202_s30 + $0x8] sm:$0xff] %v241_v1 }
  0x12 PF: > { %p665_p6 = scmp.ge.s32.totalorder %s847_s19, 1  ;;  %p259_p7 = scmp.lt.s32.totalorder %s847_s19, 9 }
  0x14   : > { %p260_p8 = pnand %p665_p6, %p259_p7 }
  0x15   : > { %s266_s5 = sand.u32 (!%p260_p8), 1, %s831_s15   ;;  %s667_s6 = sshll.u32 (!%p260_p8), %s839_s17, 5 }
  0x16   : > { %263 = sbr.rel (%p260_p8) target bundleno = 219 (0xdb), region = 70  ;;  %s666_s7 = sshll.u32 (!%p260_p8), %s266_s5, 4 }
  0x17   : > { %p311_p9 = scmp.lt.s32.totalorder (!%p260_p8), %s667_s6, 255  ;;  %s927_s12 = scalar_lea.vmem (!%p260_p8), [#allocation3], %s666_s7 }
  0x18   : > { %p669_p10 = scmp.ne.s32.totalorder (!%p260_p8), %s839_s17, 0 }
  0x1b   : > { %s990_s6 = smov (!%p311_p9, %s667_s6), 255  ;;  %337 = sbr.rel (%p669_p10) target bundleno = 35 (0x23), region = 78 }
  0x1c   : > { %s668_s8 = sshll.u32 %s990_s6, 2 }
  0x1d   : > { %s925_s11 = scalar_lea.vmem %s979_s1, %s668_s8 }
  0x20   : > { %v849_v2 = vmov 0.0  }
  0x21   : > { %338 = vst [vmem:[#allocation2] sm:$0xff] %v849_v2 }
  0x22   : > { %339 = vst [vmem:[#allocation2 + $0x8] sm:$0xff] %v849_v2 }
  0x23 PF: > { %v757_v3 = vld [vmem:[%s925_s11 + $0x38] sm:$0xff]  ;;  %v756_v5 = vld [vmem:[%s925_s11 + $0x30] sm:$0xff]  ;;  %v755_v7 = vld [vmem:[%s925_s11 + $0x28] sm:$0xff]  ;;  %p742_p11 = scmp.ne.s32.totalorder %s839_s17, 7 }
  0x24   : > { %v765_v4 = vld [vmem:[%s925_s11 + $0x78] sm:$0xff]  ;;  %482 = vmatpush.bf16.msra.mxu0 %v757_v3  ;;  %v764_v6 = vld [vmem:[%s925_s11 + $0x70] sm:$0xff]  ;;  %v763_v8 = vld [vmem:[%s925_s11 + $0x68] sm:$0xff] }
  0x25   : > { %496 = vmatpush.bf16.msra.mxu1 %v765_v4  ;;  %v754_v9 = vld [vmem:[%s925_s11 + $0x20] sm:$0xff]  ;;  %v753_v11 = vld [vmem:[%s925_s11 + $0x18] sm:$0xff]  ;;  %v752_v13 = vld [vmem:[%s925_s11 + $0x10] sm:$0xff] }
  0x26   : > { %v762_v10 = vld [vmem:[%s925_s11 + $0x60] sm:$0xff]  ;;  %v761_v12 = vld [vmem:[%s925_s11 + $0x58] sm:$0xff]  ;;  %v760_v14 = vld [vmem:[%s925_s11 + $0x50] sm:$0xff] }
  0x27   : > { %v751_v15 = vld [vmem:[%s925_s11 + $0x8] sm:$0xff]  ;;  %v750_v17 = vld [vmem:[%s925_s11] sm:$0xff] }
  0x28   : > { %483 = vmatpush.bf16.msra.mxu0 %v756_v5  ;;  %v759_v16 = vld [vmem:[%s925_s11 + $0x48] sm:$0xff]  ;;  %v758_v18 = vld [vmem:[%s925_s11 + $0x40] sm:$0xff] }
  0x29   : > { %497 = vmatpush.bf16.msra.mxu1 %v764_v6  ;;  %v672_v19 = vld [vmem:[%s927_s12] sm:$0xf]  ;;  %v749_v20 = vld [vmem:[%s927_s12 + $0x4] sm:$0xf0]  ;;  %v748_v21 = vld [vmem:[%s927_s12 + $0x4] sm:$0xf] }
  0x2a   : > { %v674_v22 = vld [vmem:[%s927_s12 + $0x8] sm:$0xf0]  ;;  %v673_v23 = vor.u32 %v749_v20, %v672_v19  ;;  %v340_v26 = vld [vmem:[#allocation2] sm:$0xff] }
  0x2b   : > { %v677_v24 = vor.u32 %v748_v21, %v674_v22  ;;  %v341_v31 = vld [vmem:[#allocation2 + $0x8] sm:$0xff] }
  0x2c   : > { %484 = vmatpush.bf16.msra.mxu0 %v755_v7 }
  0x2d   : > { %498 = vmatpush.bf16.msra.mxu1 %v763_v8 }
  0x30   : > { %485 = vmatpush.bf16.msra.mxu0 %v754_v9 }
  0x31   : > { %499 = vmatpush.bf16.msra.mxu1 %v762_v10 }
  0x34   : > { %486 = vmatpush.bf16.msra.mxu0 %v753_v11 }
  0x35   : > { %500 = vmatpush.bf16.msra.mxu1 %v761_v12 }
  0x38   : > { %487 = vmatpush.bf16.msra.mxu0 %v752_v13 }
  0x39   : > { %501 = vmatpush.bf16.msra.mxu1 %v760_v14 }
  0x3c   : > { %488 = vmatpush.bf16.msra.mxu0 %v751_v15 }
  0x3d   : > { %502 = vmatpush.bf16.msra.mxu1 %v759_v16 }
  0x40   : > { %489 = vmatpush.bf16.msra.mxu0 %v750_v17 }
  0x41   : > { %503 = vmatpush.bf16.msra.mxu1 %v758_v18 }
  0x43   : > { %490 = vmatmul.bf16.vlgmr.msra.gmra.mxu0 %v673_v23 }
  0x44   : > { %504 = vmatmul.bf16.vlgmr.msra.gmra.mxu1 %v677_v24 }
  0xc0   : > { %v491_v25 = vpop.f32.mrf.mxu0 }
  0xc1   : > { %v505_v27 = vpop.f32.mrf.mxu1 }
  0xc2   : > { %v506_v28 = vadd.f32 %v505_v27, %v491_v25 }
  0xc4   : > { %v510_v29 = vadd.f32 %v506_v28, %v340_v26 }
  0xc6   : > { %512 = vst [vmem:[#allocation2] sm:$0xff] %v510_v29 }
  0xc8   : > { %v493_v30 = vpop.f32.mrf.mxu0 }
  0xc9   : > { %v507_v32 = vpop.f32.mrf.mxu1 }
  0xca   : > { %v508_v33 = vadd.f32 %v507_v32, %v493_v30  ;;  %517 = sbr.rel (%p742_p11) target bundleno = 219 (0xdb), region = 82 }
  0xcc   : > { %v511_v34 = vadd.f32 %v508_v33, %v341_v31 }
  0xce   : > { %513 = vst [vmem:[#allocation2 + $0x8] sm:$0xff] %v511_v34 }
  0xcf   : > { %v518_v35 = vld [vmem:[#allocation2] sm:$0xff] }
  0xd0   : > { %v807_v36 = vld [vmem:[%s980_s2] ss:$0 sm:$0xff] }
  0xd1   : > { %v808_v37 = vld [vmem:[%s981_s3] ss:$0 sm:$0xff]  ;;  %v524_v39 = vmul.f32 %v807_v36, %v518_v35 }
  0xd3   : > { %v530_v41 = vadd.f32 %v808_v37, %v524_v39 }
  0xd5   : > { %v519_v38 = vld [vmem:[#allocation2 + $0x8] sm:$0xff]  ;;  %532 = vst [vmem:[%s982_s4] sm:$0xff] %v530_v41 }
  0xd6   : > { %v525_v40 = vmul.f32 %v807_v36, %v519_v38 }
  0xd8   : > { %v531_v42 = vadd.f32 %v808_v37, %v525_v40 }
  0xda   : > { %533 = vst [vmem:[%s982_s4 + $0x8] sm:$0xff] %v531_v42 }
  0xdb PF: > { %s14_s19 = sadd.s32 1, %s847_s19   ;;  %s983_s15 = smov %s835_s16 }
  0xdc   : > { %p11_p12 = scmp.ge.s32.totalorder %s14_s19, 10   ;;  %s984_s16 = smov %s910_s23 }
  0xdd   : > { %s985_s17 = smov %s843_s18  ;;  %s986_s18 = smov %s988_s20 }
  0xde   :  { %13 = sbr.rel (!%p11_p12) target bundleno = 3 (0x3), region = 126 }

// kernel: _forward_impl.20
= control target key start
LH: loop header
LB: loop body
LE: loop exit
PB: predicated region body
PF: predicated region fallthrough
CT: control target
= control target key end

     0   :  { %12 = vsyncpa [#allocation7], 0  ;;  %s14177_s0 = inlined_call_operand.vmem [shape: bf16[6,2,2048], index: 0, kind: input, shape index: {}]   ;;  %s14178_s1 = inlined_call_operand.vmem [shape: bf16[6,2,2048], index: 1, kind: input, shape index: {}]   ;;  %s14179_s2 = inlined_call_operand.hbm [shape: bf16[512,2048], index: 2, kind: input, shape index: {}]   ;;  %s14180_s3 = inlined_call_operand.hbm [shape: bf16[512,2048], index: 3, kind: input, shape index: {}]   ;;  %s14181_s4 = inlined_call_operand.hbm [shape: s32[2,1], index: 4, kind: input, shape index: {}]   ;;  %s14182_s5 = inlined_call_operand.vmem [shape: f32[6,2,512], index: 5, kind: output, shape index: {0}]   ;;  %s14183_s6 = inlined_call_operand.vmem [shape: f32[6,2,512], index: 6, kind: output, shape index: {1}]  }
   0x1   :  { %13 = vsyncpa [#allocation9], 0  ;;  %s43_s23 = sshll.u32 %s14180_s3, 4  ;;  %s13740_s24 = smov [#allocation8]   ;;  %s44_s23 = int_to_ptr.hbm [resolvable:$true] %s43_s23 }
   0x2   :  { %s45_s25 = sshll.u32 %s13740_s24, 4  ;;  %s30_s28 = sshll.u32 %s14179_s2, 4  ;;  %s46_s25 = int_to_ptr.vmem [resolvable:$true] %s45_s25  ;;  %s31_s28 = int_to_ptr.hbm [resolvable:$true] %s30_s28 }
   0x3   :  { %s13741_s29 = smov 1024   ;;  %s13742_s30 = smov 64  }
   0x4   :  { %51 = dma.hbm_to_vmem [thread:$0]  %s44_s23, 65536, %s46_s25, [#allocation9], %s13741_s29, %s13741_s29, %s13742_s30  }
   0x5   :  { %s13743_s7 = smov [#allocation6]   ;;  %s57_s11 = sshll.u32 %s14181_s4, 4  ;;  %s58_s11 = int_to_ptr.hbm [resolvable:$true] %s57_s11 }
   0x6   :  { %s32_s8 = sshll.u32 %s13743_s7, 4  ;;  %s13744_s3 = smov [#allocation10]   ;;  %s33_s8 = int_to_ptr.vmem [resolvable:$true] %s32_s8 }
   0x7   :  { %38 = dma.hbm_to_vmem [thread:$0]  %s31_s28, 65536, %s33_s8, [#allocation7], %s13741_s29, %s13741_s29, %s13742_s30  }
   0x8   :  { %s59_s12 = sshll.u32 %s13744_s3, 4  ;;  %s60_s12 = int_to_ptr.vmem [resolvable:$true] %s59_s12 }
   0x9   :  { %62 = dma.hbm_to_vmem [thread:$0]  %s58_s11, 32, %s60_s12, [#allocation9]  }
   0xa   :  { %13732 = dma.done.wait [#allocation7], 65536  }
   0xb   :  { %13733 = vsyncadd [#allocation7], 4294901760 }
   0xc   :  { %13734 = dma.done.wait [#allocation9], 65568  }
   0xd   :  { %13735 = vsyncadd [#allocation9], 4294901728  ;;  %v13745_v0 = vmov 0.0   ;;  %v13791_v1 = vld [vmem:[#allocation10] sm:$0x3]  ;;  %s13793_s2 = smov 0  }
   0xe   :  { %109 = vst [vmem:[#allocation2] sm:$0xff] %v13745_v0 }
   0xf   :  { %110 = vst [vmem:[#allocation3] sm:$0xff] %v13745_v0 }
  0x10   :  { %111 = vst [vmem:[#allocation4] sm:$0xff] %v13745_v0 }
  0x11   :  { %112 = vst [vmem:[#allocation5] sm:$0xff] %v13745_v0 }
  0x12 LB: > { %v8925_v2 = vld [vmem:[#allocation6 + $0x380] sm:$0xf]  ;;  %vm4077_vm0 = vcmask 1041408   ;;  %vm4079_vm1 = vcmask 1045508   ;;  %vm4081_vm2 = vcmask 1043456   ;;  %s8474_s4 = sshll.u32 %s13738_s2, 4  ;;  %s13738_s2 = sphi %s13793_s2, %s119_s2  }
  0x13   : > { %v12702_v3 = vld [vmem:[#allocation6 + $0x3bc] sm:$0xf0]  ;;  %s13903_s15 = scalar_lea.vmem %s14177_s0, %s8474_s4  ;;  %s13094_s16 = sshll.u32 %s13738_s2, 3 }
  0x14   : > { %v9437_v4 = vld [vmem:[#allocation6 + $0x780] sm:$0xf]  ;;  %v8926_v5 = vor.u32 %v12702_v3, %v8925_v2  ;;  %s4269_s19 = scalar_lea.vmem %s14182_s5, %s13094_s16  ;;  %s14100_s20 = ssub.s32 5, %s13738_s2 }
  0x15   : > { %v12830_v6 = vld [vmem:[#allocation6 + $0x7bc] sm:$0xf0]  ;;  %s10528_s21 = sshll.u32 %s14100_s20, 4  ;;  %s13607_s25 = sshll.u32 %s14100_s20, 3 }
  0x16   : > { %v9949_v7 = vld [vmem:[#allocation6 + $0xb80] sm:$0xf]  ;;  %v9438_v9 = vor.u32 %v12830_v6, %v9437_v4  ;;  %3217 = vmatpush.bf16.msra.mxu0 %v8926_v5  ;;  %s14110_s24 = scalar_lea.vmem %s14178_s1, %s10528_s21  ;;  %s8419_s28 = scalar_lea.vmem %s14183_s6, %s13607_s25 }
  0x17   : > { %v12958_v8 = vld [vmem:[#allocation6 + $0xbbc] sm:$0xf0] }
  0x18   : > { %v9950_v10 = vor.u32 %v12958_v8, %v9949_v7  ;;  %v10461_v11 = vld [vmem:[#allocation6 + $0xf80] sm:$0xf]  ;;  %3230 = vmatpush.bf16.msra.mxu1 %v9438_v9 }
  0x19   : > { %v13086_v12 = vld [vmem:[#allocation6 + $0xfbc] sm:$0xf0] }
  0x1a   : > { %v8861_v13 = vld [vmem:[#allocation6 + $0x300] sm:$0xf]  ;;  %v10462_v14 = vor.u32 %v13086_v12, %v10461_v11  ;;  %3243 = vmatpush.bf16.msra.mxu2 %v9950_v10 }
  0x1b   : > { %v12686_v15 = vld [vmem:[#allocation6 + $0x33c] sm:$0xf0] }
  0x1c   : > { %v9373_v16 = vld [vmem:[#allocation6 + $0x700] sm:$0xf]  ;;  %v8862_v18 = vor.u32 %v12686_v15, %v8861_v13  ;;  %3256 = vmatpush.bf16.msra.mxu3 %v10462_v14 }
  0x1d   : > { %v12814_v17 = vld [vmem:[#allocation6 + $0x73c] sm:$0xf0] }
  0x1e   : > { %v9374_v19 = vor.u32 %v12814_v17, %v9373_v16  ;;  %v9885_v20 = vld [vmem:[#allocation6 + $0xb00] sm:$0xf]  ;;  %3218 = vmatpush.bf16.msra.mxu0 %v8862_v18 }
  0x1f   : > { %v12942_v21 = vld [vmem:[#allocation6 + $0xb3c] sm:$0xf0] }
  0x20   : > { %v10397_v22 = vld [vmem:[#allocation6 + $0xf00] sm:$0xf]  ;;  %v9886_v23 = vor.u32 %v12942_v21, %v9885_v20  ;;  %3231 = vmatpush.bf16.msra.mxu1 %v9374_v19 }
  0x21   : > { %v13070_v24 = vld [vmem:[#allocation6 + $0xf3c] sm:$0xf0] }
  0x22   : > { %v8797_v25 = vld [vmem:[#allocation6 + $0x280] sm:$0xf]  ;;  %v10398_v27 = vor.u32 %v13070_v24, %v10397_v22  ;;  %3244 = vmatpush.bf16.msra.mxu2 %v9886_v23 }
  0x23   : > { %v12670_v26 = vld [vmem:[#allocation6 + $0x2bc] sm:$0xf0] }
  0x24   : > { %v9309_v28 = vld [vmem:[#allocation6 + $0x680] sm:$0xf]  ;;  %v8798_v31 = vor.u32 %v12670_v26, %v8797_v25  ;;  %3257 = vmatpush.bf16.msra.mxu3 %v10398_v27 }
  0x25   : > { %v12798_v29 = vld [vmem:[#allocation6 + $0x6bc] sm:$0xf0] }
  0x26   : > { %v9821_v30 = vld [vmem:[#allocation6 + $0xa80] sm:$0xf]  ;;  %v9310_v35 = vor.u32 %v12798_v29, %v9309_v28  ;;  %3219 = vmatpush.bf16.msra.mxu0 %v8798_v31  ;;  %v12694_v31 = vld [vmem:[#allocation6 + $0x384] sm:$0xf] }
  0x27   : > { %v12926_v32 = vld [vmem:[#allocation6 + $0xabc] sm:$0xf0] }
  0x28   : > { %v10333_v33 = vld [vmem:[#allocation6 + $0xe80] sm:$0xf]  ;;  %v9822_v36 = vor.u32 %v12926_v32, %v9821_v30  ;;  %3232 = vmatpush.bf16.msra.mxu1 %v9310_v35  ;;  %v8927_v32 = vld [vmem:[#allocation6 + $0x3c0] sm:$0xf0] }
  0x29   : > { %v13054_v34 = vld [vmem:[#allocation6 + $0xebc] sm:$0xf0]  ;;  %v9439_v35 = vld [vmem:[#allocation6 + $0x7c0] sm:$0xf0] }
  0x2a   : > { %v8733_v37 = vld [vmem:[#allocation6 + $0x200] sm:$0xf]  ;;  %v10334_v40 = vor.u32 %v13054_v34, %v10333_v33  ;;  %3245 = vmatpush.bf16.msra.mxu2 %v9822_v36  ;;  %v12822_v33 = vld [vmem:[#allocation6 + $0x784] sm:$0xf] }
  0x2b   : > { %v12654_v38 = vld [vmem:[#allocation6 + $0x23c] sm:$0xf0]  ;;  %v12950_v36 = vld [vmem:[#allocation6 + $0xb84] sm:$0xf] }
  0x2c   : > { %v9245_v39 = vld [vmem:[#allocation6 + $0x600] sm:$0xf]  ;;  %v8734_v46 = vor.u32 %v12654_v38, %v8733_v37  ;;  %3258 = vmatpush.bf16.msra.mxu3 %v10334_v40  ;;  %v9951_v37 = vld [vmem:[#allocation6 + $0xbc0] sm:$0xf0] }
  0x2d   : > { %v12782_v41 = vld [vmem:[#allocation6 + $0x63c] sm:$0xf0]  ;;  %v13078_v40 = vld [vmem:[#allocation6 + $0xf84] sm:$0xf] }
  0x2e   : > { %v9757_v42 = vld [vmem:[#allocation6 + $0xa00] sm:$0xf]  ;;  %v9246_v47 = vor.u32 %v12782_v41, %v9245_v39  ;;  %3220 = vmatpush.bf16.msra.mxu0 %v8734_v46  ;;  %v10463_v41 = vld [vmem:[#allocation6 + $0xfc0] sm:$0xf0] }
  0x2f   : > { %v12910_v43 = vld [vmem:[#allocation6 + $0xa3c] sm:$0xf0]  ;;  %v12678_v46 = vld [vmem:[#allocation6 + $0x304] sm:$0xf] }
  0x30   : > { %v10269_v44 = vld [vmem:[#allocation6 + $0xe00] sm:$0xf]  ;;  %v9758_v48 = vor.u32 %v12910_v43, %v9757_v42  ;;  %3233 = vmatpush.bf16.msra.mxu1 %v9246_v47  ;;  %v8930_v43 = vor.u32 %v12694_v31, %v8927_v32  ;;  %v8863_v47 = vld [vmem:[#allocation6 + $0x340] sm:$0xf0] }
  0x31   : > { %v13038_v45 = vld [vmem:[#allocation6 + $0xe3c] sm:$0xf0]  ;;  %v9183_v32 = vld [vmem:[#allocation6 + $0x5c0] sm:$0xf0] }
  0x32   : > { %v8669_v49 = vld [vmem:[#allocation6 + $0x180] sm:$0xf]  ;;  %v10270_v52 = vor.u32 %v13038_v45, %v10269_v44  ;;  %3246 = vmatpush.bf16.msra.mxu2 %v9758_v48  ;;  %v9442_v44 = vor.u32 %v12822_v33, %v9439_v35  ;;  %v9954_v45 = vor.u32 %v12950_v36, %v9951_v37  ;;  %v12806_v48 = vld [vmem:[#allocation6 + $0x704] sm:$0xf] }
  0x33   : > { %v12638_v50 = vld [vmem:[#allocation6 + $0x1bc] sm:$0xf0]  ;;  %v12886_v33 = vld [vmem:[#allocation6 + $0x984] sm:$0xf] }
  0x34   : > { %v9181_v51 = vld [vmem:[#allocation6 + $0x580] sm:$0xf]  ;;  %v8670_v58 = vor.u32 %v12638_v50, %v8669_v49  ;;  %3259 = vmatpush.bf16.msra.mxu3 %v10270_v52  ;;  %v10466_v49 = vor.u32 %v13078_v40, %v10463_v41  ;;  %v9375_v50 = vld [vmem:[#allocation6 + $0x740] sm:$0xf0] }
  0x35   : > { %v12766_v53 = vld [vmem:[#allocation6 + $0x5bc] sm:$0xf0]  ;;  %v9887_v52 = vld [vmem:[#allocation6 + $0xb40] sm:$0xf0] }
  0x36   : > { %v9693_v54 = vld [vmem:[#allocation6 + $0x980] sm:$0xf]  ;;  %v9182_v59 = vor.u32 %v12766_v53, %v9181_v51  ;;  %3221 = vmatpush.bf16.msra.mxu0 %v8670_v58  ;;  %v12934_v51 = vld [vmem:[#allocation6 + $0xb04] sm:$0xf] }
  0x37   : > { %v12894_v55 = vld [vmem:[#allocation6 + $0x9bc] sm:$0xf0]  ;;  %v13062_v53 = vld [vmem:[#allocation6 + $0xf04] sm:$0xf]  ;;  %v9890_v58 = vor.u32 %v12934_v51, %v9887_v52 }
  0x38   : > { %v10205_v56 = vld [vmem:[#allocation6 + $0xd80] sm:$0xf]  ;;  %v9694_v60 = vor.u32 %v12894_v55, %v9693_v54  ;;  %3234 = vmatpush.bf16.msra.mxu1 %v9182_v59  ;;  %v10399_v54 = vld [vmem:[#allocation6 + $0xf40] sm:$0xf0] }
  0x39   : > { %v13022_v57 = vld [vmem:[#allocation6 + $0xdbc] sm:$0xf0]  ;;  %v12662_v59 = vld [vmem:[#allocation6 + $0x284] sm:$0xf] }
  0x3a   : > { %v8605_v61 = vld [vmem:[#allocation6 + $0x100] sm:$0xf]  ;;  %v10206_v0 = vor.u32 %v13022_v57, %v10205_v56  ;;  %3247 = vmatpush.bf16.msra.mxu2 %v9694_v60  ;;  %v8866_v56 = vor.u32 %v12678_v46, %v8863_v47  ;;  %v9378_v57 = vor.u32 %v12806_v48, %v9375_v50  ;;  %v8799_v60 = vld [vmem:[#allocation6 + $0x2c0] sm:$0xf0] }
  0x3b   : > { %v12622_v62 = vld [vmem:[#allocation6 + $0x13c] sm:$0xf0]  ;;  %v13014_v35 = vld [vmem:[#allocation6 + $0xd84] sm:$0xf] }
  0x3c   : > { %v9117_v63 = vld [vmem:[#allocation6 + $0x500] sm:$0xf]  ;;  %v8606_v7 = vor.u32 %v12622_v62, %v8605_v61  ;;  %3260 = vmatpush.bf16.msra.mxu3 %v10206_v0  ;;  %v12790_v61 = vld [vmem:[#allocation6 + $0x684] sm:$0xf]  ;;  %v10402_v62 = vor.u32 %v13062_v53, %v10399_v54 }
  0x3d   : > { %v12750_v2 = vld [vmem:[#allocation6 + $0x53c] sm:$0xf0]  ;;  %v12918_v0 = vld [vmem:[#allocation6 + $0xa84] sm:$0xf] }
  0x3e   : > { %v9629_v3 = vld [vmem:[#allocation6 + $0x900] sm:$0xf]  ;;  %v9118_v8 = vor.u32 %v12750_v2, %v9117_v63  ;;  %3222 = vmatpush.bf16.msra.mxu0 %v8606_v7  ;;  %v9311_v63 = vld [vmem:[#allocation6 + $0x6c0] sm:$0xf0] }
  0x3f   : > { %v12878_v4 = vld [vmem:[#allocation6 + $0x93c] sm:$0xf0]  ;;  %v9823_v2 = vld [vmem:[#allocation6 + $0xac0] sm:$0xf0] }
  0x40   : > { %v10141_v5 = vld [vmem:[#allocation6 + $0xd00] sm:$0xf]  ;;  %v9630_v9 = vor.u32 %v12878_v4, %v9629_v3  ;;  %3235 = vmatpush.bf16.msra.mxu1 %v9118_v8  ;;  %v13046_v3 = vld [vmem:[#allocation6 + $0xe84] sm:$0xf]  ;;  %v9314_v8 = vor.u32 %v12790_v61, %v9311_v63 }
  0x41   : > { %v13006_v6 = vld [vmem:[#allocation6 + $0xd3c] sm:$0xf0]  ;;  %v10335_v4 = vld [vmem:[#allocation6 + $0xec0] sm:$0xf0] }
  0x42   : > { %v8541_v10 = vld [vmem:[#allocation6 + $0x80] sm:$0xf]  ;;  %v10142_v13 = vor.u32 %v13006_v6, %v10141_v5  ;;  %3248 = vmatpush.bf16.msra.mxu2 %v9630_v9  ;;  %v8802_v5 = vor.u32 %v12662_v59, %v8799_v60  ;;  %v12646_v6 = vld [vmem:[#allocation6 + $0x204] sm:$0xf]  ;;  %v9826_v9 = vor.u32 %v12918_v0, %v9823_v2 }
  0x43   : > { %v12606_v11 = vld [vmem:[#allocation6 + $0xbc] sm:$0xf0]  ;;  %v8735_v7 = vld [vmem:[#allocation6 + $0x240] sm:$0xf0] }
  0x44   : > { %v9053_v12 = vld [vmem:[#allocation6 + $0x480] sm:$0xf]  ;;  %v8542_v19 = vor.u32 %v12606_v11, %v8541_v10  ;;  %3261 = vmatpush.bf16.msra.mxu3 %v10142_v13  ;;  %v12774_v10 = vld [vmem:[#allocation6 + $0x604] sm:$0xf]  ;;  %v10338_v13 = vor.u32 %v13046_v3, %v10335_v4 }
  0x45   : > { %v12734_v14 = vld [vmem:[#allocation6 + $0x4bc] sm:$0xf0]  ;;  %v9247_v11 = vld [vmem:[#allocation6 + $0x640] sm:$0xf0] }
  0x46   : > { %v9565_v15 = vld [vmem:[#allocation6 + $0x880] sm:$0xf]  ;;  %v9054_v22 = vor.u32 %v12734_v14, %v9053_v12  ;;  %3223 = vmatpush.bf16.msra.mxu0 %v8542_v19  ;;  %v12902_v12 = vld [vmem:[#allocation6 + $0xa04] sm:$0xf]  ;;  %v8738_v19 = vor.u32 %v12646_v6, %v8735_v7 }
  0x47   : > { %v12862_v16 = vld [vmem:[#allocation6 + $0x8bc] sm:$0xf0]  ;;  %v9759_v14 = vld [vmem:[#allocation6 + $0xa40] sm:$0xf0] }
  0x48   : > { %v10077_v17 = vld [vmem:[#allocation6 + $0xc80] sm:$0xf]  ;;  %v9566_v23 = vor.u32 %v12862_v16, %v9565_v15  ;;  %3236 = vmatpush.bf16.msra.mxu1 %v9054_v22  ;;  %v13030_v15 = vld [vmem:[#allocation6 + $0xe04] sm:$0xf] }
  0x49   : > { %v12990_v18 = vld [vmem:[#allocation6 + $0xcbc] sm:$0xf0]  ;;  %v10271_v16 = vld [vmem:[#allocation6 + $0xe40] sm:$0xf0] }
  0x4a   : > { %v8477_v20 = vld [vmem:[#allocation6] sm:$0xf]  ;;  %v10078_v27 = vor.u32 %v12990_v18, %v10077_v17  ;;  %3249 = vmatpush.bf16.msra.mxu2 %v9566_v23  ;;  %v10274_v31 = vor.u32 %v13030_v15, %v10271_v16  ;;  %v10207_v36 = vld [vmem:[#allocation6 + $0xdc0] sm:$0xf0]  ;;  %v12831_v15 = vld [vmem:[#allocation6 + $0x7c4] sm:$0xf0] }
  0x4b   : > { %v12590_v21 = vld [vmem:[#allocation6 + $0x3c] sm:$0xf0]  ;;  %v12614_v40 = vld [vmem:[#allocation6 + $0x104] sm:$0xf]  ;;  %v9957_v16 = vld [vmem:[#allocation6 + $0xb88] sm:$0xf] }
  0x4c   : > { %v8989_v24 = vld [vmem:[#allocation6 + $0x400] sm:$0xf]  ;;  %v8478_v34 = vor.u32 %v12590_v21, %v8477_v20  ;;  %3262 = vmatpush.bf16.msra.mxu3 %v10078_v27  ;;  %v9250_v20 = vor.u32 %v12774_v10, %v9247_v11  ;;  %v8671_v27 = vld [vmem:[#allocation6 + $0x1c0] sm:$0xf0]  ;;  %v8933_v11 = vld [vmem:[#allocation6 + $0x388] sm:$0xf] }
  0x4d   : > { %v12718_v25 = vld [vmem:[#allocation6 + $0x43c] sm:$0xf0]  ;;  %v8607_v41 = vld [vmem:[#allocation6 + $0x140] sm:$0xf0] }
  0x4e   : > { %v9501_v26 = vld [vmem:[#allocation6 + $0x800] sm:$0xf]  ;;  %v8990_v38 = vor.u32 %v12718_v25, %v8989_v24  ;;  %3224 = vmatpush.bf16.msra.mxu0 %v8478_v34  ;;  %v9762_v25 = vor.u32 %v12902_v12, %v9759_v14  ;;  %v9695_v34 = vld [vmem:[#allocation6 + $0x9c0] sm:$0xf0]  ;;  %v12703_v12 = vld [vmem:[#allocation6 + $0x3c4] sm:$0xf0] }
  0x4f   : > { %v12846_v28 = vld [vmem:[#allocation6 + $0x83c] sm:$0xf0]  ;;  %v9631_v46 = vld [vmem:[#allocation6 + $0x940] sm:$0xf0] }
  0x50   : > { %v10013_v29 = vld [vmem:[#allocation6 + $0xc00] sm:$0xf]  ;;  %v9502_v39 = vor.u32 %v12846_v28, %v9501_v26  ;;  %3237 = vmatpush.bf16.msra.mxu1 %v8990_v38  ;;  %v12630_v26 = vld [vmem:[#allocation6 + $0x184] sm:$0xf] }
  0x51   : > { %v12974_v30 = vld [vmem:[#allocation6 + $0xc3c] sm:$0xf0]  ;;  %v12758_v28 = vld [vmem:[#allocation6 + $0x584] sm:$0xf]  ;;  %v8674_v37 = vor.u32 %v12630_v26, %v8671_v27 }
  0x52   : > { %v10014_v42 = vor.u32 %v12974_v30, %v10013_v29  ;;  %3250 = vmatpush.bf16.msra.mxu2 %v9502_v39  ;;  %v13798_v55 = vld [vmem:[#allocation2] sm:$0xff]  ;;  %3269 = vmatpush.bf16.msrb.mxu0 %v8930_v43  ;;  %v9186_v38 = vor.u32 %v12758_v28, %v9183_v32  ;;  %v9698_v39 = vor.u32 %v12886_v33, %v9695_v34  ;;  %v8869_v28 = vld [vmem:[#allocation6 + $0x308] sm:$0xf] }
  0x53   : > { %132 = vst [vmem:[#allocation1] ss:$4 sm:$0xff] %v13798_v55  ;;  %v10210_v43 = vor.u32 %v13014_v35, %v10207_v36  ;;  %v12998_v47 = vld [vmem:[#allocation6 + $0xd04] sm:$0xf]  ;;  %v9381_v32 = vld [vmem:[#allocation6 + $0x708] sm:$0xf] }
  0x54   : > { %3263 = vmatpush.bf16.msra.mxu3 %v10014_v42  ;;  %3282 = vmatpush.bf16.msrb.mxu1 %v9442_v44  ;;  %v12742_v42 = vld [vmem:[#allocation6 + $0x504] sm:$0xf]  ;;  %v12815_v34 = vld [vmem:[#allocation6 + $0x744] sm:$0xf0] }
  0x55   : > { %v9119_v44 = vld [vmem:[#allocation6 + $0x540] sm:$0xf0]  ;;  %v9893_v35 = vld [vmem:[#allocation6 + $0xb08] sm:$0xf] }
  0x56   : > { %3295 = vmatpush.bf16.msrb.mxu2 %v9954_v45  ;;  %3270 = vmatpush.bf16.msrb.mxu0 %v8866_v56  ;;  %v12870_v45 = vld [vmem:[#allocation6 + $0x904] sm:$0xf]  ;;  %v9122_v50 = vor.u32 %v12742_v42, %v9119_v44  ;;  %v12943_v36 = vld [vmem:[#allocation6 + $0xb44] sm:$0xf0] }
  0x57   : > { %v10143_v48 = vld [vmem:[#allocation6 + $0xd40] sm:$0xf0]  ;;  %v9634_v51 = vor.u32 %v12870_v45, %v9631_v46  ;;  %v8805_v42 = vld [vmem:[#allocation6 + $0x288] sm:$0xf] }
  0x58   : > { %3308 = vmatpush.bf16.msrb.mxu3 %v10466_v49  ;;  %3283 = vmatpush.bf16.msrb.mxu1 %v9378_v57  ;;  %v8610_v49 = vor.u32 %v12614_v40, %v8607_v41  ;;  %v12598_v52 = vld [vmem:[#allocation6 + $0x84] sm:$0xf]  ;;  %v10146_v56 = vor.u32 %v12998_v47, %v10143_v48  ;;  %v9382_v40 = vor.u32 %v12815_v34, %v9381_v32  ;;  %v9317_v44 = vld [vmem:[#allocation6 + $0x688] sm:$0xf] }
  0x59   : > { %v8543_v53 = vld [vmem:[#allocation6 + $0xc0] sm:$0xf0]  ;;  %v9894_v41 = vor.u32 %v12943_v36, %v9893_v35  ;;  %v12799_v46 = vld [vmem:[#allocation6 + $0x6c4] sm:$0xf0] }
  0x5a   : > { %3296 = vmatpush.bf16.msrb.mxu2 %v9890_v58  ;;  %v135_v17 = vld.sshfl [vmem:[#allocation1 + $0x10] sm:$0xff pattern:$0x73625140]  ;;  %v136_v18 = vld.sshfl [vmem:[#allocation1 + $0x18] sm:$0xff pattern:$0x73625140]  ;;  %3271 = vmatpush.bf16.msrb.mxu0 %v8802_v5 }
  0x5b   : > { %v13801_v21 = vpack.c.bf16 %v135_v17, %v135_v17  ;;  %v13803_v22 = vpack.c.bf16 %v136_v18, %v136_v18  ;;  %v133_v23 = vld.sshfl [vmem:[#allocation1] sm:$0xff pattern:$0x73625140]  ;;  %v134_v24 = vld.sshfl [vmem:[#allocation1 + $0x8] sm:$0xff pattern:$0x73625140] }
  0x5c   : > { %3309 = vmatpush.bf16.msrb.mxu3 %v10402_v62  ;;  %3284 = vmatpush.bf16.msrb.mxu1 %v9314_v8  ;;  %v13805_v29 = vpack.c.bf16 %v133_v23, %v133_v23  ;;  %v13807_v30 = vpack.c.bf16 %v134_v24, %v134_v24  ;;  %v12726_v54 = vld [vmem:[#allocation6 + $0x484] sm:$0xf]  ;;  %v8546_v62 = vor.u32 %v12598_v52, %v8543_v53  ;;  %v12959_v17 = vld [vmem:[#allocation6 + $0xbc4] sm:$0xf0] }
  0x5d   : > { %3251 = vmatmul.bf16.vlgmr.msra.gmra.mxu2 %v13801_v21  ;;  %3264 = vmatmul.bf16.vlgmr.msra.gmra.mxu3 %v13803_v22  ;;  %v9055_v57 = vld [vmem:[#allocation6 + $0x4c0] sm:$0xf0]  ;;  %v13087_v23 = vld [vmem:[#allocation6 + $0xfc4] sm:$0xf0]  ;;  %v9958_v27 = vor.u32 %v12959_v17, %v9957_v16  ;;  %v9318_v52 = vor.u32 %v12799_v46, %v9317_v44 }
  0x5e   : > { %3297 = vmatpush.bf16.msrb.mxu2 %v9826_v9  ;;  %3225 = vmatmul.bf16.vlgmr.msra.gmra.mxu0 %v13805_v29  ;;  %v12854_v58 = vld [vmem:[#allocation6 + $0x884] sm:$0xf]  ;;  %v9058_v2 = vor.u32 %v12726_v54, %v9055_v57  ;;  %v9829_v47 = vld [vmem:[#allocation6 + $0xa88] sm:$0xf] }
  0x5f   : > { %3272 = vmatpush.bf16.msrb.mxu0 %v8738_v19  ;;  %3238 = vmatmul.bf16.vlgmr.msra.gmra.mxu1 %v13807_v30  ;;  %v9567_v59 = vld [vmem:[#allocation6 + $0x8c0] sm:$0xf0]  ;;  %v12927_v48 = vld [vmem:[#allocation6 + $0xac4] sm:$0xf0] }
  0x60   : > { %3310 = vmatpush.bf16.msrb.mxu3 %v10338_v13  ;;  %3285 = vmatpush.bf16.msrb.mxu1 %v9250_v20  ;;  %v12982_v60 = vld [vmem:[#allocation6 + $0xc84] sm:$0xf]  ;;  %v9570_v3 = vor.u32 %v12854_v58, %v9567_v59  ;;  %v9445_v13 = vld [vmem:[#allocation6 + $0x788] sm:$0xf]  ;;  %v9830_v53 = vor.u32 %v12927_v48, %v9829_v47 }
  0x61   : > { %v10079_v61 = vld [vmem:[#allocation6 + $0xcc0] sm:$0xf0]  ;;  %v10469_v20 = vld [vmem:[#allocation6 + $0xf88] sm:$0xf]  ;;  %v9446_v26 = vor.u32 %v12831_v15, %v9445_v13 }
  0x62   : > { %3298 = vmatpush.bf16.msrb.mxu2 %v9762_v25  ;;  %v12582_v63 = vld [vmem:[#allocation6 + $0x4] sm:$0xf]  ;;  %v10082_v7 = vor.u32 %v12982_v60, %v10079_v61  ;;  %v8934_v25 = vor.u32 %v12703_v12, %v8933_v11  ;;  %v10470_v33 = vor.u32 %v13087_v23, %v10469_v20  ;;  %v8741_v54 = vld [vmem:[#allocation6 + $0x208] sm:$0xf] }
  0x63   : > { %3273 = vmatpush.bf16.msrb.mxu0 %v8674_v37  ;;  %v8479_v0 = vld [vmem:[#allocation6 + $0x40] sm:$0xf0]  ;;  %v10405_v37 = vld [vmem:[#allocation6 + $0xf08] sm:$0xf] }
  0x64   : > { %3311 = vmatpush.bf16.msrb.mxu3 %v10274_v31  ;;  %3286 = vmatpush.bf16.msrb.mxu1 %v9186_v38  ;;  %v12710_v4 = vld [vmem:[#allocation6 + $0x404] sm:$0xf]  ;;  %v8482_v14 = vor.u32 %v12582_v63, %v8479_v0  ;;  %v12687_v31 = vld [vmem:[#allocation6 + $0x344] sm:$0xf0] }
  0x65   : > { %v8991_v5 = vld [vmem:[#allocation6 + $0x440] sm:$0xf0]  ;;  %v13071_v38 = vld [vmem:[#allocation6 + $0xf44] sm:$0xf0] }
  0x66   : > { %3299 = vmatpush.bf16.msrb.mxu2 %v9698_v39  ;;  %v12838_v6 = vld [vmem:[#allocation6 + $0x804] sm:$0xf]  ;;  %v8994_v18 = vor.u32 %v12710_v4, %v8991_v5  ;;  %v8870_v39 = vor.u32 %v12687_v31, %v8869_v28  ;;  %v10406_v45 = vor.u32 %v13071_v38, %v10405_v37  ;;  %v9253_v57 = vld [vmem:[#allocation6 + $0x608] sm:$0xf] }
  0x67   : > { %3274 = vmatpush.bf16.msrb.mxu0 %v8610_v49  ;;  %v9503_v8 = vld [vmem:[#allocation6 + $0x840] sm:$0xf0]  ;;  %v10341_v49 = vld [vmem:[#allocation6 + $0xe88] sm:$0xf] }
  0x68   : > { %3312 = vmatpush.bf16.msrb.mxu3 %v10210_v43  ;;  %3287 = vmatpush.bf16.msrb.mxu1 %v9122_v50  ;;  %v12966_v9 = vld [vmem:[#allocation6 + $0xc04] sm:$0xf]  ;;  %v9506_v19 = vor.u32 %v12838_v6, %v9503_v8  ;;  %v12671_v43 = vld [vmem:[#allocation6 + $0x2c4] sm:$0xf0] }
  0x69   : > { %v10015_v10 = vld [vmem:[#allocation6 + $0xc40] sm:$0xf0]  ;;  %v13055_v50 = vld [vmem:[#allocation6 + $0xec4] sm:$0xf0] }
  0x6a   : > { %3300 = vmatpush.bf16.msrb.mxu2 %v9634_v51  ;;  %v10018_v24 = vor.u32 %v12966_v9, %v10015_v10  ;;  %v8806_v51 = vor.u32 %v12671_v43, %v8805_v42  ;;  %v10342_v58 = vor.u32 %v13055_v50, %v10341_v49  ;;  %v12783_v59 = vld [vmem:[#allocation6 + $0x644] sm:$0xf0] }
  0x6b   : > { %3275 = vmatpush.bf16.msrb.mxu0 %v8546_v62  ;;  %v9765_v60 = vld [vmem:[#allocation6 + $0xa08] sm:$0xf] }
  0x6c   : > { %3313 = vmatpush.bf16.msrb.mxu3 %v10146_v56  ;;  %3288 = vmatpush.bf16.msrb.mxu1 %v9058_v2  ;;  %v12655_v56 = vld [vmem:[#allocation6 + $0x244] sm:$0xf0]  ;;  %v9254_v2 = vor.u32 %v12783_v59, %v9253_v57  ;;  %v12951_v59 = vld [vmem:[#allocation6 + $0xb8c] sm:$0xf] }
  0x6d   : > { %v12911_v61 = vld [vmem:[#allocation6 + $0xa44] sm:$0xf0]  ;;  %v8742_v0 = vor.u32 %v12655_v56, %v8741_v54  ;;  %v8935_v54 = vld [vmem:[#allocation6 + $0x3c8] sm:$0xf0] }
  0x6e   : > { %3301 = vmatpush.bf16.msrb.mxu2 %v9570_v3  ;;  %v10277_v62 = vld [vmem:[#allocation6 + $0xe08] sm:$0xf]  ;;  %v9766_v3 = vor.u32 %v12911_v61, %v9765_v60  ;;  %v12823_v56 = vld [vmem:[#allocation6 + $0x78c] sm:$0xf] }
  0x6f   : > { %3276 = vmatpush.bf16.msrb.mxu0 %v8482_v14  ;;  %v13039_v63 = vld [vmem:[#allocation6 + $0xe44] sm:$0xf0]  ;;  %v9959_v60 = vld [vmem:[#allocation6 + $0xbc8] sm:$0xf0] }
  0x70   : > { %3314 = vmatpush.bf16.msrb.mxu3 %v10082_v7  ;;  %3289 = vmatpush.bf16.msrb.mxu1 %v8994_v18  ;;  %v8677_v4 = vld [vmem:[#allocation6 + $0x188] sm:$0xf]  ;;  %v10278_v7 = vor.u32 %v13039_v63, %v10277_v62  ;;  %v13079_v63 = vld [vmem:[#allocation6 + $0xf8c] sm:$0xf] }
  0x71   : > { %v12639_v5 = vld [vmem:[#allocation6 + $0x1c4] sm:$0xf0] }
  0x72   : > { %3302 = vmatpush.bf16.msrb.mxu2 %v9506_v19  ;;  %3277 = vmatmul.bf16.vlgmr.msrb.gmra.mxu0 %v13805_v29  ;;  %v9189_v6 = vld [vmem:[#allocation6 + $0x588] sm:$0xf]  ;;  %v8678_v13 = vor.u32 %v12639_v5, %v8677_v4  ;;  %v9962_v5 = vor.u32 %v12951_v59, %v9959_v60  ;;  %v12615_v59 = vld [vmem:[#allocation6 + $0x10c] sm:$0xf] }
  0x73   : > { %3321 = vmatpush.bf16.msra.mxu0 %v8934_v25  ;;  %3290 = vmatmul.bf16.vlgmr.msrb.gmra.mxu1 %v13807_v30  ;;  %v12767_v8 = vld [vmem:[#allocation6 + $0x5c4] sm:$0xf0]  ;;  %v8615_v60 = vld [vmem:[#allocation6 + $0x148] sm:$0xf0] }
  0x74   : > { %3315 = vmatpush.bf16.msrb.mxu3 %v10018_v24  ;;  %3334 = vmatpush.bf16.msra.mxu1 %v9446_v26  ;;  %v9701_v9 = vld [vmem:[#allocation6 + $0x988] sm:$0xf]  ;;  %v9190_v14 = vor.u32 %v12767_v8, %v9189_v6  ;;  %v12679_v6 = vld [vmem:[#allocation6 + $0x30c] sm:$0xf] }
  0x75   : > { %3303 = vmatmul.bf16.vlgmr.msrb.gmra.mxu2 %v13801_v21  ;;  %v12895_v10 = vld [vmem:[#allocation6 + $0x9c4] sm:$0xf0]  ;;  %v12807_v8 = vld [vmem:[#allocation6 + $0x70c] sm:$0xf] }
  0x76   : > { %3347 = vmatpush.bf16.msra.mxu2 %v9958_v27  ;;  %v10213_v11 = vld [vmem:[#allocation6 + $0xd88] sm:$0xf]  ;;  %v9702_v15 = vor.u32 %v12895_v10, %v9701_v9  ;;  %v9383_v10 = vld [vmem:[#allocation6 + $0x748] sm:$0xf0] }
  0x77   : > { %3316 = vmatmul.bf16.vlgmr.msrb.gmra.mxu3 %v13803_v22  ;;  %3322 = vmatpush.bf16.msra.mxu0 %v8870_v39  ;;  %v13023_v12 = vld [vmem:[#allocation6 + $0xdc4] sm:$0xf0] }
  0x78   : > { %3360 = vmatpush.bf16.msra.mxu3 %v10470_v33  ;;  %3335 = vmatpush.bf16.msra.mxu1 %v9382_v40  ;;  %v8613_v16 = vld [vmem:[#allocation6 + $0x108] sm:$0xf]  ;;  %v10214_v19 = vor.u32 %v13023_v12, %v10213_v11  ;;  %v12935_v11 = vld [vmem:[#allocation6 + $0xb0c] sm:$0xf] }
  0x79   : > { %v12623_v17 = vld [vmem:[#allocation6 + $0x144] sm:$0xf0]  ;;  %v9895_v12 = vld [vmem:[#allocation6 + $0xb48] sm:$0xf0] }
  0x7a   : > { %3348 = vmatpush.bf16.msra.mxu2 %v9894_v41  ;;  %v9125_v18 = vld [vmem:[#allocation6 + $0x508] sm:$0xf]  ;;  %v8614_v27 = vor.u32 %v12623_v17, %v8613_v16  ;;  %v9386_v16 = vor.u32 %v12807_v8, %v9383_v10  ;;  %v9898_v17 = vor.u32 %v12935_v11, %v9895_v12  ;;  %v12599_v8 = vld [vmem:[#allocation6 + $0x8c] sm:$0xf] }
  0x7b   : > { %3323 = vmatpush.bf16.msra.mxu0 %v8806_v51  ;;  %v12751_v20 = vld [vmem:[#allocation6 + $0x544] sm:$0xf0]  ;;  %v12727_v10 = vld [vmem:[#allocation6 + $0x48c] sm:$0xf] }
  0x7c   : > { %3361 = vmatpush.bf16.msra.mxu3 %v10406_v45  ;;  %3336 = vmatpush.bf16.msra.mxu1 %v9318_v52  ;;  %v9637_v23 = vld [vmem:[#allocation6 + $0x908] sm:$0xf]  ;;  %v9126_v28 = vor.u32 %v12751_v20, %v9125_v18  ;;  %v12663_v18 = vld [vmem:[#allocation6 + $0x28c] sm:$0xf] }
  0x7d   : > { %v12879_v24 = vld [vmem:[#allocation6 + $0x944] sm:$0xf0]  ;;  %v12791_v20 = vld [vmem:[#allocation6 + $0x68c] sm:$0xf] }
  0x7e   : > { %3349 = vmatpush.bf16.msra.mxu2 %v9830_v53  ;;  %v10149_v25 = vld [vmem:[#allocation6 + $0xd08] sm:$0xf]  ;;  %v9638_v31 = vor.u32 %v12879_v24, %v9637_v23  ;;  %v12695_v53 = vld [vmem:[#allocation6 + $0x38c] sm:$0xf] }
  0x7f   : > { %3324 = vmatpush.bf16.msra.mxu0 %v8742_v0  ;;  %v13007_v26 = vld [vmem:[#allocation6 + $0xd44] sm:$0xf0]  ;;  %v10471_v0 = vld [vmem:[#allocation6 + $0xfc8] sm:$0xf0] }
  0x80   : > { %3362 = vmatpush.bf16.msra.mxu3 %v10342_v58  ;;  %3337 = vmatpush.bf16.msra.mxu1 %v9254_v2  ;;  %v8549_v32 = vld [vmem:[#allocation6 + $0x88] sm:$0xf]  ;;  %v10150_v35 = vor.u32 %v13007_v26, %v10149_v25  ;;  %v9447_v58 = vld [vmem:[#allocation6 + $0x7c8] sm:$0xf0]  ;;  %v10474_v9 = vor.u32 %v13079_v63, %v10471_v0 }
  0x81   : > { %v12607_v33 = vld [vmem:[#allocation6 + $0xc4] sm:$0xf0]  ;;  %v9450_v4 = vor.u32 %v12823_v56, %v9447_v58  ;;  %v9319_v24 = vld [vmem:[#allocation6 + $0x6c8] sm:$0xf0] }
  0x82   : > { %3350 = vmatpush.bf16.msra.mxu2 %v9766_v3  ;;  %v9061_v34 = vld [vmem:[#allocation6 + $0x488] sm:$0xf]  ;;  %v8550_v41 = vor.u32 %v12607_v33, %v8549_v32  ;;  %v8938_v3 = vor.u32 %v12695_v53, %v8935_v54  ;;  %v12919_v25 = vld [vmem:[#allocation6 + $0xa8c] sm:$0xf]  ;;  %v9322_v32 = vor.u32 %v12791_v20, %v9319_v24 }
  0x83   : > { %3325 = vmatpush.bf16.msra.mxu0 %v8678_v13  ;;  %v12735_v36 = vld [vmem:[#allocation6 + $0x4c4] sm:$0xf0]  ;;  %v13063_v13 = vld [vmem:[#allocation6 + $0xf0c] sm:$0xf] }
  0x84   : > { %3363 = vmatpush.bf16.msra.mxu3 %v10278_v7  ;;  %3338 = vmatpush.bf16.msra.mxu1 %v9190_v14  ;;  %v9573_v37 = vld [vmem:[#allocation6 + $0x888] sm:$0xf]  ;;  %v9062_v44 = vor.u32 %v12735_v36, %v9061_v34  ;;  %v8871_v7 = vld [vmem:[#allocation6 + $0x348] sm:$0xf0] }
  0x85   : > { %v12863_v38 = vld [vmem:[#allocation6 + $0x8c4] sm:$0xf0]  ;;  %v10407_v14 = vld [vmem:[#allocation6 + $0xf48] sm:$0xf0] }
  0x86   : > { %3351 = vmatpush.bf16.msra.mxu2 %v9702_v15  ;;  %v10085_v39 = vld [vmem:[#allocation6 + $0xc88] sm:$0xf]  ;;  %v9574_v45 = vor.u32 %v12863_v38, %v9573_v37  ;;  %v8874_v15 = vor.u32 %v12679_v6, %v8871_v7  ;;  %v10410_v23 = vor.u32 %v13063_v13, %v10407_v14  ;;  %v9831_v26 = vld [vmem:[#allocation6 + $0xac8] sm:$0xf0] }
  0x87   : > { %v12991_v40 = vld [vmem:[#allocation6 + $0xcc4] sm:$0xf0]  ;;  %3326 = vmatpush.bf16.msra.mxu0 %v8614_v27  ;;  %v13047_v27 = vld [vmem:[#allocation6 + $0xe8c] sm:$0xf]  ;;  %v9834_v33 = vor.u32 %v12919_v25, %v9831_v26 }
  0x88   : > { %3364 = vmatpush.bf16.msra.mxu3 %v10214_v19  ;;  %v8485_v42 = vld [vmem:[#allocation6 + $0x8] sm:$0xf]  ;;  %3339 = vmatpush.bf16.msra.mxu1 %v9126_v28  ;;  %v10086_v49 = vor.u32 %v12991_v40, %v10085_v39  ;;  %v8807_v19 = vld [vmem:[#allocation6 + $0x2c8] sm:$0xf0] }
  0x89   : > { %v12591_v43 = vld [vmem:[#allocation6 + $0x44] sm:$0xf0]  ;;  %v10343_v28 = vld [vmem:[#allocation6 + $0xec8] sm:$0xf0] }
  0x8a   : > { %3352 = vmatpush.bf16.msra.mxu2 %v9638_v31  ;;  %v8997_v46 = vld [vmem:[#allocation6 + $0x408] sm:$0xf]  ;;  %v8486_v57 = vor.u32 %v12591_v43, %v8485_v42  ;;  %v8810_v31 = vor.u32 %v12663_v18, %v8807_v19  ;;  %v12647_v34 = vld [vmem:[#allocation6 + $0x20c] sm:$0xf]  ;;  %v10346_v37 = vor.u32 %v13047_v27, %v10343_v28 }
  0x8b   : > { %v12719_v47 = vld [vmem:[#allocation6 + $0x444] sm:$0xf0]  ;;  %3327 = vmatpush.bf16.msra.mxu0 %v8550_v41  ;;  %v12775_v36 = vld [vmem:[#allocation6 + $0x60c] sm:$0xf] }
  0x8c   : > { %v9509_v48 = vld [vmem:[#allocation6 + $0x808] sm:$0xf]  ;;  %3365 = vmatpush.bf16.msra.mxu3 %v10150_v35  ;;  %3340 = vmatpush.bf16.msra.mxu1 %v9062_v44  ;;  %v8998_v61 = vor.u32 %v12719_v47, %v8997_v46  ;;  %v8743_v35 = vld [vmem:[#allocation6 + $0x248] sm:$0xf0] }
  0x8d   : > { %v12847_v50 = vld [vmem:[#allocation6 + $0x844] sm:$0xf0]  ;;  %v9255_v38 = vld [vmem:[#allocation6 + $0x648] sm:$0xf0]  ;;  %v8746_v43 = vor.u32 %v12647_v34, %v8743_v35  ;;  %v12704_v34 = vld [vmem:[#allocation6 + $0x3cc] sm:$0xf0] }
  0x8e   : > { %v10021_v51 = vld [vmem:[#allocation6 + $0xc08] sm:$0xf]  ;;  %3353 = vmatpush.bf16.msra.mxu2 %v9574_v45  ;;  %v9510_v62 = vor.u32 %v12847_v50, %v9509_v48  ;;  %v12903_v39 = vld [vmem:[#allocation6 + $0xa0c] sm:$0xf]  ;;  %v9258_v44 = vor.u32 %v12775_v36, %v9255_v38  ;;  %v9453_v35 = vld [vmem:[#allocation6 + $0x790] sm:$0xf] }
  0x8f   : > { %v12975_v52 = vld [vmem:[#allocation6 + $0xc44] sm:$0xf0]  ;;  %3328 = vmatpush.bf16.msra.mxu0 %v8486_v57  ;;  %v9767_v40 = vld [vmem:[#allocation6 + $0xa48] sm:$0xf0]  ;;  %v9965_v38 = vld [vmem:[#allocation6 + $0xb90] sm:$0xf] }
  0x90   : > { %3366 = vmatpush.bf16.msra.mxu3 %v10086_v49  ;;  %v10022_v2 = vor.u32 %v12975_v52, %v10021_v51  ;;  %3341 = vmatpush.bf16.msra.mxu1 %v8998_v61  ;;  %v13031_v41 = vld [vmem:[#allocation6 + $0xe0c] sm:$0xf]  ;;  %v9770_v45 = vor.u32 %v12903_v39, %v9767_v40  ;;  %v12960_v39 = vld [vmem:[#allocation6 + $0xbcc] sm:$0xf0] }
  0x91   : > { %v10279_v42 = vld [vmem:[#allocation6 + $0xe48] sm:$0xf0] }
  0x92   : > { %3354 = vmatpush.bf16.msra.mxu2 %v9510_v62  ;;  %3329 = vmatmul.bf16.vlgmr.msra.gmra.mxu0 %v13805_v29  ;;  %v12631_v46 = vld [vmem:[#allocation6 + $0x18c] sm:$0xf]  ;;  %v10282_v49 = vor.u32 %v13031_v41, %v10279_v42  ;;  %v10477_v42 = vld [vmem:[#allocation6 + $0xf90] sm:$0xf] }
  0x93   : > { %3373 = vmatpush.bf16.msrb.mxu0 %v8938_v3  ;;  %3342 = vmatmul.bf16.vlgmr.msra.gmra.mxu1 %v13807_v30  ;;  %v8679_v47 = vld [vmem:[#allocation6 + $0x1c8] sm:$0xf0] }
  0x94   : > { %3367 = vmatpush.bf16.msra.mxu3 %v10022_v2  ;;  %3386 = vmatpush.bf16.msrb.mxu1 %v9450_v4  ;;  %v12759_v48 = vld [vmem:[#allocation6 + $0x58c] sm:$0xf]  ;;  %v8682_v56 = vor.u32 %v12631_v46, %v8679_v47  ;;  %v9966_v47 = vor.u32 %v12960_v39, %v9965_v38  ;;  %v8621_v38 = vld [vmem:[#allocation6 + $0x110] sm:$0xf] }
  0x95   : > { %3355 = vmatmul.bf16.vlgmr.msra.gmra.mxu2 %v13801_v21  ;;  %v9191_v50 = vld [vmem:[#allocation6 + $0x5c8] sm:$0xf0]  ;;  %v12624_v39 = vld [vmem:[#allocation6 + $0x14c] sm:$0xf0] }
  0x96   : > { %3399 = vmatpush.bf16.msrb.mxu2 %v9962_v5  ;;  %v12887_v51 = vld [vmem:[#allocation6 + $0x98c] sm:$0xf]  ;;  %v9194_v57 = vor.u32 %v12759_v48, %v9191_v50  ;;  %v8618_v5 = vor.u32 %v12615_v59, %v8615_v60  ;;  %v8877_v48 = vld [vmem:[#allocation6 + $0x310] sm:$0xf] }
  0x97   : > { %3368 = vmatmul.bf16.vlgmr.msra.gmra.mxu3 %v13803_v22  ;;  %3374 = vmatpush.bf16.msrb.mxu0 %v8874_v15  ;;  %v9703_v52 = vld [vmem:[#allocation6 + $0x9c8] sm:$0xf0]  ;;  %v9389_v50 = vld [vmem:[#allocation6 + $0x710] sm:$0xf] }
  0x98   : > { %3412 = vmatpush.bf16.msrb.mxu3 %v10474_v9  ;;  %3387 = vmatpush.bf16.msrb.mxu1 %v9386_v16  ;;  %v13015_v53 = vld [vmem:[#allocation6 + $0xd8c] sm:$0xf]  ;;  %v9706_v58 = vor.u32 %v12887_v51, %v9703_v52  ;;  %v12816_v52 = vld [vmem:[#allocation6 + $0x74c] sm:$0xf0] }
  0x99   : > { %v10215_v54 = vld [vmem:[#allocation6 + $0xdc8] sm:$0xf0]  ;;  %v9390_v59 = vor.u32 %v12816_v52, %v9389_v50  ;;  %v8557_v50 = vld [vmem:[#allocation6 + $0x90] sm:$0xf] }
  0x9a   : > { %3400 = vmatpush.bf16.msrb.mxu2 %v9898_v17  ;;  %v12743_v61 = vld [vmem:[#allocation6 + $0x50c] sm:$0xf]  ;;  %v10218_v62 = vor.u32 %v13015_v53, %v10215_v54  ;;  %v9901_v53 = vld [vmem:[#allocation6 + $0xb10] sm:$0xf] }
  0x9b   : > { %3375 = vmatpush.bf16.msrb.mxu0 %v8810_v31  ;;  %v9127_v63 = vld [vmem:[#allocation6 + $0x548] sm:$0xf0]  ;;  %v12944_v54 = vld [vmem:[#allocation6 + $0xb4c] sm:$0xf0] }
  0x9c   : > { %3413 = vmatpush.bf16.msrb.mxu3 %v10410_v23  ;;  %3388 = vmatpush.bf16.msrb.mxu1 %v9322_v32  ;;  %v12871_v0 = vld [vmem:[#allocation6 + $0x90c] sm:$0xf]  ;;  %v9130_v6 = vor.u32 %v12743_v61, %v9127_v63  ;;  %v9902_v60 = vor.u32 %v12944_v54, %v9901_v53  ;;  %v8813_v61 = vld [vmem:[#allocation6 + $0x290] sm:$0xf] }
  0x9d   : > { %v9639_v2 = vld [vmem:[#allocation6 + $0x948] sm:$0xf0]  ;;  %v9325_v63 = vld [vmem:[#allocation6 + $0x690] sm:$0xf] }
  0x9e   : > { %3401 = vmatpush.bf16.msrb.mxu2 %v9834_v33  ;;  %v12999_v3 = vld [vmem:[#allocation6 + $0xd0c] sm:$0xf]  ;;  %v9642_v7 = vor.u32 %v12871_v0, %v9639_v2  ;;  %v8941_v33 = vld [vmem:[#allocation6 + $0x390] sm:$0xf] }
  0x9f   : > { %3376 = vmatpush.bf16.msrb.mxu0 %v8746_v43  ;;  %v10151_v4 = vld [vmem:[#allocation6 + $0xd48] sm:$0xf0]  ;;  %v13088_v43 = vld [vmem:[#allocation6 + $0xfcc] sm:$0xf0] }
  0xa0   : > { %3414 = vmatpush.bf16.msrb.mxu3 %v10346_v37  ;;  %3389 = vmatpush.bf16.msrb.mxu1 %v9258_v44  ;;  %v8551_v9 = vld [vmem:[#allocation6 + $0xc8] sm:$0xf0]  ;;  %v10154_v11 = vor.u32 %v12999_v3, %v10151_v4  ;;  %v12832_v37 = vld [vmem:[#allocation6 + $0x7cc] sm:$0xf0]  ;;  %v10478_v51 = vor.u32 %v13088_v43, %v10477_v42 }
  0xa1   : > { %v9063_v12 = vld [vmem:[#allocation6 + $0x4c8] sm:$0xf0]  ;;  %v8554_v17 = vor.u32 %v12599_v8, %v8551_v9  ;;  %v9454_v46 = vor.u32 %v12832_v37, %v9453_v35  ;;  %v12800_v2 = vld [vmem:[#allocation6 + $0x6cc] sm:$0xf0] }
  0xa2   : > { %3402 = vmatpush.bf16.msrb.mxu2 %v9770_v45  ;;  %v12855_v13 = vld [vmem:[#allocation6 + $0x88c] sm:$0xf]  ;;  %v9066_v20 = vor.u32 %v12727_v10, %v9063_v12  ;;  %v8942_v45 = vor.u32 %v12704_v34, %v8941_v33  ;;  %v9837_v3 = vld [vmem:[#allocation6 + $0xa90] sm:$0xf]  ;;  %v9326_v8 = vor.u32 %v12800_v2, %v9325_v63 }
  0xa3   : > { %3377 = vmatpush.bf16.msrb.mxu0 %v8682_v56  ;;  %v9575_v14 = vld [vmem:[#allocation6 + $0x8c8] sm:$0xf0]  ;;  %v10413_v56 = vld [vmem:[#allocation6 + $0xf10] sm:$0xf] }
  0xa4   : > { %3415 = vmatpush.bf16.msrb.mxu3 %v10282_v49  ;;  %3390 = vmatpush.bf16.msrb.mxu1 %v9194_v57  ;;  %v12983_v15 = vld [vmem:[#allocation6 + $0xc8c] sm:$0xf]  ;;  %v9578_v23 = vor.u32 %v12855_v13, %v9575_v14  ;;  %v12688_v49 = vld [vmem:[#allocation6 + $0x34c] sm:$0xf0] }
  0xa5   : > { %v10087_v16 = vld [vmem:[#allocation6 + $0xcc8] sm:$0xf0]  ;;  %v13072_v57 = vld [vmem:[#allocation6 + $0xf4c] sm:$0xf0] }
  0xa6   : > { %3403 = vmatpush.bf16.msrb.mxu2 %v9706_v58  ;;  %v12583_v18 = vld [vmem:[#allocation6 + $0xc] sm:$0xf]  ;;  %v10090_v27 = vor.u32 %v12983_v15, %v10087_v16  ;;  %v8878_v58 = vor.u32 %v12688_v49, %v8877_v48  ;;  %v10414_v0 = vor.u32 %v13072_v57, %v10413_v56  ;;  %v12928_v4 = vld [vmem:[#allocation6 + $0xacc] sm:$0xf0] }
  0xa7   : > { %3378 = vmatpush.bf16.msrb.mxu0 %v8618_v5  ;;  %v8487_v19 = vld [vmem:[#allocation6 + $0x48] sm:$0xf0]  ;;  %v10349_v5 = vld [vmem:[#allocation6 + $0xe90] sm:$0xf]  ;;  %v9838_v9 = vor.u32 %v12928_v4, %v9837_v3 }
  0xa8   : > { %3416 = vmatpush.bf16.msrb.mxu3 %v10218_v62  ;;  %3391 = vmatpush.bf16.msrb.mxu1 %v9130_v6  ;;  %v12711_v24 = vld [vmem:[#allocation6 + $0x40c] sm:$0xf]  ;;  %v8490_v36 = vor.u32 %v12583_v18, %v8487_v19  ;;  %v12672_v62 = vld [vmem:[#allocation6 + $0x2cc] sm:$0xf0] }
  0xa9   : > { %v8999_v25 = vld [vmem:[#allocation6 + $0x448] sm:$0xf0]  ;;  %v13056_v6 = vld [vmem:[#allocation6 + $0xecc] sm:$0xf0] }
  0xaa   : > { %3404 = vmatpush.bf16.msrb.mxu2 %v9642_v7  ;;  %v12839_v26 = vld [vmem:[#allocation6 + $0x80c] sm:$0xf]  ;;  %v9002_v40 = vor.u32 %v12711_v24, %v8999_v25  ;;  %v8814_v7 = vor.u32 %v12672_v62, %v8813_v61  ;;  %v8749_v10 = vld [vmem:[#allocation6 + $0x210] sm:$0xf]  ;;  %v10350_v13 = vor.u32 %v13056_v6, %v10349_v5 }
  0xab   : > { %v9511_v28 = vld [vmem:[#allocation6 + $0x848] sm:$0xf0]  ;;  %3379 = vmatpush.bf16.msrb.mxu0 %v8554_v17  ;;  %v9261_v12 = vld [vmem:[#allocation6 + $0x610] sm:$0xf] }
  0xac   : > { %3417 = vmatpush.bf16.msrb.mxu3 %v10154_v11  ;;  %v12967_v31 = vld [vmem:[#allocation6 + $0xc0c] sm:$0xf]  ;;  %3392 = vmatpush.bf16.msrb.mxu1 %v9066_v20  ;;  %v9514_v41 = vor.u32 %v12839_v26, %v9511_v28  ;;  %v12656_v11 = vld [vmem:[#allocation6 + $0x24c] sm:$0xf0] }
  0xad   : > { %v10023_v32 = vld [vmem:[#allocation6 + $0xc48] sm:$0xf0]  ;;  %v12784_v14 = vld [vmem:[#allocation6 + $0x64c] sm:$0xf0]  ;;  %v8750_v19 = vor.u32 %v12656_v11, %v8749_v10  ;;  %v8943_v10 = vld [vmem:[#allocation6 + $0x3d0] sm:$0xf0] }
  0xae   : > { %3405 = vmatpush.bf16.msrb.mxu2 %v9578_v23  ;;  %v10026_v44 = vor.u32 %v12967_v31, %v10023_v32  ;;  %v9773_v15 = vld [vmem:[#allocation6 + $0xa10] sm:$0xf]  ;;  %v9262_v20 = vor.u32 %v12784_v14, %v9261_v12  ;;  %v12824_v11 = vld [vmem:[#allocation6 + $0x794] sm:$0xf] }
  0xaf   : > { %3380 = vmatpush.bf16.msrb.mxu0 %v8490_v36  ;;  %v12912_v16 = vld [vmem:[#allocation6 + $0xa4c] sm:$0xf0]  ;;  %v12952_v14 = vld [vmem:[#allocation6 + $0xb94] sm:$0xf] }
  0xb0   : > { %3418 = vmatpush.bf16.msrb.mxu3 %v10090_v27  ;;  %3393 = vmatpush.bf16.msrb.mxu1 %v9002_v40  ;;  %v10285_v17 = vld [vmem:[#allocation6 + $0xe10] sm:$0xf]  ;;  %v9774_v23 = vor.u32 %v12912_v16, %v9773_v15  ;;  %v9967_v15 = vld [vmem:[#allocation6 + $0xbd0] sm:$0xf0] }
  0xb1   : > { %v13040_v18 = vld [vmem:[#allocation6 + $0xe4c] sm:$0xf0] }
  0xb2   : > { %3406 = vmatpush.bf16.msrb.mxu2 %v9514_v41  ;;  %3381 = vmatmul.bf16.vlgmr.msrb.gmra.mxu0 %v13805_v29  ;;  %v8685_v24 = vld [vmem:[#allocation6 + $0x190] sm:$0xf]  ;;  %v10286_v27 = vor.u32 %v13040_v18, %v10285_v17  ;;  %v13080_v18 = vld [vmem:[#allocation6 + $0xf94] sm:$0xf] }
  0xb3   : > { %3425 = vmatpush.bf16.msra.mxu0 %v8942_v45  ;;  %3394 = vmatmul.bf16.vlgmr.msrb.gmra.mxu1 %v13807_v30  ;;  %v12640_v25 = vld [vmem:[#allocation6 + $0x1cc] sm:$0xf0] }
  0xb4   : > { %3419 = vmatpush.bf16.msrb.mxu3 %v10026_v44  ;;  %3438 = vmatpush.bf16.msra.mxu1 %v9454_v46  ;;  %v9197_v26 = vld [vmem:[#allocation6 + $0x590] sm:$0xf]  ;;  %v8686_v35 = vor.u32 %v12640_v25, %v8685_v24  ;;  %v9970_v25 = vor.u32 %v12952_v14, %v9967_v15  ;;  %v12616_v14 = vld [vmem:[#allocation6 + $0x114] sm:$0xf] }
  0xb5   : > { %3407 = vmatmul.bf16.vlgmr.msrb.gmra.mxu2 %v13801_v21  ;;  %v12768_v28 = vld [vmem:[#allocation6 + $0x5cc] sm:$0xf0]  ;;  %v8623_v15 = vld [vmem:[#allocation6 + $0x150] sm:$0xf0] }
  0xb6   : > { %3451 = vmatpush.bf16.msra.mxu2 %v9966_v47  ;;  %v9709_v31 = vld [vmem:[#allocation6 + $0x990] sm:$0xf]  ;;  %v9198_v36 = vor.u32 %v12768_v28, %v9197_v26  ;;  %v8622_v47 = vor.u32 %v12624_v39, %v8621_v38  ;;  %v12680_v26 = vld [vmem:[#allocation6 + $0x314] sm:$0xf] }
  0xb7   : > { %3420 = vmatmul.bf16.vlgmr.msrb.gmra.mxu3 %v13803_v22  ;;  %3426 = vmatpush.bf16.msra.mxu0 %v8878_v58  ;;  %v12896_v32 = vld [vmem:[#allocation6 + $0x9cc] sm:$0xf0]  ;;  %v12808_v28 = vld [vmem:[#allocation6 + $0x714] sm:$0xf] }
  0xb8   : > { %3464 = vmatpush.bf16.msra.mxu3 %v10478_v51  ;;  %3439 = vmatpush.bf16.msra.mxu1 %v9390_v59  ;;  %v10221_v33 = vld [vmem:[#allocation6 + $0xd90] sm:$0xf]  ;;  %v9710_v37 = vor.u32 %v12896_v32, %v9709_v31  ;;  %v9391_v32 = vld [vmem:[#allocation6 + $0x750] sm:$0xf0] }
  0xb9   : > { %v13024_v34 = vld [vmem:[#allocation6 + $0xdcc] sm:$0xf0]  ;;  %v9394_v38 = vor.u32 %v12808_v28, %v9391_v32  ;;  %v8559_v32 = vld [vmem:[#allocation6 + $0xd0] sm:$0xf0] }
  0xba   : > { %3452 = vmatpush.bf16.msra.mxu2 %v9902_v60  ;;  %v9133_v40 = vld [vmem:[#allocation6 + $0x510] sm:$0xf]  ;;  %v10222_v41 = vor.u32 %v13024_v34, %v10221_v33  ;;  %v12936_v33 = vld [vmem:[#allocation6 + $0xb14] sm:$0xf] }
  0xbb   : > { %3427 = vmatpush.bf16.msra.mxu0 %v8814_v7  ;;  %v12752_v42 = vld [vmem:[#allocation6 + $0x54c] sm:$0xf0]  ;;  %v9903_v34 = vld [vmem:[#allocation6 + $0xb50] sm:$0xf0] }
  0xbc   : > { %3465 = vmatpush.bf16.msra.mxu3 %v10414_v0  ;;  %3440 = vmatpush.bf16.msra.mxu1 %v9326_v8  ;;  %v9645_v43 = vld [vmem:[#allocation6 + $0x910] sm:$0xf]  ;;  %v9134_v48 = vor.u32 %v12752_v42, %v9133_v40  ;;  %v9906_v39 = vor.u32 %v12936_v33, %v9903_v34  ;;  %v12664_v40 = vld [vmem:[#allocation6 + $0x294] sm:$0xf] }
  0xbd   : > { %v12880_v44 = vld [vmem:[#allocation6 + $0x94c] sm:$0xf0]  ;;  %v12792_v42 = vld [vmem:[#allocation6 + $0x694] sm:$0xf] }
  0xbe   : > { %3453 = vmatpush.bf16.msra.mxu2 %v9838_v9  ;;  %v10157_v45 = vld [vmem:[#allocation6 + $0xd10] sm:$0xf]  ;;  %v9646_v49 = vor.u32 %v12880_v44, %v9645_v43  ;;  %v12696_v9 = vld [vmem:[#allocation6 + $0x394] sm:$0xf] }
  0xbf   : > { %3428 = vmatpush.bf16.msra.mxu0 %v8750_v19  ;;  %v13008_v46 = vld [vmem:[#allocation6 + $0xd4c] sm:$0xf0]  ;;  %v10479_v19 = vld [vmem:[#allocation6 + $0xfd0] sm:$0xf0] }
  0xc0   : > { %3466 = vmatpush.bf16.msra.mxu3 %v10350_v13  ;;  %3441 = vmatpush.bf16.msra.mxu1 %v9262_v20  ;;  %v12608_v51 = vld [vmem:[#allocation6 + $0xcc] sm:$0xf0]  ;;  %v10158_v53 = vor.u32 %v13008_v46, %v10157_v45  ;;  %v9455_v13 = vld [vmem:[#allocation6 + $0x7d0] sm:$0xf0]  ;;  %v10482_v31 = vor.u32 %v13080_v18, %v10479_v19 }
  0xc1   : > { %v9069_v52 = vld [vmem:[#allocation6 + $0x490] sm:$0xf]  ;;  %v8558_v60 = vor.u32 %v12608_v51, %v8557_v50  ;;  %v9458_v24 = vor.u32 %v12824_v11, %v9455_v13  ;;  %v9327_v44 = vld [vmem:[#allocation6 + $0x6d0] sm:$0xf0] }
  0xc2   : > { %3454 = vmatpush.bf16.msra.mxu2 %v9774_v23  ;;  %v12736_v54 = vld [vmem:[#allocation6 + $0x4cc] sm:$0xf0]  ;;  %v8946_v23 = vor.u32 %v12696_v9, %v8943_v10  ;;  %v12920_v45 = vld [vmem:[#allocation6 + $0xa94] sm:$0xf]  ;;  %v9330_v50 = vor.u32 %v12792_v42, %v9327_v44 }
  0xc3   : > { %3429 = vmatpush.bf16.msra.mxu0 %v8686_v35  ;;  %v9581_v56 = vld [vmem:[#allocation6 + $0x890] sm:$0xf]  ;;  %v9070_v63 = vor.u32 %v12736_v54, %v9069_v52  ;;  %v13064_v35 = vld [vmem:[#allocation6 + $0xf14] sm:$0xf] }
  0xc4   : > { %3467 = vmatpush.bf16.msra.mxu3 %v10286_v27  ;;  %3442 = vmatpush.bf16.msra.mxu1 %v9198_v36  ;;  %v12864_v57 = vld [vmem:[#allocation6 + $0x8cc] sm:$0xf0]  ;;  %v8879_v27 = vld [vmem:[#allocation6 + $0x350] sm:$0xf0] }
  0xc5   : > { %v10093_v58 = vld [vmem:[#allocation6 + $0xc90] sm:$0xf]  ;;  %v9582_v0 = vor.u32 %v12864_v57, %v9581_v56  ;;  %v10415_v36 = vld [vmem:[#allocation6 + $0xf50] sm:$0xf0] }
  0xc6   : > { %3455 = vmatpush.bf16.msra.mxu2 %v9710_v37  ;;  %v12992_v59 = vld [vmem:[#allocation6 + $0xccc] sm:$0xf0]  ;;  %v8882_v37 = vor.u32 %v12680_v26, %v8879_v27  ;;  %v10418_v43 = vor.u32 %v13064_v35, %v10415_v36  ;;  %v9839_v46 = vld [vmem:[#allocation6 + $0xad0] sm:$0xf0] }
  0xc7   : > { %3430 = vmatpush.bf16.msra.mxu0 %v8622_v47  ;;  %v8493_v61 = vld [vmem:[#allocation6 + $0x10] sm:$0xf]  ;;  %v10094_v5 = vor.u32 %v12992_v59, %v10093_v58  ;;  %v13048_v47 = vld [vmem:[#allocation6 + $0xe94] sm:$0xf]  ;;  %v9842_v51 = vor.u32 %v12920_v45, %v9839_v46 }
  0xc8   : > { %3468 = vmatpush.bf16.msra.mxu3 %v10222_v41  ;;  %v12592_v62 = vld [vmem:[#allocation6 + $0x4c] sm:$0xf0]  ;;  %3443 = vmatpush.bf16.msra.mxu1 %v9134_v48  ;;  %v8815_v41 = vld [vmem:[#allocation6 + $0x2d0] sm:$0xf0] }
  0xc9   : > { %v9005_v2 = vld [vmem:[#allocation6 + $0x410] sm:$0xf]  ;;  %v8494_v12 = vor.u32 %v12592_v62, %v8493_v61  ;;  %v10351_v48 = vld [vmem:[#allocation6 + $0xed0] sm:$0xf0] }
  0xca   : > { %3456 = vmatpush.bf16.msra.mxu2 %v9646_v49  ;;  %v12720_v3 = vld [vmem:[#allocation6 + $0x44c] sm:$0xf0]  ;;  %v8818_v49 = vor.u32 %v12664_v40, %v8815_v41  ;;  %v12648_v52 = vld [vmem:[#allocation6 + $0x214] sm:$0xf]  ;;  %v10354_v56 = vor.u32 %v13048_v47, %v10351_v48 }
  0xcb   : > { %v9517_v4 = vld [vmem:[#allocation6 + $0x810] sm:$0xf]  ;;  %3431 = vmatpush.bf16.msra.mxu0 %v8558_v60  ;;  %v9006_v16 = vor.u32 %v12720_v3, %v9005_v2  ;;  %v12776_v54 = vld [vmem:[#allocation6 + $0x614] sm:$0xf] }
  0xcc   : > { %3469 = vmatpush.bf16.msra.mxu3 %v10158_v53  ;;  %v12848_v6 = vld [vmem:[#allocation6 + $0x84c] sm:$0xf0]  ;;  %3444 = vmatpush.bf16.msra.mxu1 %v9070_v63  ;;  %v8751_v53 = vld [vmem:[#allocation6 + $0x250] sm:$0xf0] }
  0xcd   : > { %v10029_v7 = vld [vmem:[#allocation6 + $0xc10] sm:$0xf]  ;;  %v9518_v17 = vor.u32 %v12848_v6, %v9517_v4  ;;  %v9263_v57 = vld [vmem:[#allocation6 + $0x650] sm:$0xf0]  ;;  %v8754_v62 = vor.u32 %v12648_v52, %v8751_v53 }
  0xce   : > { %v12976_v8 = vld [vmem:[#allocation6 + $0xc4c] sm:$0xf0]  ;;  %3457 = vmatpush.bf16.msra.mxu2 %v9582_v0  ;;  %v12904_v58 = vld [vmem:[#allocation6 + $0xa14] sm:$0xf]  ;;  %v9266_v63 = vor.u32 %v12776_v54, %v9263_v57 }
  0xcf   : > { %v10030_v20 = vor.u32 %v12976_v8, %v10029_v7  ;;  %3432 = vmatpush.bf16.msra.mxu0 %v8494_v12  ;;  %v9775_v59 = vld [vmem:[#allocation6 + $0xa50] sm:$0xf0] }
  0xd0   : > { %3470 = vmatpush.bf16.msra.mxu3 %v10094_v5  ;;  %3445 = vmatpush.bf16.msra.mxu1 %v9006_v16  ;;  %v13032_v60 = vld [vmem:[#allocation6 + $0xe14] sm:$0xf]  ;;  %v9778_v0 = vor.u32 %v12904_v58, %v9775_v59  ;;  %v8949_v58 = vld [vmem:[#allocation6 + $0x398] sm:$0xf] }
  0xd1   : > { %v10287_v61 = vld [vmem:[#allocation6 + $0xe50] sm:$0xf0]  ;;  %v12705_v59 = vld [vmem:[#allocation6 + $0x3d4] sm:$0xf0] }
  0xd2   : > { %3458 = vmatpush.bf16.msra.mxu2 %v9518_v17  ;;  %3433 = vmatmul.bf16.vlgmr.msra.gmra.mxu0 %v13805_v29  ;;  %v12632_v2 = vld [vmem:[#allocation6 + $0x194] sm:$0xf]  ;;  %v10290_v5 = vor.u32 %v13032_v60, %v10287_v61  ;;  %v9461_v60 = vld [vmem:[#allocation6 + $0x798] sm:$0xf] }
  0xd3   : > { %3477 = vmatpush.bf16.msrb.mxu0 %v8946_v23  ;;  %3446 = vmatmul.bf16.vlgmr.msra.gmra.mxu1 %v13807_v30  ;;  %v8687_v3 = vld [vmem:[#allocation6 + $0x1d0] sm:$0xf0] }
  0xd4   : > { %3471 = vmatpush.bf16.msra.mxu3 %v10030_v20  ;;  %3490 = vmatpush.bf16.msrb.mxu1 %v9458_v24  ;;  %v12760_v4 = vld [vmem:[#allocation6 + $0x594] sm:$0xf]  ;;  %v8690_v11 = vor.u32 %v12632_v2, %v8687_v3 }
  0xd5   : > { %3459 = vmatmul.bf16.vlgmr.msra.gmra.mxu2 %v13801_v21  ;;  %v9199_v6 = vld [vmem:[#allocation6 + $0x5d0] sm:$0xf0] }
  0xd6   : > { %3503 = vmatpush.bf16.msrb.mxu2 %v9970_v25  ;;  %v12888_v7 = vld [vmem:[#allocation6 + $0x994] sm:$0xf]  ;;  %v9202_v12 = vor.u32 %v12760_v4, %v9199_v6  ;;  %v8626_v25 = vor.u32 %v12616_v14, %v8623_v15  ;;  %v10485_v6 = vld [vmem:[#allocation6 + $0xf98] sm:$0xf] }
  0xd7   : > { %3472 = vmatmul.bf16.vlgmr.msra.gmra.mxu3 %v13803_v22  ;;  %3478 = vmatpush.bf16.msrb.mxu0 %v8882_v37  ;;  %v9711_v8 = vld [vmem:[#allocation6 + $0x9d0] sm:$0xf0]  ;;  %v12689_v14 = vld [vmem:[#allocation6 + $0x354] sm:$0xf0] }
  0xd8   : > { %3516 = vmatpush.bf16.msrb.mxu3 %v10482_v31  ;;  %3491 = vmatpush.bf16.msrb.mxu1 %v9394_v38  ;;  %v13016_v9 = vld [vmem:[#allocation6 + $0xd94] sm:$0xf]  ;;  %v9714_v13 = vor.u32 %v12888_v7, %v9711_v8  ;;  %v13089_v7 = vld [vmem:[#allocation6 + $0xfd4] sm:$0xf0] }
  0xd9   : > { %v10223_v10 = vld [vmem:[#allocation6 + $0xdd0] sm:$0xf0]  ;;  %v9397_v15 = vld [vmem:[#allocation6 + $0x718] sm:$0xf] }
  0xda   : > { %3504 = vmatpush.bf16.msrb.mxu2 %v9906_v39  ;;  %v12744_v16 = vld [vmem:[#allocation6 + $0x514] sm:$0xf]  ;;  %v10226_v17 = vor.u32 %v13016_v9, %v10223_v10  ;;  %v8950_v10 = vor.u32 %v12705_v59, %v8949_v58  ;;  %v8693_v58 = vld [vmem:[#allocation6 + $0x198] sm:$0xf] }
  0xdb   : > { %3479 = vmatpush.bf16.msrb.mxu0 %v8818_v49  ;;  %v9135_v18 = vld [vmem:[#allocation6 + $0x550] sm:$0xf0]  ;;  %v3226_v26 = vpop.f32.mrf.mxu0  ;;  %v12641_v59 = vld [vmem:[#allocation6 + $0x1d4] sm:$0xf0] }
  0xdc   : > { %3517 = vmatpush.bf16.msrb.mxu3 %v10418_v43  ;;  %3492 = vmatpush.bf16.msrb.mxu1 %v9330_v50  ;;  %v12872_v19 = vld [vmem:[#allocation6 + $0x914] sm:$0xf]  ;;  %v9138_v27 = vor.u32 %v12744_v16, %v9135_v18  ;;  %v3239_v34 = vpop.f32.mrf.mxu1  ;;  %v10486_v16 = vor.u32 %v13089_v7, %v10485_v6  ;;  %v9909_v18 = vld [vmem:[#allocation6 + $0xb18] sm:$0xf]  ;;  %v8694_v6 = vor.u32 %v12641_v59, %v8693_v58  ;;  %v12825_v58 = vld [vmem:[#allocation6 + $0x79c] sm:$0xf] }
  0xdd   : > { %v9647_v20 = vld [vmem:[#allocation6 + $0x950] sm:$0xf0]  ;;  %v3240_v39 = vadd.f32 %v3239_v34, %v3226_v26 }
  0xde   : > { %3505 = vmatpush.bf16.msrb.mxu2 %v9842_v51  ;;  %v13000_v23 = vld [vmem:[#allocation6 + $0xd14] sm:$0xf]  ;;  %v9650_v28 = vor.u32 %v12872_v19, %v9647_v20  ;;  %v12945_v19 = vld [vmem:[#allocation6 + $0xb54] sm:$0xf0] }
  0xdf   : > { %3480 = vmatpush.bf16.msrb.mxu0 %v8754_v62  ;;  %v10159_v24 = vld [vmem:[#allocation6 + $0xd50] sm:$0xf0]  ;;  %v12833_v62 = vld [vmem:[#allocation6 + $0x7d4] sm:$0xf0] }
  0xe0   : > { %3518 = vmatpush.bf16.msrb.mxu3 %v10354_v56  ;;  %3493 = vmatpush.bf16.msrb.mxu1 %v9266_v63  ;;  %v12600_v31 = vld [vmem:[#allocation6 + $0x94] sm:$0xf]  ;;  %v10162_v35 = vor.u32 %v13000_v23, %v10159_v24  ;;  %v3252_v50 = vpop.f32.mrf.mxu2  ;;  %v3265_v57 = vpop.f32.mrf.mxu3  ;;  %v9973_v63 = vld [vmem:[#allocation6 + $0xb98] sm:$0xf] }
  0xe1   : > { %v12728_v33 = vld [vmem:[#allocation6 + $0x494] sm:$0xf]  ;;  %v8562_v42 = vor.u32 %v12600_v31, %v8559_v32  ;;  %v3253_v56 = vadd.f32 %v3252_v50, %v3240_v39  ;;  %v10421_v20 = vld [vmem:[#allocation6 + $0xf18] sm:$0xf] }
  0xe2   : > { %3506 = vmatpush.bf16.msrb.mxu2 %v9778_v0  ;;  %v9071_v36 = vld [vmem:[#allocation6 + $0x4d0] sm:$0xf0]  ;;  %v12961_v0 = vld [vmem:[#allocation6 + $0xbd4] sm:$0xf0] }
  0xe3   : > { %3481 = vmatpush.bf16.msrb.mxu0 %v8690_v11  ;;  %v12856_v37 = vld [vmem:[#allocation6 + $0x894] sm:$0xf]  ;;  %v9074_v45 = vor.u32 %v12728_v33, %v9071_v36  ;;  %v13829_v2 = vadd.f32 %v3265_v57, %v3253_v56  ;;  %v3228_v3 = vpop.f32.mrf.mxu0  ;;  %v9462_v11 = vor.u32 %v12833_v62, %v9461_v60  ;;  %v13073_v23 = vld [vmem:[#allocation6 + $0xf54] sm:$0xf0] }
  0xe4   : > { %3519 = vmatpush.bf16.msrb.mxu3 %v10290_v5  ;;  %3494 = vmatpush.bf16.msrb.mxu1 %v9202_v12  ;;  %v9583_v38 = vld [vmem:[#allocation6 + $0x8d0] sm:$0xf0]  ;;  %v3241_v8 = vpop.f32.mrf.mxu1  ;;  %v9974_v12 = vor.u32 %v12961_v0, %v9973_v63  ;;  %v8821_v31 = vld [vmem:[#allocation6 + $0x298] sm:$0xf]  ;;  %v10422_v34 = vor.u32 %v13073_v23, %v10421_v20 }
  0xe5   : > { %v12984_v40 = vld [vmem:[#allocation6 + $0xc94] sm:$0xf]  ;;  %v9586_v46 = vor.u32 %v12856_v37, %v9583_v38  ;;  %v12673_v32 = vld [vmem:[#allocation6 + $0x2d4] sm:$0xf0] }
  0xe6   : > { %3507 = vmatpush.bf16.msrb.mxu2 %v9714_v13  ;;  %v10095_v41 = vld [vmem:[#allocation6 + $0xcd0] sm:$0xf0]  ;;  %v8885_v13 = vld [vmem:[#allocation6 + $0x318] sm:$0xf] }
  0xe7   : > { %3482 = vmatpush.bf16.msrb.mxu0 %v8626_v25  ;;  %v12584_v43 = vld [vmem:[#allocation6 + $0x14] sm:$0xf]  ;;  %v10098_v51 = vor.u32 %v12984_v40, %v10095_v41  ;;  %v8886_v25 = vor.u32 %v12689_v14, %v8885_v13  ;;  %v9333_v33 = vld [vmem:[#allocation6 + $0x698] sm:$0xf]  ;;  %v8822_v40 = vor.u32 %v12673_v32, %v8821_v31 }
  0xe8   : > { %3520 = vmatpush.bf16.msrb.mxu3 %v10226_v17  ;;  %v8495_v44 = vld [vmem:[#allocation6 + $0x50] sm:$0xf0]  ;;  %3495 = vmatpush.bf16.msrb.mxu1 %v9138_v27  ;;  %v12817_v17 = vld [vmem:[#allocation6 + $0x754] sm:$0xf0]  ;;  %v3254_v24 = vpop.f32.mrf.mxu2  ;;  %v3267_v26 = vpop.f32.mrf.mxu3 }
  0xe9   : > { %v12712_v47 = vld [vmem:[#allocation6 + $0x414] sm:$0xf]  ;;  %v8498_v61 = vor.u32 %v12584_v43, %v8495_v44  ;;  %v9398_v27 = vor.u32 %v12817_v17, %v9397_v15  ;;  %v9845_v36 = vld [vmem:[#allocation6 + $0xa98] sm:$0xf] }
  0xea   : > { %3508 = vmatpush.bf16.msrb.mxu2 %v9650_v28  ;;  %v9007_v48 = vld [vmem:[#allocation6 + $0x450] sm:$0xf0]  ;;  %v9910_v28 = vor.u32 %v12945_v19, %v9909_v18  ;;  %v12929_v37 = vld [vmem:[#allocation6 + $0xad4] sm:$0xf0] }
  0xeb   : > { %v12840_v49 = vld [vmem:[#allocation6 + $0x814] sm:$0xf]  ;;  %3483 = vmatpush.bf16.msrb.mxu0 %v8562_v42  ;;  %v9010_v4 = vor.u32 %v12712_v47, %v9007_v48  ;;  %v10357_v38 = vld [vmem:[#allocation6 + $0xe98] sm:$0xf]  ;;  %v9846_v42 = vor.u32 %v12929_v37, %v9845_v36 }
  0xec   : > { %3521 = vmatpush.bf16.msrb.mxu3 %v10162_v35  ;;  %v9519_v52 = vld [vmem:[#allocation6 + $0x850] sm:$0xf0]  ;;  %3496 = vmatpush.bf16.msrb.mxu1 %v9074_v45  ;;  %v12801_v35 = vld [vmem:[#allocation6 + $0x6d4] sm:$0xf0] }
  0xed   : > { %v12968_v53 = vld [vmem:[#allocation6 + $0xc14] sm:$0xf]  ;;  %v9522_v5 = vor.u32 %v12840_v49, %v9519_v52  ;;  %v13057_v39 = vld [vmem:[#allocation6 + $0xed4] sm:$0xf0]  ;;  %v9334_v41 = vor.u32 %v12801_v35, %v9333_v33 }
  0xee   : > { %v10031_v54 = vld [vmem:[#allocation6 + $0xc50] sm:$0xf0]  ;;  %3509 = vmatpush.bf16.msrb.mxu2 %v9586_v46  ;;  %v8757_v43 = vld [vmem:[#allocation6 + $0x218] sm:$0xf]  ;;  %v10358_v46 = vor.u32 %v13057_v39, %v10357_v38 }
  0xef   : > { %v10034_v9 = vor.u32 %v12968_v53, %v10031_v54  ;;  %3484 = vmatpush.bf16.msrb.mxu0 %v8498_v61  ;;  %v12657_v44 = vld [vmem:[#allocation6 + $0x254] sm:$0xf0]  ;;  %v3278_v53 = vpop.f32.mrf.mxu0 }
  0xf0   : > { %3522 = vmatpush.bf16.msrb.mxu3 %v10098_v51  ;;  %3497 = vmatpush.bf16.msrb.mxu1 %v9010_v4  ;;  %v9269_v45 = vld [vmem:[#allocation6 + $0x618] sm:$0xf]  ;;  %v8758_v52 = vor.u32 %v12657_v44, %v8757_v43  ;;  %v3291_v57 = vpop.f32.mrf.mxu1 }
  0xf1   : > { %v12785_v47 = vld [vmem:[#allocation6 + $0x654] sm:$0xf0]  ;;  %v3292_v62 = vadd.f32 %v3291_v57, %v3278_v53  ;;  %v8951_v57 = vld [vmem:[#allocation6 + $0x3d8] sm:$0xf0] }
  0xf2   : > { %3510 = vmatpush.bf16.msrb.mxu2 %v9522_v5  ;;  %3485 = vmatmul.bf16.vlgmr.msrb.gmra.mxu0 %v13805_v29  ;;  %v9781_v48 = vld [vmem:[#allocation6 + $0xa18] sm:$0xf]  ;;  %v9270_v54 = vor.u32 %v12785_v47, %v9269_v45 }
  0xf3   : > { %3529 = vmatpush.bf16.msra.mxu0 %v8950_v10  ;;  %3498 = vmatmul.bf16.vlgmr.msrb.gmra.mxu1 %v13807_v30  ;;  %v12913_v49 = vld [vmem:[#allocation6 + $0xa54] sm:$0xf0] }
  0xf4   : > { %3523 = vmatpush.bf16.msrb.mxu3 %v10034_v9  ;;  %3542 = vmatpush.bf16.msra.mxu1 %v9462_v11  ;;  %v10293_v50 = vld [vmem:[#allocation6 + $0xe18] sm:$0xf]  ;;  %v9782_v56 = vor.u32 %v12913_v49, %v9781_v48 }
  0xf5   : > { %3511 = vmatmul.bf16.vlgmr.msrb.gmra.mxu2 %v13801_v21  ;;  %v13041_v51 = vld [vmem:[#allocation6 + $0xe54] sm:$0xf0] }
  0xf6   : > { %3555 = vmatpush.bf16.msra.mxu2 %v9974_v12  ;;  %v9205_v60 = vld [vmem:[#allocation6 + $0x598] sm:$0xf]  ;;  %v10294_v61 = vor.u32 %v13041_v51, %v10293_v50 }
  0xf7   : > { %3524 = vmatmul.bf16.vlgmr.msrb.gmra.mxu3 %v13803_v22  ;;  %3530 = vmatpush.bf16.msra.mxu0 %v8886_v25  ;;  %v12769_v63 = vld [vmem:[#allocation6 + $0x5d4] sm:$0xf0]  ;;  %v3280_v26 = vpop.f32.mrf.mxu0 }
  0xf8   : > { %3568 = vmatpush.bf16.msra.mxu3 %v10486_v16  ;;  %3543 = vmatpush.bf16.msra.mxu1 %v9398_v27  ;;  %v9717_v0 = vld [vmem:[#allocation6 + $0x998] sm:$0xf]  ;;  %v9206_v7 = vor.u32 %v12769_v63, %v9205_v60  ;;  %v3304_v9 = vpop.f32.mrf.mxu2  ;;  %v9463_v60 = vld [vmem:[#allocation6 + $0x7d8] sm:$0xf0] }
  0xf9   : > { %v12897_v3 = vld [vmem:[#allocation6 + $0x9d4] sm:$0xf0]  ;;  %v3305_v14 = vadd.f32 %v3304_v9, %v3292_v62  ;;  %v9975_v62 = vld [vmem:[#allocation6 + $0xbd8] sm:$0xf0] }
  0xfa   : > { %3556 = vmatpush.bf16.msra.mxu2 %v9910_v28  ;;  %v10229_v4 = vld [vmem:[#allocation6 + $0xd98] sm:$0xf]  ;;  %v9718_v8 = vor.u32 %v12897_v3, %v9717_v0  ;;  %v3317_v15 = vpop.f32.mrf.mxu3  ;;  %v13081_v3 = vld [vmem:[#allocation6 + $0xf9c] sm:$0xf] }
  0xfb   : > { %3531 = vmatpush.bf16.msra.mxu0 %v8822_v40  ;;  %v13025_v5 = vld [vmem:[#allocation6 + $0xdd4] sm:$0xf0]  ;;  %v3318_v23 = vadd.f32 %v3317_v15, %v3305_v14  ;;  %v12681_v9 = vld [vmem:[#allocation6 + $0x31c] sm:$0xf] }
  0xfc   : > { %3569 = vmatpush.bf16.msra.mxu3 %v10422_v34  ;;  %3544 = vmatpush.bf16.msra.mxu1 %v9334_v41  ;;  %v8629_v10 = vld [vmem:[#allocation6 + $0x118] sm:$0xf]  ;;  %v10230_v13 = vor.u32 %v13025_v5, %v10229_v4  ;;  %v3293_v34 = vpop.f32.mrf.mxu1  ;;  %v10487_v4 = vld [vmem:[#allocation6 + $0xfd8] sm:$0xf0] }
  0xfd   : > { %v12625_v11 = vld [vmem:[#allocation6 + $0x154] sm:$0xf0]  ;;  %v4065_v35 = vrot.slane %v3318_v23, 6  ;;  %v12937_v14 = vld [vmem:[#allocation6 + $0xb1c] sm:$0xf] }
  0xfe   : > { %3557 = vmatpush.bf16.msra.mxu2 %v9846_v42  ;;  %v9141_v12 = vld [vmem:[#allocation6 + $0x518] sm:$0xf]  ;;  %v8630_v24 = vor.u32 %v12625_v11, %v8629_v10  ;;  %v8887_v10 = vld [vmem:[#allocation6 + $0x358] sm:$0xf0] }
  0xff   : > { %3532 = vmatpush.bf16.msra.mxu0 %v8758_v52  ;;  %v12753_v16 = vld [vmem:[#allocation6 + $0x554] sm:$0xf0]  ;;  %v13837_v41 = vsel %vm4077_vm0, %v13829_v2, %v4065_v35  ;;  %v12697_v2 = vld [vmem:[#allocation6 + $0x39c] sm:$0xf] }
 0x100   : > { %3570 = vmatpush.bf16.msra.mxu3 %v10358_v46  ;;  %3545 = vmatpush.bf16.msra.mxu1 %v9270_v54  ;;  %v9653_v17 = vld [vmem:[#allocation6 + $0x918] sm:$0xf]  ;;  %v9142_v27 = vor.u32 %v12753_v16, %v9141_v12  ;;  %v3306_v50 = vpop.f32.mrf.mxu2  ;;  %v12809_v11 = vld [vmem:[#allocation6 + $0x71c] sm:$0xf]  ;;  %v10490_v12 = vor.u32 %v13081_v3, %v10487_v4 }
 0x101   : > { %v12881_v18 = vld [vmem:[#allocation6 + $0x954] sm:$0xf0]  ;;  %v9911_v15 = vld [vmem:[#allocation6 + $0xb58] sm:$0xf0] }
 0x102   : > { %3558 = vmatpush.bf16.msra.mxu2 %v9782_v56  ;;  %v10165_v19 = vld [vmem:[#allocation6 + $0xd18] sm:$0xf]  ;;  %v9654_v28 = vor.u32 %v12881_v18, %v9653_v17  ;;  %v3319_v56 = vpop.f32.mrf.mxu3  ;;  %v13065_v16 = vld [vmem:[#allocation6 + $0xf1c] sm:$0xf]  ;;  %v8890_v18 = vor.u32 %v12681_v9, %v8887_v10 }
 0x103   : > { %v13009_v20 = vld [vmem:[#allocation6 + $0xd54] sm:$0xf0]  ;;  %3533 = vmatpush.bf16.msra.mxu0 %v8694_v6  ;;  %v8954_v6 = vor.u32 %v12697_v2, %v8951_v57  ;;  %v10423_v17 = vld [vmem:[#allocation6 + $0xf58] sm:$0xf0] }
 0x104   : > { %3571 = vmatpush.bf16.msra.mxu3 %v10294_v61  ;;  %v8565_v25 = vld [vmem:[#allocation6 + $0x98] sm:$0xf]  ;;  %3546 = vmatpush.bf16.msra.mxu1 %v9206_v7  ;;  %v10166_v36 = vor.u32 %v13009_v20, %v10165_v19  ;;  %v12953_v61 = vld [vmem:[#allocation6 + $0xb9c] sm:$0xf]  ;;  %v9466_v7 = vor.u32 %v12825_v58, %v9463_v60  ;;  %v9914_v20 = vor.u32 %v12937_v14, %v9911_v15 }
 0x105   : > { %v12609_v31 = vld [vmem:[#allocation6 + $0xd4] sm:$0xf0]  ;;  %v12665_v23 = vld [vmem:[#allocation6 + $0x29c] sm:$0xf]  ;;  %v10426_v26 = vor.u32 %v13065_v16, %v10423_v17 }
 0x106   : > { %3559 = vmatpush.bf16.msra.mxu2 %v9718_v8  ;;  %v9077_v32 = vld [vmem:[#allocation6 + $0x498] sm:$0xf]  ;;  %v8566_v42 = vor.u32 %v12609_v31, %v8565_v25  ;;  %v9978_v8 = vor.u32 %v12953_v61, %v9975_v62  ;;  %v12793_v25 = vld [vmem:[#allocation6 + $0x69c] sm:$0xf] }
 0x107   : > { %v12737_v33 = vld [vmem:[#allocation6 + $0x4d4] sm:$0xf0]  ;;  %3534 = vmatpush.bf16.msra.mxu0 %v8630_v24  ;;  %v8823_v24 = vld [vmem:[#allocation6 + $0x2d8] sm:$0xf0] }
 0x108   : > { %3572 = vmatpush.bf16.msra.mxu3 %v10230_v13  ;;  %v9589_v37 = vld [vmem:[#allocation6 + $0x898] sm:$0xf]  ;;  %3547 = vmatpush.bf16.msra.mxu1 %v9142_v27  ;;  %v9078_v45 = vor.u32 %v12737_v33, %v9077_v32  ;;  %v9399_v13 = vld [vmem:[#allocation6 + $0x758] sm:$0xf0]  ;;  %v8826_v34 = vor.u32 %v12665_v23, %v8823_v24 }
 0x109   : > { %v12865_v38 = vld [vmem:[#allocation6 + $0x8d4] sm:$0xf0]  ;;  %v9402_v19 = vor.u32 %v12809_v11, %v9399_v13  ;;  %v9335_v27 = vld [vmem:[#allocation6 + $0x6d8] sm:$0xf0] }
 0x10a   : > { %v10101_v39 = vld [vmem:[#allocation6 + $0xc98] sm:$0xf]  ;;  %3560 = vmatpush.bf16.msra.mxu2 %v9654_v28  ;;  %v9590_v46 = vor.u32 %v12865_v38, %v9589_v37  ;;  %v12921_v28 = vld [vmem:[#allocation6 + $0xa9c] sm:$0xf]  ;;  %v9338_v35 = vor.u32 %v12793_v25, %v9335_v27 }
 0x10b   : > { %v12993_v40 = vld [vmem:[#allocation6 + $0xcd4] sm:$0xf0]  ;;  %3535 = vmatpush.bf16.msra.mxu0 %v8566_v42  ;;  %v9847_v31 = vld [vmem:[#allocation6 + $0xad8] sm:$0xf0] }
 0x10c   : > { %v8501_v43 = vld [vmem:[#allocation6 + $0x18] sm:$0xf]  ;;  %3573 = vmatpush.bf16.msra.mxu3 %v10166_v36  ;;  %v10102_v51 = vor.u32 %v12993_v40, %v10101_v39  ;;  %3548 = vmatpush.bf16.msra.mxu1 %v9078_v45  ;;  %v13049_v32 = vld [vmem:[#allocation6 + $0xe9c] sm:$0xf]  ;;  %v9850_v36 = vor.u32 %v12921_v28, %v9847_v31 }
 0x10d   : > { %v12593_v44 = vld [vmem:[#allocation6 + $0x54] sm:$0xf0]  ;;  %v10359_v33 = vld [vmem:[#allocation6 + $0xed8] sm:$0xf0] }
 0x10e   : > { %v9013_v47 = vld [vmem:[#allocation6 + $0x418] sm:$0xf]  ;;  %v8502_v59 = vor.u32 %v12593_v44, %v8501_v43  ;;  %3561 = vmatpush.bf16.msra.mxu2 %v9590_v46  ;;  %v12649_v37 = vld [vmem:[#allocation6 + $0x21c] sm:$0xf]  ;;  %v10362_v40 = vor.u32 %v13049_v32, %v10359_v33 }
 0x10f   : > { %v12721_v48 = vld [vmem:[#allocation6 + $0x454] sm:$0xf0]  ;;  %v8759_v38 = vld [vmem:[#allocation6 + $0x258] sm:$0xf0] }
 0x110   : > { %v9525_v49 = vld [vmem:[#allocation6 + $0x818] sm:$0xf]  ;;  %v9014_v63 = vor.u32 %v12721_v48, %v9013_v47  ;;  %3574 = vmatpush.bf16.msra.mxu3 %v10102_v51  ;;  %3536 = vmatpush.bf16.msra.mxu0 %v8502_v59  ;;  %v12777_v39 = vld [vmem:[#allocation6 + $0x61c] sm:$0xf]  ;;  %v8762_v47 = vor.u32 %v12649_v37, %v8759_v38  ;;  %v3330_v48 = vpop.f32.mrf.mxu0 }
 0x111   : > { %v12849_v52 = vld [vmem:[#allocation6 + $0x854] sm:$0xf0]  ;;  %v9271_v42 = vld [vmem:[#allocation6 + $0x658] sm:$0xf0] }
 0x112   : > { %v10037_v53 = vld [vmem:[#allocation6 + $0xc18] sm:$0xf]  ;;  %v9526_v0 = vor.u32 %v12849_v52, %v9525_v49  ;;  %3549 = vmatpush.bf16.msra.mxu1 %v9014_v63  ;;  %v12905_v43 = vld [vmem:[#allocation6 + $0xa1c] sm:$0xf]  ;;  %v9274_v49 = vor.u32 %v12777_v39, %v9271_v42 }
 0x113   : > { %v12977_v54 = vld [vmem:[#allocation6 + $0xc54] sm:$0xf0]  ;;  %3537 = vmatmul.bf16.vlgmr.msra.gmra.mxu0 %v13805_v29  ;;  %v9783_v44 = vld [vmem:[#allocation6 + $0xa58] sm:$0xf0] }
 0x114   : > { %v10038_v5 = vor.u32 %v12977_v54, %v10037_v53  ;;  %3562 = vmatpush.bf16.msra.mxu2 %v9526_v0  ;;  %3581 = vmatpush.bf16.msrb.mxu0 %v8954_v6  ;;  %v13033_v45 = vld [vmem:[#allocation6 + $0xe1c] sm:$0xf]  ;;  %v9786_v50 = vor.u32 %v12905_v43, %v9783_v44  ;;  %v3343_v54 = vpop.f32.mrf.mxu1 }
 0x115   : > { %3550 = vmatmul.bf16.vlgmr.msra.gmra.mxu1 %v13807_v30  ;;  %v10295_v46 = vld [vmem:[#allocation6 + $0xe58] sm:$0xf0]  ;;  %v3344_v59 = vadd.f32 %v3343_v54, %v3330_v48  ;;  %v9981_v54 = vld [vmem:[#allocation6 + $0xba0] sm:$0xf] }
 0x116   : > { %3575 = vmatpush.bf16.msra.mxu3 %v10038_v5  ;;  %3594 = vmatpush.bf16.msrb.mxu1 %v9466_v7  ;;  %v12633_v51 = vld [vmem:[#allocation6 + $0x19c] sm:$0xf]  ;;  %v10298_v56 = vor.u32 %v13033_v45, %v10295_v46 }
 0x117   : > { %3563 = vmatmul.bf16.vlgmr.msra.gmra.mxu2 %v13801_v21  ;;  %v8695_v52 = vld [vmem:[#allocation6 + $0x1d8] sm:$0xf0] }
 0x118   : > { %3607 = vmatpush.bf16.msrb.mxu2 %v9978_v8  ;;  %3582 = vmatpush.bf16.msrb.mxu0 %v8890_v18  ;;  %v12761_v53 = vld [vmem:[#allocation6 + $0x59c] sm:$0xf]  ;;  %v8698_v62 = vor.u32 %v12633_v51, %v8695_v52  ;;  %v3356_v6 = vpop.f32.mrf.mxu2  ;;  %v3332_v17 = vpop.f32.mrf.mxu0  ;;  %v9469_v51 = vld [vmem:[#allocation6 + $0x7a0] sm:$0xf] }
 0x119   : > { %3576 = vmatmul.bf16.vlgmr.msra.gmra.mxu3 %v13803_v22  ;;  %v9207_v2 = vld [vmem:[#allocation6 + $0x5d8] sm:$0xf0]  ;;  %v3357_v11 = vadd.f32 %v3356_v6, %v3344_v59  ;;  %v13090_v59 = vld [vmem:[#allocation6 + $0xfdc] sm:$0xf0] }
 0x11a   : > { %3620 = vmatpush.bf16.msrb.mxu3 %v10490_v12  ;;  %3595 = vmatpush.bf16.msrb.mxu1 %v9402_v19  ;;  %v12889_v57 = vld [vmem:[#allocation6 + $0x99c] sm:$0xf]  ;;  %v9210_v63 = vor.u32 %v12761_v53, %v9207_v2  ;;  %v3369_v12 = vpop.f32.mrf.mxu3  ;;  %v12834_v53 = vld [vmem:[#allocation6 + $0x7dc] sm:$0xf0] }
 0x11b   : > { %v9719_v58 = vld [vmem:[#allocation6 + $0x9d8] sm:$0xf0]  ;;  %v13843_v16 = vadd.f32 %v3369_v12, %v3357_v11  ;;  %v12818_v6 = vld [vmem:[#allocation6 + $0x75c] sm:$0xf0] }
 0x11c   : > { %3608 = vmatpush.bf16.msrb.mxu2 %v9914_v20  ;;  %3583 = vmatpush.bf16.msrb.mxu0 %v8826_v34  ;;  %v13017_v60 = vld [vmem:[#allocation6 + $0xd9c] sm:$0xf]  ;;  %v9722_v0 = vor.u32 %v12889_v57, %v9719_v58  ;;  %v3345_v25 = vpop.f32.mrf.mxu1  ;;  %v10493_v58 = vld [vmem:[#allocation6 + $0xfa0] sm:$0xf] }
 0x11d   : > { %v10231_v61 = vld [vmem:[#allocation6 + $0xdd8] sm:$0xf0]  ;;  %v9341_v17 = vld [vmem:[#allocation6 + $0x6a0] sm:$0xf] }
 0x11e   : > { %3621 = vmatpush.bf16.msrb.mxu3 %v10426_v26  ;;  %3596 = vmatpush.bf16.msrb.mxu1 %v9338_v35  ;;  %v12617_v3 = vld [vmem:[#allocation6 + $0x11c] sm:$0xf]  ;;  %v10234_v7 = vor.u32 %v13017_v60, %v10231_v61  ;;  %v13058_v25 = vld [vmem:[#allocation6 + $0xedc] sm:$0xf0] }
 0x11f   : > { %v8631_v4 = vld [vmem:[#allocation6 + $0x158] sm:$0xf0] }
 0x120   : > { %3609 = vmatpush.bf16.msrb.mxu2 %v9850_v36  ;;  %3584 = vmatpush.bf16.msrb.mxu0 %v8762_v47  ;;  %v12745_v5 = vld [vmem:[#allocation6 + $0x51c] sm:$0xf]  ;;  %v8634_v15 = vor.u32 %v12617_v3, %v8631_v4  ;;  %v3358_v43 = vpop.f32.mrf.mxu2  ;;  %v12690_v3 = vld [vmem:[#allocation6 + $0x35c] sm:$0xf0] }
 0x121   : > { %v9143_v8 = vld [vmem:[#allocation6 + $0x558] sm:$0xf0]  ;;  %v9405_v4 = vld [vmem:[#allocation6 + $0x720] sm:$0xf] }
 0x122   : > { %3622 = vmatpush.bf16.msrb.mxu3 %v10362_v40  ;;  %3597 = vmatpush.bf16.msrb.mxu1 %v9274_v49  ;;  %v12873_v9 = vld [vmem:[#allocation6 + $0x91c] sm:$0xf]  ;;  %v9146_v18 = vor.u32 %v12745_v5, %v9143_v8  ;;  %v3371_v48 = vpop.f32.mrf.mxu3  ;;  %v8957_v49 = vld [vmem:[#allocation6 + $0x3a0] sm:$0xf]  ;;  %v10494_v5 = vor.u32 %v13090_v59, %v10493_v58  ;;  %v9406_v12 = vor.u32 %v12818_v6, %v9405_v4 }
 0x123   : > { %v9655_v10 = vld [vmem:[#allocation6 + $0x958] sm:$0xf0]  ;;  %v12946_v8 = vld [vmem:[#allocation6 + $0xb5c] sm:$0xf0] }
 0x124   : > { %3610 = vmatpush.bf16.msrb.mxu2 %v9786_v50  ;;  %v13001_v13 = vld [vmem:[#allocation6 + $0xd1c] sm:$0xf]  ;;  %3585 = vmatpush.bf16.msrb.mxu0 %v8698_v62  ;;  %v9658_v19 = vor.u32 %v12873_v9, %v9655_v10  ;;  %v12706_v50 = vld [vmem:[#allocation6 + $0x3dc] sm:$0xf0]  ;;  %v9470_v62 = vor.u32 %v12834_v53, %v9469_v51 }
 0x125   : > { %v10167_v14 = vld [vmem:[#allocation6 + $0xd58] sm:$0xf0]  ;;  %v8958_v61 = vor.u32 %v12706_v50, %v8957_v49  ;;  %v10429_v9 = vld [vmem:[#allocation6 + $0xf20] sm:$0xf] }
 0x126   : > { %3623 = vmatpush.bf16.msrb.mxu3 %v10298_v56  ;;  %3598 = vmatpush.bf16.msrb.mxu1 %v9210_v63  ;;  %v12601_v20 = vld [vmem:[#allocation6 + $0x9c] sm:$0xf]  ;;  %v10170_v26 = vor.u32 %v13001_v13, %v10167_v14  ;;  %v12962_v56 = vld [vmem:[#allocation6 + $0xbdc] sm:$0xf0] }
 0x127   : > { %v8567_v23 = vld [vmem:[#allocation6 + $0xd8] sm:$0xf0]  ;;  %v9982_v63 = vor.u32 %v12962_v56, %v9981_v54  ;;  %v13074_v10 = vld [vmem:[#allocation6 + $0xf5c] sm:$0xf0] }
 0x128   : > { %3611 = vmatpush.bf16.msrb.mxu2 %v9722_v0  ;;  %v12729_v24 = vld [vmem:[#allocation6 + $0x49c] sm:$0xf]  ;;  %3586 = vmatpush.bf16.msrb.mxu0 %v8634_v15  ;;  %v8570_v34 = vor.u32 %v12601_v20, %v8567_v23  ;;  %v8893_v0 = vld [vmem:[#allocation6 + $0x320] sm:$0xf] }
 0x129   : > { %v9079_v27 = vld [vmem:[#allocation6 + $0x4d8] sm:$0xf0]  ;;  %v8894_v11 = vor.u32 %v12690_v3, %v8893_v0  ;;  %v8829_v14 = vld [vmem:[#allocation6 + $0x2a0] sm:$0xf] }
 0x12a   : > { %3624 = vmatpush.bf16.msrb.mxu3 %v10234_v7  ;;  %v12857_v28 = vld [vmem:[#allocation6 + $0x89c] sm:$0xf]  ;;  %3599 = vmatpush.bf16.msrb.mxu1 %v9146_v18  ;;  %v9082_v37 = vor.u32 %v12729_v24, %v9079_v27  ;;  %v9917_v7 = vld [vmem:[#allocation6 + $0xb20] sm:$0xf]  ;;  %v10430_v18 = vor.u32 %v13074_v10, %v10429_v9  ;;  %v4066_v9 = vrot.slane %v13843_v16, 4 }
 0x12b   : > { %v9591_v31 = vld [vmem:[#allocation6 + $0x8d8] sm:$0xf0]  ;;  %v9918_v13 = vor.u32 %v12946_v8, %v9917_v7  ;;  %v12674_v15 = vld [vmem:[#allocation6 + $0x2dc] sm:$0xf0] }
 0x12c   : > { %v12985_v32 = vld [vmem:[#allocation6 + $0xc9c] sm:$0xf]  ;;  %3612 = vmatpush.bf16.msrb.mxu2 %v9658_v19  ;;  %v9594_v38 = vor.u32 %v12857_v28, %v9591_v31  ;;  %3587 = vmatpush.bf16.msrb.mxu0 %v8570_v34  ;;  %v12802_v19 = vld [vmem:[#allocation6 + $0x6dc] sm:$0xf0] }
 0x12d   : > { %v10103_v33 = vld [vmem:[#allocation6 + $0xcd8] sm:$0xf0]  ;;  %v9853_v20 = vld [vmem:[#allocation6 + $0xaa0] sm:$0xf]  ;;  %v9342_v27 = vor.u32 %v12802_v19, %v9341_v17 }
 0x12e   : > { %v12585_v35 = vld [vmem:[#allocation6 + $0x1c] sm:$0xf]  ;;  %3625 = vmatpush.bf16.msrb.mxu3 %v10170_v26  ;;  %v10106_v44 = vor.u32 %v12985_v32, %v10103_v33  ;;  %3600 = vmatpush.bf16.msrb.mxu1 %v9082_v37  ;;  %v12930_v23 = vld [vmem:[#allocation6 + $0xadc] sm:$0xf0]  ;;  %v8830_v26 = vor.u32 %v12674_v15, %v8829_v14 }
 0x12f   : > { %v8503_v36 = vld [vmem:[#allocation6 + $0x58] sm:$0xf0]  ;;  %v10365_v24 = vld [vmem:[#allocation6 + $0xea0] sm:$0xf]  ;;  %v9854_v28 = vor.u32 %v12930_v23, %v9853_v20 }
 0x130   : > { %v12713_v39 = vld [vmem:[#allocation6 + $0x41c] sm:$0xf]  ;;  %v8506_v52 = vor.u32 %v12585_v35, %v8503_v36  ;;  %3613 = vmatpush.bf16.msrb.mxu2 %v9594_v38  ;;  %v8765_v31 = vld [vmem:[#allocation6 + $0x220] sm:$0xf]  ;;  %v10366_v34 = vor.u32 %v13058_v25, %v10365_v24 }
 0x131   : > { %v9015_v40 = vld [vmem:[#allocation6 + $0x458] sm:$0xf0]  ;;  %v12658_v32 = vld [vmem:[#allocation6 + $0x25c] sm:$0xf0] }
 0x132   : > { %v12841_v42 = vld [vmem:[#allocation6 + $0x81c] sm:$0xf]  ;;  %v9018_v2 = vor.u32 %v12713_v39, %v9015_v40  ;;  %3626 = vmatpush.bf16.msrb.mxu3 %v10106_v44  ;;  %3588 = vmatpush.bf16.msrb.mxu0 %v8506_v52  ;;  %v9277_v33 = vld [vmem:[#allocation6 + $0x620] sm:$0xf]  ;;  %v8766_v40 = vor.u32 %v12658_v32, %v8765_v31 }
 0x133   : > { %v9527_v45 = vld [vmem:[#allocation6 + $0x858] sm:$0xf0]  ;;  %v12786_v35 = vld [vmem:[#allocation6 + $0x65c] sm:$0xf0] }
 0x134   : > { %v12969_v46 = vld [vmem:[#allocation6 + $0xc1c] sm:$0xf]  ;;  %v9530_v57 = vor.u32 %v12841_v42, %v9527_v45  ;;  %3601 = vmatpush.bf16.msrb.mxu1 %v9018_v2  ;;  %v9789_v36 = vld [vmem:[#allocation6 + $0xa20] sm:$0xf]  ;;  %v3382_v42 = vpop.f32.mrf.mxu0  ;;  %v9278_v43 = vor.u32 %v12786_v35, %v9277_v33  ;;  %v3395_v45 = vpop.f32.mrf.mxu1 }
 0x135   : > { %v10039_v47 = vld [vmem:[#allocation6 + $0xc58] sm:$0xf0]  ;;  %3589 = vmatmul.bf16.vlgmr.msrb.gmra.mxu0 %v13805_v29  ;;  %v12914_v37 = vld [vmem:[#allocation6 + $0xa5c] sm:$0xf0]  ;;  %v3396_v50 = vadd.f32 %v3395_v45, %v3382_v42 }
 0x136   : > { %v10042_v60 = vor.u32 %v12969_v46, %v10039_v47  ;;  %3614 = vmatpush.bf16.msrb.mxu2 %v9530_v57  ;;  %3633 = vmatpush.bf16.msra.mxu0 %v8958_v61  ;;  %v10301_v38 = vld [vmem:[#allocation6 + $0xe20] sm:$0xf]  ;;  %v9790_v44 = vor.u32 %v12914_v37, %v9789_v36 }
 0x137   : > { %3602 = vmatmul.bf16.vlgmr.msrb.gmra.mxu1 %v13807_v30  ;;  %v13042_v39 = vld [vmem:[#allocation6 + $0xe5c] sm:$0xf0] }
 0x138   : > { %3627 = vmatpush.bf16.msrb.mxu3 %v10042_v60  ;;  %3646 = vmatpush.bf16.msra.mxu1 %v9470_v62  ;;  %v8701_v46 = vld [vmem:[#allocation6 + $0x1a0] sm:$0xf]  ;;  %v10302_v49 = vor.u32 %v13042_v39, %v10301_v38  ;;  %v3408_v59 = vpop.f32.mrf.mxu2 }
 0x139   : > { %3615 = vmatmul.bf16.vlgmr.msrb.gmra.mxu2 %v13801_v21  ;;  %v12642_v47 = vld [vmem:[#allocation6 + $0x1dc] sm:$0xf0]  ;;  %v3409_v0 = vadd.f32 %v3408_v59, %v3396_v50  ;;  %v9471_v50 = vld [vmem:[#allocation6 + $0x7e0] sm:$0xf0] }
 0x13a   : > { %3659 = vmatpush.bf16.msra.mxu2 %v9982_v63  ;;  %3634 = vmatpush.bf16.msra.mxu0 %v8894_v11  ;;  %v9213_v48 = vld [vmem:[#allocation6 + $0x5a0] sm:$0xf]  ;;  %v8702_v2 = vor.u32 %v12642_v47, %v8701_v46  ;;  %v3421_v3 = vpop.f32.mrf.mxu3  ;;  %v12698_v47 = vld [vmem:[#allocation6 + $0x3a4] sm:$0xf] }
 0x13b   : > { %3628 = vmatmul.bf16.vlgmr.msrb.gmra.mxu3 %v13803_v22  ;;  %v12770_v51 = vld [vmem:[#allocation6 + $0x5dc] sm:$0xf0]  ;;  %v3422_v10 = vadd.f32 %v3421_v3, %v3409_v0  ;;  %v9407_v3 = vld [vmem:[#allocation6 + $0x760] sm:$0xf0] }
 0x13c   : > { %3672 = vmatpush.bf16.msra.mxu3 %v10494_v5  ;;  %3647 = vmatpush.bf16.msra.mxu1 %v9406_v12  ;;  %v9725_v52 = vld [vmem:[#allocation6 + $0x9a0] sm:$0xf]  ;;  %v9214_v57 = vor.u32 %v12770_v51, %v9213_v48  ;;  %v3397_v20 = vpop.f32.mrf.mxu1  ;;  %v8959_v48 = vld [vmem:[#allocation6 + $0x3e0] sm:$0xf0] }
 0x13d   : > { %v12898_v53 = vld [vmem:[#allocation6 + $0x9dc] sm:$0xf0]  ;;  %v4067_v23 = vrot.slane %v3422_v10, 2  ;;  %v12954_v51 = vld [vmem:[#allocation6 + $0xba4] sm:$0xf] }
 0x13e   : > { %3660 = vmatpush.bf16.msra.mxu2 %v9918_v13  ;;  %3635 = vmatpush.bf16.msra.mxu0 %v8830_v26  ;;  %v10237_v54 = vld [vmem:[#allocation6 + $0xda0] sm:$0xf]  ;;  %v9726_v58 = vor.u32 %v12898_v53, %v9725_v52  ;;  %v3384_v13 = vpop.f32.mrf.mxu0  ;;  %v9983_v52 = vld [vmem:[#allocation6 + $0xbe0] sm:$0xf0] }
 0x13f   : > { %v13026_v56 = vld [vmem:[#allocation6 + $0xddc] sm:$0xf0]  ;;  %v12794_v13 = vld [vmem:[#allocation6 + $0x6a4] sm:$0xf] }
 0x140   : > { %3673 = vmatpush.bf16.msra.mxu3 %v10430_v18  ;;  %3648 = vmatpush.bf16.msra.mxu1 %v9342_v27  ;;  %v8637_v60 = vld [vmem:[#allocation6 + $0x120] sm:$0xf]  ;;  %v10238_v63 = vor.u32 %v13026_v56, %v10237_v54  ;;  %v13082_v56 = vld [vmem:[#allocation6 + $0xfa4] sm:$0xf] }
 0x141   : > { %v12626_v61 = vld [vmem:[#allocation6 + $0x15c] sm:$0xf0]  ;;  %v10367_v20 = vld [vmem:[#allocation6 + $0xee0] sm:$0xf0] }
 0x142   : > { %3661 = vmatpush.bf16.msra.mxu2 %v9854_v28  ;;  %3636 = vmatpush.bf16.msra.mxu0 %v8766_v40  ;;  %v9149_v62 = vld [vmem:[#allocation6 + $0x520] sm:$0xf]  ;;  %v8638_v11 = vor.u32 %v12626_v61, %v8637_v60  ;;  %v4080_v28 = vsel %vm4079_vm1, %v4066_v9, %v4067_v23  ;;  %v3410_v40 = vpop.f32.mrf.mxu2  ;;  %v3423_v46 = vpop.f32.mrf.mxu3  ;;  %v9986_v60 = vor.u32 %v12954_v51, %v9983_v52  ;;  %v12682_v61 = vld [vmem:[#allocation6 + $0x324] sm:$0xf] }
 0x143   : > { %v12754_v4 = vld [vmem:[#allocation6 + $0x55c] sm:$0xf0]  ;;  %v10239_v51 = vld [vmem:[#allocation6 + $0xde0] sm:$0xf0] }
 0x144   : > { %3674 = vmatpush.bf16.msra.mxu3 %v10366_v34  ;;  %3649 = vmatpush.bf16.msra.mxu1 %v9278_v43  ;;  %v9661_v5 = vld [vmem:[#allocation6 + $0x920] sm:$0xf]  ;;  %v9150_v14 = vor.u32 %v12754_v4, %v9149_v62  ;;  %v13853_v34 = vsel %vm4081_vm2, %v13837_v41, %v4080_v28  ;;  %v8895_v62 = vld [vmem:[#allocation6 + $0x360] sm:$0xf0] }
 0x145   : > { %v12882_v6 = vld [vmem:[#allocation6 + $0x95c] sm:$0xf0]  ;;  %v12938_v4 = vld [vmem:[#allocation6 + $0xb24] sm:$0xf] }
 0x146   : > { %3662 = vmatpush.bf16.msra.mxu2 %v9790_v44  ;;  %v10173_v7 = vld [vmem:[#allocation6 + $0xd20] sm:$0xf]  ;;  %3637 = vmatpush.bf16.msra.mxu0 %v8702_v2  ;;  %v9662_v15 = vor.u32 %v12882_v6, %v9661_v5  ;;  %v10495_v2 = vld [vmem:[#allocation6 + $0xfe0] sm:$0xf0] }
 0x147   : > { %v13010_v8 = vld [vmem:[#allocation6 + $0xd5c] sm:$0xf0]  ;;  %v10498_v0 = vor.u32 %v13082_v56, %v10495_v2  ;;  %v9919_v5 = vld [vmem:[#allocation6 + $0xb60] sm:$0xf0] }
 0x148   : > { %3675 = vmatpush.bf16.msra.mxu3 %v10302_v49  ;;  %v8573_v12 = vld [vmem:[#allocation6 + $0xa0] sm:$0xf]  ;;  %3650 = vmatpush.bf16.msra.mxu1 %v9214_v57  ;;  %v10174_v24 = vor.u32 %v13010_v8, %v10173_v7  ;;  %v12826_v49 = vld [vmem:[#allocation6 + $0x7a4] sm:$0xf]  ;;  %v8898_v8 = vor.u32 %v12682_v61, %v8895_v62  ;;  %v9922_v10 = vor.u32 %v12938_v4, %v9919_v5 }
 0x149   : > { %v12610_v17 = vld [vmem:[#allocation6 + $0xdc] sm:$0xf0]  ;;  %v9474_v59 = vor.u32 %v12826_v49, %v9471_v50  ;;  %v13066_v6 = vld [vmem:[#allocation6 + $0xf24] sm:$0xf] }
 0x14a   : > { %3663 = vmatpush.bf16.msra.mxu2 %v9726_v58  ;;  %v9085_v18 = vld [vmem:[#allocation6 + $0x4a0] sm:$0xf]  ;;  %3638 = vmatpush.bf16.msra.mxu0 %v8638_v11  ;;  %v8574_v31 = vor.u32 %v12610_v17, %v8573_v12  ;;  %v8962_v58 = vor.u32 %v12698_v47, %v8959_v48  ;;  %v10431_v7 = vld [vmem:[#allocation6 + $0xf60] sm:$0xf0] }
 0x14b   : > { %v12738_v19 = vld [vmem:[#allocation6 + $0x4dc] sm:$0xf0]  ;;  %v12666_v11 = vld [vmem:[#allocation6 + $0x2a4] sm:$0xf] }
 0x14c   : > { %3676 = vmatpush.bf16.msra.mxu3 %v10238_v63  ;;  %v9597_v25 = vld [vmem:[#allocation6 + $0x8a0] sm:$0xf]  ;;  %3651 = vmatpush.bf16.msra.mxu1 %v9150_v14  ;;  %v9086_v35 = vor.u32 %v12738_v19, %v9085_v18  ;;  %v12810_v63 = vld [vmem:[#allocation6 + $0x724] sm:$0xf]  ;;  %v10434_v14 = vor.u32 %v13066_v6, %v10431_v7 }
 0x14d   : > { %v12866_v16 = vld [vmem:[#allocation6 + $0x8dc] sm:$0xf0]  ;;  %v9410_v9 = vor.u32 %v12810_v63, %v9407_v3  ;;  %v8831_v12 = vld [vmem:[#allocation6 + $0x2e0] sm:$0xf0] }
 0x14e   : > { %v10109_v26 = vld [vmem:[#allocation6 + $0xca0] sm:$0xf]  ;;  %3664 = vmatpush.bf16.msra.mxu2 %v9662_v15  ;;  %v9598_v36 = vor.u32 %v12866_v16, %v9597_v25  ;;  %3639 = vmatpush.bf16.msra.mxu0 %v8574_v31  ;;  %v9343_v15 = vld [vmem:[#allocation6 + $0x6e0] sm:$0xf0]  ;;  %v8834_v23 = vor.u32 %v12666_v11, %v8831_v12 }
 0x14f   : > { %v12994_v27 = vld [vmem:[#allocation6 + $0xcdc] sm:$0xf0]  ;;  %v12922_v17 = vld [vmem:[#allocation6 + $0xaa4] sm:$0xf] }
 0x150   : > { %v8509_v32 = vld [vmem:[#allocation6 + $0x20] sm:$0xf]  ;;  %3677 = vmatpush.bf16.msra.mxu3 %v10174_v24  ;;  %v10110_v42 = vor.u32 %v12994_v27, %v10109_v26  ;;  %3652 = vmatpush.bf16.msra.mxu1 %v9086_v35  ;;  %v9855_v18 = vld [vmem:[#allocation6 + $0xae0] sm:$0xf0]  ;;  %v9346_v24 = vor.u32 %v12794_v13, %v9343_v15 }
 0x151   : > { %v12594_v33 = vld [vmem:[#allocation6 + $0x5c] sm:$0xf0]  ;;  %v13050_v19 = vld [vmem:[#allocation6 + $0xea4] sm:$0xf]  ;;  %v9858_v25 = vor.u32 %v12922_v17, %v9855_v18 }
 0x152   : > { %v9021_v37 = vld [vmem:[#allocation6 + $0x420] sm:$0xf]  ;;  %v8510_v41 = vor.u32 %v12594_v33, %v8509_v32  ;;  %3665 = vmatpush.bf16.msra.mxu2 %v9598_v36  ;;  %v12650_v16 = vld [vmem:[#allocation6 + $0x224] sm:$0xf]  ;;  %v10370_v28 = vor.u32 %v13050_v19, %v10367_v20 }
 0x153   : > { %v12722_v38 = vld [vmem:[#allocation6 + $0x45c] sm:$0xf0]  ;;  %v8767_v26 = vld [vmem:[#allocation6 + $0x260] sm:$0xf0] }
 0x154   : > { %v9533_v39 = vld [vmem:[#allocation6 + $0x820] sm:$0xf]  ;;  %v9022_v53 = vor.u32 %v12722_v38, %v9021_v37  ;;  %3678 = vmatpush.bf16.msra.mxu3 %v10110_v42  ;;  %3640 = vmatpush.bf16.msra.mxu0 %v8510_v41  ;;  %v12778_v27 = vld [vmem:[#allocation6 + $0x624] sm:$0xf]  ;;  %v8770_v37 = vor.u32 %v12650_v16, %v8767_v26  ;;  %v3434_v38 = vpop.f32.mrf.mxu0 }
 0x155   : > { %v12850_v43 = vld [vmem:[#allocation6 + $0x85c] sm:$0xf0]  ;;  %v9279_v31 = vld [vmem:[#allocation6 + $0x660] sm:$0xf0] }
 0x156   : > { %v10045_v44 = vld [vmem:[#allocation6 + $0xc20] sm:$0xf]  ;;  %v9534_v54 = vor.u32 %v12850_v43, %v9533_v39  ;;  %3653 = vmatpush.bf16.msra.mxu1 %v9022_v53  ;;  %v12906_v32 = vld [vmem:[#allocation6 + $0xa24] sm:$0xf]  ;;  %v9282_v39 = vor.u32 %v12778_v27, %v9279_v31 }
 0x157   : > { %v12978_v45 = vld [vmem:[#allocation6 + $0xc5c] sm:$0xf0]  ;;  %3641 = vmatmul.bf16.vlgmr.msra.gmra.mxu0 %v13805_v29  ;;  %v9791_v33 = vld [vmem:[#allocation6 + $0xa60] sm:$0xf0] }
 0x158   : > { %v10046_v57 = vor.u32 %v12978_v45, %v10045_v44  ;;  %3666 = vmatpush.bf16.msra.mxu2 %v9534_v54  ;;  %3685 = vmatpush.bf16.msrb.mxu0 %v8962_v58  ;;  %v13034_v35 = vld [vmem:[#allocation6 + $0xe24] sm:$0xf]  ;;  %v9794_v40 = vor.u32 %v12906_v32, %v9791_v33  ;;  %v3447_v45 = vpop.f32.mrf.mxu1  ;;  %v3460_v58 = vpop.f32.mrf.mxu2 }
 0x159   : > { %3654 = vmatmul.bf16.vlgmr.msra.gmra.mxu1 %v13807_v30  ;;  %v10303_v36 = vld [vmem:[#allocation6 + $0xe60] sm:$0xf0]  ;;  %v3448_v41 = vadd.f32 %v3447_v45, %v3434_v38  ;;  %v9989_v45 = vld [vmem:[#allocation6 + $0xba8] sm:$0xf] }
 0x15a   : > { %3679 = vmatpush.bf16.msra.mxu3 %v10046_v57  ;;  %3698 = vmatpush.bf16.msrb.mxu1 %v9474_v59  ;;  %v12634_v42 = vld [vmem:[#allocation6 + $0x1a4] sm:$0xf]  ;;  %v10306_v46 = vor.u32 %v13034_v35, %v10303_v36 }
 0x15b   : > { %3667 = vmatmul.bf16.vlgmr.msra.gmra.mxu2 %v13801_v21  ;;  %v8703_v43 = vld [vmem:[#allocation6 + $0x1e0] sm:$0xf0]  ;;  %v3461_v63 = vadd.f32 %v3460_v58, %v3448_v41  ;;  %v13091_v41 = vld [vmem:[#allocation6 + $0xfe4] sm:$0xf0] }
 0x15c   : > { %3711 = vmatpush.bf16.msrb.mxu2 %v9986_v60  ;;  %3686 = vmatpush.bf16.msrb.mxu0 %v8898_v8  ;;  %v12762_v44 = vld [vmem:[#allocation6 + $0x5a4] sm:$0xf]  ;;  %v8706_v52 = vor.u32 %v12634_v42, %v8703_v43  ;;  %v3436_v7 = vpop.f32.mrf.mxu0  ;;  %v9477_v42 = vld [vmem:[#allocation6 + $0x7a8] sm:$0xf] }
 0x15d   : > { %3680 = vmatmul.bf16.vlgmr.msra.gmra.mxu3 %v13803_v22  ;;  %v9215_v47 = vld [vmem:[#allocation6 + $0x5e0] sm:$0xf0]  ;;  %v12819_v58 = vld [vmem:[#allocation6 + $0x764] sm:$0xf0] }
 0x15e   : > { %3724 = vmatpush.bf16.msrb.mxu3 %v10498_v0  ;;  %3699 = vmatpush.bf16.msrb.mxu1 %v9410_v9  ;;  %v12890_v48 = vld [vmem:[#allocation6 + $0x9a4] sm:$0xf]  ;;  %v9218_v53 = vor.u32 %v12762_v44, %v9215_v47  ;;  %v3473_v0 = vpop.f32.mrf.mxu3  ;;  %v12835_v44 = vld [vmem:[#allocation6 + $0x7e4] sm:$0xf0] }
 0x15f   : > { %v9727_v49 = vld [vmem:[#allocation6 + $0x9e0] sm:$0xf0]  ;;  %v13859_v6 = vadd.f32 %v3473_v0, %v3461_v63  ;;  %v9349_v7 = vld [vmem:[#allocation6 + $0x6a8] sm:$0xf] }
 0x160   : > { %3712 = vmatpush.bf16.msrb.mxu2 %v9922_v10  ;;  %3687 = vmatpush.bf16.msrb.mxu0 %v8834_v23  ;;  %v13018_v50 = vld [vmem:[#allocation6 + $0xda4] sm:$0xf]  ;;  %v9730_v54 = vor.u32 %v12890_v48, %v9727_v49  ;;  %v3449_v13 = vpop.f32.mrf.mxu1  ;;  %v3462_v32 = vpop.f32.mrf.mxu2  ;;  %v10501_v49 = vld [vmem:[#allocation6 + $0xfa8] sm:$0xf] }
 0x161   : > { %v12618_v56 = vld [vmem:[#allocation6 + $0x124] sm:$0xf]  ;;  %v10242_v59 = vor.u32 %v13018_v50, %v10239_v51  ;;  %v13059_v13 = vld [vmem:[#allocation6 + $0xee4] sm:$0xf0] }
 0x162   : > { %3725 = vmatpush.bf16.msrb.mxu3 %v10434_v14  ;;  %3700 = vmatpush.bf16.msrb.mxu1 %v9346_v24  ;;  %v8639_v2 = vld [vmem:[#allocation6 + $0x160] sm:$0xf0] }
 0x163   : > { %v12746_v57 = vld [vmem:[#allocation6 + $0x524] sm:$0xf]  ;;  %v8642_v5 = vor.u32 %v12618_v56, %v8639_v2  ;;  %v12691_v56 = vld [vmem:[#allocation6 + $0x364] sm:$0xf0] }
 0x164   : > { %3713 = vmatpush.bf16.msrb.mxu2 %v9858_v25  ;;  %3688 = vmatpush.bf16.msrb.mxu0 %v8770_v37  ;;  %v9151_v60 = vld [vmem:[#allocation6 + $0x560] sm:$0xf0]  ;;  %v9413_v2 = vld [vmem:[#allocation6 + $0x728] sm:$0xf] }
 0x165   : > { %v12874_v61 = vld [vmem:[#allocation6 + $0x924] sm:$0xf]  ;;  %v9154_v8 = vor.u32 %v12746_v57, %v9151_v60  ;;  %v10502_v57 = vor.u32 %v13091_v41, %v10501_v49  ;;  %v12947_v60 = vld [vmem:[#allocation6 + $0xb64] sm:$0xf0]  ;;  %v9414_v0 = vor.u32 %v12819_v58, %v9413_v2 }
 0x166   : > { %3726 = vmatpush.bf16.msrb.mxu3 %v10370_v28  ;;  %3701 = vmatpush.bf16.msrb.mxu1 %v9282_v39  ;;  %v9663_v62 = vld [vmem:[#allocation6 + $0x960] sm:$0xf0]  ;;  %v3475_v38 = vpop.f32.mrf.mxu3  ;;  %v8965_v39 = vld [vmem:[#allocation6 + $0x3a8] sm:$0xf] }
 0x167   : > { %v13002_v3 = vld [vmem:[#allocation6 + $0xd24] sm:$0xf]  ;;  %v9666_v9 = vor.u32 %v12874_v61, %v9663_v62  ;;  %v10437_v61 = vld [vmem:[#allocation6 + $0xf28] sm:$0xf] }
 0x168   : > { %3714 = vmatpush.bf16.msrb.mxu2 %v9794_v40  ;;  %v10175_v4 = vld [vmem:[#allocation6 + $0xd60] sm:$0xf0]  ;;  %3689 = vmatpush.bf16.msrb.mxu0 %v8706_v52  ;;  %v12707_v40 = vld [vmem:[#allocation6 + $0x3e4] sm:$0xf0]  ;;  %v9478_v52 = vor.u32 %v12835_v44, %v9477_v42 }
 0x169   : > { %v12602_v10 = vld [vmem:[#allocation6 + $0xa4] sm:$0xf]  ;;  %v10178_v14 = vor.u32 %v13002_v3, %v10175_v4  ;;  %v8966_v51 = vor.u32 %v12707_v40, %v8965_v39  ;;  %v13075_v62 = vld [vmem:[#allocation6 + $0xf64] sm:$0xf0] }
 0x16a   : > { %3727 = vmatpush.bf16.msrb.mxu3 %v10306_v46  ;;  %3702 = vmatpush.bf16.msrb.mxu1 %v9218_v53  ;;  %v8575_v11 = vld [vmem:[#allocation6 + $0xe0] sm:$0xf0]  ;;  %v12963_v46 = vld [vmem:[#allocation6 + $0xbe4] sm:$0xf0] }
 0x16b   : > { %v12730_v12 = vld [vmem:[#allocation6 + $0x4a4] sm:$0xf]  ;;  %v8578_v23 = vor.u32 %v12602_v10, %v8575_v11  ;;  %v9990_v53 = vor.u32 %v12963_v46, %v9989_v45  ;;  %v8837_v4 = vld [vmem:[#allocation6 + $0x2a8] sm:$0xf] }
 0x16c   : > { %3715 = vmatpush.bf16.msrb.mxu2 %v9730_v54  ;;  %v9087_v15 = vld [vmem:[#allocation6 + $0x4e0] sm:$0xf0]  ;;  %3690 = vmatpush.bf16.msrb.mxu0 %v8642_v5  ;;  %v8901_v54 = vld [vmem:[#allocation6 + $0x328] sm:$0xf] }
 0x16d   : > { %v12858_v17 = vld [vmem:[#allocation6 + $0x8a4] sm:$0xf]  ;;  %v9090_v16 = vor.u32 %v12730_v12, %v9087_v15  ;;  %v8902_v63 = vor.u32 %v12691_v56, %v8901_v54  ;;  %v12675_v5 = vld [vmem:[#allocation6 + $0x2e4] sm:$0xf0] }
 0x16e   : > { %3728 = vmatpush.bf16.msrb.mxu3 %v10242_v59  ;;  %v9599_v18 = vld [vmem:[#allocation6 + $0x8e0] sm:$0xf0]  ;;  %3703 = vmatpush.bf16.msrb.mxu1 %v9154_v8  ;;  %v9925_v59 = vld [vmem:[#allocation6 + $0xb28] sm:$0xf]  ;;  %v10438_v8 = vor.u32 %v13075_v62, %v10437_v61 }
 0x16f   : > { %v12986_v19 = vld [vmem:[#allocation6 + $0xca4] sm:$0xf]  ;;  %v9602_v26 = vor.u32 %v12858_v17, %v9599_v18  ;;  %v9926_v3 = vor.u32 %v12947_v60, %v9925_v59  ;;  %v9861_v10 = vld [vmem:[#allocation6 + $0xaa8] sm:$0xf] }
 0x170   : > { %v10111_v20 = vld [vmem:[#allocation6 + $0xce0] sm:$0xf0]  ;;  %3716 = vmatpush.bf16.msrb.mxu2 %v9666_v9  ;;  %3691 = vmatpush.bf16.msrb.mxu0 %v8578_v23  ;;  %v12803_v9 = vld [vmem:[#allocation6 + $0x6e4] sm:$0xf0] }
 0x171   : > { %v12586_v24 = vld [vmem:[#allocation6 + $0x24] sm:$0xf]  ;;  %v10114_v33 = vor.u32 %v12986_v19, %v10111_v20  ;;  %v12931_v11 = vld [vmem:[#allocation6 + $0xae4] sm:$0xf0]  ;;  %v9350_v15 = vor.u32 %v12803_v9, %v9349_v7 }
 0x172   : > { %v8511_v25 = vld [vmem:[#allocation6 + $0x60] sm:$0xf0]  ;;  %3729 = vmatpush.bf16.msrb.mxu3 %v10178_v14  ;;  %3704 = vmatpush.bf16.msrb.mxu1 %v9090_v16  ;;  %v10373_v12 = vld [vmem:[#allocation6 + $0xea8] sm:$0xf]  ;;  %v8838_v14 = vor.u32 %v12675_v5, %v8837_v4  ;;  %v9862_v17 = vor.u32 %v12931_v11, %v9861_v10 }
 0x173   : > { %v12714_v27 = vld [vmem:[#allocation6 + $0x424] sm:$0xf]  ;;  %v8514_v43 = vor.u32 %v12586_v24, %v8511_v25  ;;  %v8773_v18 = vld [vmem:[#allocation6 + $0x228] sm:$0xf]  ;;  %v10374_v23 = vor.u32 %v13059_v13, %v10373_v12 }
 0x174   : > { %v9023_v28 = vld [vmem:[#allocation6 + $0x460] sm:$0xf0]  ;;  %3717 = vmatpush.bf16.msrb.mxu2 %v9602_v26  ;;  %v12659_v19 = vld [vmem:[#allocation6 + $0x264] sm:$0xf0] }
 0x175   : > { %v12842_v31 = vld [vmem:[#allocation6 + $0x824] sm:$0xf]  ;;  %v9026_v47 = vor.u32 %v12714_v27, %v9023_v28  ;;  %3692 = vmatpush.bf16.msrb.mxu0 %v8514_v43  ;;  %v9285_v20 = vld [vmem:[#allocation6 + $0x628] sm:$0xf]  ;;  %v8774_v28 = vor.u32 %v12659_v19, %v8773_v18 }
 0x176   : > { %v9535_v35 = vld [vmem:[#allocation6 + $0x860] sm:$0xf0]  ;;  %3730 = vmatpush.bf16.msrb.mxu3 %v10114_v33  ;;  %v12787_v24 = vld [vmem:[#allocation6 + $0x664] sm:$0xf0] }
 0x177   : > { %v12970_v36 = vld [vmem:[#allocation6 + $0xc24] sm:$0xf]  ;;  %v9538_v48 = vor.u32 %v12842_v31, %v9535_v35  ;;  %3705 = vmatpush.bf16.msrb.mxu1 %v9026_v47  ;;  %v9797_v25 = vld [vmem:[#allocation6 + $0xa28] sm:$0xf]  ;;  %v3486_v31 = vpop.f32.mrf.mxu0  ;;  %v9286_v32 = vor.u32 %v12787_v24, %v9285_v20  ;;  %v3499_v35 = vpop.f32.mrf.mxu1 }
 0x178   : > { %v10047_v37 = vld [vmem:[#allocation6 + $0xc60] sm:$0xf0]  ;;  %3693 = vmatmul.bf16.vlgmr.msrb.gmra.mxu0 %v13805_v29  ;;  %v12915_v16 = vld [vmem:[#allocation6 + $0xa64] sm:$0xf0]  ;;  %v3500_v40 = vadd.f32 %v3499_v35, %v3486_v31  ;;  %v3512_v41 = vpop.f32.mrf.mxu2 }
 0x179   : > { %v10050_v50 = vor.u32 %v12970_v36, %v10047_v37  ;;  %3718 = vmatpush.bf16.msrb.mxu2 %v9538_v48  ;;  %3737 = vmatpush.bf16.msra.mxu0 %v8966_v51  ;;  %v10309_v26 = vld [vmem:[#allocation6 + $0xe28] sm:$0xf]  ;;  %v9798_v33 = vor.u32 %v12915_v16, %v9797_v25 }
 0x17a   : > { %3706 = vmatmul.bf16.vlgmr.msrb.gmra.mxu1 %v13807_v30  ;;  %v13043_v27 = vld [vmem:[#allocation6 + $0xe64] sm:$0xf0]  ;;  %v3513_v54 = vadd.f32 %v3512_v41, %v3500_v40  ;;  %v3525_v56 = vpop.f32.mrf.mxu3  ;;  %v12955_v40 = vld [vmem:[#allocation6 + $0xbac] sm:$0xf] }
 0x17b   : > { %3731 = vmatpush.bf16.msrb.mxu3 %v10050_v50  ;;  %3750 = vmatpush.bf16.msra.mxu1 %v9478_v52  ;;  %v8709_v36 = vld [vmem:[#allocation6 + $0x1a8] sm:$0xf]  ;;  %v10310_v39 = vor.u32 %v13043_v27, %v10309_v26 }
 0x17c   : > { %3719 = vmatmul.bf16.vlgmr.msrb.gmra.mxu2 %v13801_v21  ;;  %v12643_v37 = vld [vmem:[#allocation6 + $0x1e4] sm:$0xf0]  ;;  %v3526_v61 = vadd.f32 %v3525_v56, %v3513_v54  ;;  %v9415_v54 = vld [vmem:[#allocation6 + $0x768] sm:$0xf0] }
 0x17d   : > { %3763 = vmatpush.bf16.msra.mxu2 %v9990_v53  ;;  %3738 = vmatpush.bf16.msra.mxu0 %v8902_v63  ;;  %v9221_v38 = vld [vmem:[#allocation6 + $0x5a8] sm:$0xf]  ;;  %v8710_v47 = vor.u32 %v12643_v37, %v8709_v36  ;;  %v8967_v36 = vld [vmem:[#allocation6 + $0x3e8] sm:$0xf0] }
 0x17e   : > { %3732 = vmatmul.bf16.vlgmr.msrb.gmra.mxu3 %v13803_v22  ;;  %v12771_v42 = vld [vmem:[#allocation6 + $0x5e4] sm:$0xf0]  ;;  %v4068_v10 = vrot.slane %v3526_v61, 6  ;;  %v12827_v37 = vld [vmem:[#allocation6 + $0x7ac] sm:$0xf] }
 0x17f   : > { %3776 = vmatpush.bf16.msra.mxu3 %v10502_v57  ;;  %3751 = vmatpush.bf16.msra.mxu1 %v9414_v0  ;;  %v9733_v43 = vld [vmem:[#allocation6 + $0x9a8] sm:$0xf]  ;;  %v9222_v48 = vor.u32 %v12771_v42, %v9221_v38  ;;  %v3488_v0 = vpop.f32.mrf.mxu0  ;;  %v3501_v9 = vpop.f32.mrf.mxu1  ;;  %v9991_v42 = vld [vmem:[#allocation6 + $0xbe8] sm:$0xf0] }
 0x180   : > { %v12899_v44 = vld [vmem:[#allocation6 + $0x9e4] sm:$0xf0]  ;;  %v3514_v27 = vpop.f32.mrf.mxu2  ;;  %v9994_v41 = vor.u32 %v12955_v40, %v9991_v42  ;;  %v12939_v56 = vld [vmem:[#allocation6 + $0xb2c] sm:$0xf] }
 0x181   : > { %3764 = vmatpush.bf16.msra.mxu2 %v9926_v3  ;;  %3739 = vmatpush.bf16.msra.mxu0 %v8838_v14  ;;  %v10245_v45 = vld [vmem:[#allocation6 + $0xda8] sm:$0xf]  ;;  %v9734_v49 = vor.u32 %v12899_v44, %v9733_v43  ;;  %v12795_v0 = vld [vmem:[#allocation6 + $0x6ac] sm:$0xf] }
 0x182   : > { %v13027_v46 = vld [vmem:[#allocation6 + $0xde4] sm:$0xf0]  ;;  %v3527_v35 = vpop.f32.mrf.mxu3  ;;  %v10375_v9 = vld [vmem:[#allocation6 + $0xee8] sm:$0xf0] }
 0x183   : > { %3777 = vmatpush.bf16.msra.mxu3 %v10438_v8  ;;  %3752 = vmatpush.bf16.msra.mxu1 %v9350_v15  ;;  %v8645_v50 = vld [vmem:[#allocation6 + $0x128] sm:$0xf]  ;;  %v10246_v53 = vor.u32 %v13027_v46, %v10245_v45  ;;  %v13083_v45 = vld [vmem:[#allocation6 + $0xfac] sm:$0xf] }
 0x184   : > { %v12627_v51 = vld [vmem:[#allocation6 + $0x164] sm:$0xf0]  ;;  %v10503_v46 = vld [vmem:[#allocation6 + $0xfe8] sm:$0xf0] }
 0x185   : > { %3765 = vmatpush.bf16.msra.mxu2 %v9862_v17  ;;  %3740 = vmatpush.bf16.msra.mxu0 %v8774_v28  ;;  %v9157_v52 = vld [vmem:[#allocation6 + $0x528] sm:$0xf]  ;;  %v8646_v62 = vor.u32 %v12627_v51, %v8645_v50  ;;  %v13867_v17 = vsel %vm4077_vm0, %v13859_v6, %v4068_v10  ;;  %v12699_v6 = vld [vmem:[#allocation6 + $0x3ac] sm:$0xf] }
 0x186   : > { %v12755_v2 = vld [vmem:[#allocation6 + $0x564] sm:$0xf0]  ;;  %v12683_v50 = vld [vmem:[#allocation6 + $0x32c] sm:$0xf] }
 0x187   : > { %3778 = vmatpush.bf16.msra.mxu3 %v10374_v23  ;;  %3753 = vmatpush.bf16.msra.mxu1 %v9286_v32  ;;  %v9669_v57 = vld [vmem:[#allocation6 + $0x928] sm:$0xf]  ;;  %v9158_v3 = vor.u32 %v12755_v2, %v9157_v52  ;;  %v8903_v51 = vld [vmem:[#allocation6 + $0x368] sm:$0xf0] }
 0x188   : > { %v12883_v58 = vld [vmem:[#allocation6 + $0x964] sm:$0xf0]  ;;  %v12811_v52 = vld [vmem:[#allocation6 + $0x72c] sm:$0xf] }
 0x189   : > { %3766 = vmatpush.bf16.msra.mxu2 %v9798_v33  ;;  %v10181_v59 = vld [vmem:[#allocation6 + $0xd28] sm:$0xf]  ;;  %3741 = vmatpush.bf16.msra.mxu0 %v8710_v47  ;;  %v9670_v4 = vor.u32 %v12883_v58, %v9669_v57  ;;  %v9927_v2 = vld [vmem:[#allocation6 + $0xb68] sm:$0xf0] }
 0x18a   : > { %v13011_v60 = vld [vmem:[#allocation6 + $0xd64] sm:$0xf0]  ;;  %v13067_v57 = vld [vmem:[#allocation6 + $0xf2c] sm:$0xf]  ;;  %v9930_v61 = vor.u32 %v12939_v56, %v9927_v2 }
 0x18b   : > { %3779 = vmatpush.bf16.msra.mxu3 %v10310_v39  ;;  %v8581_v63 = vld [vmem:[#allocation6 + $0xa8] sm:$0xf]  ;;  %3754 = vmatpush.bf16.msra.mxu1 %v9222_v48  ;;  %v10182_v11 = vor.u32 %v13011_v60, %v10181_v59  ;;  %v9479_v39 = vld [vmem:[#allocation6 + $0x7e8] sm:$0xf0]  ;;  %v8970_v48 = vor.u32 %v12699_v6, %v8967_v36  ;;  %v8906_v59 = vor.u32 %v12683_v50, %v8903_v51 }
 0x18c   : > { %v12611_v5 = vld [vmem:[#allocation6 + $0xe4] sm:$0xf0]  ;;  %v10439_v58 = vld [vmem:[#allocation6 + $0xf68] sm:$0xf0]  ;;  %v9418_v60 = vor.u32 %v12811_v52, %v9415_v54 }
 0x18d   : > { %3767 = vmatpush.bf16.msra.mxu2 %v9734_v49  ;;  %v9093_v7 = vld [vmem:[#allocation6 + $0x4a8] sm:$0xf]  ;;  %3742 = vmatpush.bf16.msra.mxu0 %v8646_v62  ;;  %v8582_v18 = vor.u32 %v12611_v5, %v8581_v63  ;;  %v9482_v49 = vor.u32 %v12827_v37, %v9479_v39  ;;  %v12667_v62 = vld [vmem:[#allocation6 + $0x2ac] sm:$0xf] }
 0x18e   : > { %v12739_v8 = vld [vmem:[#allocation6 + $0x4e4] sm:$0xf0]  ;;  %v8839_v63 = vld [vmem:[#allocation6 + $0x2e8] sm:$0xf0] }
 0x18f   : > { %3780 = vmatpush.bf16.msra.mxu3 %v10246_v53  ;;  %v9605_v12 = vld [vmem:[#allocation6 + $0x8a8] sm:$0xf]  ;;  %3755 = vmatpush.bf16.msra.mxu1 %v9158_v3  ;;  %v9094_v23 = vor.u32 %v12739_v8, %v9093_v7  ;;  %v10506_v53 = vor.u32 %v13083_v45, %v10503_v46  ;;  %v10442_v3 = vor.u32 %v13067_v57, %v10439_v58  ;;  %v12923_v5 = vld [vmem:[#allocation6 + $0xaac] sm:$0xf] }
 0x190   : > { %v12867_v13 = vld [vmem:[#allocation6 + $0x8e4] sm:$0xf0]  ;;  %v9863_v7 = vld [vmem:[#allocation6 + $0xae8] sm:$0xf0]  ;;  %v8842_v10 = vor.u32 %v12667_v62, %v8839_v63 }
 0x191   : > { %v10117_v14 = vld [vmem:[#allocation6 + $0xca8] sm:$0xf]  ;;  %3768 = vmatpush.bf16.msra.mxu2 %v9670_v4  ;;  %v9606_v24 = vor.u32 %v12867_v13, %v9605_v12  ;;  %3743 = vmatpush.bf16.msra.mxu0 %v8582_v18  ;;  %v9351_v4 = vld [vmem:[#allocation6 + $0x6e8] sm:$0xf0]  ;;  %v9866_v12 = vor.u32 %v12923_v5, %v9863_v7 }
 0x192   : > { %v12995_v15 = vld [vmem:[#allocation6 + $0xce4] sm:$0xf0]  ;;  %v13051_v8 = vld [vmem:[#allocation6 + $0xeac] sm:$0xf]  ;;  %v3551_v35 = vpop.f32.mrf.mxu1 }
 0x193   : > { %v8517_v19 = vld [vmem:[#allocation6 + $0x28] sm:$0xf]  ;;  %3781 = vmatpush.bf16.msra.mxu3 %v10182_v11  ;;  %v10118_v28 = vor.u32 %v12995_v15, %v10117_v14  ;;  %3756 = vmatpush.bf16.msra.mxu1 %v9094_v23  ;;  %v9354_v11 = vor.u32 %v12795_v0, %v9351_v4  ;;  %v12651_v13 = vld [vmem:[#allocation6 + $0x22c] sm:$0xf]  ;;  %v10378_v18 = vor.u32 %v13051_v8, %v10375_v9 }
 0x194   : > { %v12595_v20 = vld [vmem:[#allocation6 + $0x64] sm:$0xf0]  ;;  %v8775_v14 = vld [vmem:[#allocation6 + $0x268] sm:$0xf0] }
 0x195   : > { %v9029_v25 = vld [vmem:[#allocation6 + $0x428] sm:$0xf]  ;;  %v8518_v38 = vor.u32 %v12595_v20, %v8517_v19  ;;  %3769 = vmatpush.bf16.msra.mxu2 %v9606_v24  ;;  %v12779_v15 = vld [vmem:[#allocation6 + $0x62c] sm:$0xf] }
 0x196   : > { %v12723_v16 = vld [vmem:[#allocation6 + $0x464] sm:$0xf0]  ;;  %v9287_v19 = vld [vmem:[#allocation6 + $0x668] sm:$0xf0] }
 0x197   : > { %v9541_v26 = vld [vmem:[#allocation6 + $0x828] sm:$0xf]  ;;  %v9030_v43 = vor.u32 %v12723_v16, %v9029_v25  ;;  %3782 = vmatpush.bf16.msra.mxu3 %v10118_v28  ;;  %3744 = vmatpush.bf16.msra.mxu0 %v8518_v38  ;;  %v12907_v20 = vld [vmem:[#allocation6 + $0xa2c] sm:$0xf]  ;;  %v8778_v16 = vor.u32 %v12651_v13, %v8775_v14  ;;  %v9290_v27 = vor.u32 %v12779_v15, %v9287_v19 }
 0x198   : > { %v12851_v31 = vld [vmem:[#allocation6 + $0x864] sm:$0xf0]  ;;  %v9799_v23 = vld [vmem:[#allocation6 + $0xa68] sm:$0xf0] }
 0x199   : > { %v10053_v32 = vld [vmem:[#allocation6 + $0xc28] sm:$0xf]  ;;  %v9542_v44 = vor.u32 %v12851_v31, %v9541_v26  ;;  %3757 = vmatpush.bf16.msra.mxu1 %v9030_v43  ;;  %v13035_v24 = vld [vmem:[#allocation6 + $0xe2c] sm:$0xf]  ;;  %v3538_v26 = vpop.f32.mrf.mxu0  ;;  %v9802_v28 = vor.u32 %v12907_v20, %v9799_v23 }
 0x19a   : > { %v12979_v33 = vld [vmem:[#allocation6 + $0xc64] sm:$0xf0]  ;;  %3745 = vmatmul.bf16.vlgmr.msra.gmra.mxu0 %v13805_v29  ;;  %v10311_v25 = vld [vmem:[#allocation6 + $0xe68] sm:$0xf0]  ;;  %v3552_v39 = vadd.f32 %v3551_v35, %v3538_v26  ;;  %v12836_v35 = vld [vmem:[#allocation6 + $0x7ec] sm:$0xf0] }
 0x19b   : > { %v10054_v47 = vor.u32 %v12979_v33, %v10053_v32  ;;  %3770 = vmatpush.bf16.msra.mxu2 %v9542_v44  ;;  %3789 = vmatpush.bf16.msrb.mxu0 %v8970_v48  ;;  %v12635_v31 = vld [vmem:[#allocation6 + $0x1ac] sm:$0xf]  ;;  %v10314_v6 = vor.u32 %v13035_v24, %v10311_v25 }
 0x19c   : > { %3758 = vmatmul.bf16.vlgmr.msra.gmra.mxu1 %v13807_v30  ;;  %v8711_v32 = vld [vmem:[#allocation6 + $0x1e8] sm:$0xf0]  ;;  %v3577_v54 = vpop.f32.mrf.mxu3 }
 0x19d   : > { %3783 = vmatpush.bf16.msra.mxu3 %v10054_v47  ;;  %3802 = vmatpush.bf16.msrb.mxu1 %v9482_v49  ;;  %v12763_v33 = vld [vmem:[#allocation6 + $0x5ac] sm:$0xf]  ;;  %v8714_v43 = vor.u32 %v12635_v31, %v8711_v32  ;;  %v3564_v49 = vpop.f32.mrf.mxu2  ;;  %v12708_v31 = vld [vmem:[#allocation6 + $0x3ec] sm:$0xf0] }
 0x19e   : > { %3771 = vmatmul.bf16.vlgmr.msra.gmra.mxu2 %v13801_v21  ;;  %v9223_v36 = vld [vmem:[#allocation6 + $0x5e8] sm:$0xf0]  ;;  %v9485_v32 = vld [vmem:[#allocation6 + $0x7b0] sm:$0xf] }
 0x19f   : > { %3815 = vmatpush.bf16.msrb.mxu2 %v9994_v41  ;;  %3790 = vmatpush.bf16.msrb.mxu0 %v8906_v59  ;;  %v12891_v37 = vld [vmem:[#allocation6 + $0x9ac] sm:$0xf]  ;;  %v9226_v44 = vor.u32 %v12763_v33, %v9223_v36  ;;  %v12964_v36 = vld [vmem:[#allocation6 + $0xbec] sm:$0xf0] }
 0x1a0   : > { %3784 = vmatmul.bf16.vlgmr.msra.gmra.mxu3 %v13803_v22  ;;  %v9735_v38 = vld [vmem:[#allocation6 + $0x9e8] sm:$0xf0] }
 0x1a1   : > { %3828 = vmatpush.bf16.msrb.mxu3 %v10506_v53  ;;  %3803 = vmatpush.bf16.msrb.mxu1 %v9418_v60  ;;  %v13019_v40 = vld [vmem:[#allocation6 + $0xdac] sm:$0xf]  ;;  %v9738_v45 = vor.u32 %v12891_v37, %v9735_v38  ;;  %v3565_v53 = vadd.f32 %v3564_v49, %v3552_v39  ;;  %v3540_v59 = vpop.f32.mrf.mxu0  ;;  %v10509_v39 = vld [vmem:[#allocation6 + $0xfb0] sm:$0xf] }
 0x1a2   : > { %v10247_v42 = vld [vmem:[#allocation6 + $0xde8] sm:$0xf0]  ;;  %v12676_v59 = vld [vmem:[#allocation6 + $0x2ec] sm:$0xf0] }
 0x1a3   : > { %3816 = vmatpush.bf16.msrb.mxu2 %v9930_v61  ;;  %3791 = vmatpush.bf16.msrb.mxu0 %v8842_v10  ;;  %v12619_v46 = vld [vmem:[#allocation6 + $0x12c] sm:$0xf]  ;;  %v10250_v41 = vor.u32 %v13019_v40, %v10247_v42  ;;  %v13873_v58 = vadd.f32 %v3577_v54, %v3565_v53  ;;  %v13092_v40 = vld [vmem:[#allocation6 + $0xfec] sm:$0xf0] }
 0x1a4   : > { %v8647_v47 = vld [vmem:[#allocation6 + $0x168] sm:$0xf0]  ;;  %v10510_v49 = vor.u32 %v13092_v40, %v10509_v39  ;;  %v13076_v53 = vld [vmem:[#allocation6 + $0xf6c] sm:$0xf0] }
 0x1a5   : > { %3829 = vmatpush.bf16.msrb.mxu3 %v10442_v3  ;;  %3804 = vmatpush.bf16.msrb.mxu1 %v9354_v11  ;;  %v12747_v48 = vld [vmem:[#allocation6 + $0x52c] sm:$0xf]  ;;  %v8650_v57 = vor.u32 %v12619_v46, %v8647_v47  ;;  %v3553_v3 = vpop.f32.mrf.mxu1  ;;  %v3566_v23 = vpop.f32.mrf.mxu2  ;;  %v8909_v46 = vld [vmem:[#allocation6 + $0x330] sm:$0xf] }
 0x1a6   : > { %v9159_v50 = vld [vmem:[#allocation6 + $0x568] sm:$0xf0]  ;;  %v12692_v47 = vld [vmem:[#allocation6 + $0x36c] sm:$0xf0] }
 0x1a7   : > { %3817 = vmatpush.bf16.msrb.mxu2 %v9866_v12  ;;  %3792 = vmatpush.bf16.msrb.mxu0 %v8778_v16  ;;  %v12875_v51 = vld [vmem:[#allocation6 + $0x92c] sm:$0xf]  ;;  %v9162_v60 = vor.u32 %v12747_v48, %v9159_v50  ;;  %v9421_v48 = vld [vmem:[#allocation6 + $0x730] sm:$0xf]  ;;  %v8910_v54 = vor.u32 %v12692_v47, %v8909_v46 }
 0x1a8   : > { %v9671_v52 = vld [vmem:[#allocation6 + $0x968] sm:$0xf0]  ;;  %v9933_v50 = vld [vmem:[#allocation6 + $0xb30] sm:$0xf] }
 0x1a9   : > { %3830 = vmatpush.bf16.msrb.mxu3 %v10378_v18  ;;  %3805 = vmatpush.bf16.msrb.mxu1 %v9290_v27  ;;  %v13003_v56 = vld [vmem:[#allocation6 + $0xd2c] sm:$0xf]  ;;  %v9674_v61 = vor.u32 %v12875_v51, %v9671_v52  ;;  %v3579_v27 = vpop.f32.mrf.mxu3  ;;  %v12948_v51 = vld [vmem:[#allocation6 + $0xb6c] sm:$0xf0] }
 0x1aa   : > { %v10183_v2 = vld [vmem:[#allocation6 + $0xd68] sm:$0xf0]  ;;  %v10445_v52 = vld [vmem:[#allocation6 + $0xf30] sm:$0xf] }
 0x1ab   : > { %3818 = vmatpush.bf16.msrb.mxu2 %v9802_v28  ;;  %3793 = vmatpush.bf16.msrb.mxu0 %v8714_v43  ;;  %v12603_v62 = vld [vmem:[#allocation6 + $0xac] sm:$0xf]  ;;  %v10186_v4 = vor.u32 %v13003_v56, %v10183_v2  ;;  %v8973_v28 = vld [vmem:[#allocation6 + $0x3b0] sm:$0xf]  ;;  %v9934_v2 = vor.u32 %v12948_v51, %v9933_v50 }
 0x1ac   : > { %v8583_v63 = vld [vmem:[#allocation6 + $0xe8] sm:$0xf0]  ;;  %v8974_v43 = vor.u32 %v12708_v31, %v8973_v28  ;;  %v10381_v3 = vld [vmem:[#allocation6 + $0xeb0] sm:$0xf] }
 0x1ad   : > { %3831 = vmatpush.bf16.msrb.mxu3 %v10314_v6  ;;  %3806 = vmatpush.bf16.msrb.mxu1 %v9226_v44  ;;  %v12731_v0 = vld [vmem:[#allocation6 + $0x4ac] sm:$0xf]  ;;  %v8586_v11 = vor.u32 %v12603_v62, %v8583_v63  ;;  %v9997_v6 = vld [vmem:[#allocation6 + $0xbb0] sm:$0xf]  ;;  %v9486_v44 = vor.u32 %v12836_v35, %v9485_v32 }
 0x1ae   : > { %v9095_v5 = vld [vmem:[#allocation6 + $0x4e8] sm:$0xf0]  ;;  %v12804_v62 = vld [vmem:[#allocation6 + $0x6ec] sm:$0xf0] }
 0x1af   : > { %3819 = vmatpush.bf16.msrb.mxu2 %v9738_v45  ;;  %v12859_v7 = vld [vmem:[#allocation6 + $0x8ac] sm:$0xf]  ;;  %3794 = vmatpush.bf16.msrb.mxu0 %v8650_v57  ;;  %v9098_v14 = vor.u32 %v12731_v0, %v9095_v5  ;;  %v9998_v45 = vor.u32 %v12964_v36, %v9997_v6  ;;  %v8845_v57 = vld [vmem:[#allocation6 + $0x2b0] sm:$0xf] }
 0x1b0   : > { %v9607_v8 = vld [vmem:[#allocation6 + $0x8e8] sm:$0xf0]  ;;  %v9869_v63 = vld [vmem:[#allocation6 + $0xab0] sm:$0xf]  ;;  %v8846_v5 = vor.u32 %v12676_v59, %v8845_v57 }
 0x1b1   : > { %3832 = vmatpush.bf16.msrb.mxu3 %v10250_v41  ;;  %v12987_v9 = vld [vmem:[#allocation6 + $0xcac] sm:$0xf]  ;;  %3807 = vmatpush.bf16.msrb.mxu1 %v9162_v60  ;;  %v9610_v15 = vor.u32 %v12859_v7, %v9607_v8  ;;  %v12820_v41 = vld [vmem:[#allocation6 + $0x76c] sm:$0xf0] }
 0x1b2   : > { %v10119_v10 = vld [vmem:[#allocation6 + $0xce8] sm:$0xf0]  ;;  %v9422_v56 = vor.u32 %v12820_v41, %v9421_v48  ;;  %v9357_v60 = vld [vmem:[#allocation6 + $0x6b0] sm:$0xf]  ;;  %v3590_v23 = vpop.f32.mrf.mxu0 }
 0x1b3   : > { %v12587_v12 = vld [vmem:[#allocation6 + $0x2c] sm:$0xf]  ;;  %3820 = vmatpush.bf16.msrb.mxu2 %v9674_v61  ;;  %v10122_v24 = vor.u32 %v12987_v9, %v10119_v10  ;;  %3795 = vmatpush.bf16.msrb.mxu0 %v8586_v11  ;;  %v10446_v61 = vor.u32 %v13076_v53, %v10445_v52  ;;  %v12932_v0 = vld [vmem:[#allocation6 + $0xaec] sm:$0xf0]  ;;  %v9358_v7 = vor.u32 %v12804_v62, %v9357_v60 }
 0x1b4   : > { %v8519_v13 = vld [vmem:[#allocation6 + $0x68] sm:$0xf0]  ;;  %v9870_v8 = vor.u32 %v12932_v0, %v9869_v63  ;;  %v8781_v9 = vld [vmem:[#allocation6 + $0x230] sm:$0xf]  ;;  %v4069_v0 = vrot.slane %v13873_v58, 4 }
 0x1b5   : > { %v12715_v18 = vld [vmem:[#allocation6 + $0x42c] sm:$0xf]  ;;  %3833 = vmatpush.bf16.msrb.mxu3 %v10186_v4  ;;  %v8522_v33 = vor.u32 %v12587_v12, %v8519_v13  ;;  %3808 = vmatpush.bf16.msrb.mxu1 %v9098_v14  ;;  %v13060_v4 = vld [vmem:[#allocation6 + $0xeec] sm:$0xf0] }
 0x1b6   : > { %v9031_v19 = vld [vmem:[#allocation6 + $0x468] sm:$0xf0]  ;;  %v12660_v10 = vld [vmem:[#allocation6 + $0x26c] sm:$0xf0]  ;;  %v10382_v12 = vor.u32 %v13060_v4, %v10381_v3 }
 0x1b7   : > { %v12843_v20 = vld [vmem:[#allocation6 + $0x82c] sm:$0xf]  ;;  %3821 = vmatpush.bf16.msrb.mxu2 %v9610_v15  ;;  %v9034_v37 = vor.u32 %v12715_v18, %v9031_v19  ;;  %3796 = vmatpush.bf16.msrb.mxu0 %v8522_v33  ;;  %v9293_v11 = vld [vmem:[#allocation6 + $0x630] sm:$0xf] }
 0x1b8   : > { %v9543_v25 = vld [vmem:[#allocation6 + $0x868] sm:$0xf0]  ;;  %v12788_v13 = vld [vmem:[#allocation6 + $0x66c] sm:$0xf0] }
 0x1b9   : > { %v12971_v16 = vld [vmem:[#allocation6 + $0xc2c] sm:$0xf]  ;;  %v9546_v38 = vor.u32 %v12843_v20, %v9543_v25  ;;  %3834 = vmatpush.bf16.msrb.mxu3 %v10122_v24  ;;  %3809 = vmatpush.bf16.msrb.mxu1 %v9034_v37  ;;  %v9805_v14 = vld [vmem:[#allocation6 + $0xa30] sm:$0xf]  ;;  %v8782_v20 = vor.u32 %v12660_v10, %v8781_v9  ;;  %v9294_v24 = vor.u32 %v12788_v13, %v9293_v11 }
 0x1ba   : > { %v10055_v26 = vld [vmem:[#allocation6 + $0xc68] sm:$0xf0]  ;;  %3797 = vmatmul.bf16.vlgmr.msrb.gmra.mxu0 %v13805_v29  ;;  %v12916_v15 = vld [vmem:[#allocation6 + $0xa6c] sm:$0xf0] }
 0x1bb   : > { %v10058_v42 = vor.u32 %v12971_v16, %v10055_v26  ;;  %3822 = vmatpush.bf16.msrb.mxu2 %v9546_v38  ;;  %3841 = vmatpush.bf16.msra.mxu0 %v8974_v43  ;;  %v10317_v18 = vld [vmem:[#allocation6 + $0xe30] sm:$0xf]  ;;  %v9806_v25 = vor.u32 %v12916_v15, %v9805_v14  ;;  %v3603_v16 = vpop.f32.mrf.mxu1 }
 0x1bc   : > { %3810 = vmatmul.bf16.vlgmr.msrb.gmra.mxu1 %v13807_v30  ;;  %v13044_v19 = vld [vmem:[#allocation6 + $0xe6c] sm:$0xf0]  ;;  %v3604_v32 = vadd.f32 %v3603_v16, %v3590_v23 }
 0x1bd   : > { %3835 = vmatpush.bf16.msrb.mxu3 %v10058_v42  ;;  %3854 = vmatpush.bf16.msra.mxu1 %v9486_v44  ;;  %v8717_v26 = vld [vmem:[#allocation6 + $0x1b0] sm:$0xf]  ;;  %v10318_v31 = vor.u32 %v13044_v19, %v10317_v18  ;;  %v3616_v42 = vpop.f32.mrf.mxu2 }
 0x1be   : > { %3823 = vmatmul.bf16.vlgmr.msrb.gmra.mxu2 %v13801_v21  ;;  %v12644_v27 = vld [vmem:[#allocation6 + $0x1ec] sm:$0xf0]  ;;  %v3617_v47 = vadd.f32 %v3616_v42, %v3604_v32  ;;  %v3629_v48 = vpop.f32.mrf.mxu3  ;;  %v12828_v32 = vld [vmem:[#allocation6 + $0x7b4] sm:$0xf] }
 0x1bf   : > { %3867 = vmatpush.bf16.msra.mxu2 %v9998_v45  ;;  %3842 = vmatpush.bf16.msra.mxu0 %v8910_v54  ;;  %v9229_v28 = vld [vmem:[#allocation6 + $0x5b0] sm:$0xf]  ;;  %v8718_v38 = vor.u32 %v12644_v27, %v8717_v26 }
 0x1c0   : > { %3836 = vmatmul.bf16.vlgmr.msrb.gmra.mxu3 %v13803_v22  ;;  %v12772_v33 = vld [vmem:[#allocation6 + $0x5ec] sm:$0xf0]  ;;  %v3630_v53 = vadd.f32 %v3629_v48, %v3617_v47  ;;  %v12812_v47 = vld [vmem:[#allocation6 + $0x734] sm:$0xf] }
 0x1c1   : > { %3880 = vmatpush.bf16.msra.mxu3 %v10510_v49  ;;  %3855 = vmatpush.bf16.msra.mxu1 %v9422_v56  ;;  %v9741_v35 = vld [vmem:[#allocation6 + $0x9b0] sm:$0xf]  ;;  %v9230_v39 = vor.u32 %v12772_v33, %v9229_v28  ;;  %v12700_v28 = vld [vmem:[#allocation6 + $0x3b4] sm:$0xf] }
 0x1c2   : > { %v12900_v6 = vld [vmem:[#allocation6 + $0x9ec] sm:$0xf0]  ;;  %v4070_v3 = vrot.slane %v3630_v53, 2  ;;  %v9487_v33 = vld [vmem:[#allocation6 + $0x7f0] sm:$0xf0] }
 0x1c3   : > { %3868 = vmatpush.bf16.msra.mxu2 %v9934_v2  ;;  %3843 = vmatpush.bf16.msra.mxu0 %v8846_v5  ;;  %v10253_v36 = vld [vmem:[#allocation6 + $0xdb0] sm:$0xf]  ;;  %v9742_v40 = vor.u32 %v12900_v6, %v9741_v35  ;;  %v3592_v2 = vpop.f32.mrf.mxu0  ;;  %v3605_v63 = vpop.f32.mrf.mxu1  ;;  %v12956_v35 = vld [vmem:[#allocation6 + $0xbb4] sm:$0xf] }
 0x1c4   : > { %v13028_v37 = vld [vmem:[#allocation6 + $0xdec] sm:$0xf0]  ;;  %v4084_v10 = vsel %vm4079_vm1, %v4069_v0, %v4070_v3  ;;  %v9999_v6 = vld [vmem:[#allocation6 + $0xbf0] sm:$0xf0] }
 0x1c5   : > { %3881 = vmatpush.bf16.msra.mxu3 %v10446_v61  ;;  %3856 = vmatpush.bf16.msra.mxu1 %v9358_v7  ;;  %v8653_v43 = vld [vmem:[#allocation6 + $0x130] sm:$0xf]  ;;  %v10254_v46 = vor.u32 %v13028_v37, %v10253_v36  ;;  %v13883_v14 = vsel %vm4081_vm2, %v13867_v17, %v4084_v10  ;;  %v3618_v23 = vpop.f32.mrf.mxu2  ;;  %v12668_v2 = vld [vmem:[#allocation6 + $0x2b4] sm:$0xf] }
 0x1c6   : > { %v12628_v44 = vld [vmem:[#allocation6 + $0x16c] sm:$0xf0]  ;;  %v3631_v27 = vpop.f32.mrf.mxu3  ;;  %v9871_v63 = vld [vmem:[#allocation6 + $0xaf0] sm:$0xf0] }
 0x1c7   : > { %3869 = vmatpush.bf16.msra.mxu2 %v9870_v8  ;;  %3844 = vmatpush.bf16.msra.mxu0 %v8782_v20  ;;  %v9165_v45 = vld [vmem:[#allocation6 + $0x530] sm:$0xf]  ;;  %v8654_v54 = vor.u32 %v12628_v44, %v8653_v43  ;;  %v9490_v43 = vor.u32 %v12828_v32, %v9487_v33  ;;  %v10002_v44 = vor.u32 %v12956_v35, %v9999_v6  ;;  %v13052_v0 = vld [vmem:[#allocation6 + $0xeb4] sm:$0xf] }
 0x1c8   : > { %v12756_v49 = vld [vmem:[#allocation6 + $0x56c] sm:$0xf0]  ;;  %v10383_v3 = vld [vmem:[#allocation6 + $0xef0] sm:$0xf0] }
 0x1c9   : > { %3882 = vmatpush.bf16.msra.mxu3 %v10382_v12  ;;  %3857 = vmatpush.bf16.msra.mxu1 %v9294_v24  ;;  %v9677_v41 = vld [vmem:[#allocation6 + $0x930] sm:$0xf]  ;;  %v9166_v57 = vor.u32 %v12756_v49, %v9165_v45  ;;  %v12684_v45 = vld [vmem:[#allocation6 + $0x334] sm:$0xf] }
 0x1ca   : > { %v12884_v50 = vld [vmem:[#allocation6 + $0x96c] sm:$0xf0]  ;;  %v9423_v49 = vld [vmem:[#allocation6 + $0x770] sm:$0xf0] }
 0x1cb   : > { %3870 = vmatpush.bf16.msra.mxu2 %v9806_v25  ;;  %v10189_v51 = vld [vmem:[#allocation6 + $0xd30] sm:$0xf]  ;;  %3845 = vmatpush.bf16.msra.mxu0 %v8718_v38  ;;  %v9678_v59 = vor.u32 %v12884_v50, %v9677_v41  ;;  %v13084_v38 = vld [vmem:[#allocation6 + $0xfb4] sm:$0xf] }
 0x1cc   : > { %v13012_v52 = vld [vmem:[#allocation6 + $0xd6c] sm:$0xf0]  ;;  %v12940_v41 = vld [vmem:[#allocation6 + $0xb34] sm:$0xf] }
 0x1cd   : > { %3883 = vmatpush.bf16.msra.mxu3 %v10318_v31  ;;  %v8589_v56 = vld [vmem:[#allocation6 + $0xb0] sm:$0xf]  ;;  %3858 = vmatpush.bf16.msra.mxu1 %v9230_v39  ;;  %v10190_v4 = vor.u32 %v13012_v52, %v10189_v51  ;;  %v8975_v31 = vld [vmem:[#allocation6 + $0x3f0] sm:$0xf0] }
 0x1ce   : > { %v12612_v60 = vld [vmem:[#allocation6 + $0xec] sm:$0xf0]  ;;  %v10511_v39 = vld [vmem:[#allocation6 + $0xff0] sm:$0xf0]  ;;  %v8978_v42 = vor.u32 %v12700_v28, %v8975_v31 }
 0x1cf   : > { %3871 = vmatpush.bf16.msra.mxu2 %v9742_v40  ;;  %v9101_v61 = vld [vmem:[#allocation6 + $0x4b0] sm:$0xf]  ;;  %3846 = vmatpush.bf16.msra.mxu0 %v8654_v54  ;;  %v8590_v11 = vor.u32 %v12612_v60, %v8589_v56  ;;  %v10514_v48 = vor.u32 %v13084_v38, %v10511_v39  ;;  %v9935_v50 = vld [vmem:[#allocation6 + $0xb70] sm:$0xf0]  ;;  %v9426_v54 = vor.u32 %v12812_v47, %v9423_v49 }
 0x1d0   : > { %v12740_v62 = vld [vmem:[#allocation6 + $0x4ec] sm:$0xf0]  ;;  %v13068_v51 = vld [vmem:[#allocation6 + $0xf34] sm:$0xf]  ;;  %v9938_v56 = vor.u32 %v12940_v41, %v9935_v50 }
 0x1d1   : > { %3884 = vmatpush.bf16.msra.mxu3 %v10254_v46  ;;  %v9613_v5 = vld [vmem:[#allocation6 + $0x8b0] sm:$0xf]  ;;  %3859 = vmatpush.bf16.msra.mxu1 %v9166_v57  ;;  %v9102_v58 = vor.u32 %v12740_v62, %v9101_v61  ;;  %v8911_v46 = vld [vmem:[#allocation6 + $0x370] sm:$0xf0] }
 0x1d2   : > { %v12868_v7 = vld [vmem:[#allocation6 + $0x8ec] sm:$0xf0]  ;;  %v10447_v52 = vld [vmem:[#allocation6 + $0xf70] sm:$0xf0]  ;;  %v8914_v53 = vor.u32 %v12684_v45, %v8911_v46 }
 0x1d3   : > { %v10125_v8 = vld [vmem:[#allocation6 + $0xcb0] sm:$0xf]  ;;  %3872 = vmatpush.bf16.msra.mxu2 %v9678_v59  ;;  %v9614_v15 = vor.u32 %v12868_v7, %v9613_v5  ;;  %3847 = vmatpush.bf16.msra.mxu0 %v8590_v11  ;;  %v8847_v57 = vld [vmem:[#allocation6 + $0x2f0] sm:$0xf0]  ;;  %v10450_v60 = vor.u32 %v13068_v51, %v10447_v52  ;;  %v10386_v11 = vor.u32 %v13052_v0, %v10383_v3 }
 0x1d4   : > { %v12996_v9 = vld [vmem:[#allocation6 + $0xcec] sm:$0xf0]  ;;  %v12796_v59 = vld [vmem:[#allocation6 + $0x6b4] sm:$0xf] }
 0x1d5   : > { %v8525_v12 = vld [vmem:[#allocation6 + $0x30] sm:$0xf]  ;;  %3885 = vmatpush.bf16.msra.mxu3 %v10190_v4  ;;  %v10126_v24 = vor.u32 %v12996_v9, %v10125_v8  ;;  %3860 = vmatpush.bf16.msra.mxu1 %v9102_v58  ;;  %v9359_v61 = vld [vmem:[#allocation6 + $0x6f0] sm:$0xf0]  ;;  %v8850_v4 = vor.u32 %v12668_v2, %v8847_v57 }
 0x1d6   : > { %v12596_v13 = vld [vmem:[#allocation6 + $0x6c] sm:$0xf0]  ;;  %v12924_v62 = vld [vmem:[#allocation6 + $0xab4] sm:$0xf]  ;;  %v9362_v5 = vor.u32 %v12796_v59, %v9359_v61  ;;  %v3655_v27 = vpop.f32.mrf.mxu1 }
 0x1d7   : > { %v9037_v18 = vld [vmem:[#allocation6 + $0x430] sm:$0xf]  ;;  %v8526_v17 = vor.u32 %v12596_v13, %v8525_v12  ;;  %3873 = vmatpush.bf16.msra.mxu2 %v9614_v15  ;;  %v9874_v7 = vor.u32 %v12924_v62, %v9871_v63  ;;  %v12652_v8 = vld [vmem:[#allocation6 + $0x234] sm:$0xf] }
 0x1d8   : > { %v12724_v19 = vld [vmem:[#allocation6 + $0x46c] sm:$0xf0]  ;;  %v8783_v9 = vld [vmem:[#allocation6 + $0x270] sm:$0xf0] }
 0x1d9   : > { %v9549_v20 = vld [vmem:[#allocation6 + $0x830] sm:$0xf]  ;;  %v9038_v36 = vor.u32 %v12724_v19, %v9037_v18  ;;  %3886 = vmatpush.bf16.msra.mxu3 %v10126_v24  ;;  %3848 = vmatpush.bf16.msra.mxu0 %v8526_v17  ;;  %v12780_v10 = vld [vmem:[#allocation6 + $0x634] sm:$0xf]  ;;  %v8786_v19 = vor.u32 %v12652_v8, %v8783_v9 }
 0x1da   : > { %v12852_v25 = vld [vmem:[#allocation6 + $0x86c] sm:$0xf0]  ;;  %v9295_v12 = vld [vmem:[#allocation6 + $0x670] sm:$0xf0] }
 0x1db   : > { %v10061_v16 = vld [vmem:[#allocation6 + $0xc30] sm:$0xf]  ;;  %v9550_v37 = vor.u32 %v12852_v25, %v9549_v20  ;;  %3861 = vmatpush.bf16.msra.mxu1 %v9038_v36  ;;  %v12908_v13 = vld [vmem:[#allocation6 + $0xa34] sm:$0xf]  ;;  %v3642_v20 = vpop.f32.mrf.mxu0  ;;  %v9298_v23 = vor.u32 %v12780_v10, %v9295_v12 }
 0x1dc   : > { %v12980_v26 = vld [vmem:[#allocation6 + $0xc6c] sm:$0xf0]  ;;  %3849 = vmatmul.bf16.vlgmr.msra.gmra.mxu0 %v13805_v29  ;;  %v9807_v58 = vld [vmem:[#allocation6 + $0xa70] sm:$0xf0]  ;;  %v3656_v33 = vadd.f32 %v3655_v27, %v3642_v20  ;;  %v12837_v27 = vld [vmem:[#allocation6 + $0x7f4] sm:$0xf0] }
 0x1dd   : > { %v10062_v40 = vor.u32 %v12980_v26, %v10061_v16  ;;  %3874 = vmatpush.bf16.msra.mxu2 %v9550_v37  ;;  %3893 = vmatpush.bf16.msrb.mxu0 %v8978_v42  ;;  %v13036_v15 = vld [vmem:[#allocation6 + $0xe34] sm:$0xf]  ;;  %v9810_v24 = vor.u32 %v12908_v13, %v9807_v58 }
 0x1de   : > { %3862 = vmatmul.bf16.vlgmr.msra.gmra.mxu1 %v13807_v30  ;;  %v10319_v18 = vld [vmem:[#allocation6 + $0xe70] sm:$0xf0] }
 0x1df   : > { %3887 = vmatpush.bf16.msra.mxu3 %v10062_v40  ;;  %3906 = vmatpush.bf16.msrb.mxu1 %v9490_v43  ;;  %v12636_v25 = vld [vmem:[#allocation6 + $0x1b4] sm:$0xf]  ;;  %v10322_v28 = vor.u32 %v13036_v15, %v10319_v18  ;;  %v3668_v43 = vpop.f32.mrf.mxu2 }
 0x1e0   : > { %3875 = vmatmul.bf16.vlgmr.msra.gmra.mxu2 %v13801_v21  ;;  %v8719_v16 = vld [vmem:[#allocation6 + $0x1f0] sm:$0xf0]  ;;  %v3681_v49 = vpop.f32.mrf.mxu3 }
 0x1e1   : > { %3919 = vmatpush.bf16.msrb.mxu2 %v10002_v44  ;;  %3894 = vmatpush.bf16.msrb.mxu0 %v8914_v53  ;;  %v12764_v26 = vld [vmem:[#allocation6 + $0x5b4] sm:$0xf]  ;;  %v8722_v36 = vor.u32 %v12636_v25, %v8719_v16  ;;  %v12709_v25 = vld [vmem:[#allocation6 + $0x3f4] sm:$0xf0] }
 0x1e2   : > { %3888 = vmatmul.bf16.vlgmr.msra.gmra.mxu3 %v13803_v22  ;;  %v9231_v31 = vld [vmem:[#allocation6 + $0x5f0] sm:$0xf0]  ;;  %v9493_v16 = vld [vmem:[#allocation6 + $0x7b8] sm:$0xf] }
 0x1e3   : > { %3932 = vmatpush.bf16.msrb.mxu3 %v10514_v48  ;;  %3907 = vmatpush.bf16.msrb.mxu1 %v9426_v54  ;;  %v12892_v32 = vld [vmem:[#allocation6 + $0x9b4] sm:$0xf]  ;;  %v9234_v37 = vor.u32 %v12764_v26, %v9231_v31  ;;  %v3669_v48 = vadd.f32 %v3668_v43, %v3656_v33  ;;  %v3644_v53 = vpop.f32.mrf.mxu0  ;;  %v12965_v31 = vld [vmem:[#allocation6 + $0xbf4] sm:$0xf0] }
 0x1e4   : > { %v9743_v17 = vld [vmem:[#allocation6 + $0x9f0] sm:$0xf0]  ;;  %v10517_v33 = vld [vmem:[#allocation6 + $0xfb8] sm:$0xf] }
 0x1e5   : > { %3920 = vmatpush.bf16.msrb.mxu2 %v9938_v56  ;;  %3895 = vmatpush.bf16.msrb.mxu0 %v8850_v4  ;;  %v13020_v35 = vld [vmem:[#allocation6 + $0xdb4] sm:$0xf]  ;;  %v9746_v38 = vor.u32 %v12892_v32, %v9743_v17  ;;  %v13889_v52 = vadd.f32 %v3681_v49, %v3669_v48  ;;  %v13077_v48 = vld [vmem:[#allocation6 + $0xf74] sm:$0xf0] }
 0x1e6   : > { %v10255_v6 = vld [vmem:[#allocation6 + $0xdf0] sm:$0xf0]  ;;  %v12677_v53 = vld [vmem:[#allocation6 + $0x2f4] sm:$0xf0] }
 0x1e7   : > { %3933 = vmatpush.bf16.msrb.mxu3 %v10450_v60  ;;  %3908 = vmatpush.bf16.msrb.mxu1 %v9362_v5  ;;  %v12620_v39 = vld [vmem:[#allocation6 + $0x134] sm:$0xf]  ;;  %v10258_v44 = vor.u32 %v13020_v35, %v10255_v6  ;;  %v3657_v60 = vpop.f32.mrf.mxu1  ;;  %v3670_v58 = vpop.f32.mrf.mxu2  ;;  %v13093_v35 = vld [vmem:[#allocation6 + $0xff4] sm:$0xf0] }
 0x1e8   : > { %v8655_v40 = vld [vmem:[#allocation6 + $0x170] sm:$0xf0]  ;;  %v10518_v43 = vor.u32 %v13093_v35, %v10517_v33  ;;  %v10389_v60 = vld [vmem:[#allocation6 + $0xeb8] sm:$0xf] }
 0x1e9   : > { %3921 = vmatpush.bf16.msrb.mxu2 %v9874_v7  ;;  %3896 = vmatpush.bf16.msrb.mxu0 %v8786_v19  ;;  %v12748_v42 = vld [vmem:[#allocation6 + $0x534] sm:$0xf]  ;;  %v8658_v51 = vor.u32 %v12620_v39, %v8655_v40  ;;  %v8917_v39 = vld [vmem:[#allocation6 + $0x338] sm:$0xf] }
 0x1ea   : > { %v9167_v45 = vld [vmem:[#allocation6 + $0x570] sm:$0xf0]  ;;  %v12693_v40 = vld [vmem:[#allocation6 + $0x374] sm:$0xf0] }
 0x1eb   : > { %3934 = vmatpush.bf16.msrb.mxu3 %v10386_v11  ;;  %3909 = vmatpush.bf16.msrb.mxu1 %v9298_v23  ;;  %v12876_v46 = vld [vmem:[#allocation6 + $0x934] sm:$0xf]  ;;  %v9170_v54 = vor.u32 %v12748_v42, %v9167_v45  ;;  %v3683_v23 = vpop.f32.mrf.mxu3  ;;  %v9429_v42 = vld [vmem:[#allocation6 + $0x738] sm:$0xf]  ;;  %v8918_v49 = vor.u32 %v12693_v40, %v8917_v39 }
 0x1ec   : > { %v9679_v47 = vld [vmem:[#allocation6 + $0x970] sm:$0xf0]  ;;  %v9941_v45 = vld [vmem:[#allocation6 + $0xb38] sm:$0xf] }
 0x1ed   : > { %3922 = vmatpush.bf16.msrb.mxu2 %v9810_v24  ;;  %v13004_v41 = vld [vmem:[#allocation6 + $0xd34] sm:$0xf]  ;;  %3897 = vmatpush.bf16.msrb.mxu0 %v8722_v36  ;;  %v9682_v56 = vor.u32 %v12876_v46, %v9679_v47  ;;  %v8981_v24 = vld [vmem:[#allocation6 + $0x3b8] sm:$0xf] }
 0x1ee   : > { %v10191_v50 = vld [vmem:[#allocation6 + $0xd70] sm:$0xf0]  ;;  %v8982_v36 = vor.u32 %v12709_v25, %v8981_v24  ;;  %v12949_v46 = vld [vmem:[#allocation6 + $0xb74] sm:$0xf0] }
 0x1ef   : > { %3935 = vmatpush.bf16.msrb.mxu3 %v10322_v28  ;;  %3910 = vmatpush.bf16.msrb.mxu1 %v9234_v37  ;;  %v12604_v2 = vld [vmem:[#allocation6 + $0xb4] sm:$0xf]  ;;  %v10194_v61 = vor.u32 %v13004_v41, %v10191_v50  ;;  %v10005_v28 = vld [vmem:[#allocation6 + $0xbb8] sm:$0xf]  ;;  %v9494_v37 = vor.u32 %v12837_v27, %v9493_v16  ;;  %v9942_v50 = vor.u32 %v12949_v46, %v9941_v45 }
 0x1f0   : > { %v8591_v57 = vld [vmem:[#allocation6 + $0xf0] sm:$0xf0]  ;;  %v10453_v47 = vld [vmem:[#allocation6 + $0xf38] sm:$0xf] }
 0x1f1   : > { %3923 = vmatpush.bf16.msrb.mxu2 %v9746_v38  ;;  %v12732_v59 = vld [vmem:[#allocation6 + $0x4b4] sm:$0xf]  ;;  %3898 = vmatpush.bf16.msrb.mxu0 %v8658_v51  ;;  %v8594_v5 = vor.u32 %v12604_v2, %v8591_v57  ;;  %v10006_v38 = vor.u32 %v12965_v31, %v10005_v28  ;;  %v8853_v51 = vld [vmem:[#allocation6 + $0x2b8] sm:$0xf] }
 0x1f2   : > { %v9103_v62 = vld [vmem:[#allocation6 + $0x4f0] sm:$0xf0]  ;;  %v12805_v2 = vld [vmem:[#allocation6 + $0x6f4] sm:$0xf0] }
 0x1f3   : > { %3936 = vmatpush.bf16.msrb.mxu3 %v10258_v44  ;;  %v12860_v63 = vld [vmem:[#allocation6 + $0x8b4] sm:$0xf]  ;;  %3911 = vmatpush.bf16.msrb.mxu1 %v9170_v54  ;;  %v9106_v9 = vor.u32 %v12732_v59, %v9103_v62  ;;  %v12821_v44 = vld [vmem:[#allocation6 + $0x774] sm:$0xf0]  ;;  %v8854_v62 = vor.u32 %v12677_v53, %v8853_v51 }
 0x1f4   : > { %v9615_v0 = vld [vmem:[#allocation6 + $0x8f0] sm:$0xf0]  ;;  %v9430_v41 = vor.u32 %v12821_v44, %v9429_v42  ;;  %v9365_v54 = vld [vmem:[#allocation6 + $0x6b8] sm:$0xf] }
 0x1f5   : > { %v12988_v3 = vld [vmem:[#allocation6 + $0xcb4] sm:$0xf]  ;;  %3924 = vmatpush.bf16.msrb.mxu2 %v9682_v56  ;;  %v9618_v10 = vor.u32 %v12860_v63, %v9615_v0  ;;  %3899 = vmatpush.bf16.msrb.mxu0 %v8594_v5  ;;  %v10454_v56 = vor.u32 %v13077_v48, %v10453_v47  ;;  %v9877_v57 = vld [vmem:[#allocation6 + $0xab8] sm:$0xf]  ;;  %v9366_v63 = vor.u32 %v12805_v2, %v9365_v54  ;;  %v3694_v58 = vpop.f32.mrf.mxu0 }
 0x1f6   : > { %v10127_v4 = vld [vmem:[#allocation6 + $0xcf0] sm:$0xf0]  ;;  %v12933_v59 = vld [vmem:[#allocation6 + $0xaf4] sm:$0xf0] }
 0x1f7   : > { %v12588_v7 = vld [vmem:[#allocation6 + $0x34] sm:$0xf]  ;;  %3937 = vmatpush.bf16.msrb.mxu3 %v10194_v61  ;;  %v10130_v15 = vor.u32 %v12988_v3, %v10127_v4  ;;  %3912 = vmatpush.bf16.msrb.mxu1 %v9106_v9  ;;  %v13061_v61 = vld [vmem:[#allocation6 + $0xef4] sm:$0xf0]  ;;  %v9878_v0 = vor.u32 %v12933_v59, %v9877_v57 }
 0x1f8   : > { %v8527_v8 = vld [vmem:[#allocation6 + $0x70] sm:$0xf0]  ;;  %v8789_v3 = vld [vmem:[#allocation6 + $0x238] sm:$0xf] }
 0x1f9   : > { %v12716_v11 = vld [vmem:[#allocation6 + $0x434] sm:$0xf]  ;;  %v8530_v26 = vor.u32 %v12588_v7, %v8527_v8  ;;  %3925 = vmatpush.bf16.msrb.mxu2 %v9618_v10  ;;  %v12661_v4 = vld [vmem:[#allocation6 + $0x274] sm:$0xf0]  ;;  %v10390_v7 = vor.u32 %v13061_v61, %v10389_v60 }
 0x1fa   : > { %v9039_v12 = vld [vmem:[#allocation6 + $0x470] sm:$0xf0]  ;;  %v9301_v5 = vld [vmem:[#allocation6 + $0x638] sm:$0xf] }
 0x1fb   : > { %v12844_v13 = vld [vmem:[#allocation6 + $0x834] sm:$0xf]  ;;  %v9042_v32 = vor.u32 %v12716_v11, %v9039_v12  ;;  %3938 = vmatpush.bf16.msrb.mxu3 %v10130_v15  ;;  %3900 = vmatpush.bf16.msrb.mxu0 %v8530_v26  ;;  %v12789_v8 = vld [vmem:[#allocation6 + $0x674] sm:$0xf0] }
 0x1fc   : > { %v9551_v18 = vld [vmem:[#allocation6 + $0x870] sm:$0xf0]  ;;  %v9813_v9 = vld [vmem:[#allocation6 + $0xa38] sm:$0xf]  ;;  %v9302_v15 = vor.u32 %v12789_v8, %v9301_v5 }
 0x1fd   : > { %v12972_v19 = vld [vmem:[#allocation6 + $0xc34] sm:$0xf]  ;;  %v9554_v17 = vor.u32 %v12844_v13, %v9551_v18  ;;  %3913 = vmatpush.bf16.msrb.mxu1 %v9042_v32  ;;  %v12917_v10 = vld [vmem:[#allocation6 + $0xa74] sm:$0xf0]  ;;  %v8790_v13 = vor.u32 %v12661_v4, %v8789_v3 }
 0x1fe   : > { %v10063_v20 = vld [vmem:[#allocation6 + $0xc70] sm:$0xf0]  ;;  %3901 = vmatmul.bf16.vlgmr.msrb.gmra.mxu0 %v13805_v29  ;;  %v10325_v11 = vld [vmem:[#allocation6 + $0xe38] sm:$0xf]  ;;  %v9814_v18 = vor.u32 %v12917_v10, %v9813_v9 }
 0x1ff   : > { %v10066_v6 = vor.u32 %v12972_v19, %v10063_v20  ;;  %3926 = vmatpush.bf16.msrb.mxu2 %v9554_v17  ;;  %3945 = vmatpush.bf16.msra.mxu0 %v8982_v36  ;;  %v13045_v12 = vld [vmem:[#allocation6 + $0xe74] sm:$0xf0]  ;;  %v3707_v19 = vpop.f32.mrf.mxu1 }
 0x200   : > { %3914 = vmatmul.bf16.vlgmr.msrb.gmra.mxu1 %v13807_v30  ;;  %v8725_v20 = vld [vmem:[#allocation6 + $0x1b8] sm:$0xf]  ;;  %v10326_v25 = vor.u32 %v13045_v12, %v10325_v11  ;;  %v3708_v16 = vadd.f32 %v3707_v19, %v3694_v58 }
 0x201   : > { %3939 = vmatpush.bf16.msrb.mxu3 %v10066_v6  ;;  %3958 = vmatpush.bf16.msra.mxu1 %v9494_v37  ;;  %v12645_v23 = vld [vmem:[#allocation6 + $0x1f4] sm:$0xf0]  ;;  %v3720_v6 = vpop.f32.mrf.mxu2  ;;  %v3733_v42 = vpop.f32.mrf.mxu3 }
 0x202   : > { %3927 = vmatmul.bf16.vlgmr.msrb.gmra.mxu2 %v13801_v21  ;;  %v9237_v24 = vld [vmem:[#allocation6 + $0x5b8] sm:$0xf]  ;;  %v8726_v17 = vor.u32 %v12645_v23, %v8725_v20  ;;  %v3721_v40 = vadd.f32 %v3720_v6, %v3708_v16  ;;  %v8983_v23 = vld [vmem:[#allocation6 + $0x3f8] sm:$0xf0] }
 0x203   : > { %3971 = vmatpush.bf16.msra.mxu2 %v10006_v38  ;;  %3946 = vmatpush.bf16.msra.mxu0 %v8918_v49  ;;  %v12773_v26 = vld [vmem:[#allocation6 + $0x5f4] sm:$0xf0]  ;;  %v9495_v16 = vld [vmem:[#allocation6 + $0x7f8] sm:$0xf0] }
 0x204   : > { %3940 = vmatmul.bf16.vlgmr.msrb.gmra.mxu3 %v13803_v22  ;;  %v9749_v27 = vld [vmem:[#allocation6 + $0x9b8] sm:$0xf]  ;;  %v9238_v33 = vor.u32 %v12773_v26, %v9237_v24  ;;  %v3734_v48 = vadd.f32 %v3733_v42, %v3721_v40  ;;  %v12829_v24 = vld [vmem:[#allocation6 + $0x7bc] sm:$0xf] }
 0x205   : > { %3984 = vmatpush.bf16.msra.mxu3 %v10518_v43  ;;  %3959 = vmatpush.bf16.msra.mxu1 %v9430_v41  ;;  %v12901_v28 = vld [vmem:[#allocation6 + $0x9f4] sm:$0xf0]  ;;  %v12957_v26 = vld [vmem:[#allocation6 + $0xbbc] sm:$0xf]  ;;  %v9498_v6 = vor.u32 %v12829_v24, %v9495_v16 }
 0x206   : > { %v10261_v31 = vld [vmem:[#allocation6 + $0xdb8] sm:$0xf]  ;;  %v9750_v35 = vor.u32 %v12901_v28, %v9749_v27  ;;  %v4071_v59 = vrot.slane %v3734_v48, 6  ;;  %v10007_v27 = vld [vmem:[#allocation6 + $0xbf8] sm:$0xf0] }
 0x207   : > { %3972 = vmatpush.bf16.msra.mxu2 %v9942_v50  ;;  %3947 = vmatpush.bf16.msra.mxu0 %v8854_v62  ;;  %v13029_v32 = vld [vmem:[#allocation6 + $0xdf4] sm:$0xf0]  ;;  %v3696_v50 = vpop.f32.mrf.mxu0  ;;  %v3709_v57 = vpop.f32.mrf.mxu1  ;;  %v9431_v42 = vld [vmem:[#allocation6 + $0x778] sm:$0xf0] }
 0x208   : > { %v8661_v36 = vld [vmem:[#allocation6 + $0x138] sm:$0xf]  ;;  %v10262_v39 = vor.u32 %v13029_v32, %v10261_v31  ;;  %v13897_v3 = vsel %vm4077_vm0, %v13889_v52, %v4071_v59  ;;  %v12701_v52 = vld [vmem:[#allocation6 + $0x3bc] sm:$0xf] }
 0x209   : > { %3985 = vmatpush.bf16.msra.mxu3 %v10454_v56  ;;  %3960 = vmatpush.bf16.msra.mxu1 %v9366_v63  ;;  %v12629_v37 = vld [vmem:[#allocation6 + $0x174] sm:$0xf0]  ;;  %v3735_v20 = vpop.f32.mrf.mxu3  ;;  %v13085_v32 = vld [vmem:[#allocation6 + $0xfbc] sm:$0xf] }
 0x20a   : > { %v9173_v38 = vld [vmem:[#allocation6 + $0x538] sm:$0xf]  ;;  %v8662_v49 = vor.u32 %v12629_v37, %v8661_v36  ;;  %v10010_v36 = vor.u32 %v12957_v26, %v10007_v27  ;;  %v12685_v37 = vld [vmem:[#allocation6 + $0x33c] sm:$0xf] }
 0x20b   : > { %3973 = vmatpush.bf16.msra.mxu2 %v9878_v0  ;;  %3948 = vmatpush.bf16.msra.mxu0 %v8790_v13  ;;  %v12757_v43 = vld [vmem:[#allocation6 + $0x574] sm:$0xf0]  ;;  %v3722_v13 = vpop.f32.mrf.mxu2  ;;  %v8855_v50 = vld [vmem:[#allocation6 + $0x2f8] sm:$0xf0] }
 0x20c   : > { %v9685_v44 = vld [vmem:[#allocation6 + $0x938] sm:$0xf]  ;;  %v9174_v51 = vor.u32 %v12757_v43, %v9173_v38  ;;  %v8919_v38 = vld [vmem:[#allocation6 + $0x378] sm:$0xf0] }
 0x20d   : > { %3986 = vmatpush.bf16.msra.mxu3 %v10390_v7  ;;  %3961 = vmatpush.bf16.msra.mxu1 %v9302_v15  ;;  %v12885_v45 = vld [vmem:[#allocation6 + $0x974] sm:$0xf0]  ;;  %v12941_v43 = vld [vmem:[#allocation6 + $0xb3c] sm:$0xf] }
 0x20e   : > { %v10197_v46 = vld [vmem:[#allocation6 + $0xd38] sm:$0xf]  ;;  %v9686_v53 = vor.u32 %v12885_v45, %v9685_v44  ;;  %v9943_v44 = vld [vmem:[#allocation6 + $0xb78] sm:$0xf0] }
 0x20f   : > { %3974 = vmatpush.bf16.msra.mxu2 %v9814_v18  ;;  %v13013_v47 = vld [vmem:[#allocation6 + $0xd74] sm:$0xf0]  ;;  %3949 = vmatpush.bf16.msra.mxu0 %v8726_v17  ;;  %v10519_v17 = vld [vmem:[#allocation6 + $0xff8] sm:$0xf0] }
 0x210   : > { %v8597_v41 = vld [vmem:[#allocation6 + $0xb8] sm:$0xf]  ;;  %v10198_v60 = vor.u32 %v13013_v47, %v10197_v46  ;;  %v10522_v40 = vor.u32 %v13085_v32, %v10519_v17  ;;  %v13069_v45 = vld [vmem:[#allocation6 + $0xf3c] sm:$0xf]  ;;  %v8922_v47 = vor.u32 %v12685_v37, %v8919_v38 }
 0x211   : > { %3987 = vmatpush.bf16.msra.mxu3 %v10326_v25  ;;  %3962 = vmatpush.bf16.msra.mxu1 %v9238_v33  ;;  %v12613_v54 = vld [vmem:[#allocation6 + $0xf4] sm:$0xf0]  ;;  %v10455_v46 = vld [vmem:[#allocation6 + $0xf78] sm:$0xf0] }
 0x212   : > { %v9109_v56 = vld [vmem:[#allocation6 + $0x4b8] sm:$0xf]  ;;  %v8598_v4 = vor.u32 %v12613_v54, %v8597_v41  ;;  %v12669_v41 = vld [vmem:[#allocation6 + $0x2bc] sm:$0xf] }
 0x213   : > { %3975 = vmatpush.bf16.msra.mxu2 %v9750_v35  ;;  %v12741_v2 = vld [vmem:[#allocation6 + $0x4f4] sm:$0xf0]  ;;  %3950 = vmatpush.bf16.msra.mxu0 %v8662_v49  ;;  %v8986_v35 = vor.u32 %v12701_v52, %v8983_v23  ;;  %v9946_v49 = vor.u32 %v12941_v43, %v9943_v44  ;;  %v9367_v54 = vld [vmem:[#allocation6 + $0x6f8] sm:$0xf0] }
 0x214   : > { %v9621_v61 = vld [vmem:[#allocation6 + $0x8b8] sm:$0xf]  ;;  %v9110_v8 = vor.u32 %v12741_v2, %v9109_v56  ;;  %v12925_v56 = vld [vmem:[#allocation6 + $0xabc] sm:$0xf] }
 0x215   : > { %3988 = vmatpush.bf16.msra.mxu3 %v10262_v39  ;;  %v12869_v62 = vld [vmem:[#allocation6 + $0x8f4] sm:$0xf0]  ;;  %3963 = vmatpush.bf16.msra.mxu1 %v9174_v51  ;;  %v12813_v39 = vld [vmem:[#allocation6 + $0x73c] sm:$0xf] }
 0x216   : > { %v10133_v63 = vld [vmem:[#allocation6 + $0xcb8] sm:$0xf]  ;;  %v9622_v9 = vor.u32 %v12869_v62, %v9621_v61  ;;  %v9434_v48 = vor.u32 %v12813_v39, %v9431_v42  ;;  %v12797_v51 = vld [vmem:[#allocation6 + $0x6bc] sm:$0xf]  ;;  %v8858_v61 = vor.u32 %v12669_v41, %v8855_v50 }
 0x217   : > { %v12997_v0 = vld [vmem:[#allocation6 + $0xcf4] sm:$0xf0]  ;;  %3976 = vmatpush.bf16.msra.mxu2 %v9686_v53  ;;  %3951 = vmatpush.bf16.msra.mxu0 %v8598_v4  ;;  %v10458_v53 = vor.u32 %v13069_v45, %v10455_v46  ;;  %v9879_v2 = vld [vmem:[#allocation6 + $0xaf8] sm:$0xf0] }
 0x218   : > { %v8533_v5 = vld [vmem:[#allocation6 + $0x38] sm:$0xf]  ;;  %v10134_v58 = vor.u32 %v12997_v0, %v10133_v63  ;;  %v13053_v57 = vld [vmem:[#allocation6 + $0xebc] sm:$0xf]  ;;  %v9370_v63 = vor.u32 %v12797_v51, %v9367_v54  ;;  %v9882_v0 = vor.u32 %v12925_v56, %v9879_v2 }
 0x219   : > { %v12597_v7 = vld [vmem:[#allocation6 + $0x74] sm:$0xf0]  ;;  %3989 = vmatpush.bf16.msra.mxu3 %v10198_v60  ;;  %3964 = vmatpush.bf16.msra.mxu1 %v9110_v8  ;;  %v10391_v59 = vld [vmem:[#allocation6 + $0xef8] sm:$0xf0]  ;;  %v3759_v16 = vpop.f32.mrf.mxu1 }
 0x21a   : > { %v9045_v10 = vld [vmem:[#allocation6 + $0x438] sm:$0xf]  ;;  %v8534_v25 = vor.u32 %v12597_v7, %v8533_v5  ;;  %v12653_v4 = vld [vmem:[#allocation6 + $0x23c] sm:$0xf]  ;;  %v10394_v8 = vor.u32 %v13053_v57, %v10391_v59 }
 0x21b   : > { %v12725_v11 = vld [vmem:[#allocation6 + $0x474] sm:$0xf0]  ;;  %3977 = vmatpush.bf16.msra.mxu2 %v9622_v9  ;;  %v8791_v5 = vld [vmem:[#allocation6 + $0x278] sm:$0xf0] }
 0x21c   : > { %v9557_v12 = vld [vmem:[#allocation6 + $0x838] sm:$0xf]  ;;  %v9046_v28 = vor.u32 %v12725_v11, %v9045_v10  ;;  %3952 = vmatpush.bf16.msra.mxu0 %v8534_v25  ;;  %v12781_v7 = vld [vmem:[#allocation6 + $0x63c] sm:$0xf] }
 0x21d   : > { %v12853_v15 = vld [vmem:[#allocation6 + $0x874] sm:$0xf0]  ;;  %3990 = vmatpush.bf16.msra.mxu3 %v10134_v58  ;;  %v9303_v9 = vld [vmem:[#allocation6 + $0x678] sm:$0xf0] }
 0x21e   : > { %v10069_v18 = vld [vmem:[#allocation6 + $0xc38] sm:$0xf]  ;;  %v9558_v31 = vor.u32 %v12853_v15, %v9557_v12  ;;  %3965 = vmatpush.bf16.msra.mxu1 %v9046_v28  ;;  %v12909_v10 = vld [vmem:[#allocation6 + $0xa3c] sm:$0xf]  ;;  %v8794_v15 = vor.u32 %v12653_v4, %v8791_v5  ;;  %v9306_v20 = vor.u32 %v12781_v7, %v9303_v9 }
 0x21f   : > { %v12981_v19 = vld [vmem:[#allocation6 + $0xc74] sm:$0xf0]  ;;  %3953 = vmatmul.bf16.vlgmr.msra.gmra.mxu0 %v13805_v29  ;;  %v9815_v11 = vld [vmem:[#allocation6 + $0xa78] sm:$0xf0] }
 0x220   : > { %v10070_v33 = vor.u32 %v12981_v19, %v10069_v18  ;;  %3978 = vmatpush.bf16.msra.mxu2 %v9558_v31  ;;  %3997 = vmatpush.bf16.msrb.mxu0 %v8986_v35  ;;  %v124_v60 = vld [vmem:[%s13903_s15] sm:$0xff]  ;;  %v3746_v18 = vpop.f32.mrf.mxu0  ;;  %v9818_v52 = vor.u32 %v12909_v10, %v9815_v11 }
 0x221   : > { %3966 = vmatmul.bf16.vlgmr.msra.gmra.mxu1 %v13807_v30  ;;  %v127_v62 = vunpack.c.h.bf16 %v124_v60  ;;  %v13037_v12 = vld [vmem:[#allocation6 + $0xe3c] sm:$0xf]  ;;  %v126_v58 = vunpack.c.l.bf16 %v124_v60  ;;  %v3760_v32 = vadd.f32 %v3759_v16, %v3746_v18  ;;  %v3772_v42 = vpop.f32.mrf.mxu2  ;;  %v3761_v60 = vpop.f32.mrf.mxu1 }
 0x222   : > { %3991 = vmatpush.bf16.msra.mxu3 %v10070_v33  ;;  %4010 = vmatpush.bf16.msrb.mxu1 %v9498_v6  ;;  %v10327_v13 = vld [vmem:[#allocation6 + $0xe78] sm:$0xf0] }
 0x223   : > { %3979 = vmatmul.bf16.vlgmr.msra.gmra.mxu2 %v13801_v21  ;;  %v4097_v19 = vadd.f32 %v13883_v14, %v127_v62  ;;  %v12637_v23 = vld [vmem:[#allocation6 + $0x1bc] sm:$0xf]  ;;  %v10330_v26 = vor.u32 %v13037_v12, %v10327_v13  ;;  %v4096_v35 = vadd.f32 %v13853_v34, %v126_v58 }
 0x224   : > { %4023 = vmatpush.bf16.msrb.mxu2 %v10010_v36  ;;  %3998 = vmatpush.bf16.msrb.mxu0 %v8922_v47  ;;  %v8727_v24 = vld [vmem:[#allocation6 + $0x1f8] sm:$0xf0]  ;;  %v3773_v47 = vadd.f32 %v3772_v42, %v3760_v32 }
 0x225   : > { %3992 = vmatmul.bf16.vlgmr.msra.gmra.mxu3 %v13803_v22  ;;  %v12765_v25 = vld [vmem:[#allocation6 + $0x5bc] sm:$0xf]  ;;  %v8730_v14 = vor.u32 %v12637_v23, %v8727_v24  ;;  %v10524_v6 = vmul.f32 -1.442695, %v4097_v19  ;;  %v10523_v41 = vmul.f32 -1.442695, %v4096_v35 }
 0x226   : > { %4036 = vmatpush.bf16.msrb.mxu3 %v10522_v40  ;;  %4011 = vmatpush.bf16.msrb.mxu1 %v9434_v48  ;;  %v9239_v27 = vld [vmem:[#allocation6 + $0x5f8] sm:$0xf0]  ;;  %v3785_v48 = vpop.f32.mrf.mxu3 }
 0x227   : > { %v12893_v28 = vld [vmem:[#allocation6 + $0x9bc] sm:$0xf]  ;;  %v9242_v36 = vor.u32 %v12765_v25, %v9239_v27  ;;  %v13912_v51 = vadd.f32 %v3785_v48, %v3773_v47  ;;  %13624 = vpow2.f32 %v10524_v6 }
 0x228   : > { %4024 = vmatpush.bf16.msrb.mxu2 %v9946_v49  ;;  %3999 = vmatpush.bf16.msrb.mxu0 %v8858_v61  ;;  %v9751_v31 = vld [vmem:[#allocation6 + $0x9f8] sm:$0xf0]  ;;  %13626 = vpow2.f32 %v10523_v41 }
 0x229   : > { %v13021_v17 = vld [vmem:[#allocation6 + $0xdbc] sm:$0xf]  ;;  %v9754_v37 = vor.u32 %v12893_v28, %v9751_v31  ;;  %v3774_v13 = vpop.f32.mrf.mxu2 }
 0x22a   : > { %4037 = vmatpush.bf16.msrb.mxu3 %v10458_v53  ;;  %4012 = vmatpush.bf16.msrb.mxu1 %v9370_v63  ;;  %v10263_v33 = vld [vmem:[#allocation6 + $0xdf8] sm:$0xf0]  ;;  %v3748_v53 = vpop.f32.mrf.mxu0 }
 0x22b   : > { %v12621_v38 = vld [vmem:[#allocation6 + $0x13c] sm:$0xf]  ;;  %v10266_v43 = vor.u32 %v13021_v17, %v10263_v33 }
 0x22c   : > { %4025 = vmatpush.bf16.msrb.mxu2 %v9882_v0  ;;  %4000 = vmatpush.bf16.msrb.mxu0 %v8794_v15  ;;  %v8663_v39 = vld [vmem:[#allocation6 + $0x178] sm:$0xf0] }
 0x22d   : > { %v12749_v40 = vld [vmem:[#allocation6 + $0x53c] sm:$0xf]  ;;  %v8666_v50 = vor.u32 %v12621_v38, %v8663_v39 }
 0x22e   : > { %4038 = vmatpush.bf16.msrb.mxu3 %v10394_v8  ;;  %4013 = vmatpush.bf16.msrb.mxu1 %v9306_v20  ;;  %v9175_v44 = vld [vmem:[#allocation6 + $0x578] sm:$0xf0]  ;;  %v3787_v20 = vpop.f32.mrf.mxu3 }
 0x22f   : > { %v12877_v45 = vld [vmem:[#allocation6 + $0x93c] sm:$0xf]  ;;  %v9178_v54 = vor.u32 %v12749_v40, %v9175_v44 }
 0x230   : > { %4026 = vmatpush.bf16.msrb.mxu2 %v9818_v52  ;;  %v9687_v46 = vld [vmem:[#allocation6 + $0x978] sm:$0xf0]  ;;  %4001 = vmatpush.bf16.msrb.mxu0 %v8730_v14  ;;  %v13625_v52 = vpop.eup %13624 }
 0x231   : > { %v13005_v49 = vld [vmem:[#allocation6 + $0xd3c] sm:$0xf]  ;;  %v9690_v56 = vor.u32 %v12877_v45, %v9687_v46  ;;  %v13627_v16 = vpop.eup %13626  ;;  %v4122_v31 = vadd.f32 1.0, %v13625_v52 }
 0x232   : > { %4039 = vmatpush.bf16.msrb.mxu3 %v10330_v26  ;;  %v10199_v34 = vld [vmem:[#allocation6 + $0xd78] sm:$0xf0]  ;;  %4014 = vmatpush.bf16.msrb.mxu1 %v9242_v36  ;;  %v4103_v32 = vadd.f32 1.0, %v13627_v16 }
 0x233   : > { %v12605_v2 = vld [vmem:[#allocation6 + $0xbc] sm:$0xf]  ;;  %v10202_v61 = vor.u32 %v13005_v49, %v10199_v34  ;;  %13628 = vrcp.f32 %v4122_v31  ;;  %vm4128_vm5 = vweird.f32 %v4122_v31 }
 0x234   : > { %4027 = vmatpush.bf16.msrb.mxu2 %v9754_v37  ;;  %v8599_v57 = vld [vmem:[#allocation6 + $0xf8] sm:$0xf0]  ;;  %4002 = vmatpush.bf16.msrb.mxu0 %v8666_v50  ;;  %13630 = vrcp.f32 %v4103_v32  ;;  %v13746_v50 = vmov 0   ;;  %vm4109_vm7 = vweird.f32 %v4103_v32  ;;  %v4113_v60 = vand.u32 2147483647, %v4103_v32 }
 0x235   : > { %v12733_v59 = vld [vmem:[#allocation6 + $0x4bc] sm:$0xf]  ;;  %v8602_v7 = vor.u32 %v12605_v2, %v8599_v57  ;;  %13623 = vset.pattern.permute.xlu0 %v13746_v50  ;;  %v4134_v2 = vand.u32 2147483648, %v4122_v31 }
 0x236   : > { %4040 = vmatpush.bf16.msrb.mxu3 %v10266_v43  ;;  %v9111_v62 = vld [vmem:[#allocation6 + $0x4f8] sm:$0xf0]  ;;  %4015 = vmatpush.bf16.msrb.mxu1 %v9178_v54  ;;  %vm4114_vm10 = vcmp.eq.f32.partialorder %v4113_v60, 8.507059e+37 }
 0x237   : > { %v12861_v63 = vld [vmem:[#allocation6 + $0x8bc] sm:$0xf]  ;;  %v9114_v8 = vor.u32 %v12733_v59, %v9111_v62  ;;  %v3798_v35 = vpop.f32.mrf.mxu0  ;;  %v4115_v59 = vand.u32 2147483648, %v4103_v32 }
 0x238   : > { %v9623_v0 = vld [vmem:[#allocation6 + $0x8f8] sm:$0xf0]  ;;  %4028 = vmatpush.bf16.msrb.mxu2 %v9690_v56  ;;  %4003 = vmatpush.bf16.msrb.mxu0 %v8602_v7 }
 0x239   : > { %v12989_v4 = vld [vmem:[#allocation6 + $0xcbc] sm:$0xf]  ;;  %v9626_v9 = vor.u32 %v12861_v63, %v9623_v0  ;;  %v13629_v17 = vpop.eup %13628  ;;  %v3811_v14 = vpop.f32.mrf.mxu1  ;;  %v13927_v63 = vld [vmem:[#allocation3] sm:$0xff]  ;;  %v4116_v0 = vor.u32 1.1754944e-38, %v4115_v59 }
 0x23a   : > { %v10135_v5 = vld [vmem:[#allocation6 + $0xcf8] sm:$0xf0]  ;;  %4041 = vmatpush.bf16.msrb.mxu3 %v10202_v61  ;;  %4016 = vmatpush.bf16.msrb.mxu1 %v9114_v8  ;;  %v13631_v33 = vpop.eup %13630  ;;  %v4124_v6 = vmul.f32 %v13629_v17, %v4122_v31  ;;  %v3812_v36 = vadd.f32 %v3811_v14, %v3798_v35  ;;  %vm4129_vm3 = vweird.f32 %v13629_v17  ;;  %v4135_v61 = vor.u32 1.1754944e-38, %v4134_v2  ;;  %v13471_v2 = vld [vmem:[#allocation8 + $0xbbc] sm:$0xf0] }
 0x23b   : > { %v12589_v10 = vld [vmem:[#allocation6 + $0x3c] sm:$0xf]  ;;  %v10138_v58 = vor.u32 %v12989_v4, %v10135_v5  ;;  %v4105_v37 = vmul.f32 %v13631_v33, %v4103_v32  ;;  %vm4110_vm4 = vweird.f32 %v13631_v33  ;;  %vm4130_vm6 = vmor %vm4128_vm5, %vm4129_vm3 }
 0x23c   : > { %v8535_v11 = vld [vmem:[#allocation6 + $0x78] sm:$0xf0]  ;;  %4029 = vmatpush.bf16.msrb.mxu2 %v9626_v9  ;;  %v4125_v39 = vsub.f32 1.0, %v4124_v6  ;;  %vm4111_vm8 = vmor %vm4109_vm7, %vm4110_vm4 }
 0x23d   : > { %v12717_v12 = vld [vmem:[#allocation6 + $0x43c] sm:$0xf]  ;;  %v8538_v25 = vor.u32 %v12589_v10, %v8535_v11  ;;  %v4106_v43 = vsub.f32 1.0, %v4105_v37 }
 0x23e   : > { %v9047_v15 = vld [vmem:[#allocation6 + $0x478] sm:$0xf0]  ;;  %4042 = vmatpush.bf16.msrb.mxu3 %v10138_v58  ;;  %v4126_v45 = vmul.f32 %v13629_v17, %v4125_v39 }
 0x23f   : > { %v12845_v18 = vld [vmem:[#allocation6 + $0x83c] sm:$0xf]  ;;  %v9050_v26 = vor.u32 %v12717_v12, %v9047_v15  ;;  %4004 = vmatpush.bf16.msrb.mxu0 %v8538_v25  ;;  %v3800_v44 = vpop.f32.mrf.mxu0  ;;  %v4107_v48 = vmul.f32 %v13631_v33, %v4106_v43  ;;  %v4164_v12 = vstv %s13738_s2  ;;  %s119_s2 = sadd.s32 1, %s13738_s2  }
 0x240   : > { %v9559_v19 = vld [vmem:[#allocation6 + $0x878] sm:$0xf0]  ;;  %v4127_v53 = vadd.f32 %v13629_v17, %v4126_v45  ;;  %vm4165_vm11 = vcmp.gt.s32.totalorder %v13791_v1, %v4164_v12  ;;  %v11427_v12 = vld [vmem:[#allocation8 + $0x700] sm:$0xf]  ;;  %p116_p0 = scmp.ge.s32.totalorder %s119_s2, 6  }
 0x241   : > { %v12973_v23 = vld [vmem:[#allocation6 + $0xc3c] sm:$0xf]  ;;  %v9562_v27 = vor.u32 %v12845_v18, %v9559_v19  ;;  %4017 = vmatpush.bf16.msrb.mxu1 %v9050_v26  ;;  %v3824_v38 = vpop.f32.mrf.mxu2  ;;  %v4108_v57 = vadd.f32 %v13631_v33, %v4107_v48  ;;  %v4166_v15 = vsel %vm4165_vm11, 1, %v13746_v50  ;;  %v10979_v48 = vld [vmem:[#allocation8 + $0x380] sm:$0xf] }
 0x242   : > { %v10071_v24 = vld [vmem:[#allocation6 + $0xc78] sm:$0xf0]  ;;  %4005 = vmatmul.bf16.vlgmr.msrb.gmra.mxu0 %v13805_v29  ;;  %v3825_v40 = vadd.f32 %v3824_v38, %v3812_v36  ;;  %v13919_v29 = vld [vmem:[%s13903_s15 + $0x8] sm:$0xff]  ;;  %4168 = vperm.xlu0 %13623, %v4166_v15  }
 0x243   : > { %v10074_v28 = vor.u32 %v12973_v23, %v10071_v24  ;;  %4030 = vmatpush.bf16.msrb.mxu2 %v9562_v27  ;;  %v3837_v42 = vpop.f32.mrf.mxu3  ;;  %v128_v47 = vunpack.c.l.bf16 %v13919_v29  ;;  %v4112_v62 = vsel %vm4111_vm8, %v13631_v33, %v4108_v57  ;;  %v13327_v15 = vld [vmem:[#allocation8 + $0x73c] sm:$0xf0] }
 0x244   : > { %4018 = vmatmul.bf16.vlgmr.msrb.gmra.mxu1 %v13807_v30  ;;  %v3838_v30 = vadd.f32 %v3837_v42, %v3825_v40  ;;  %v4117_v7 = vsel %vm4114_vm10, %v4116_v0, %v4112_v62  ;;  %v12515_v62 = vld [vmem:[#allocation8 + $0xf80] sm:$0xf] }
 0x245   : > { %4043 = vmatpush.bf16.msrb.mxu3 %v10074_v28  ;;  %v13599_v0 = vld [vmem:[#allocation8 + $0xfbc] sm:$0xf0] }
 0x246   : > { %4031 = vmatmul.bf16.vlgmr.msrb.gmra.mxu2 %v13801_v21  ;;  %v3813_v21 = vpop.f32.mrf.mxu1  ;;  %v4073_v46 = vrot.slane %v3838_v30, 2 }
 0x248   : > { %4044 = vmatmul.bf16.vlgmr.msrb.gmra.mxu3 %v13803_v22  ;;  %v4072_v22 = vrot.slane %v13912_v51, 4  ;;  %v4132_v51 = vand.u32 2147483647, %v4122_v31 }
 0x249   : > { %v3826_v41 = vpop.f32.mrf.mxu2 }
 0x24a   : > { %v4087_v49 = vsel %vm4079_vm1, %v4072_v22, %v4073_v46  ;;  %vm4133_vm9 = vcmp.eq.f32.partialorder %v4132_v51, 8.507059e+37 }
 0x24b   : > { %v4088_v34 = vsel %vm4081_vm2, %v13897_v3, %v4087_v49  ;;  %v3839_v54 = vpop.f32.mrf.mxu3  ;;  %v4131_v3 = vsel %vm4130_vm6, %v13629_v17, %v4127_v53  ;;  %v13215_v49 = vld [vmem:[#allocation8 + $0x3bc] sm:$0xf0] }
 0x24c   : > { %v4098_v56 = vadd.f32 %v4088_v34, %v128_v47  ;;  %v4136_v4 = vsel %vm4133_vm9, %v4135_v61, %v4131_v3  ;;  %v11491_v34 = vld [vmem:[#allocation8 + $0x780] sm:$0xf]  ;;  %v10980_v53 = vor.u32 %v13215_v49, %v10979_v48 }
 0x24d   : > { %v4159_v8 = vmul.f32 %v13927_v63, %v4136_v4  ;;  %v13343_v54 = vld [vmem:[#allocation8 + $0x7bc] sm:$0xf0] }
 0x24e   : > { %13632 = vtanh.f32 %v4098_v56  ;;  %v12003_v56 = vld [vmem:[#allocation8 + $0xb80] sm:$0xf]  ;;  %v11492_v3 = vor.u32 %v13343_v54, %v11491_v34  ;;  %7370 = vmatpush.bf16.msra.mxu0 %v10980_v53 }
 0x24f   : > { %v12004_v61 = vor.u32 %v13471_v2, %v12003_v56  ;;  %v11811_v49 = vld [vmem:[#allocation8 + $0xa00] sm:$0xf] }
 0x250   : > { %7383 = vmatpush.bf16.msra.mxu1 %v11492_v3  ;;  %v13423_v34 = vld [vmem:[#allocation8 + $0xa3c] sm:$0xf0] }
 0x251   : > { %7396 = vmatpush.bf16.msra.mxu2 %v12004_v61  ;;  %v12323_v53 = vld [vmem:[#allocation8 + $0xe00] sm:$0xf] }
 0x252   : > { %v13551_v54 = vld [vmem:[#allocation8 + $0xe3c] sm:$0xf0] }
 0x253   : > { %v10723_v56 = vld [vmem:[#allocation8 + $0x180] sm:$0xf]  ;;  %v12324_v2 = vor.u32 %v13551_v54, %v12323_v53 }
 0x254   : > { %v13633_v5 = vpop.eup %13632  ;;  %v11747_v3 = vld [vmem:[#allocation8 + $0x980] sm:$0xf] }
 0x255   : > { %v4160_v9 = vmul.f32 %v13633_v5, %v4117_v7  ;;  %v12516_v7 = vor.u32 %v13599_v0, %v12515_v62  ;;  %v13407_v61 = vld [vmem:[#allocation8 + $0x9bc] sm:$0xf0] }
 0x256   : > { %v12259_v62 = vld [vmem:[#allocation8 + $0xd80] sm:$0xf] }
 0x257   : > { %v13930_v10 = vadd.f32 %v4160_v9, %v4159_v8  ;;  %v10915_v9 = vld [vmem:[#allocation8 + $0x300] sm:$0xf]  ;;  %7409 = vmatpush.bf16.msra.mxu3 %v12516_v7 }
 0x258   : > { %v10659_v7 = vld [vmem:[#allocation8 + $0x100] sm:$0xf] }
 0x259   : > { %v3850_v11 = vpop.f32.mrf.mxu0  ;;  %v13487_v53 = vld [vmem:[#allocation8 + $0xc3c] sm:$0xf0] }
 0x25b   : > { %v3863_v13 = vpop.f32.mrf.mxu1 }
 0x25c   : > { %v3864_v58 = vadd.f32 %v3863_v13, %v3850_v11  ;;  %v13199_v11 = vld [vmem:[#allocation8 + $0x33c] sm:$0xf0]  ;;  %v129_v13 = vunpack.c.h.bf16 %v13919_v29 }
 0x25d   : > { %v10851_v29 = vld [vmem:[#allocation8 + $0x280] sm:$0xf] }
 0x261   : > { %v3852_v23 = vpop.f32.mrf.mxu0 }
 0x263   : > { %v3876_v18 = vpop.f32.mrf.mxu2  ;;  %v3865_v24 = vpop.f32.mrf.mxu1 }
 0x264   : > { %v3877_v19 = vadd.f32 %v3876_v18, %v3864_v58  ;;  %v10916_v58 = vor.u32 %v13199_v11, %v10915_v9  ;;  %v11939_v18 = vld [vmem:[#allocation8 + $0xb00] sm:$0xf]  ;;  %v11428_v24 = vor.u32 %v13327_v15, %v11427_v12 }
 0x265   : > { %v3889_v20 = vpop.f32.mrf.mxu3  ;;  %v11171_v11 = vld [vmem:[#allocation8 + $0x500] sm:$0xf] }
 0x266   : > { %v13935_v52 = vadd.f32 %v3889_v20, %v3877_v19  ;;  %v13455_v19 = vld [vmem:[#allocation8 + $0xb3c] sm:$0xf0]  ;;  %7371 = vmatpush.bf16.msra.mxu0 %v10916_v58  ;;  %7384 = vmatpush.bf16.msra.mxu1 %v11428_v24 }
 0x267   : > { %v13263_v12 = vld [vmem:[#allocation8 + $0x53c] sm:$0xf0] }
 0x268   : > { %v13391_v58 = vld [vmem:[#allocation8 + $0x93c] sm:$0xf0] }
 0x269   : > { %v12195_v15 = vld [vmem:[#allocation8 + $0xd00] sm:$0xf] }
 0x26b   : > { %v3878_v25 = vpop.f32.mrf.mxu2 }
 0x26c   : > { %v11940_v25 = vor.u32 %v13455_v19, %v11939_v18  ;;  %v13519_v18 = vld [vmem:[#allocation8 + $0xd3c] sm:$0xf0] }
 0x26d   : > { %v3891_v16 = vpop.f32.mrf.mxu3 }
 0x26e   : > { %v12451_v16 = vld [vmem:[#allocation8 + $0xf00] sm:$0xf]  ;;  %7397 = vmatpush.bf16.msra.mxu2 %v11940_v25 }
 0x27b   : > { %v3902_v26 = vpop.f32.mrf.mxu0 }
 0x27d   : > { %v3915_v27 = vpop.f32.mrf.mxu1 }
 0x27e   : > { %v3916_v43 = vadd.f32 %v3915_v27, %v3902_v26  ;;  %v13583_v26 = vld [vmem:[#allocation8 + $0xf3c] sm:$0xf0] }
 0x27f   : > { %v12452_v27 = vor.u32 %v13583_v26, %v12451_v16  ;;  %v12196_v16 = vor.u32 %v13519_v18, %v12195_v15 }
 0x281   : > { %7410 = vmatpush.bf16.msra.mxu3 %v12452_v27 }
 0x283   : > { %v3904_v32 = vpop.f32.mrf.mxu0 }
 0x284   : > { %v13183_v32 = vld [vmem:[#allocation8 + $0x2bc] sm:$0xf0] }
 0x285   : > { %v3928_v28 = vpop.f32.mrf.mxu2  ;;  %v3917_v17 = vpop.f32.mrf.mxu1 }
 0x286   : > { %v3929_v21 = vadd.f32 %v3928_v28, %v3916_v43  ;;  %v11363_v17 = vld [vmem:[#allocation8 + $0x680] sm:$0xf] }
 0x287   : > { %v3941_v31 = vpop.f32.mrf.mxu3  ;;  %v13567_v43 = vld [vmem:[#allocation8 + $0xebc] sm:$0xf0] }
 0x288   : > { %v3942_v47 = vadd.f32 %v3941_v31, %v3929_v21  ;;  %v13167_v21 = vld [vmem:[#allocation8 + $0x23c] sm:$0xf0] }
 0x28a   : > { %v4074_v4 = vrot.slane %v3942_v47, 6 }
 0x28c   : > { %v4089_v28 = vsel %vm4077_vm0, %v13935_v52, %v4074_v4  ;;  %v12387_v52 = vld [vmem:[#allocation8 + $0xe80] sm:$0xf]  ;;  %v11748_v4 = vor.u32 %v13407_v61, %v11747_v3  ;;  %v11493_v3 = vld [vmem:[#allocation8 + $0x7c0] sm:$0xf0] }
 0x28d   : > { %v3930_v33 = vpop.f32.mrf.mxu2  ;;  %v13463_v61 = vld [vmem:[#allocation8 + $0xb84] sm:$0xf] }
 0x28f   : > { %v3943_v35 = vpop.f32.mrf.mxu3 }
 0x29c   : > { %v3954_v14 = vpop.f32.mrf.mxu0 }
 0x29e   : > { %v3967_v6 = vpop.f32.mrf.mxu1 }
 0x29f   : > { %v3968_v30 = vadd.f32 %v3967_v6, %v3954_v14  ;;  %v10852_v14 = vor.u32 %v13183_v32, %v10851_v29  ;;  %v13311_v6 = vld [vmem:[#allocation8 + $0x6bc] sm:$0xf0] }
 0x2a0   : > { %v11107_v29 = vld [vmem:[#allocation8 + $0x480] sm:$0xf] }
 0x2a1   : > { %7372 = vmatpush.bf16.msra.mxu0 %v10852_v14  ;;  %v13375_v14 = vld [vmem:[#allocation8 + $0x8bc] sm:$0xf0] }
 0x2a4   : > { %v3956_v38 = vpop.f32.mrf.mxu0 }
 0x2a6   : > { %v3980_v36 = vpop.f32.mrf.mxu2  ;;  %v3969_v39 = vpop.f32.mrf.mxu1 }
 0x2a7   : > { %v3981_v22 = vadd.f32 %v3980_v36, %v3968_v30  ;;  %v11875_v36 = vld [vmem:[#allocation8 + $0xa80] sm:$0xf] }
 0x2a8   : > { %v3993_v37 = vpop.f32.mrf.mxu3  ;;  %v10787_v30 = vld [vmem:[#allocation8 + $0x200] sm:$0xf] }
 0x2a9   : > { %v3994_v57 = vadd.f32 %v3993_v37, %v3981_v22  ;;  %v13439_v37 = vld [vmem:[#allocation8 + $0xabc] sm:$0xf0]  ;;  %v10788_v47 = vor.u32 %v13167_v21, %v10787_v30 }
 0x2aa   : > { %v13295_v22 = vld [vmem:[#allocation8 + $0x63c] sm:$0xf0] }
 0x2ab   : > { %v4075_v20 = vrot.slane %v3994_v57, 4  ;;  %v13151_v57 = vld [vmem:[#allocation8 + $0x1bc] sm:$0xf0]  ;;  %7373 = vmatpush.bf16.msra.mxu0 %v10788_v47 }
 0x2ac   : > { %v13103_v21 = vld [vmem:[#allocation8 + $0x3c] sm:$0xf0] }
 0x2ad   : > { %v11555_v47 = vld [vmem:[#allocation8 + $0x800] sm:$0xf] }
 0x2ae   : > { %v3982_v40 = vpop.f32.mrf.mxu2 }
 0x2af   : > { %v11364_v40 = vor.u32 %v13311_v6, %v11363_v17 }
 0x2b0   : > { %v3995_v42 = vpop.f32.mrf.mxu3 }
 0x2b1   : > { %v11876_v42 = vor.u32 %v13439_v37, %v11875_v36  ;;  %7385 = vmatpush.bf16.msra.mxu1 %v11364_v40  ;;  %v13159_v40 = vld [vmem:[#allocation8 + $0x204] sm:$0xf] }
 0x2b3   : > { %7398 = vmatpush.bf16.msra.mxu2 %v11876_v42 }
 0x2bf   : > { %v4006_v44 = vpop.f32.mrf.mxu0 }
 0x2c1   : > { %v4019_v45 = vpop.f32.mrf.mxu1 }
 0x2c2   : > { %v4020_v46 = vadd.f32 %v4019_v45, %v4006_v44  ;;  %v12388_v44 = vor.u32 %v13567_v43, %v12387_v52  ;;  %v11299_v45 = vld [vmem:[#allocation8 + $0x600] sm:$0xf] }
 0x2c3   : > { %v11300_v48 = vor.u32 %v13295_v22, %v11299_v45  ;;  %v11043_v22 = vld [vmem:[#allocation8 + $0x400] sm:$0xf] }
 0x2c4   : > { %7411 = vmatpush.bf16.msra.mxu3 %v12388_v44  ;;  %v10531_v44 = vld [vmem:[#allocation8] sm:$0xf] }
 0x2c5   : > { %7386 = vmatpush.bf16.msra.mxu1 %v11300_v48  ;;  %v10532_v45 = vor.u32 %v13103_v21, %v10531_v44  ;;  %v13415_v44 = vld [vmem:[#allocation8 + $0xa04] sm:$0xf] }
 0x2c6   : > { %v11813_v21 = vld [vmem:[#allocation8 + $0xa40] sm:$0xf0] }
 0x2c7   : > { %v4008_v60 = vpop.f32.mrf.mxu0 }
 0x2c8   : > { %v10724_v60 = vor.u32 %v13151_v57, %v10723_v56  ;;  %7412 = vmatpush.bf16.msra.mxu3 %v12324_v2  ;;  %v13207_v2 = vld [vmem:[#allocation8 + $0x384] sm:$0xf] }
 0x2c9   : > { %v4032_v41 = vpop.f32.mrf.mxu2  ;;  %v4021_v5 = vpop.f32.mrf.mxu1  ;;  %v10981_v57 = vld [vmem:[#allocation8 + $0x3c0] sm:$0xf0] }
 0x2ca   : > { %v4033_v51 = vadd.f32 %v4032_v41, %v4020_v46  ;;  %v11812_v41 = vor.u32 %v13423_v34, %v11811_v49  ;;  %v13535_v5 = vld [vmem:[#allocation8 + $0xdbc] sm:$0xf0]  ;;  %7374 = vmatpush.bf16.msra.mxu0 %v10724_v60  ;;  %v10984_v60 = vor.u32 %v13207_v2, %v10981_v57  ;;  %v13271_v57 = vld [vmem:[#allocation8 + $0x584] sm:$0xf] }
 0x2cb   : > { %v4045_v59 = vpop.f32.mrf.mxu3  ;;  %v12260_v9 = vor.u32 %v13535_v5, %v12259_v62  ;;  %v13359_v34 = vld [vmem:[#allocation8 + $0x83c] sm:$0xf0]  ;;  %v12005_v62 = vld [vmem:[#allocation8 + $0xbc0] sm:$0xf0] }
 0x2cc   : > { %v4046_v8 = vadd.f32 %v4045_v59, %v4033_v51  ;;  %v11235_v51 = vld [vmem:[#allocation8 + $0x580] sm:$0xf]  ;;  %7399 = vmatpush.bf16.msra.mxu2 %v11812_v41  ;;  %v11556_v54 = vor.u32 %v13359_v34, %v11555_v47  ;;  %v13591_v5 = vld [vmem:[#allocation8 + $0xf84] sm:$0xf] }
 0x2cd   : > { %v13279_v59 = vld [vmem:[#allocation8 + $0x5bc] sm:$0xf0]  ;;  %7413 = vmatpush.bf16.msra.mxu3 %v12260_v9  ;;  %v12325_v47 = vld [vmem:[#allocation8 + $0xe40] sm:$0xf0] }
 0x2ce   : > { %v4076_v23 = vrot.slane %v4046_v8, 2  ;;  %v11236_v0 = vor.u32 %v13279_v59, %v11235_v51  ;;  %v13135_v8 = vld [vmem:[#allocation8 + $0x13c] sm:$0xf0]  ;;  %v13335_v51 = vld [vmem:[#allocation8 + $0x784] sm:$0xf] }
 0x2cf   : > { %v10660_v19 = vor.u32 %v13135_v8, %v10659_v7  ;;  %v12067_v41 = vld [vmem:[#allocation8 + $0xc00] sm:$0xf]  ;;  %v12517_v7 = vld [vmem:[#allocation8 + $0xfc0] sm:$0xf0] }
 0x2d0   : > { %v4090_v31 = vsel %vm4079_vm1, %v4075_v20, %v4076_v23  ;;  %7387 = vmatpush.bf16.msra.mxu1 %v11236_v0  ;;  %7400 = vmatpush.bf16.msra.mxu2 %v11748_v4  ;;  %v11172_v23 = vor.u32 %v13263_v12, %v11171_v11  ;;  %v12068_v56 = vor.u32 %v13487_v53, %v12067_v41  ;;  %v13191_v8 = vld [vmem:[#allocation8 + $0x304] sm:$0xf] }
 0x2d1   : > { %v4091_v33 = vsel %vm4081_vm2, %v4089_v28, %v4090_v31  ;;  %v4034_v35 = vpop.f32.mrf.mxu2  ;;  %7375 = vmatpush.bf16.msra.mxu0 %v10660_v19  ;;  %7414 = vmatpush.bf16.msra.mxu3 %v12196_v16  ;;  %v10595_v28 = vld [vmem:[#allocation8 + $0x80] sm:$0xf]  ;;  %v11496_v0 = vor.u32 %v13335_v51, %v11493_v3  ;;  %v12008_v4 = vor.u32 %v13463_v61, %v12005_v62  ;;  %v10917_v12 = vld [vmem:[#allocation8 + $0x340] sm:$0xf0] }
 0x2d2   : > { %v4099_v38 = vadd.f32 %v4091_v33, %v129_v13  ;;  %v11683_v13 = vld [vmem:[#allocation8 + $0x900] sm:$0xf]  ;;  %v12520_v11 = vor.u32 %v13591_v5, %v12517_v7  ;;  %v10920_v19 = vor.u32 %v13191_v8, %v10917_v12  ;;  %v11237_v51 = vld [vmem:[#allocation8 + $0x5c0] sm:$0xf0] }
 0x2d3   : > { %v4047_v39 = vpop.f32.mrf.mxu3  ;;  %v11684_v24 = vor.u32 %v13391_v58, %v11683_v13  ;;  %v13119_v31 = vld [vmem:[#allocation8 + $0xbc] sm:$0xf0]  ;;  %v13319_v13 = vld [vmem:[#allocation8 + $0x704] sm:$0xf]  ;;  %v11240_v3 = vor.u32 %v13271_v57, %v11237_v51 }
 0x2d4   : > { %v10525_v46 = vmul.f32 -1.442695, %v4099_v38  ;;  %7388 = vmatpush.bf16.msra.mxu1 %v11172_v23  ;;  %v10596_v17 = vor.u32 %v13119_v31, %v10595_v28  ;;  %v13247_v33 = vld [vmem:[#allocation8 + $0x4bc] sm:$0xf0]  ;;  %v11429_v58 = vld [vmem:[#allocation8 + $0x740] sm:$0xf0] }
 0x2d5   : > { %7401 = vmatpush.bf16.msra.mxu2 %v11684_v24  ;;  %v11619_v35 = vld [vmem:[#allocation8 + $0x880] sm:$0xf]  ;;  %v11108_v36 = vor.u32 %v13247_v33, %v11107_v29  ;;  %v13447_v23 = vld [vmem:[#allocation8 + $0xb04] sm:$0xf] }
 0x2d6   : > { %13634 = vpow2.f32 %v10525_v46  ;;  %v11620_v37 = vor.u32 %v13375_v14, %v11619_v35  ;;  %v12131_v38 = vld [vmem:[#allocation8 + $0xc80] sm:$0xf]  ;;  %7376 = vmatpush.bf16.msra.mxu0 %v10596_v17  ;;  %v11941_v24 = vld [vmem:[#allocation8 + $0xb40] sm:$0xf0] }
 0x2d7   : > { %v13503_v39 = vld [vmem:[#allocation8 + $0xcbc] sm:$0xf0]  ;;  %v13175_v31 = vld [vmem:[#allocation8 + $0x284] sm:$0xf] }
 0x2d8   : > { %v12132_v42 = vor.u32 %v13503_v39, %v12131_v38  ;;  %7389 = vmatpush.bf16.msra.mxu1 %v11108_v36  ;;  %v13231_v46 = vld [vmem:[#allocation8 + $0x43c] sm:$0xf0]  ;;  %v10853_v29 = vld [vmem:[#allocation8 + $0x2c0] sm:$0xf0] }
 0x2d9   : > { %7402 = vmatpush.bf16.msra.mxu2 %v11620_v37  ;;  %v11044_v49 = vor.u32 %v13231_v46, %v11043_v22  ;;  %v10856_v17 = vor.u32 %v13175_v31, %v10853_v29  ;;  %v11365_v33 = vld [vmem:[#allocation8 + $0x6c0] sm:$0xf0]  ;;  %v11816_v22 = vor.u32 %v13415_v44, %v11813_v21 }
 0x2da   : > { %7415 = vmatpush.bf16.msra.mxu3 %v12132_v42  ;;  %7377 = vmatpush.bf16.msra.mxu0 %v10532_v45  ;;  %v13431_v35 = vld [vmem:[#allocation8 + $0xa84] sm:$0xf] }
 0x2db   : > { %v13559_v36 = vld [vmem:[#allocation8 + $0xe84] sm:$0xf] }
 0x2dc   : > { %v13635_v20 = vpop.eup %13634  ;;  %7390 = vmatpush.bf16.msra.mxu1 %v11044_v49  ;;  %v12389_v37 = vld [vmem:[#allocation8 + $0xec0] sm:$0xf0] }
 0x2dd   : > { %v4142_v25 = vadd.f32 1.0, %v13635_v20  ;;  %7403 = vmatpush.bf16.msra.mxu2 %v11556_v54  ;;  %v11432_v20 = vor.u32 %v13319_v13, %v11429_v58  ;;  %v12392_v39 = vor.u32 %v13559_v36, %v12389_v37  ;;  %v10789_v42 = vld [vmem:[#allocation8 + $0x240] sm:$0xf0] }
 0x2de   : > { %7416 = vmatpush.bf16.msra.mxu3 %v12068_v56  ;;  %7422 = vmatpush.bf16.msrb.mxu0 %v10984_v60  ;;  %v10792_v43 = vor.u32 %v13159_v40, %v10789_v42  ;;  %v13543_v46 = vld [vmem:[#allocation8 + $0xe04] sm:$0xf]  ;;  %v13959_v60 = vpop.permute.xlu0 %4168 }
 0x2df   : > { %13636 = vrcp.f32 %v4142_v25  ;;  %v4152_v26 = vand.u32 2147483647, %v4142_v25  ;;  %v4154_v27 = vand.u32 2147483648, %v4142_v25  ;;  %vm4148_vm13 = vweird.f32 %v4142_v25  ;;  %v13143_v54 = vld [vmem:[#allocation8 + $0x184] sm:$0xf] }
 0x2e0   : > { %13638 = vtanh.f32 %v13930_v10  ;;  %7435 = vmatpush.bf16.msrb.mxu1 %v11496_v0  ;;  %v10725_v56 = vld [vmem:[#allocation8 + $0x1c0] sm:$0xf0]  ;;  %vm4170_vm3 = vcmp.eq.s32.totalorder %v13959_v60, 1  ;;  %v13200_v60 = vld [vmem:[#allocation8 + $0x344] sm:$0xf0] }
 0x2e1   : > { %vm13942_vm14 = vcmp.eq.f32.partialorder %v4152_v26, 8.507059e+37  ;;  %v4155_v30 = vor.u32 1.1754944e-38, %v4154_v27  ;;  %7448 = vmatpush.bf16.msrb.mxu2 %v12008_v4  ;;  %v11944_v26 = vor.u32 %v13447_v23, %v11941_v24  ;;  %v12453_v27 = vld [vmem:[#allocation8 + $0xf40] sm:$0xf0]  ;;  %v10728_v2 = vor.u32 %v13143_v54, %v10725_v56 }
 0x2e2   : > { %7461 = vmatpush.bf16.msrb.mxu3 %v12520_v11  ;;  %7423 = vmatpush.bf16.msrb.mxu0 %v10920_v19  ;;  %v11749_v61 = vld [vmem:[#allocation8 + $0x9c0] sm:$0xf0] }
 0x2e3   : > { %v13527_v62 = vld [vmem:[#allocation8 + $0xd84] sm:$0xf] }
 0x2e4   : > { %7436 = vmatpush.bf16.msrb.mxu1 %v11432_v20  ;;  %v12261_v0 = vld [vmem:[#allocation8 + $0xdc0] sm:$0xf0] }
 0x2e5   : > { %v13637_v32 = vpop.eup %13636  ;;  %7449 = vmatpush.bf16.msrb.mxu2 %v11944_v26  ;;  %v12264_v5 = vor.u32 %v13527_v62, %v12261_v0  ;;  %v13127_v7 = vld [vmem:[#allocation8 + $0x104] sm:$0xf] }
 0x2e6   : > { %v4144_v6 = vmul.f32 %v13637_v32, %v4142_v25  ;;  %vm4149_vm12 = vweird.f32 %v13637_v32  ;;  %v13639_v15 = vpop.eup %13638  ;;  %v13575_v25 = vld [vmem:[#allocation8 + $0xf04] sm:$0xf]  ;;  %7424 = vmatpush.bf16.msrb.mxu0 %v10856_v17 }
 0x2e7   : > { %vm13946_vm15 = vmor %vm4148_vm13, %vm4149_vm12  ;;  %v12456_v28 = vor.u32 %v13575_v25, %v12453_v27  ;;  %v13255_v8 = vld [vmem:[#allocation8 + $0x504] sm:$0xf] }
 0x2e8   : > { %v4145_v52 = vsub.f32 1.0, %v4144_v6  ;;  %v11877_v6 = vld [vmem:[#allocation8 + $0xac0] sm:$0xf0] }
 0x2e9   : > { %7462 = vmatpush.bf16.msrb.mxu3 %v12456_v28  ;;  %v11880_v38 = vor.u32 %v13431_v35, %v11877_v6  ;;  %v11173_v11 = vld [vmem:[#allocation8 + $0x540] sm:$0xf0] }
 0x2ea   : > { %v4146_v48 = vmul.f32 %v13637_v32, %v4145_v52  ;;  %v13287_v52 = vld [vmem:[#allocation8 + $0x604] sm:$0xf]  ;;  %7425 = vmatpush.bf16.msrb.mxu0 %v10792_v43  ;;  %v11176_v58 = vor.u32 %v13255_v8, %v11173_v11 }
 0x2eb   : > { %7450 = vmatpush.bf16.msrb.mxu2 %v11880_v38  ;;  %v13383_v12 = vld [vmem:[#allocation8 + $0x904] sm:$0xf] }
 0x2ec   : > { %v4147_v59 = vadd.f32 %v13637_v32, %v4146_v48  ;;  %v12328_v48 = vor.u32 %v13543_v46, %v12325_v47  ;;  %v11685_v13 = vld [vmem:[#allocation8 + $0x940] sm:$0xf0] }
 0x2ed   : > { %7463 = vmatpush.bf16.msrb.mxu3 %v12392_v39  ;;  %v12197_v19 = vld [vmem:[#allocation8 + $0xd40] sm:$0xf0] }
 0x2ee   : > { %v4151_v9 = vsel %vm13946_vm15, %v13637_v32, %v4147_v59  ;;  %v13303_v32 = vld [vmem:[#allocation8 + $0x684] sm:$0xf]  ;;  %7426 = vmatpush.bf16.msrb.mxu0 %v10728_v2 }
 0x2ef   : > { %v4156_v18 = vsel %vm13942_vm14, %v4155_v30, %v4151_v9  ;;  %v11368_v14 = vor.u32 %v13303_v32, %v11365_v33  ;;  %v11301_v30 = vld [vmem:[#allocation8 + $0x640] sm:$0xf0]  ;;  %7451 = vmatpush.bf16.msrb.mxu2 %v11816_v22 }
 0x2f0   : > { %v13955_v16 = vmul.f32 %v13639_v15, %v4156_v18  ;;  %v11304_v45 = vor.u32 %v13287_v52, %v11301_v30  ;;  %v13399_v59 = vld [vmem:[#allocation8 + $0x984] sm:$0xf]  ;;  %v11688_v15 = vor.u32 %v13383_v12, %v11685_v13 }
 0x2f1   : > { %7437 = vmatpush.bf16.msrb.mxu1 %v11368_v14  ;;  %7464 = vmatpush.bf16.msrb.mxu3 %v12328_v48  ;;  %v11752_v4 = vor.u32 %v13399_v59, %v11749_v61  ;;  %v13511_v18 = vld [vmem:[#allocation8 + $0xd04] sm:$0xf] }
 0x2f2   : > { %4172 = vst [vmem:[#allocation1] ss:$4 sm:$0xff] %v13955_v16  ;;  %v12200_v20 = vor.u32 %v13511_v18, %v12197_v19  ;;  %v13111_v23 = vld [vmem:[#allocation8 + $0x84] sm:$0xf] }
 0x2f3   : > { %7452 = vmatpush.bf16.msrb.mxu2 %v11752_v4  ;;  %v10597_v24 = vld [vmem:[#allocation8 + $0xc0] sm:$0xf0] }
 0x2f4   : > { %v13239_v25 = vld [vmem:[#allocation8 + $0x484] sm:$0xf]  ;;  %v10600_v28 = vor.u32 %v13111_v23, %v10597_v24 }
 0x2f5   : > { %7438 = vmatpush.bf16.msrb.mxu1 %v11304_v45  ;;  %7465 = vmatpush.bf16.msrb.mxu3 %v12264_v5  ;;  %v11109_v14 = vld [vmem:[#allocation8 + $0x4c0] sm:$0xf0] }
 0x2f6   : > { %v11112_v38 = vor.u32 %v13239_v25, %v11109_v14  ;;  %v13367_v39 = vld [vmem:[#allocation8 + $0x884] sm:$0xf]  ;;  %v11499_v14 = vld [vmem:[#allocation8 + $0x788] sm:$0xf] }
 0x2f7   : > { %7453 = vmatpush.bf16.msrb.mxu2 %v11688_v15  ;;  %v11621_v40 = vld [vmem:[#allocation8 + $0x8c0] sm:$0xf0]  ;;  %v13988_v15 = vld [vmem:[#allocation4] sm:$0xff] }
 0x2f8   : > { %v11624_v52 = vor.u32 %v13367_v39, %v11621_v40  ;;  %v13495_v43 = vld [vmem:[#allocation8 + $0xc84] sm:$0xf]  ;;  %v13600_v39 = vld [vmem:[#allocation8 + $0xfc4] sm:$0xf0] }
 0x2f9   : > { %v4173_v49 = vld.sshfl [vmem:[#allocation1] sm:$0xff pattern:$0x73625140]  ;;  %v4174_v34 = vld.sshfl [vmem:[#allocation1 + $0x8] sm:$0xff pattern:$0x73625140]  ;;  %7439 = vmatpush.bf16.msrb.mxu1 %v11240_v3  ;;  %7466 = vmatpush.bf16.msrb.mxu3 %v12200_v20 }
 0x2fa   : > { %v4175_v41 = vld.sshfl [vmem:[#allocation1 + $0x10] sm:$0xff pattern:$0x73625140]  ;;  %v4176_v53 = vld.sshfl [vmem:[#allocation1 + $0x18] sm:$0xff pattern:$0x73625140] }
 0x2fb   : > { %4181 = vst [vmem:[#allocation1] ss:$4 sm:$0xff] %v13798_v55  ;;  %v10661_v55 = vld [vmem:[#allocation8 + $0x140] sm:$0xf0]  ;;  %7454 = vmatpush.bf16.msrb.mxu2 %v11624_v52  ;;  %v10923_v52 = vld [vmem:[#allocation8 + $0x308] sm:$0xf] }
 0x2fc   : > { %v10664_v9 = vor.u32 %v13127_v7, %v10661_v55  ;;  %v12133_v30 = vld [vmem:[#allocation8 + $0xcc0] sm:$0xf0] }
 0x2fd   : > { %7440 = vmatpush.bf16.msrb.mxu1 %v11176_v58  ;;  %v13095_v44 = vld [vmem:[#allocation8 + $0x4] sm:$0xf]  ;;  %v12136_v21 = vor.u32 %v13495_v43, %v12133_v30 }
 0x2fe   : > { %7427 = vmatpush.bf16.msrb.mxu0 %v10664_v9  ;;  %v10533_v45 = vld [vmem:[#allocation8 + $0x40] sm:$0xf0] }
 0x2ff   : > { %v13223_v22 = vld [vmem:[#allocation8 + $0x404] sm:$0xf]  ;;  %v10536_v48 = vor.u32 %v13095_v44, %v10533_v45  ;;  %7467 = vmatpush.bf16.msrb.mxu3 %v12136_v21 }
 0x300   : > { %v11045_v46 = vld [vmem:[#allocation8 + $0x440] sm:$0xf0] }
 0x301   : > { %7441 = vmatpush.bf16.msrb.mxu1 %v11112_v38  ;;  %v12069_v56 = vld [vmem:[#allocation8 + $0xc40] sm:$0xf0]  ;;  %v12523_v38 = vld [vmem:[#allocation8 + $0xf88] sm:$0xf] }
 0x302   : > { %v4182_v26 = vld.sshfl [vmem:[#allocation1] sm:$0xff pattern:$0x73625140]  ;;  %v4183_v27 = vld.sshfl [vmem:[#allocation1 + $0x8] sm:$0xff pattern:$0x73625140]  ;;  %7428 = vmatpush.bf16.msrb.mxu0 %v10600_v28 }
 0x303   : > { %v4184_v31 = vld.sshfl [vmem:[#allocation1 + $0x10] sm:$0xff pattern:$0x73625140]  ;;  %v4185_v29 = vld.sshfl [vmem:[#allocation1 + $0x18] sm:$0xff pattern:$0x73625140]  ;;  %v4191_v32 = vsel %vm4170_vm3, %v4174_v34, %v4183_v27  ;;  %v4190_v6 = vsel %vm4170_vm3, %v4173_v49, %v4182_v26  ;;  %v11048_v49 = vor.u32 %v13223_v22, %v11045_v46 }
 0x304   : > { %v4192_v17 = vsel %vm4170_vm3, %v4175_v41, %v4184_v31  ;;  %v4193_v33 = vsel %vm4170_vm3, %v4176_v53, %v4185_v29  ;;  %v4198_v35 = vrot.slane %v4191_v32, 6  ;;  %4208 = vst [vmem:[#allocation1] ss:$4 sm:$0xff] %v13930_v10  ;;  %v13351_v34 = vld [vmem:[#allocation8 + $0x804] sm:$0xf] }
 0x305   : > { %v4199_v36 = vrot.slane %v4192_v17, 4  ;;  %v4200_v37 = vrot.slane %v4193_v33, 2  ;;  %v11557_v41 = vld [vmem:[#allocation8 + $0x840] sm:$0xf0]  ;;  %7442 = vmatpush.bf16.msrb.mxu1 %v11048_v49  ;;  %v10987_v33 = vld [vmem:[#allocation8 + $0x388] sm:$0xf] }
 0x306   : > { %v4201_v42 = vsel %vm4077_vm0, %v4190_v6, %v4198_v35  ;;  %v13479_v53 = vld [vmem:[#allocation8 + $0xc04] sm:$0xf]  ;;  %v11560_v54 = vor.u32 %v13351_v34, %v11557_v41  ;;  %7429 = vmatpush.bf16.msrb.mxu0 %v10536_v48  ;;  %v13216_v35 = vld [vmem:[#allocation8 + $0x3c4] sm:$0xf0]  ;;  %v12524_v48 = vor.u32 %v13600_v39, %v12523_v38 }
 0x307   : > { %v4202_v10 = vsel %vm4079_vm1, %v4199_v36, %v4200_v37  ;;  %v12072_v2 = vor.u32 %v13479_v53, %v12069_v56  ;;  %v13344_v6 = vld [vmem:[#allocation8 + $0x7c4] sm:$0xf0]  ;;  %v10988_v21 = vor.u32 %v13216_v35, %v10987_v33 }
 0x308   : > { %v4203_v47 = vsel %vm4081_vm2, %v4201_v42, %v4202_v10  ;;  %7455 = vmatpush.bf16.msrb.mxu2 %v11560_v54  ;;  %v12011_v36 = vld [vmem:[#allocation8 + $0xb88] sm:$0xf]  ;;  %v11500_v45 = vor.u32 %v13344_v6, %v11499_v14 }
 0x309   : > { %4205 = vst [vmem:[#allocation2] sm:$0xff] %v4203_v47  ;;  %7468 = vmatpush.bf16.msrb.mxu3 %v12072_v2  ;;  %v13472_v37 = vld [vmem:[#allocation8 + $0xbc4] sm:$0xf0]  ;;  %v10924_v2 = vor.u32 %v13200_v60, %v10923_v52 }
 0x30a   : > { %v12012_v47 = vor.u32 %v13472_v37, %v12011_v36  ;;  %v11435_v49 = vld [vmem:[#allocation8 + $0x708] sm:$0xf] }
 0x30b   : > { %v4209_v57 = vld.sshfl [vmem:[#allocation1] sm:$0xff pattern:$0x73625140]  ;;  %v4210_v51 = vld.sshfl [vmem:[#allocation1 + $0x8] sm:$0xff pattern:$0x73625140] }
 0x30c   : > { %v4211_v59 = vld.sshfl [vmem:[#allocation1 + $0x10] sm:$0xff pattern:$0x73625140]  ;;  %v4212_v3 = vld.sshfl [vmem:[#allocation1 + $0x18] sm:$0xff pattern:$0x73625140] }
 0x30d   : > { %4218 = vst [vmem:[#allocation1] ss:$4 sm:$0xff] %v13927_v63  ;;  %v13328_v34 = vld [vmem:[#allocation8 + $0x744] sm:$0xf0] }
 0x30e   : > { %v11947_v41 = vld [vmem:[#allocation8 + $0xb08] sm:$0xf] }
 0x30f   : > { %v13456_v53 = vld [vmem:[#allocation8 + $0xb44] sm:$0xf0] }
 0x310   : > { %v12459_v54 = vld [vmem:[#allocation8 + $0xf08] sm:$0xf] }
 0x311   : > { %v13584_v56 = vld [vmem:[#allocation8 + $0xf44] sm:$0xf0] }
 0x312   : > { %v13408_v33 = vld [vmem:[#allocation8 + $0x9c4] sm:$0xf0] }
 0x313   : > { %v12267_v35 = vld [vmem:[#allocation8 + $0xd88] sm:$0xf] }
 0x314   : > { %v4219_v61 = vld.sshfl [vmem:[#allocation1] sm:$0xff pattern:$0x73625140]  ;;  %v4220_v62 = vld.sshfl [vmem:[#allocation1 + $0x8] sm:$0xff pattern:$0x73625140] }
 0x315   : > { %v4221_v0 = vld.sshfl [vmem:[#allocation1 + $0x10] sm:$0xff pattern:$0x73625140]  ;;  %v4222_v4 = vld.sshfl [vmem:[#allocation1 + $0x18] sm:$0xff pattern:$0x73625140]  ;;  %v4228_v5 = vsel %vm4170_vm3, %v4210_v51, %v4220_v62  ;;  %v4227_v63 = vsel %vm4170_vm3, %v4209_v57, %v4219_v61  ;;  %v11436_v57 = vor.u32 %v13328_v34, %v11435_v49  ;;  %v12460_v61 = vor.u32 %v13584_v56, %v12459_v54 }
 0x316   : > { %v4229_v7 = vsel %vm4170_vm3, %v4211_v59, %v4221_v0  ;;  %v4230_v55 = vsel %vm4170_vm3, %v4212_v3, %v4222_v4  ;;  %v4235_v8 = vrot.slane %v4228_v5, 6  ;;  %4243 = vst [vmem:[#allocation1] ss:$4 sm:$0xff] %v13955_v16  ;;  %v10859_v51 = vld [vmem:[#allocation8 + $0x288] sm:$0xf]  ;;  %v11948_v3 = vor.u32 %v13456_v53, %v11947_v41 }
 0x317   : > { %v4236_v9 = vrot.slane %v4229_v7, 4  ;;  %v4237_v11 = vrot.slane %v4230_v55, 2  ;;  %v13184_v59 = vld [vmem:[#allocation8 + $0x2c4] sm:$0xf0] }
 0x318   : > { %v4238_v12 = vsel %vm4077_vm0, %v4227_v63, %v4235_v8  ;;  %v11371_v62 = vld [vmem:[#allocation8 + $0x688] sm:$0xf]  ;;  %v10860_v8 = vor.u32 %v13184_v59, %v10859_v51 }
 0x319   : > { %v4239_v13 = vsel %vm4079_vm1, %v4236_v9, %v4237_v11  ;;  %v13312_v0 = vld [vmem:[#allocation8 + $0x6c4] sm:$0xf0] }
 0x31a   : > { %v4240_v58 = vsel %vm4081_vm2, %v4238_v12, %v4239_v13  ;;  %v11883_v4 = vld [vmem:[#allocation8 + $0xa88] sm:$0xf]  ;;  %v11372_v63 = vor.u32 %v13312_v0, %v11371_v62 }
 0x31b   : > { %4242 = vst [vmem:[#allocation3] sm:$0xff] %v4240_v58  ;;  %v13440_v5 = vld [vmem:[#allocation8 + $0xac4] sm:$0xf0] }
 0x31c   : > { %v12395_v7 = vld [vmem:[#allocation8 + $0xe88] sm:$0xf]  ;;  %v11884_v12 = vor.u32 %v13440_v5, %v11883_v4 }
 0x31d   : > { %v4244_v18 = vld.sshfl [vmem:[#allocation1] sm:$0xff pattern:$0x73625140]  ;;  %v4245_v19 = vld.sshfl [vmem:[#allocation1 + $0x8] sm:$0xff pattern:$0x73625140] }
 0x31e   : > { %v4246_v20 = vld.sshfl [vmem:[#allocation1 + $0x10] sm:$0xff pattern:$0x73625140]  ;;  %v4247_v23 = vld.sshfl [vmem:[#allocation1 + $0x18] sm:$0xff pattern:$0x73625140] }
 0x31f   : > { %v4253_v16 = vsel %vm4170_vm3, %v4245_v19, 0.0  ;;  %v4254_v24 = vsel %vm4170_vm3, %v4246_v20, 0.0  ;;  %v4255_v25 = vsel %vm4170_vm3, %v4247_v23, 0.0  ;;  %4285 = vst [vmem:[#allocation1] ss:$4 sm:$0xff] %v13988_v15  ;;  %v4252_v31 = vsel %vm4170_vm3, %v4244_v18, 0.0 }
 0x320   : > { %v4260_v26 = vrot.slane %v4253_v16, 6  ;;  %v4261_v27 = vrot.slane %v4254_v24, 4  ;;  %v4262_v28 = vrot.slane %v4255_v25, 2  ;;  %v13568_v55 = vld [vmem:[#allocation8 + $0xec4] sm:$0xf0] }
 0x321   : > { %v10795_v9 = vld [vmem:[#allocation8 + $0x208] sm:$0xf]  ;;  %v12396_v13 = vor.u32 %v13568_v55, %v12395_v7 }
 0x322   : > { %v4263_v29 = vsel %vm4077_vm0, %v4252_v31, %v4260_v26  ;;  %v4264_v32 = vsel %vm4079_vm1, %v4261_v27, %v4262_v28  ;;  %v13168_v11 = vld [vmem:[#allocation8 + $0x244] sm:$0xf0] }
 0x323   : > { %v4265_v17 = vsel %vm4081_vm2, %v4263_v29, %v4264_v32  ;;  %v11307_v58 = vld [vmem:[#allocation8 + $0x608] sm:$0xf]  ;;  %v10796_v24 = vor.u32 %v13168_v11, %v10795_v9  ;;  %v13208_v11 = vld [vmem:[#allocation8 + $0x38c] sm:$0xf] }
 0x324   : > { %4270 = vst [vmem:[%s4269_s19] sm:$0xff] %v4265_v17  ;;  %v13296_v18 = vld [vmem:[#allocation8 + $0x644] sm:$0xf0] }
 0x325   : > { %v11819_v19 = vld [vmem:[#allocation8 + $0xa08] sm:$0xf]  ;;  %v11308_v25 = vor.u32 %v13296_v18, %v11307_v58  ;;  %v11501_v58 = vld [vmem:[#allocation8 + $0x7c8] sm:$0xf0] }
 0x326   : > { %v4286_v40 = vld.sshfl [vmem:[#allocation1] sm:$0xff pattern:$0x73625140]  ;;  %v4287_v42 = vld.sshfl [vmem:[#allocation1 + $0x8] sm:$0xff pattern:$0x73625140] }
 0x327   : > { %v14005_v43 = vpack.c.bf16 %v4286_v40, %v4286_v40  ;;  %v14007_v30 = vpack.c.bf16 %v4287_v42, %v4287_v42  ;;  %v4288_v44 = vld.sshfl [vmem:[#allocation1 + $0x10] sm:$0xff pattern:$0x73625140]  ;;  %v4289_v10 = vld.sshfl [vmem:[#allocation1 + $0x18] sm:$0xff pattern:$0x73625140] }
 0x328   : > { %v14009_v22 = vpack.c.bf16 %v4288_v44, %v4288_v44  ;;  %v14011_v46 = vpack.c.bf16 %v4289_v10, %v4289_v10  ;;  %v13424_v20 = vld [vmem:[#allocation8 + $0xa44] sm:$0xf0]  ;;  %v13464_v18 = vld [vmem:[#allocation8 + $0xb8c] sm:$0xf] }
 0x329   : > { %7378 = vmatmul.bf16.vlgmr.msra.gmra.mxu0 %v14005_v43  ;;  %7391 = vmatmul.bf16.vlgmr.msra.gmra.mxu1 %v14007_v30  ;;  %v12331_v23 = vld [vmem:[#allocation8 + $0xe08] sm:$0xf]  ;;  %v11820_v28 = vor.u32 %v13424_v20, %v11819_v19 }
 0x32a   : > { %7404 = vmatmul.bf16.vlgmr.msra.gmra.mxu2 %v14009_v22  ;;  %7417 = vmatmul.bf16.vlgmr.msra.gmra.mxu3 %v14011_v46  ;;  %v13552_v16 = vld [vmem:[#allocation8 + $0xe44] sm:$0xf0] }
 0x32b   : > { %7474 = vmatpush.bf16.msra.mxu0 %v10988_v21  ;;  %7487 = vmatpush.bf16.msra.mxu1 %v11500_v45  ;;  %v10731_v26 = vld [vmem:[#allocation8 + $0x188] sm:$0xf]  ;;  %v12332_v31 = vor.u32 %v13552_v16, %v12331_v23  ;;  %v12013_v23 = vld [vmem:[#allocation8 + $0xbc8] sm:$0xf0] }
 0x32c   : > { %7500 = vmatpush.bf16.msra.mxu2 %v12012_v47  ;;  %7513 = vmatpush.bf16.msra.mxu3 %v12524_v48  ;;  %v13152_v27 = vld [vmem:[#allocation8 + $0x1c4] sm:$0xf0]  ;;  %v13592_v16 = vld [vmem:[#allocation8 + $0xf8c] sm:$0xf] }
 0x32d   : > { %v11243_v29 = vld [vmem:[#allocation8 + $0x588] sm:$0xf]  ;;  %v10732_v6 = vor.u32 %v13152_v27, %v10731_v26 }
 0x32e   : > { %v13280_v32 = vld [vmem:[#allocation8 + $0x5c4] sm:$0xf0] }
 0x32f   : > { %7475 = vmatpush.bf16.msra.mxu0 %v10924_v2  ;;  %7488 = vmatpush.bf16.msra.mxu1 %v11436_v57  ;;  %v11755_v17 = vld [vmem:[#allocation8 + $0x988] sm:$0xf]  ;;  %v11244_v36 = vor.u32 %v13280_v32, %v11243_v29  ;;  %v10925_v29 = vld [vmem:[#allocation8 + $0x348] sm:$0xf0]  ;;  %v12016_v32 = vor.u32 %v13464_v18, %v12013_v23 }
 0x330   : > { %7501 = vmatpush.bf16.msra.mxu2 %v11948_v3  ;;  %7514 = vmatpush.bf16.msra.mxu3 %v12460_v61  ;;  %v13536_v14 = vld [vmem:[#allocation8 + $0xdc4] sm:$0xf0]  ;;  %v11756_v39 = vor.u32 %v13408_v33, %v11755_v17  ;;  %v13320_v33 = vld [vmem:[#allocation8 + $0x70c] sm:$0xf] }
 0x331   : > { %v10667_v37 = vld [vmem:[#allocation8 + $0x108] sm:$0xf]  ;;  %v12268_v40 = vor.u32 %v13536_v14, %v12267_v35  ;;  %v11437_v35 = vld [vmem:[#allocation8 + $0x748] sm:$0xf0] }
 0x332   : > { %v13136_v38 = vld [vmem:[#allocation8 + $0x144] sm:$0xf0]  ;;  %v13448_v14 = vld [vmem:[#allocation8 + $0xb0c] sm:$0xf] }
 0x333   : > { %7476 = vmatpush.bf16.msra.mxu0 %v10860_v8  ;;  %7489 = vmatpush.bf16.msra.mxu1 %v11372_v63  ;;  %v11179_v42 = vld [vmem:[#allocation8 + $0x508] sm:$0xf]  ;;  %v10668_v45 = vor.u32 %v13136_v38, %v10667_v37  ;;  %v12461_v37 = vld [vmem:[#allocation8 + $0xf48] sm:$0xf0] }
 0x334   : > { %7502 = vmatpush.bf16.msra.mxu2 %v11884_v12  ;;  %7515 = vmatpush.bf16.msra.mxu3 %v12396_v13  ;;  %v13264_v52 = vld [vmem:[#allocation8 + $0x544] sm:$0xf0]  ;;  %v10989_v12 = vld [vmem:[#allocation8 + $0x3c8] sm:$0xf0] }
 0x335   : > { %v11691_v60 = vld [vmem:[#allocation8 + $0x908] sm:$0xf]  ;;  %v11180_v47 = vor.u32 %v13264_v52, %v11179_v42  ;;  %v13336_v13 = vld [vmem:[#allocation8 + $0x78c] sm:$0xf]  ;;  %v10992_v27 = vor.u32 %v13208_v11, %v10989_v12 }
 0x336   : > { %v13392_v44 = vld [vmem:[#allocation8 + $0x944] sm:$0xf0]  ;;  %v10861_v42 = vld [vmem:[#allocation8 + $0x2c8] sm:$0xf0] }
 0x337   : > { %7477 = vmatpush.bf16.msra.mxu0 %v10796_v24  ;;  %7490 = vmatpush.bf16.msra.mxu1 %v11308_v25  ;;  %v12203_v10 = vld [vmem:[#allocation8 + $0xd08] sm:$0xf]  ;;  %v11692_v34 = vor.u32 %v13392_v44, %v11691_v60  ;;  %v12525_v24 = vld [vmem:[#allocation8 + $0xfc8] sm:$0xf0] }
 0x338   : > { %7503 = vmatpush.bf16.msra.mxu2 %v11820_v28  ;;  %7516 = vmatpush.bf16.msra.mxu3 %v12332_v31  ;;  %v13520_v21 = vld [vmem:[#allocation8 + $0xd44] sm:$0xf0]  ;;  %v11504_v28 = vor.u32 %v13336_v13, %v11501_v58  ;;  %v13192_v31 = vld [vmem:[#allocation8 + $0x30c] sm:$0xf]  ;;  %v12528_v17 = vor.u32 %v13592_v16, %v12525_v24 }
 0x339   : > { %7430 = vmatmul.bf16.vlgmr.msrb.gmra.mxu0 %v14005_v43  ;;  %7443 = vmatmul.bf16.vlgmr.msrb.gmra.mxu1 %v14007_v30  ;;  %v10603_v48 = vld [vmem:[#allocation8 + $0x88] sm:$0xf]  ;;  %v12204_v41 = vor.u32 %v13520_v21, %v12203_v10  ;;  %v10928_v38 = vor.u32 %v13192_v31, %v10925_v29  ;;  %v13304_v44 = vld [vmem:[#allocation8 + $0x68c] sm:$0xf] }
 0x33a   : > { %7456 = vmatmul.bf16.vlgmr.msrb.gmra.mxu2 %v14009_v22  ;;  %7469 = vmatmul.bf16.vlgmr.msrb.gmra.mxu3 %v14011_v46  ;;  %v13120_v49 = vld [vmem:[#allocation8 + $0xc4] sm:$0xf0]  ;;  %v11373_v10 = vld [vmem:[#allocation8 + $0x6c8] sm:$0xf0] }
 0x33b   : > { %7478 = vmatpush.bf16.msra.mxu0 %v10732_v6  ;;  %7491 = vmatpush.bf16.msra.mxu1 %v11244_v36  ;;  %v11115_v53 = vld [vmem:[#allocation8 + $0x488] sm:$0xf]  ;;  %v10604_v3 = vor.u32 %v13120_v49, %v10603_v48  ;;  %v11949_v6 = vld [vmem:[#allocation8 + $0xb48] sm:$0xf0] }
 0x33c   : > { %7504 = vmatpush.bf16.msra.mxu2 %v11756_v39  ;;  %7517 = vmatpush.bf16.msra.mxu3 %v12268_v40  ;;  %v13248_v54 = vld [vmem:[#allocation8 + $0x4c4] sm:$0xf0]  ;;  %v13576_v36 = vld [vmem:[#allocation8 + $0xf0c] sm:$0xf]  ;;  %v11440_v39 = vor.u32 %v13320_v33, %v11437_v35  ;;  %v11952_v52 = vor.u32 %v13448_v14, %v11949_v6 }
 0x33d   : > { %v11627_v56 = vld [vmem:[#allocation8 + $0x888] sm:$0xf]  ;;  %v11116_v61 = vor.u32 %v13248_v54, %v11115_v53  ;;  %v13176_v40 = vld [vmem:[#allocation8 + $0x28c] sm:$0xf]  ;;  %v12464_v60 = vor.u32 %v13576_v36, %v12461_v37 }
 0x33e   : > { %v13376_v2 = vld [vmem:[#allocation8 + $0x8c4] sm:$0xf0]  ;;  %v13432_v21 = vld [vmem:[#allocation8 + $0xa8c] sm:$0xf]  ;;  %v10864_v49 = vor.u32 %v13176_v40, %v10861_v42 }
 0x33f   : > { %v12139_v57 = vld [vmem:[#allocation8 + $0xc88] sm:$0xf]  ;;  %7479 = vmatpush.bf16.msra.mxu0 %v10668_v45  ;;  %7492 = vmatpush.bf16.msra.mxu1 %v11180_v47  ;;  %v11628_v5 = vor.u32 %v13376_v2, %v11627_v56  ;;  %v11885_v45 = vld [vmem:[#allocation8 + $0xac8] sm:$0xf0] }
 0x340   : > { %v13504_v51 = vld [vmem:[#allocation8 + $0xcc4] sm:$0xf0]  ;;  %7505 = vmatpush.bf16.msra.mxu2 %v11692_v34  ;;  %7518 = vmatpush.bf16.msra.mxu3 %v12204_v41  ;;  %v13560_v47 = vld [vmem:[#allocation8 + $0xe8c] sm:$0xf]  ;;  %v11376_v34 = vor.u32 %v13304_v44, %v11373_v10  ;;  %v11888_v54 = vor.u32 %v13432_v21, %v11885_v45 }
 0x341   : > { %v10539_v59 = vld [vmem:[#allocation8 + $0x8] sm:$0xf]  ;;  %v12140_v7 = vor.u32 %v13504_v51, %v12139_v57  ;;  %v12397_v48 = vld [vmem:[#allocation8 + $0xec8] sm:$0xf0] }
 0x342   : > { %v13104_v62 = vld [vmem:[#allocation8 + $0x44] sm:$0xf0]  ;;  %v13160_v41 = vld [vmem:[#allocation8 + $0x20c] sm:$0xf]  ;;  %v12400_v56 = vor.u32 %v13560_v47, %v12397_v48 }
 0x343   : > { %v11051_v0 = vld [vmem:[#allocation8 + $0x408] sm:$0xf]  ;;  %7480 = vmatpush.bf16.msra.mxu0 %v10604_v3  ;;  %7493 = vmatpush.bf16.msra.mxu1 %v11116_v61  ;;  %v10540_v19 = vor.u32 %v13104_v62, %v10539_v59  ;;  %v10797_v53 = vld [vmem:[#allocation8 + $0x248] sm:$0xf0] }
 0x344   : > { %v13232_v4 = vld [vmem:[#allocation8 + $0x444] sm:$0xf0]  ;;  %7506 = vmatpush.bf16.msra.mxu2 %v11628_v5  ;;  %7519 = vmatpush.bf16.msra.mxu3 %v12140_v7  ;;  %v13288_v2 = vld [vmem:[#allocation8 + $0x60c] sm:$0xf]  ;;  %v10800_v62 = vor.u32 %v13160_v41, %v10797_v53  ;;  %v10995_v53 = vld [vmem:[#allocation8 + $0x390] sm:$0xf] }
 0x345   : > { %v11563_v55 = vld [vmem:[#allocation8 + $0x808] sm:$0xf]  ;;  %v11052_v20 = vor.u32 %v13232_v4, %v11051_v0  ;;  %v11309_v57 = vld [vmem:[#allocation8 + $0x648] sm:$0xf0] }
 0x346   : > { %v13360_v8 = vld [vmem:[#allocation8 + $0x844] sm:$0xf0]  ;;  %v13416_v51 = vld [vmem:[#allocation8 + $0xa0c] sm:$0xf]  ;;  %v11312_v0 = vor.u32 %v13288_v2, %v11309_v57  ;;  %v13345_v2 = vld [vmem:[#allocation8 + $0x7cc] sm:$0xf0] }
 0x347   : > { %v12075_v63 = vld [vmem:[#allocation8 + $0xc08] sm:$0xf]  ;;  %v11564_v25 = vor.u32 %v13360_v8, %v11563_v55  ;;  %7481 = vmatpush.bf16.msra.mxu0 %v10540_v19  ;;  %7494 = vmatpush.bf16.msra.mxu1 %v11052_v20  ;;  %v11821_v59 = vld [vmem:[#allocation8 + $0xa48] sm:$0xf0]  ;;  %v12019_v57 = vld [vmem:[#allocation8 + $0xb90] sm:$0xf] }
 0x348   : > { %v13488_v9 = vld [vmem:[#allocation8 + $0xc44] sm:$0xf0]  ;;  %v13544_v3 = vld [vmem:[#allocation8 + $0xe0c] sm:$0xf]  ;;  %v11824_v7 = vor.u32 %v13416_v51, %v11821_v59 }
 0x349   : > { %v12076_v26 = vor.u32 %v13488_v9, %v12075_v63  ;;  %7507 = vmatpush.bf16.msra.mxu2 %v11564_v25  ;;  %v12333_v61 = vld [vmem:[#allocation8 + $0xe48] sm:$0xf0] }
 0x34a   : > { %7482 = vmatmul.bf16.vlgmr.msra.gmra.mxu0 %v14005_v43  ;;  %7495 = vmatmul.bf16.vlgmr.msra.gmra.mxu1 %v14007_v30  ;;  %v13144_v4 = vld [vmem:[#allocation8 + $0x18c] sm:$0xf]  ;;  %v12336_v55 = vor.u32 %v13544_v3, %v12333_v61  ;;  %v13473_v3 = vld [vmem:[#allocation8 + $0xbcc] sm:$0xf0] }
 0x34b   : > { %7520 = vmatpush.bf16.msra.mxu3 %v12076_v26  ;;  %7526 = vmatpush.bf16.msrb.mxu0 %v10992_v27  ;;  %v10733_v5 = vld [vmem:[#allocation8 + $0x1c8] sm:$0xf0]  ;;  %v12531_v61 = vld [vmem:[#allocation8 + $0xf90] sm:$0xf] }
 0x34c   : > { %7539 = vmatpush.bf16.msrb.mxu1 %v11504_v28  ;;  %7508 = vmatmul.bf16.vlgmr.msra.gmra.mxu2 %v14009_v22  ;;  %v13272_v8 = vld [vmem:[#allocation8 + $0x58c] sm:$0xf]  ;;  %v10736_v58 = vor.u32 %v13144_v4, %v10733_v5 }
 0x34d   : > { %7552 = vmatpush.bf16.msrb.mxu2 %v12016_v32  ;;  %v11245_v63 = vld [vmem:[#allocation8 + $0x5c8] sm:$0xf0] }
 0x34e   : > { %7521 = vmatmul.bf16.vlgmr.msra.gmra.mxu3 %v14011_v46  ;;  %v13400_v9 = vld [vmem:[#allocation8 + $0x98c] sm:$0xf]  ;;  %v11248_v18 = vor.u32 %v13272_v8, %v11245_v63  ;;  %v13201_v8 = vld [vmem:[#allocation8 + $0x34c] sm:$0xf0]  ;;  %v12020_v63 = vor.u32 %v13473_v3, %v12019_v57 }
 0x34f   : > { %7565 = vmatpush.bf16.msrb.mxu3 %v12528_v17  ;;  %7527 = vmatpush.bf16.msrb.mxu0 %v10928_v38  ;;  %v11757_v11 = vld [vmem:[#allocation8 + $0x9c8] sm:$0xf0] }
 0x350   : > { %7540 = vmatpush.bf16.msrb.mxu1 %v11440_v39  ;;  %v13528_v12 = vld [vmem:[#allocation8 + $0xd8c] sm:$0xf]  ;;  %v11760_v23 = vor.u32 %v13400_v9, %v11757_v11  ;;  %v11443_v11 = vld [vmem:[#allocation8 + $0x710] sm:$0xf] }
 0x351   : > { %7553 = vmatpush.bf16.msrb.mxu2 %v11952_v52  ;;  %v12269_v13 = vld [vmem:[#allocation8 + $0xdc8] sm:$0xf0] }
 0x352   : > { %v13128_v19 = vld [vmem:[#allocation8 + $0x10c] sm:$0xf]  ;;  %v12272_v16 = vor.u32 %v13528_v12, %v12269_v13  ;;  %v13329_v12 = vld [vmem:[#allocation8 + $0x74c] sm:$0xf0] }
 0x353   : > { %7566 = vmatpush.bf16.msrb.mxu3 %v12464_v60  ;;  %7528 = vmatpush.bf16.msrb.mxu0 %v10864_v49  ;;  %v10669_v20 = vld [vmem:[#allocation8 + $0x148] sm:$0xf0]  ;;  %v11955_v13 = vld [vmem:[#allocation8 + $0xb10] sm:$0xf] }
 0x354   : > { %7541 = vmatpush.bf16.msrb.mxu1 %v11376_v34  ;;  %v13256_v24 = vld [vmem:[#allocation8 + $0x50c] sm:$0xf]  ;;  %v10672_v29 = vor.u32 %v13128_v19, %v10669_v20  ;;  %v13585_v19 = vld [vmem:[#allocation8 + $0xf4c] sm:$0xf0] }
 0x355   : > { %7554 = vmatpush.bf16.msrb.mxu2 %v11888_v54  ;;  %v11181_v25 = vld [vmem:[#allocation8 + $0x548] sm:$0xf0]  ;;  %v13217_v54 = vld [vmem:[#allocation8 + $0x3cc] sm:$0xf0] }
 0x356   : > { %v13384_v26 = vld [vmem:[#allocation8 + $0x90c] sm:$0xf]  ;;  %v11184_v32 = vor.u32 %v13256_v24, %v11181_v25  ;;  %v10996_v5 = vor.u32 %v13217_v54, %v10995_v53  ;;  %v13185_v24 = vld [vmem:[#allocation8 + $0x2cc] sm:$0xf0] }
 0x357   : > { %7567 = vmatpush.bf16.msrb.mxu3 %v12400_v56  ;;  %7529 = vmatpush.bf16.msrb.mxu0 %v10800_v62  ;;  %v11693_v27 = vld [vmem:[#allocation8 + $0x948] sm:$0xf0]  ;;  %v11507_v56 = vld [vmem:[#allocation8 + $0x790] sm:$0xf] }
 0x358   : > { %7542 = vmatpush.bf16.msrb.mxu1 %v11312_v0  ;;  %v13512_v28 = vld [vmem:[#allocation8 + $0xd0c] sm:$0xf]  ;;  %v11696_v35 = vor.u32 %v13384_v26, %v11693_v27  ;;  %v13601_v62 = vld [vmem:[#allocation8 + $0xfcc] sm:$0xf0] }
 0x359   : > { %7555 = vmatpush.bf16.msrb.mxu2 %v11824_v7  ;;  %v12205_v31 = vld [vmem:[#allocation8 + $0xd48] sm:$0xf0]  ;;  %v11508_v7 = vor.u32 %v13345_v2, %v11507_v56  ;;  %v12532_v9 = vor.u32 %v13601_v62, %v12531_v61  ;;  %v11379_v27 = vld [vmem:[#allocation8 + $0x690] sm:$0xf] }
 0x35a   : > { %v13112_v17 = vld [vmem:[#allocation8 + $0x8c] sm:$0xf]  ;;  %v12208_v14 = vor.u32 %v13512_v28, %v12205_v31  ;;  %v13313_v28 = vld [vmem:[#allocation8 + $0x6cc] sm:$0xf0] }
 0x35b   : > { %7568 = vmatpush.bf16.msrb.mxu3 %v12336_v55  ;;  %7530 = vmatpush.bf16.msrb.mxu0 %v10736_v58  ;;  %v10605_v33 = vld [vmem:[#allocation8 + $0xc8] sm:$0xf0]  ;;  %v10931_v55 = vld [vmem:[#allocation8 + $0x310] sm:$0xf] }
 0x35c   : > { %7543 = vmatpush.bf16.msrb.mxu1 %v11248_v18  ;;  %v13240_v6 = vld [vmem:[#allocation8 + $0x48c] sm:$0xf]  ;;  %v10608_v52 = vor.u32 %v13112_v17, %v10605_v33  ;;  %v13457_v58 = vld [vmem:[#allocation8 + $0xb4c] sm:$0xf0]  ;;  %v10932_v20 = vor.u32 %v13201_v8, %v10931_v55 }
 0x35d   : > { %7556 = vmatpush.bf16.msrb.mxu2 %v11760_v23  ;;  %v11117_v36 = vld [vmem:[#allocation8 + $0x4c8] sm:$0xf0]  ;;  %v12467_v18 = vld [vmem:[#allocation8 + $0xf10] sm:$0xf]  ;;  %v11444_v23 = vor.u32 %v13329_v12, %v11443_v11  ;;  %v11956_v25 = vor.u32 %v13457_v58, %v11955_v13 }
 0x35e   : > { %v13368_v37 = vld [vmem:[#allocation8 + $0x88c] sm:$0xf]  ;;  %v11120_v60 = vor.u32 %v13240_v6, %v11117_v36  ;;  %v12468_v26 = vor.u32 %v13585_v19, %v12467_v18  ;;  %v11891_v31 = vld [vmem:[#allocation8 + $0xa90] sm:$0xf] }
 0x35f   : > { %7569 = vmatpush.bf16.msrb.mxu3 %v12272_v16  ;;  %v11629_v38 = vld [vmem:[#allocation8 + $0x8c8] sm:$0xf0]  ;;  %7531 = vmatpush.bf16.msrb.mxu0 %v10672_v29  ;;  %v10867_v16 = vld [vmem:[#allocation8 + $0x290] sm:$0xf] }
 0x360   : > { %v13496_v39 = vld [vmem:[#allocation8 + $0xc8c] sm:$0xf]  ;;  %7544 = vmatpush.bf16.msrb.mxu1 %v11184_v32  ;;  %v11632_v45 = vor.u32 %v13368_v37, %v11629_v38  ;;  %v13441_v29 = vld [vmem:[#allocation8 + $0xacc] sm:$0xf0]  ;;  %v10868_v33 = vor.u32 %v13185_v24, %v10867_v16 }
 0x361   : > { %v12141_v40 = vld [vmem:[#allocation8 + $0xcc8] sm:$0xf0]  ;;  %7557 = vmatpush.bf16.msrb.mxu2 %v11696_v35  ;;  %v12403_v32 = vld [vmem:[#allocation8 + $0xe90] sm:$0xf]  ;;  %v11380_v35 = vor.u32 %v13313_v28, %v11379_v27  ;;  %v11892_v36 = vor.u32 %v13441_v29, %v11891_v31 }
 0x362   : > { %v13096_v42 = vld [vmem:[#allocation8 + $0xc] sm:$0xf]  ;;  %v12144_v47 = vor.u32 %v13496_v39, %v12141_v40  ;;  %v13569_v17 = vld [vmem:[#allocation8 + $0xecc] sm:$0xf0] }
 0x363   : > { %v10541_v44 = vld [vmem:[#allocation8 + $0x48] sm:$0xf0]  ;;  %7570 = vmatpush.bf16.msrb.mxu3 %v12208_v14  ;;  %7532 = vmatpush.bf16.msrb.mxu0 %v10608_v52  ;;  %v10803_v14 = vld [vmem:[#allocation8 + $0x210] sm:$0xf]  ;;  %v12404_v37 = vor.u32 %v13569_v17, %v12403_v32 }
 0x364   : > { %v13224_v10 = vld [vmem:[#allocation8 + $0x40c] sm:$0xf]  ;;  %7545 = vmatpush.bf16.msrb.mxu1 %v11120_v60  ;;  %v10544_v51 = vor.u32 %v13096_v42, %v10541_v44  ;;  %v13169_v6 = vld [vmem:[#allocation8 + $0x24c] sm:$0xf0] }
 0x365   : > { %v11053_v21 = vld [vmem:[#allocation8 + $0x448] sm:$0xf0]  ;;  %7558 = vmatpush.bf16.msrb.mxu2 %v11632_v45  ;;  %v11315_v38 = vld [vmem:[#allocation8 + $0x610] sm:$0xf]  ;;  %v10804_v44 = vor.u32 %v13169_v6, %v10803_v14  ;;  %v13209_v6 = vld [vmem:[#allocation8 + $0x394] sm:$0xf] }
 0x366   : > { %v13352_v48 = vld [vmem:[#allocation8 + $0x80c] sm:$0xf]  ;;  %v11056_v59 = vor.u32 %v13224_v10, %v11053_v21  ;;  %v13297_v39 = vld [vmem:[#allocation8 + $0x64c] sm:$0xf0] }
 0x367   : > { %v11565_v49 = vld [vmem:[#allocation8 + $0x848] sm:$0xf0]  ;;  %7571 = vmatpush.bf16.msrb.mxu3 %v12144_v47  ;;  %7533 = vmatpush.bf16.msrb.mxu0 %v10544_v51  ;;  %v11827_v40 = vld [vmem:[#allocation8 + $0xa10] sm:$0xf]  ;;  %v11316_v10 = vor.u32 %v13297_v39, %v11315_v38  ;;  %v11509_v38 = vld [vmem:[#allocation8 + $0x7d0] sm:$0xf0] }
 0x368   : > { %v13480_v34 = vld [vmem:[#allocation8 + $0xc0c] sm:$0xf]  ;;  %v11568_v0 = vor.u32 %v13352_v48, %v11565_v49  ;;  %7546 = vmatpush.bf16.msrb.mxu1 %v11056_v59  ;;  %v13425_v42 = vld [vmem:[#allocation8 + $0xa4c] sm:$0xf0]  ;;  %v13465_v39 = vld [vmem:[#allocation8 + $0xb94] sm:$0xf] }
 0x369   : > { %v12077_v41 = vld [vmem:[#allocation8 + $0xc48] sm:$0xf0]  ;;  %v12339_v52 = vld [vmem:[#allocation8 + $0xe10] sm:$0xf]  ;;  %v11828_v47 = vor.u32 %v13425_v42, %v11827_v40 }
 0x36a   : > { %v12080_v4 = vor.u32 %v13480_v34, %v12077_v41  ;;  %7559 = vmatpush.bf16.msrb.mxu2 %v11568_v0  ;;  %7534 = vmatmul.bf16.vlgmr.msrb.gmra.mxu0 %v14005_v43  ;;  %v13553_v60 = vld [vmem:[#allocation8 + $0xe4c] sm:$0xf0] }
 0x36b   : > { %7578 = vmatpush.bf16.msra.mxu0 %v10996_v5  ;;  %7547 = vmatmul.bf16.vlgmr.msrb.gmra.mxu1 %v14007_v30  ;;  %v10739_v21 = vld [vmem:[#allocation8 + $0x190] sm:$0xf]  ;;  %v12340_v48 = vor.u32 %v13553_v60, %v12339_v52  ;;  %v12021_v52 = vld [vmem:[#allocation8 + $0xbd0] sm:$0xf0] }
 0x36c   : > { %7572 = vmatpush.bf16.msrb.mxu3 %v12080_v4  ;;  %7591 = vmatpush.bf16.msra.mxu1 %v11508_v7  ;;  %v13153_v45 = vld [vmem:[#allocation8 + $0x1cc] sm:$0xf0]  ;;  %v13593_v60 = vld [vmem:[#allocation8 + $0xf94] sm:$0xf] }
 0x36d   : > { %7560 = vmatmul.bf16.vlgmr.msrb.gmra.mxu2 %v14009_v22  ;;  %v11251_v49 = vld [vmem:[#allocation8 + $0x590] sm:$0xf]  ;;  %v10740_v2 = vor.u32 %v13153_v45, %v10739_v21 }
 0x36e   : > { %7604 = vmatpush.bf16.msra.mxu2 %v12020_v63  ;;  %v13281_v34 = vld [vmem:[#allocation8 + $0x5cc] sm:$0xf0] }
 0x36f   : > { %7573 = vmatmul.bf16.vlgmr.msrb.gmra.mxu3 %v14011_v46  ;;  %7579 = vmatpush.bf16.msra.mxu0 %v10932_v20  ;;  %v11763_v41 = vld [vmem:[#allocation8 + $0x990] sm:$0xf]  ;;  %v11252_v57 = vor.u32 %v13281_v34, %v11251_v49  ;;  %v10933_v49 = vld [vmem:[#allocation8 + $0x350] sm:$0xf0]  ;;  %v12024_v34 = vor.u32 %v13465_v39, %v12021_v52 }
 0x370   : > { %7617 = vmatpush.bf16.msra.mxu3 %v12532_v9  ;;  %7592 = vmatpush.bf16.msra.mxu1 %v11444_v23  ;;  %v13409_v53 = vld [vmem:[#allocation8 + $0x9cc] sm:$0xf0] }
 0x371   : > { %v12275_v54 = vld [vmem:[#allocation8 + $0xd90] sm:$0xf]  ;;  %v11764_v3 = vor.u32 %v13409_v53, %v11763_v41  ;;  %v13321_v53 = vld [vmem:[#allocation8 + $0x714] sm:$0xf] }
 0x372   : > { %7605 = vmatpush.bf16.msra.mxu2 %v11956_v25  ;;  %v13537_v56 = vld [vmem:[#allocation8 + $0xdcc] sm:$0xf0] }
 0x373   : > { %7580 = vmatpush.bf16.msra.mxu0 %v10868_v33  ;;  %v10675_v51 = vld [vmem:[#allocation8 + $0x110] sm:$0xf]  ;;  %v12276_v61 = vor.u32 %v13537_v56, %v12275_v54  ;;  %v11445_v54 = vld [vmem:[#allocation8 + $0x750] sm:$0xf0] }
 0x374   : > { %7618 = vmatpush.bf16.msra.mxu3 %v12468_v26  ;;  %7593 = vmatpush.bf16.msra.mxu1 %v11380_v35  ;;  %v13137_v59 = vld [vmem:[#allocation8 + $0x14c] sm:$0xf0]  ;;  %v13449_v56 = vld [vmem:[#allocation8 + $0xb14] sm:$0xf] }
 0x375   : > { %v11187_v62 = vld [vmem:[#allocation8 + $0x510] sm:$0xf]  ;;  %v10676_v8 = vor.u32 %v13137_v59, %v10675_v51  ;;  %v12469_v51 = vld [vmem:[#allocation8 + $0xf50] sm:$0xf0] }
 0x376   : > { %7606 = vmatpush.bf16.msra.mxu2 %v11892_v36  ;;  %v13265_v0 = vld [vmem:[#allocation8 + $0x54c] sm:$0xf0]  ;;  %v10997_v36 = vld [vmem:[#allocation8 + $0x3d0] sm:$0xf0] }
 0x377   : > { %7581 = vmatpush.bf16.msra.mxu0 %v10804_v44  ;;  %v11699_v4 = vld [vmem:[#allocation8 + $0x910] sm:$0xf]  ;;  %v11188_v63 = vor.u32 %v13265_v0, %v11187_v62  ;;  %v12533_v44 = vld [vmem:[#allocation8 + $0xfd0] sm:$0xf0]  ;;  %v11000_v45 = vor.u32 %v13209_v6, %v10997_v36 }
 0x378   : > { %7619 = vmatpush.bf16.msra.mxu3 %v12404_v37  ;;  %7594 = vmatpush.bf16.msra.mxu1 %v11316_v10  ;;  %v13393_v5 = vld [vmem:[#allocation8 + $0x94c] sm:$0xf0]  ;;  %v13337_v37 = vld [vmem:[#allocation8 + $0x794] sm:$0xf]  ;;  %v12536_v41 = vor.u32 %v13593_v60, %v12533_v44 }
 0x379   : > { %v12211_v7 = vld [vmem:[#allocation8 + $0xd10] sm:$0xf]  ;;  %v11700_v12 = vor.u32 %v13393_v5, %v11699_v4  ;;  %v10869_v62 = vld [vmem:[#allocation8 + $0x2d0] sm:$0xf0] }
 0x37a   : > { %7607 = vmatpush.bf16.msra.mxu2 %v11828_v47  ;;  %v13521_v55 = vld [vmem:[#allocation8 + $0xd4c] sm:$0xf0]  ;;  %v11512_v47 = vor.u32 %v13337_v37, %v11509_v38  ;;  %v13305_v5 = vld [vmem:[#allocation8 + $0x694] sm:$0xf] }
 0x37b   : > { %7582 = vmatpush.bf16.msra.mxu0 %v10740_v2  ;;  %v10611_v9 = vld [vmem:[#allocation8 + $0x90] sm:$0xf]  ;;  %v12212_v13 = vor.u32 %v13521_v55, %v12211_v7  ;;  %v11957_v2 = vld [vmem:[#allocation8 + $0xb50] sm:$0xf0] }
 0x37c   : > { %7620 = vmatpush.bf16.msra.mxu3 %v12340_v48  ;;  %7595 = vmatpush.bf16.msra.mxu1 %v11252_v57  ;;  %v13121_v11 = vld [vmem:[#allocation8 + $0xcc] sm:$0xf0]  ;;  %v13193_v48 = vld [vmem:[#allocation8 + $0x314] sm:$0xf]  ;;  %v11960_v0 = vor.u32 %v13449_v56, %v11957_v2 }
 0x37d   : > { %v11123_v58 = vld [vmem:[#allocation8 + $0x490] sm:$0xf]  ;;  %v10612_v25 = vor.u32 %v13121_v11, %v10611_v9  ;;  %v13577_v57 = vld [vmem:[#allocation8 + $0xf14] sm:$0xf]  ;;  %v10936_v59 = vor.u32 %v13193_v48, %v10933_v49 }
 0x37e   : > { %7608 = vmatpush.bf16.msra.mxu2 %v11764_v3  ;;  %v13249_v18 = vld [vmem:[#allocation8 + $0x4cc] sm:$0xf0]  ;;  %v11448_v3 = vor.u32 %v13321_v53, %v11445_v54  ;;  %v12472_v4 = vor.u32 %v13577_v57, %v12469_v51  ;;  %v11381_v7 = vld [vmem:[#allocation8 + $0x6d0] sm:$0xf0] }
 0x37f   : > { %v11635_v19 = vld [vmem:[#allocation8 + $0x890] sm:$0xf]  ;;  %7583 = vmatpush.bf16.msra.mxu0 %v10676_v8  ;;  %v11124_v26 = vor.u32 %v13249_v18, %v11123_v58  ;;  %v13433_v55 = vld [vmem:[#allocation8 + $0xa94] sm:$0xf] }
 0x380   : > { %7621 = vmatpush.bf16.msra.mxu3 %v12276_v61  ;;  %v13377_v20 = vld [vmem:[#allocation8 + $0x8cc] sm:$0xf0]  ;;  %7596 = vmatpush.bf16.msra.mxu1 %v11188_v63  ;;  %v13177_v61 = vld [vmem:[#allocation8 + $0x294] sm:$0xf] }
 0x381   : > { %v12147_v23 = vld [vmem:[#allocation8 + $0xc90] sm:$0xf]  ;;  %v11636_v29 = vor.u32 %v13377_v20, %v11635_v19  ;;  %v11893_v8 = vld [vmem:[#allocation8 + $0xad0] sm:$0xf0]  ;;  %v10872_v11 = vor.u32 %v13177_v61, %v10869_v62 }
 0x382   : > { %v13505_v16 = vld [vmem:[#allocation8 + $0xccc] sm:$0xf0]  ;;  %7609 = vmatpush.bf16.msra.mxu2 %v11700_v12  ;;  %v13561_v63 = vld [vmem:[#allocation8 + $0xe94] sm:$0xf]  ;;  %v11384_v12 = vor.u32 %v13305_v5, %v11381_v7  ;;  %v11896_v18 = vor.u32 %v13433_v55, %v11893_v8 }
 0x383   : > { %v10547_v24 = vld [vmem:[#allocation8 + $0x10] sm:$0xf]  ;;  %v12148_v32 = vor.u32 %v13505_v16, %v12147_v23  ;;  %7584 = vmatpush.bf16.msra.mxu0 %v10612_v25  ;;  %v12405_v9 = vld [vmem:[#allocation8 + $0xed0] sm:$0xf0] }
 0x384   : > { %v13105_v27 = vld [vmem:[#allocation8 + $0x4c] sm:$0xf0]  ;;  %7622 = vmatpush.bf16.msra.mxu3 %v12212_v13  ;;  %7597 = vmatpush.bf16.msra.mxu1 %v11124_v26  ;;  %v13161_v13 = vld [vmem:[#allocation8 + $0x214] sm:$0xf]  ;;  %v12408_v19 = vor.u32 %v13561_v63, %v12405_v9 }
 0x385   : > { %v11059_v28 = vld [vmem:[#allocation8 + $0x410] sm:$0xf]  ;;  %v10548_v40 = vor.u32 %v13105_v27, %v10547_v24  ;;  %v10805_v58 = vld [vmem:[#allocation8 + $0x250] sm:$0xf0] }
 0x386   : > { %v13233_v31 = vld [vmem:[#allocation8 + $0x44c] sm:$0xf0]  ;;  %7610 = vmatpush.bf16.msra.mxu2 %v11636_v29  ;;  %v13289_v20 = vld [vmem:[#allocation8 + $0x614] sm:$0xf]  ;;  %v10808_v27 = vor.u32 %v13161_v13, %v10805_v58  ;;  %v11003_v58 = vld [vmem:[#allocation8 + $0x398] sm:$0xf] }
 0x387   : > { %v11571_v17 = vld [vmem:[#allocation8 + $0x810] sm:$0xf]  ;;  %v11060_v42 = vor.u32 %v13233_v31, %v11059_v28  ;;  %7585 = vmatpush.bf16.msra.mxu0 %v10548_v40  ;;  %v11317_v23 = vld [vmem:[#allocation8 + $0x650] sm:$0xf0] }
 0x388   : > { %v13361_v33 = vld [vmem:[#allocation8 + $0x84c] sm:$0xf0]  ;;  %7623 = vmatpush.bf16.msra.mxu3 %v12148_v32  ;;  %v13417_v16 = vld [vmem:[#allocation8 + $0xa14] sm:$0xf]  ;;  %v11320_v28 = vor.u32 %v13289_v20, %v11317_v23  ;;  %v13346_v20 = vld [vmem:[#allocation8 + $0x7d4] sm:$0xf0] }
 0x389   : > { %v12083_v35 = vld [vmem:[#allocation8 + $0xc10] sm:$0xf]  ;;  %v11572_v10 = vor.u32 %v13361_v33, %v11571_v17  ;;  %7598 = vmatpush.bf16.msra.mxu1 %v11060_v42  ;;  %v11829_v24 = vld [vmem:[#allocation8 + $0xa50] sm:$0xf0]  ;;  %v12027_v23 = vld [vmem:[#allocation8 + $0xb98] sm:$0xf] }
 0x38a   : > { %v13489_v14 = vld [vmem:[#allocation8 + $0xc4c] sm:$0xf0]  ;;  %7586 = vmatmul.bf16.vlgmr.msra.gmra.mxu0 %v14005_v43  ;;  %v13545_v25 = vld [vmem:[#allocation8 + $0xe14] sm:$0xf]  ;;  %v11832_v32 = vor.u32 %v13417_v16, %v11829_v24 }
 0x38b   : > { %v12084_v21 = vor.u32 %v13489_v14, %v12083_v35  ;;  %7611 = vmatpush.bf16.msra.mxu2 %v11572_v10  ;;  %7630 = vmatpush.bf16.msrb.mxu0 %v11000_v45  ;;  %v12341_v26 = vld [vmem:[#allocation8 + $0xe50] sm:$0xf0] }
 0x38c   : > { %7599 = vmatmul.bf16.vlgmr.msra.gmra.mxu1 %v14007_v30  ;;  %v13145_v31 = vld [vmem:[#allocation8 + $0x194] sm:$0xf]  ;;  %v12344_v17 = vor.u32 %v13545_v25, %v12341_v26  ;;  %v13474_v25 = vld [vmem:[#allocation8 + $0xbd4] sm:$0xf0] }
 0x38d   : > { %7624 = vmatpush.bf16.msra.mxu3 %v12084_v21  ;;  %7643 = vmatpush.bf16.msrb.mxu1 %v11512_v47  ;;  %v10741_v29 = vld [vmem:[#allocation8 + $0x1d0] sm:$0xf0]  ;;  %v12539_v26 = vld [vmem:[#allocation8 + $0xf98] sm:$0xf] }
 0x38e   : > { %7612 = vmatmul.bf16.vlgmr.msra.gmra.mxu2 %v14009_v22  ;;  %v13273_v33 = vld [vmem:[#allocation8 + $0x594] sm:$0xf]  ;;  %v10744_v38 = vor.u32 %v13145_v31, %v10741_v29 }
 0x38f   : > { %7656 = vmatpush.bf16.msrb.mxu2 %v12024_v34  ;;  %7631 = vmatpush.bf16.msrb.mxu0 %v10936_v59  ;;  %v11253_v35 = vld [vmem:[#allocation8 + $0x5d0] sm:$0xf0] }
 0x390   : > { %7625 = vmatmul.bf16.vlgmr.msra.gmra.mxu3 %v14011_v46  ;;  %v13401_v14 = vld [vmem:[#allocation8 + $0x994] sm:$0xf]  ;;  %v11256_v39 = vor.u32 %v13273_v33, %v11253_v35  ;;  %v13202_v33 = vld [vmem:[#allocation8 + $0x354] sm:$0xf0]  ;;  %v12028_v35 = vor.u32 %v13474_v25, %v12027_v23 }
 0x391   : > { %7669 = vmatpush.bf16.msrb.mxu3 %v12536_v41  ;;  %7644 = vmatpush.bf16.msrb.mxu1 %v11448_v3  ;;  %v11765_v6 = vld [vmem:[#allocation8 + $0x9d0] sm:$0xf0]  ;;  %v13538_v25 = vld [vmem:[#allocation8 + $0xdd4] sm:$0xf0] }
 0x392   : > { %v13529_v36 = vld [vmem:[#allocation8 + $0xd94] sm:$0xf]  ;;  %v11768_v52 = vor.u32 %v13401_v14, %v11765_v6  ;;  %v11451_v6 = vld [vmem:[#allocation8 + $0x718] sm:$0xf] }
 0x393   : > { %7657 = vmatpush.bf16.msrb.mxu2 %v11960_v0  ;;  %7632 = vmatpush.bf16.msrb.mxu0 %v10872_v11  ;;  %v12277_v37 = vld [vmem:[#allocation8 + $0xdd0] sm:$0xf0] }
 0x394   : > { %v13129_v40 = vld [vmem:[#allocation8 + $0x114] sm:$0xf]  ;;  %v12280_v60 = vor.u32 %v13529_v36, %v12277_v37  ;;  %v13330_v36 = vld [vmem:[#allocation8 + $0x754] sm:$0xf0] }
 0x395   : > { %7670 = vmatpush.bf16.msrb.mxu3 %v12472_v4  ;;  %7645 = vmatpush.bf16.msrb.mxu1 %v11384_v12  ;;  %v10677_v42 = vld [vmem:[#allocation8 + $0x150] sm:$0xf0]  ;;  %v11963_v37 = vld [vmem:[#allocation8 + $0xb18] sm:$0xf] }
 0x396   : > { %v13257_v44 = vld [vmem:[#allocation8 + $0x514] sm:$0xf]  ;;  %v10680_v49 = vor.u32 %v13129_v40, %v10677_v42  ;;  %v13586_v40 = vld [vmem:[#allocation8 + $0xf54] sm:$0xf0] }
 0x397   : > { %7658 = vmatpush.bf16.msrb.mxu2 %v11896_v18  ;;  %7633 = vmatpush.bf16.msrb.mxu0 %v10808_v27  ;;  %v11189_v10 = vld [vmem:[#allocation8 + $0x550] sm:$0xf0]  ;;  %v13218_v18 = vld [vmem:[#allocation8 + $0x3d4] sm:$0xf0] }
 0x398   : > { %v13385_v21 = vld [vmem:[#allocation8 + $0x914] sm:$0xf]  ;;  %v11192_v34 = vor.u32 %v13257_v44, %v11189_v10  ;;  %v13602_v27 = vld [vmem:[#allocation8 + $0xfd4] sm:$0xf0]  ;;  %v11004_v29 = vor.u32 %v13218_v18, %v11003_v58 }
 0x399   : > { %7671 = vmatpush.bf16.msrb.mxu3 %v12408_v19  ;;  %7646 = vmatpush.bf16.msrb.mxu1 %v11320_v28  ;;  %v11701_v45 = vld [vmem:[#allocation8 + $0x950] sm:$0xf0]  ;;  %v11515_v19 = vld [vmem:[#allocation8 + $0x798] sm:$0xf]  ;;  %v12540_v14 = vor.u32 %v13602_v27, %v12539_v26 }
 0x39a   : > { %v13513_v47 = vld [vmem:[#allocation8 + $0xd14] sm:$0xf]  ;;  %v11704_v54 = vor.u32 %v13385_v21, %v11701_v45  ;;  %v13186_v44 = vld [vmem:[#allocation8 + $0x2d4] sm:$0xf0] }
 0x39b   : > { %7659 = vmatpush.bf16.msrb.mxu2 %v11832_v32  ;;  %v12213_v48 = vld [vmem:[#allocation8 + $0xd50] sm:$0xf0]  ;;  %7634 = vmatpush.bf16.msrb.mxu0 %v10744_v38  ;;  %v11516_v32 = vor.u32 %v13346_v20, %v11515_v19  ;;  %v13458_v38 = vld [vmem:[#allocation8 + $0xb54] sm:$0xf0] }
 0x39c   : > { %v13113_v41 = vld [vmem:[#allocation8 + $0x94] sm:$0xf]  ;;  %v12216_v56 = vor.u32 %v13513_v47, %v12213_v48  ;;  %v11964_v10 = vor.u32 %v13458_v38, %v11963_v37  ;;  %v11387_v45 = vld [vmem:[#allocation8 + $0x698] sm:$0xf] }
 0x39d   : > { %7672 = vmatpush.bf16.msrb.mxu3 %v12344_v17  ;;  %7647 = vmatpush.bf16.msrb.mxu1 %v11256_v39  ;;  %v10613_v53 = vld [vmem:[#allocation8 + $0xd0] sm:$0xf0]  ;;  %v10939_v17 = vld [vmem:[#allocation8 + $0x318] sm:$0xf] }
 0x39e   : > { %v13241_v2 = vld [vmem:[#allocation8 + $0x494] sm:$0xf]  ;;  %v10616_v0 = vor.u32 %v13113_v41, %v10613_v53  ;;  %v12475_v39 = vld [vmem:[#allocation8 + $0xf18] sm:$0xf]  ;;  %v10940_v42 = vor.u32 %v13202_v33, %v10939_v17 }
 0x39f   : > { %7660 = vmatpush.bf16.msrb.mxu2 %v11768_v52  ;;  %v11125_v57 = vld [vmem:[#allocation8 + $0x4d0] sm:$0xf0]  ;;  %7635 = vmatpush.bf16.msrb.mxu0 %v10680_v49  ;;  %v11452_v52 = vor.u32 %v13330_v36, %v11451_v6  ;;  %v12476_v21 = vor.u32 %v13586_v40, %v12475_v39  ;;  %v13314_v47 = vld [vmem:[#allocation8 + $0x6d4] sm:$0xf0] }
 0x3a0   : > { %v13369_v51 = vld [vmem:[#allocation8 + $0x894] sm:$0xf]  ;;  %v11128_v4 = vor.u32 %v13241_v2, %v11125_v57  ;;  %v11899_v48 = vld [vmem:[#allocation8 + $0xa98] sm:$0xf]  ;;  %v11388_v2 = vor.u32 %v13314_v47, %v11387_v45 }
 0x3a1   : > { %7673 = vmatpush.bf16.msrb.mxu3 %v12280_v60  ;;  %v11637_v59 = vld [vmem:[#allocation8 + $0x8d0] sm:$0xf0]  ;;  %7648 = vmatpush.bf16.msrb.mxu1 %v11192_v34  ;;  %v10875_v60 = vld [vmem:[#allocation8 + $0x298] sm:$0xf] }
 0x3a2   : > { %v13497_v3 = vld [vmem:[#allocation8 + $0xc94] sm:$0xf]  ;;  %v11640_v8 = vor.u32 %v13369_v51, %v11637_v59  ;;  %v13442_v49 = vld [vmem:[#allocation8 + $0xad4] sm:$0xf0] }
 0x3a3   : > { %v12149_v61 = vld [vmem:[#allocation8 + $0xcd0] sm:$0xf0]  ;;  %7661 = vmatpush.bf16.msrb.mxu2 %v11704_v54  ;;  %7636 = vmatpush.bf16.msrb.mxu0 %v10616_v0  ;;  %v12411_v34 = vld [vmem:[#allocation8 + $0xe98] sm:$0xf] }
 0x3a4   : > { %v13097_v62 = vld [vmem:[#allocation8 + $0x14] sm:$0xf]  ;;  %v12152_v63 = vor.u32 %v13497_v3, %v12149_v61  ;;  %v13570_v41 = vld [vmem:[#allocation8 + $0xed4] sm:$0xf0]  ;;  %v11900_v3 = vor.u32 %v13442_v49, %v11899_v48 }
 0x3a5   : > { %v10549_v5 = vld [vmem:[#allocation8 + $0x50] sm:$0xf0]  ;;  %7674 = vmatpush.bf16.msrb.mxu3 %v12216_v56  ;;  %7649 = vmatpush.bf16.msrb.mxu1 %v11128_v4  ;;  %v10876_v56 = vor.u32 %v13186_v44, %v10875_v60  ;;  %v10811_v51 = vld [vmem:[#allocation8 + $0x218] sm:$0xf]  ;;  %v12412_v61 = vor.u32 %v13570_v41, %v12411_v34 }
 0x3a6   : > { %v13225_v7 = vld [vmem:[#allocation8 + $0x414] sm:$0xf]  ;;  %v10552_v16 = vor.u32 %v13097_v62, %v10549_v5  ;;  %v7379_v53 = vpop.f32.mrf.mxu0  ;;  %v7392_v54 = vpop.f32.mrf.mxu1  ;;  %v13170_v59 = vld [vmem:[#allocation8 + $0x254] sm:$0xf0] }
 0x3a7   : > { %v11061_v55 = vld [vmem:[#allocation8 + $0x450] sm:$0xf0]  ;;  %7662 = vmatpush.bf16.msrb.mxu2 %v11640_v8  ;;  %v7393_v57 = vadd.f32 %v7392_v54, %v7379_v53  ;;  %v11323_v62 = vld [vmem:[#allocation8 + $0x618] sm:$0xf]  ;;  %v10812_v8 = vor.u32 %v13170_v59, %v10811_v51 }
 0x3a8   : > { %v13353_v9 = vld [vmem:[#allocation8 + $0x814] sm:$0xf]  ;;  %v11064_v24 = vor.u32 %v13225_v7, %v11061_v55  ;;  %7637 = vmatpush.bf16.msrb.mxu0 %v10552_v16  ;;  %v13298_v0 = vld [vmem:[#allocation8 + $0x654] sm:$0xf0] }
 0x3a9   : > { %v11573_v11 = vld [vmem:[#allocation8 + $0x850] sm:$0xf0]  ;;  %7675 = vmatpush.bf16.msrb.mxu3 %v12152_v63  ;;  %v11835_v4 = vld [vmem:[#allocation8 + $0xa18] sm:$0xf]  ;;  %v11324_v63 = vor.u32 %v13298_v0, %v11323_v62 }
 0x3aa   : > { %v13481_v12 = vld [vmem:[#allocation8 + $0xc14] sm:$0xf]  ;;  %v11576_v28 = vor.u32 %v13353_v9, %v11573_v11  ;;  %7650 = vmatpush.bf16.msrb.mxu1 %v11064_v24  ;;  %v13426_v5 = vld [vmem:[#allocation8 + $0xa54] sm:$0xf0] }
 0x3ab   : > { %v12085_v13 = vld [vmem:[#allocation8 + $0xc50] sm:$0xf0]  ;;  %7638 = vmatmul.bf16.vlgmr.msrb.gmra.mxu0 %v14005_v43  ;;  %v12347_v7 = vld [vmem:[#allocation8 + $0xe18] sm:$0xf] }
 0x3ac   : > { %v12088_v31 = vor.u32 %v13481_v12, %v12085_v13  ;;  %7663 = vmatpush.bf16.msrb.mxu2 %v11576_v28  ;;  %7682 = vmatpush.bf16.msra.mxu0 %v11004_v29  ;;  %v13554_v55 = vld [vmem:[#allocation8 + $0xe54] sm:$0xf0]  ;;  %v11836_v12 = vor.u32 %v13426_v5, %v11835_v4 }
 0x3ad   : > { %7651 = vmatmul.bf16.vlgmr.msrb.gmra.mxu1 %v14007_v30  ;;  %v10747_v9 = vld [vmem:[#allocation8 + $0x198] sm:$0xf]  ;;  %v12348_v13 = vor.u32 %v13554_v55, %v12347_v7  ;;  %v7405_v20 = vpop.f32.mrf.mxu2  ;;  %v7418_v23 = vpop.f32.mrf.mxu3 }
 0x3ae   : > { %7676 = vmatpush.bf16.msrb.mxu3 %v12088_v31  ;;  %7695 = vmatpush.bf16.msra.mxu1 %v11516_v32  ;;  %v13154_v11 = vld [vmem:[#allocation8 + $0x1d4] sm:$0xf0]  ;;  %v7406_v26 = vadd.f32 %v7405_v20, %v7393_v57  ;;  %v7381_v27 = vpop.f32.mrf.mxu0  ;;  %v7394_v28 = vpop.f32.mrf.mxu1  ;;  %v12029_v20 = vld [vmem:[#allocation8 + $0xbd8] sm:$0xf0] }
 0x3af   : > { %7664 = vmatmul.bf16.vlgmr.msrb.gmra.mxu2 %v14009_v22  ;;  %v11259_v58 = vld [vmem:[#allocation8 + $0x598] sm:$0xf]  ;;  %v10748_v31 = vor.u32 %v13154_v11, %v10747_v9  ;;  %v13210_v9 = vld [vmem:[#allocation8 + $0x39c] sm:$0xf] }
 0x3b0   : > { %7708 = vmatpush.bf16.msra.mxu2 %v12028_v35  ;;  %7683 = vmatpush.bf16.msra.mxu0 %v10940_v42  ;;  %v13282_v18 = vld [vmem:[#allocation8 + $0x5d4] sm:$0xf0]  ;;  %v14037_v33 = vadd.f32 %v7418_v23, %v7406_v26  ;;  %v11005_v11 = vld [vmem:[#allocation8 + $0x3d8] sm:$0xf0] }
 0x3b1   : > { %7677 = vmatmul.bf16.vlgmr.msrb.gmra.mxu3 %v14011_v46  ;;  %v11771_v19 = vld [vmem:[#allocation8 + $0x998] sm:$0xf]  ;;  %v11260_v29 = vor.u32 %v13282_v18, %v11259_v58  ;;  %v13466_v58 = vld [vmem:[#allocation8 + $0xb9c] sm:$0xf]  ;;  %v11008_v26 = vor.u32 %v13210_v9, %v11005_v11 }
 0x3b2   : > { %7721 = vmatpush.bf16.msra.mxu3 %v12540_v14  ;;  %7696 = vmatpush.bf16.msra.mxu1 %v11452_v52  ;;  %v13410_v16 = vld [vmem:[#allocation8 + $0x9d4] sm:$0xf0]  ;;  %v13594_v23 = vld [vmem:[#allocation8 + $0xf9c] sm:$0xf] }
 0x3b3   : > { %v12283_v24 = vld [vmem:[#allocation8 + $0xd98] sm:$0xf]  ;;  %v11772_v35 = vor.u32 %v13410_v16, %v11771_v19  ;;  %v12541_v16 = vld [vmem:[#allocation8 + $0xfd8] sm:$0xf0] }
 0x3b4   : > { %7709 = vmatpush.bf16.msra.mxu2 %v11964_v10  ;;  %7684 = vmatpush.bf16.msra.mxu0 %v10876_v56  ;;  %v10683_v32 = vld [vmem:[#allocation8 + $0x118] sm:$0xf]  ;;  %v12284_v14 = vor.u32 %v13538_v25, %v12283_v24  ;;  %v12349_v9 = vld [vmem:[#allocation8 + $0xe58] sm:$0xf0] }
 0x3b5   : > { %v13138_v17 = vld [vmem:[#allocation8 + $0x154] sm:$0xf0]  ;;  %v7407_v49 = vpop.f32.mrf.mxu2  ;;  %v7420_v34 = vpop.f32.mrf.mxu3 }
 0x3b6   : > { %7722 = vmatpush.bf16.msra.mxu3 %v12476_v21  ;;  %7697 = vmatpush.bf16.msra.mxu1 %v11388_v2  ;;  %v11195_v6 = vld [vmem:[#allocation8 + $0x518] sm:$0xf]  ;;  %v10684_v42 = vor.u32 %v13138_v17, %v10683_v32  ;;  %v7431_v2 = vpop.f32.mrf.mxu0  ;;  %v7444_v57 = vpop.f32.mrf.mxu1  ;;  %v10941_v32 = vld [vmem:[#allocation8 + $0x358] sm:$0xf0]  ;;  %v12032_v17 = vor.u32 %v13466_v58, %v12029_v20 }
 0x3b7   : > { %v13266_v36 = vld [vmem:[#allocation8 + $0x554] sm:$0xf0]  ;;  %v7445_v0 = vadd.f32 %v7444_v57, %v7431_v2  ;;  %v12413_v2 = vld [vmem:[#allocation8 + $0xed8] sm:$0xf0] }
 0x3b8   : > { %7710 = vmatpush.bf16.msra.mxu2 %v11900_v3  ;;  %7685 = vmatpush.bf16.msra.mxu0 %v10812_v8  ;;  %v11707_v37 = vld [vmem:[#allocation8 + $0x918] sm:$0xf]  ;;  %v11196_v52 = vor.u32 %v13266_v36, %v11195_v6  ;;  %v13322_v6 = vld [vmem:[#allocation8 + $0x71c] sm:$0xf] }
 0x3b9   : > { %v13394_v38 = vld [vmem:[#allocation8 + $0x954] sm:$0xf0]  ;;  %v11453_v36 = vld [vmem:[#allocation8 + $0x758] sm:$0xf0] }
 0x3ba   : > { %7723 = vmatpush.bf16.msra.mxu3 %v12412_v61  ;;  %7698 = vmatpush.bf16.msra.mxu1 %v11324_v63  ;;  %v12219_v39 = vld [vmem:[#allocation8 + $0xd18] sm:$0xf]  ;;  %v11708_v10 = vor.u32 %v13394_v38, %v11707_v37  ;;  %v13450_v37 = vld [vmem:[#allocation8 + $0xb1c] sm:$0xf] }
 0x3bb   : > { %v13522_v40 = vld [vmem:[#allocation8 + $0xd54] sm:$0xf0]  ;;  %v10749_v58 = vld [vmem:[#allocation8 + $0x1d8] sm:$0xf0] }
 0x3bc   : > { %7711 = vmatpush.bf16.msra.mxu2 %v11836_v12  ;;  %7686 = vmatpush.bf16.msra.mxu0 %v10748_v31  ;;  %v10619_v60 = vld [vmem:[#allocation8 + $0x98] sm:$0xf]  ;;  %v12220_v21 = vor.u32 %v13522_v40, %v12219_v39  ;;  %v13338_v12 = vld [vmem:[#allocation8 + $0x79c] sm:$0xf] }
 0x3bd   : > { %v13122_v44 = vld [vmem:[#allocation8 + $0xd4] sm:$0xf0]  ;;  %v7457_v28 = vpop.f32.mrf.mxu2  ;;  %v7470_v31 = vpop.f32.mrf.mxu3  ;;  %v11965_v40 = vld [vmem:[#allocation8 + $0xb58] sm:$0xf0] }
 0x3be   : > { %7724 = vmatpush.bf16.msra.mxu3 %v12348_v13  ;;  %7699 = vmatpush.bf16.msra.mxu1 %v11260_v29  ;;  %v11131_v45 = vld [vmem:[#allocation8 + $0x498] sm:$0xf]  ;;  %v10620_v51 = vor.u32 %v13122_v44, %v10619_v60  ;;  %v11517_v13 = vld [vmem:[#allocation8 + $0x7d8] sm:$0xf0]  ;;  %v7433_v38 = vpop.f32.mrf.mxu0  ;;  %v7446_v39 = vpop.f32.mrf.mxu1  ;;  %v11968_v49 = vor.u32 %v13450_v37, %v11965_v40 }
 0x3bf   : > { %v13250_v47 = vld [vmem:[#allocation8 + $0x4d4] sm:$0xf0]  ;;  %v11520_v27 = vor.u32 %v13338_v12, %v11517_v13  ;;  %v13194_v29 = vld [vmem:[#allocation8 + $0x31c] sm:$0xf] }
 0x3c0   : > { %7712 = vmatpush.bf16.msra.mxu2 %v11772_v35  ;;  %v11643_v48 = vld [vmem:[#allocation8 + $0x898] sm:$0xf]  ;;  %7687 = vmatpush.bf16.msra.mxu0 %v10684_v42  ;;  %v11132_v59 = vor.u32 %v13250_v47, %v11131_v45  ;;  %v12544_v35 = vor.u32 %v13594_v23, %v12541_v16  ;;  %v13578_v42 = vld [vmem:[#allocation8 + $0xf1c] sm:$0xf]  ;;  %v10944_v44 = vor.u32 %v13194_v29, %v10941_v32 }
 0x3c1   : > { %v13378_v41 = vld [vmem:[#allocation8 + $0x8d4] sm:$0xf0]  ;;  %v10877_v45 = vld [vmem:[#allocation8 + $0x2d8] sm:$0xf0] }
 0x3c2   : > { %7725 = vmatpush.bf16.msra.mxu3 %v12284_v14  ;;  %v12155_v53 = vld [vmem:[#allocation8 + $0xc98] sm:$0xf]  ;;  %7700 = vmatpush.bf16.msra.mxu1 %v11196_v52  ;;  %v11644_v4 = vor.u32 %v13378_v41, %v11643_v48  ;;  %v7458_v14 = vadd.f32 %v7457_v28, %v7445_v0  ;;  %v12477_v52 = vld [vmem:[#allocation8 + $0xf58] sm:$0xf0] }
 0x3c3   : > { %v13506_v54 = vld [vmem:[#allocation8 + $0xcd4] sm:$0xf0]  ;;  %v13306_v47 = vld [vmem:[#allocation8 + $0x69c] sm:$0xf]  ;;  %v12480_v34 = vor.u32 %v13578_v42, %v12477_v52 }
 0x3c4   : > { %v10555_v56 = vld [vmem:[#allocation8 + $0x18] sm:$0xf]  ;;  %7713 = vmatpush.bf16.msra.mxu2 %v11708_v10  ;;  %v12156_v5 = vor.u32 %v13506_v54, %v12155_v53  ;;  %7688 = vmatpush.bf16.msra.mxu0 %v10620_v51  ;;  %v7471_v60 = vadd.f32 %v7470_v31, %v7458_v14  ;;  %v11456_v10 = vor.u32 %v13322_v6, %v11453_v36  ;;  %v11389_v41 = vld [vmem:[#allocation8 + $0x6d8] sm:$0xf0] }
 0x3c5   : > { %v13106_v3 = vld [vmem:[#allocation8 + $0x54] sm:$0xf0]  ;;  %v13434_v53 = vld [vmem:[#allocation8 + $0xa9c] sm:$0xf]  ;;  %v7472_v0 = vpop.f32.mrf.mxu3 }
 0x3c6   : > { %v11067_v61 = vld [vmem:[#allocation8 + $0x418] sm:$0xf]  ;;  %7726 = vmatpush.bf16.msra.mxu3 %v12220_v21  ;;  %7701 = vmatpush.bf16.msra.mxu1 %v11132_v59  ;;  %v10556_v18 = vor.u32 %v13106_v3, %v10555_v56  ;;  %v13178_v21 = vld [vmem:[#allocation8 + $0x29c] sm:$0xf]  ;;  %v8218_v48 = vrot.slane %v7471_v60, 6  ;;  %v11392_v59 = vor.u32 %v13306_v47, %v11389_v41 }
 0x3c7   : > { %v13234_v62 = vld [vmem:[#allocation8 + $0x454] sm:$0xf0]  ;;  %v11901_v54 = vld [vmem:[#allocation8 + $0xad8] sm:$0xf0]  ;;  %v10880_v51 = vor.u32 %v13178_v21, %v10877_v45 }
 0x3c8   : > { %v11579_v7 = vld [vmem:[#allocation8 + $0x818] sm:$0xf]  ;;  %v11068_v19 = vor.u32 %v13234_v62, %v11067_v61  ;;  %7714 = vmatpush.bf16.msra.mxu2 %v11644_v4  ;;  %7689 = vmatpush.bf16.msra.mxu0 %v10556_v18  ;;  %v13562_v56 = vld [vmem:[#allocation8 + $0xe9c] sm:$0xf]  ;;  %v14043_v57 = vsel %vm4077_vm0, %v14037_v33, %v8218_v48  ;;  %v7459_v62 = vpop.f32.mrf.mxu2  ;;  %v11904_v4 = vor.u32 %v13434_v53, %v11901_v54  ;;  %v7483_v18 = vpop.f32.mrf.mxu0 }
 0x3c9   : > { %v13362_v55 = vld [vmem:[#allocation8 + $0x854] sm:$0xf0]  ;;  %v13162_v3 = vld [vmem:[#allocation8 + $0x21c] sm:$0xf] }
 0x3ca   : > { %v12091_v8 = vld [vmem:[#allocation8 + $0xc18] sm:$0xf]  ;;  %7727 = vmatpush.bf16.msra.mxu3 %v12156_v5  ;;  %v11580_v24 = vor.u32 %v13362_v55, %v11579_v7  ;;  %7702 = vmatpush.bf16.msra.mxu1 %v11068_v19  ;;  %v10813_v61 = vld [vmem:[#allocation8 + $0x258] sm:$0xf0]  ;;  %v12416_v5 = vor.u32 %v13562_v56, %v12413_v2  ;;  %v7496_v19 = vpop.f32.mrf.mxu1 }
 0x3cb   : > { %v13490_v63 = vld [vmem:[#allocation8 + $0xc54] sm:$0xf0]  ;;  %7690 = vmatmul.bf16.vlgmr.msra.gmra.mxu0 %v14005_v43  ;;  %v13290_v7 = vld [vmem:[#allocation8 + $0x61c] sm:$0xf]  ;;  %v10816_v11 = vor.u32 %v13162_v3, %v10813_v61 }
 0x3cc   : > { %v12092_v25 = vor.u32 %v13490_v63, %v12091_v8  ;;  %7715 = vmatpush.bf16.msra.mxu2 %v11580_v24  ;;  %7734 = vmatpush.bf16.msrb.mxu0 %v11008_v26  ;;  %v11325_v55 = vld [vmem:[#allocation8 + $0x658] sm:$0xf0]  ;;  %v7497_v26 = vadd.f32 %v7496_v19, %v7483_v18  ;;  %v13219_v18 = vld [vmem:[#allocation8 + $0x3dc] sm:$0xf0] }
 0x3cd   : > { %7703 = vmatmul.bf16.vlgmr.msra.gmra.mxu1 %v14007_v30  ;;  %v13418_v33 = vld [vmem:[#allocation8 + $0xa1c] sm:$0xf]  ;;  %v11328_v12 = vor.u32 %v13290_v7, %v11325_v55  ;;  %v11523_v19 = vld [vmem:[#allocation8 + $0x7a0] sm:$0xf] }
 0x3ce   : > { %7728 = vmatpush.bf16.msra.mxu3 %v12092_v25  ;;  %7747 = vmatpush.bf16.msrb.mxu1 %v11520_v27  ;;  %v11837_v8 = vld [vmem:[#allocation8 + $0xa58] sm:$0xf0] }
 0x3cf   : > { %7716 = vmatmul.bf16.vlgmr.msra.gmra.mxu2 %v14009_v22  ;;  %v13546_v63 = vld [vmem:[#allocation8 + $0xe1c] sm:$0xf]  ;;  %v11840_v20 = vor.u32 %v13418_v33, %v11837_v8 }
 0x3d0   : > { %7760 = vmatpush.bf16.msrb.mxu2 %v12032_v17  ;;  %7735 = vmatpush.bf16.msrb.mxu0 %v10944_v44  ;;  %v13146_v13 = vld [vmem:[#allocation8 + $0x19c] sm:$0xf]  ;;  %v12352_v23 = vor.u32 %v13546_v63, %v12349_v9  ;;  %v7509_v39 = vpop.f32.mrf.mxu2 }
 0x3d1   : > { %7729 = vmatmul.bf16.vlgmr.msra.gmra.mxu3 %v14011_v46  ;;  %v13274_v16 = vld [vmem:[#allocation8 + $0x59c] sm:$0xf]  ;;  %v10752_v29 = vor.u32 %v13146_v13, %v10749_v58  ;;  %v7522_v40 = vpop.f32.mrf.mxu3  ;;  %v7510_v44 = vadd.f32 %v7509_v39, %v7497_v26  ;;  %v11011_v58 = vld [vmem:[#allocation8 + $0x3a0] sm:$0xf] }
 0x3d2   : > { %7773 = vmatpush.bf16.msrb.mxu3 %v12544_v35  ;;  %7748 = vmatpush.bf16.msrb.mxu1 %v11456_v10  ;;  %v11261_v24 = vld [vmem:[#allocation8 + $0x5d8] sm:$0xf0]  ;;  %v12547_v26 = vld [vmem:[#allocation8 + $0xfa0] sm:$0xf] }
 0x3d3   : > { %v13402_v25 = vld [vmem:[#allocation8 + $0x99c] sm:$0xf]  ;;  %v11264_v32 = vor.u32 %v13274_v16, %v11261_v24  ;;  %v14047_v48 = vadd.f32 %v7522_v40, %v7510_v44  ;;  %v13459_v39 = vld [vmem:[#allocation8 + $0xb5c] sm:$0xf0] }
 0x3d4   : > { %7761 = vmatpush.bf16.msrb.mxu2 %v11968_v49  ;;  %7736 = vmatpush.bf16.msrb.mxu0 %v10880_v51  ;;  %v11773_v27 = vld [vmem:[#allocation8 + $0x9d8] sm:$0xf0]  ;;  %v7485_v49 = vpop.f32.mrf.mxu0  ;;  %v12483_v40 = vld [vmem:[#allocation8 + $0xf20] sm:$0xf] }
 0x3d5   : > { %v13530_v28 = vld [vmem:[#allocation8 + $0xd9c] sm:$0xf]  ;;  %v11776_v14 = vor.u32 %v13402_v25, %v11773_v27  ;;  %v13475_v25 = vld [vmem:[#allocation8 + $0xbdc] sm:$0xf0] }
 0x3d6   : > { %7774 = vmatpush.bf16.msrb.mxu3 %v12480_v34  ;;  %7749 = vmatpush.bf16.msrb.mxu1 %v11392_v59  ;;  %v12285_v31 = vld [vmem:[#allocation8 + $0xdd8] sm:$0xf0]  ;;  %v7498_v34 = vpop.f32.mrf.mxu1  ;;  %v13603_v27 = vld [vmem:[#allocation8 + $0xfdc] sm:$0xf0] }
 0x3d7   : > { %v13130_v17 = vld [vmem:[#allocation8 + $0x11c] sm:$0xf]  ;;  %v12288_v6 = vor.u32 %v13530_v28, %v12285_v31  ;;  %v10883_v44 = vld [vmem:[#allocation8 + $0x2a0] sm:$0xf] }
 0x3d8   : > { %7762 = vmatpush.bf16.msrb.mxu2 %v11904_v4  ;;  %7737 = vmatpush.bf16.msrb.mxu0 %v10816_v11  ;;  %v10685_v35 = vld [vmem:[#allocation8 + $0x158] sm:$0xf0]  ;;  %v7511_v11 = vpop.f32.mrf.mxu2  ;;  %v13315_v49 = vld [vmem:[#allocation8 + $0x6dc] sm:$0xf0] }
 0x3d9   : > { %v13258_v36 = vld [vmem:[#allocation8 + $0x51c] sm:$0xf]  ;;  %v10688_v10 = vor.u32 %v13130_v17, %v10685_v35  ;;  %v10947_v17 = vld [vmem:[#allocation8 + $0x320] sm:$0xf] }
 0x3da   : > { %7775 = vmatpush.bf16.msrb.mxu3 %v12416_v5  ;;  %7750 = vmatpush.bf16.msrb.mxu1 %v11328_v12  ;;  %v11197_v37 = vld [vmem:[#allocation8 + $0x558] sm:$0xf0]  ;;  %v7524_v12 = vpop.f32.mrf.mxu3  ;;  %v13203_v35 = vld [vmem:[#allocation8 + $0x35c] sm:$0xf0] }
 0x3db   : > { %v13386_v38 = vld [vmem:[#allocation8 + $0x91c] sm:$0xf]  ;;  %v11200_v21 = vor.u32 %v13258_v36, %v11197_v37  ;;  %v11459_v36 = vld [vmem:[#allocation8 + $0x720] sm:$0xf] }
 0x3dc   : > { %7763 = vmatpush.bf16.msrb.mxu2 %v11840_v20  ;;  %v11709_v42 = vld [vmem:[#allocation8 + $0x958] sm:$0xf0]  ;;  %7738 = vmatpush.bf16.msrb.mxu0 %v10752_v29  ;;  %v13347_v20 = vld [vmem:[#allocation8 + $0x7dc] sm:$0xf0]  ;;  %v11012_v29 = vor.u32 %v13219_v18, %v11011_v58 }
 0x3dd   : > { %v13514_v52 = vld [vmem:[#allocation8 + $0xd1c] sm:$0xf]  ;;  %v11712_v41 = vor.u32 %v13386_v38, %v11709_v42  ;;  %v13331_v37 = vld [vmem:[#allocation8 + $0x75c] sm:$0xf0] }
 0x3de   : > { %7776 = vmatpush.bf16.msrb.mxu3 %v12352_v23  ;;  %v12221_v60 = vld [vmem:[#allocation8 + $0xd58] sm:$0xf0]  ;;  %7751 = vmatpush.bf16.msrb.mxu1 %v11264_v32  ;;  %v12035_v23 = vld [vmem:[#allocation8 + $0xba0] sm:$0xf]  ;;  %v11524_v32 = vor.u32 %v13347_v20, %v11523_v19 }
 0x3df   : > { %v13114_v45 = vld [vmem:[#allocation8 + $0x9c] sm:$0xf]  ;;  %v12224_v53 = vor.u32 %v13514_v52, %v12221_v60  ;;  %v11971_v38 = vld [vmem:[#allocation8 + $0xb20] sm:$0xf]  ;;  %v10948_v52 = vor.u32 %v13203_v35, %v10947_v17  ;;  %v11460_v60 = vor.u32 %v13331_v37, %v11459_v36 }
 0x3e0   : > { %v10621_v47 = vld [vmem:[#allocation8 + $0xd8] sm:$0xf0]  ;;  %7764 = vmatpush.bf16.msrb.mxu2 %v11776_v14  ;;  %7739 = vmatpush.bf16.msrb.mxu0 %v10688_v10  ;;  %v12036_v14 = vor.u32 %v13475_v25, %v12035_v23  ;;  %v13587_v42 = vld [vmem:[#allocation8 + $0xf5c] sm:$0xf0] }
 0x3e1   : > { %v13242_v54 = vld [vmem:[#allocation8 + $0x49c] sm:$0xf]  ;;  %v10624_v62 = vor.u32 %v13114_v45, %v10621_v47  ;;  %v13187_v10 = vld [vmem:[#allocation8 + $0x2dc] sm:$0xf0]  ;;  %v12484_v45 = vor.u32 %v13587_v42, %v12483_v40 }
 0x3e2   : > { %7777 = vmatpush.bf16.msrb.mxu3 %v12288_v6  ;;  %v11133_v56 = vld [vmem:[#allocation8 + $0x4d8] sm:$0xf0]  ;;  %7752 = vmatpush.bf16.msrb.mxu1 %v11200_v21  ;;  %v12548_v6 = vor.u32 %v13603_v27, %v12547_v26  ;;  %v11972_v21 = vor.u32 %v13459_v39, %v11971_v38  ;;  %v11395_v47 = vld [vmem:[#allocation8 + $0x6a0] sm:$0xf] }
 0x3e3   : > { %v13370_v2 = vld [vmem:[#allocation8 + $0x89c] sm:$0xf]  ;;  %v11136_v0 = vor.u32 %v13242_v54, %v11133_v56  ;;  %v11907_v34 = vld [vmem:[#allocation8 + $0xaa0] sm:$0xf]  ;;  %v10884_v56 = vor.u32 %v13187_v10, %v10883_v44 }
 0x3e4   : > { %v11645_v51 = vld [vmem:[#allocation8 + $0x8d8] sm:$0xf0]  ;;  %7765 = vmatpush.bf16.msrb.mxu2 %v11712_v41  ;;  %7740 = vmatpush.bf16.msrb.mxu0 %v10624_v62  ;;  %v13443_v41 = vld [vmem:[#allocation8 + $0xadc] sm:$0xf0] }
 0x3e5   : > { %v13498_v59 = vld [vmem:[#allocation8 + $0xc9c] sm:$0xf]  ;;  %v11648_v55 = vor.u32 %v13370_v2, %v11645_v51  ;;  %v13571_v54 = vld [vmem:[#allocation8 + $0xedc] sm:$0xf0]  ;;  %v11396_v2 = vor.u32 %v13315_v49, %v11395_v47 }
 0x3e6   : > { %v12157_v3 = vld [vmem:[#allocation8 + $0xcd8] sm:$0xf0]  ;;  %7778 = vmatpush.bf16.msrb.mxu3 %v12224_v53  ;;  %7753 = vmatpush.bf16.msrb.mxu1 %v11136_v0  ;;  %v12419_v53 = vld [vmem:[#allocation8 + $0xea0] sm:$0xf] }
 0x3e7   : > { %v13098_v61 = vld [vmem:[#allocation8 + $0x1c] sm:$0xf]  ;;  %v12160_v33 = vor.u32 %v13498_v59, %v12157_v3  ;;  %v10819_v51 = vld [vmem:[#allocation8 + $0x220] sm:$0xf]  ;;  %v11908_v3 = vor.u32 %v13443_v41, %v11907_v34 }
 0x3e8   : > { %v10557_v4 = vld [vmem:[#allocation8 + $0x58] sm:$0xf0]  ;;  %7766 = vmatpush.bf16.msrb.mxu2 %v11648_v55  ;;  %v13171_v59 = vld [vmem:[#allocation8 + $0x25c] sm:$0xf0] }
 0x3e9   : > { %v13226_v5 = vld [vmem:[#allocation8 + $0x41c] sm:$0xf]  ;;  %v10560_v16 = vor.u32 %v13098_v61, %v10557_v4  ;;  %v12420_v61 = vor.u32 %v13571_v54, %v12419_v53  ;;  %v11331_v62 = vld [vmem:[#allocation8 + $0x620] sm:$0xf] }
 0x3ea   : > { %v11069_v7 = vld [vmem:[#allocation8 + $0x458] sm:$0xf0]  ;;  %7779 = vmatpush.bf16.msrb.mxu3 %v12160_v33  ;;  %v13299_v0 = vld [vmem:[#allocation8 + $0x65c] sm:$0xf0]  ;;  %v10820_v33 = vor.u32 %v13171_v59, %v10819_v51 }
 0x3eb   : > { %v13354_v8 = vld [vmem:[#allocation8 + $0x81c] sm:$0xf]  ;;  %v11072_v24 = vor.u32 %v13226_v5, %v11069_v7  ;;  %7741 = vmatpush.bf16.msrb.mxu0 %v10560_v16  ;;  %v11843_v4 = vld [vmem:[#allocation8 + $0xa20] sm:$0xf] }
 0x3ec   : > { %v11581_v63 = vld [vmem:[#allocation8 + $0x858] sm:$0xf0]  ;;  %v13427_v5 = vld [vmem:[#allocation8 + $0xa5c] sm:$0xf0] }
 0x3ed   : > { %v13482_v9 = vld [vmem:[#allocation8 + $0xc1c] sm:$0xf]  ;;  %v11584_v28 = vor.u32 %v13354_v8, %v11581_v63  ;;  %7754 = vmatpush.bf16.msrb.mxu1 %v11072_v24  ;;  %v12355_v7 = vld [vmem:[#allocation8 + $0xe20] sm:$0xf]  ;;  %v11332_v8 = vor.u32 %v13299_v0, %v11331_v62  ;;  %v7535_v63 = vpop.f32.mrf.mxu0 }
 0x3ee   : > { %v12093_v13 = vld [vmem:[#allocation8 + $0xc58] sm:$0xf0]  ;;  %7742 = vmatmul.bf16.vlgmr.msrb.gmra.mxu0 %v14005_v43  ;;  %v13555_v55 = vld [vmem:[#allocation8 + $0xe5c] sm:$0xf0] }
 0x3ef   : > { %v12096_v31 = vor.u32 %v13482_v9, %v12093_v13  ;;  %7767 = vmatpush.bf16.msrb.mxu2 %v11584_v28  ;;  %7786 = vmatpush.bf16.msra.mxu0 %v11012_v29  ;;  %v7548_v9 = vpop.f32.mrf.mxu1  ;;  %v10755_v11 = vld [vmem:[#allocation8 + $0x1a0] sm:$0xf]  ;;  %v11844_v13 = vor.u32 %v13427_v5, %v11843_v4  ;;  %v12356_v58 = vor.u32 %v13555_v55, %v12355_v7 }
 0x3f0   : > { %7755 = vmatmul.bf16.vlgmr.msrb.gmra.mxu1 %v14007_v30  ;;  %v13155_v12 = vld [vmem:[#allocation8 + $0x1dc] sm:$0xf0]  ;;  %v7549_v18 = vadd.f32 %v7548_v9, %v7535_v63  ;;  %v7561_v17 = vpop.f32.mrf.mxu2 }
 0x3f1   : > { %7780 = vmatpush.bf16.msrb.mxu3 %v12096_v31  ;;  %7799 = vmatpush.bf16.msra.mxu1 %v11524_v32  ;;  %v11267_v19 = vld [vmem:[#allocation8 + $0x5a0] sm:$0xf]  ;;  %v10756_v26 = vor.u32 %v13155_v12, %v10755_v11 }
 0x3f2   : > { %7768 = vmatmul.bf16.vlgmr.msrb.gmra.mxu2 %v14009_v22  ;;  %v13283_v20 = vld [vmem:[#allocation8 + $0x5dc] sm:$0xf0]  ;;  %v7574_v35 = vpop.f32.mrf.mxu3  ;;  %v7562_v37 = vadd.f32 %v7561_v17, %v7549_v18  ;;  %v11013_v18 = vld [vmem:[#allocation8 + $0x3e0] sm:$0xf0] }
 0x3f3   : > { %7812 = vmatpush.bf16.msra.mxu2 %v12036_v14  ;;  %7787 = vmatpush.bf16.msra.mxu0 %v10948_v52  ;;  %v11779_v23 = vld [vmem:[#allocation8 + $0x9a0] sm:$0xf]  ;;  %v11268_v27 = vor.u32 %v13283_v20, %v11267_v19  ;;  %v13339_v19 = vld [vmem:[#allocation8 + $0x7a4] sm:$0xf] }
 0x3f4   : > { %7781 = vmatmul.bf16.vlgmr.msrb.gmra.mxu3 %v14011_v46  ;;  %v13411_v16 = vld [vmem:[#allocation8 + $0x9dc] sm:$0xf0]  ;;  %v7575_v42 = vadd.f32 %v7574_v35, %v7562_v37  ;;  %v11525_v20 = vld [vmem:[#allocation8 + $0x7e0] sm:$0xf0] }
 0x3f5   : > { %7825 = vmatpush.bf16.msra.mxu3 %v12548_v6  ;;  %7800 = vmatpush.bf16.msra.mxu1 %v11460_v60  ;;  %v12291_v24 = vld [vmem:[#allocation8 + $0xda0] sm:$0xf]  ;;  %v11780_v29 = vor.u32 %v13411_v16, %v11779_v23  ;;  %v13467_v23 = vld [vmem:[#allocation8 + $0xba4] sm:$0xf] }
 0x3f6   : > { %v13539_v25 = vld [vmem:[#allocation8 + $0xddc] sm:$0xf0]  ;;  %v10949_v17 = vld [vmem:[#allocation8 + $0x360] sm:$0xf0] }
 0x3f7   : > { %7813 = vmatpush.bf16.msra.mxu2 %v11972_v21  ;;  %7788 = vmatpush.bf16.msra.mxu0 %v10884_v56  ;;  %v10691_v28 = vld [vmem:[#allocation8 + $0x120] sm:$0xf]  ;;  %v12292_v32 = vor.u32 %v13539_v25, %v12291_v24  ;;  %v7550_v47 = vpop.f32.mrf.mxu1  ;;  %v8219_v56 = vrot.slane %v14047_v48, 4  ;;  %v12037_v24 = vld [vmem:[#allocation8 + $0xbe0] sm:$0xf0] }
 0x3f8   : > { %v13139_v31 = vld [vmem:[#allocation8 + $0x15c] sm:$0xf0]  ;;  %v7563_v11 = vpop.f32.mrf.mxu2  ;;  %v13595_v25 = vld [vmem:[#allocation8 + $0xfa4] sm:$0xf]  ;;  %v12040_v35 = vor.u32 %v13467_v23, %v12037_v24 }
 0x3f9   : > { %7826 = vmatpush.bf16.msra.mxu3 %v12484_v45  ;;  %7801 = vmatpush.bf16.msra.mxu1 %v11396_v2  ;;  %v11203_v14 = vld [vmem:[#allocation8 + $0x520] sm:$0xf]  ;;  %v10692_v52 = vor.u32 %v13139_v31, %v10691_v28  ;;  %v7537_v45 = vpop.f32.mrf.mxu0  ;;  %v8220_v2 = vrot.slane %v7575_v42, 2  ;;  %v13451_v37 = vld [vmem:[#allocation8 + $0xb24] sm:$0xf] }
 0x3fa   : > { %v13267_v6 = vld [vmem:[#allocation8 + $0x55c] sm:$0xf0]  ;;  %v7576_v12 = vpop.f32.mrf.mxu3  ;;  %v13307_v45 = vld [vmem:[#allocation8 + $0x6a4] sm:$0xf] }
 0x3fb   : > { %7814 = vmatpush.bf16.msra.mxu2 %v11908_v3  ;;  %7789 = vmatpush.bf16.msra.mxu0 %v10820_v33  ;;  %v11715_v36 = vld [vmem:[#allocation8 + $0x920] sm:$0xf]  ;;  %v11204_v60 = vor.u32 %v13267_v6, %v11203_v14  ;;  %v13323_v6 = vld [vmem:[#allocation8 + $0x724] sm:$0xf] }
 0x3fc   : > { %v13395_v38 = vld [vmem:[#allocation8 + $0x95c] sm:$0xf0]  ;;  %v11397_v47 = vld [vmem:[#allocation8 + $0x6e0] sm:$0xf0] }
 0x3fd   : > { %7827 = vmatpush.bf16.msra.mxu3 %v12420_v61  ;;  %7802 = vmatpush.bf16.msra.mxu1 %v11332_v8  ;;  %v12227_v39 = vld [vmem:[#allocation8 + $0xd20] sm:$0xf]  ;;  %v11716_v49 = vor.u32 %v13395_v38, %v11715_v36  ;;  %v8231_v61 = vsel %vm4079_vm1, %v8219_v56, %v8220_v2  ;;  %v11461_v36 = vld [vmem:[#allocation8 + $0x760] sm:$0xf0]  ;;  %v11400_v56 = vor.u32 %v13307_v45, %v11397_v47 }
 0x3fe   : > { %v13523_v40 = vld [vmem:[#allocation8 + $0xd5c] sm:$0xf0]  ;;  %v14057_v55 = vsel %vm4081_vm2, %v14043_v57, %v8231_v61  ;;  %v11973_v38 = vld [vmem:[#allocation8 + $0xb60] sm:$0xf0] }
 0x3ff   : > { %7815 = vmatpush.bf16.msra.mxu2 %v11844_v13  ;;  %7790 = vmatpush.bf16.msra.mxu0 %v10756_v26  ;;  %v10627_v44 = vld [vmem:[#allocation8 + $0xa0] sm:$0xf]  ;;  %v12228_v34 = vor.u32 %v13523_v40, %v12227_v39  ;;  %v12549_v26 = vld [vmem:[#allocation8 + $0xfe0] sm:$0xf0] }
 0x400   : > { %v13123_v10 = vld [vmem:[#allocation8 + $0xdc] sm:$0xf0]  ;;  %v12552_v14 = vor.u32 %v13595_v25, %v12549_v26  ;;  %v13579_v39 = vld [vmem:[#allocation8 + $0xf24] sm:$0xf] }
 0x401   : > { %7828 = vmatpush.bf16.msra.mxu3 %v12356_v58  ;;  %7803 = vmatpush.bf16.msra.mxu1 %v11268_v27  ;;  %v11139_v21 = vld [vmem:[#allocation8 + $0x4a0] sm:$0xf]  ;;  %v10628_v62 = vor.u32 %v13123_v10, %v10627_v44  ;;  %v13211_v58 = vld [vmem:[#allocation8 + $0x3a4] sm:$0xf]  ;;  %v11976_v10 = vor.u32 %v13451_v37, %v11973_v38 }
 0x402   : > { %v13251_v41 = vld [vmem:[#allocation8 + $0x4dc] sm:$0xf0]  ;;  %v11016_v31 = vor.u32 %v13211_v58, %v11013_v18  ;;  %v12485_v40 = vld [vmem:[#allocation8 + $0xf60] sm:$0xf0] }
 0x403   : > { %7816 = vmatpush.bf16.msra.mxu2 %v11780_v29  ;;  %v11651_v53 = vld [vmem:[#allocation8 + $0x8a0] sm:$0xf]  ;;  %7791 = vmatpush.bf16.msra.mxu0 %v10692_v52  ;;  %v11140_v0 = vor.u32 %v13251_v41, %v11139_v21  ;;  %v11528_v29 = vor.u32 %v13339_v19, %v11525_v20  ;;  %v11464_v52 = vor.u32 %v13323_v6, %v11461_v36  ;;  %v10885_v44 = vld [vmem:[#allocation8 + $0x2e0] sm:$0xf0] }
 0x404   : > { %v13379_v54 = vld [vmem:[#allocation8 + $0x8dc] sm:$0xf0]  ;;  %v12488_v21 = vor.u32 %v13579_v39, %v12485_v40  ;;  %v13563_v41 = vld [vmem:[#allocation8 + $0xea4] sm:$0xf] }
 0x405   : > { %7829 = vmatpush.bf16.msra.mxu3 %v12292_v32  ;;  %v12163_v51 = vld [vmem:[#allocation8 + $0xca0] sm:$0xf]  ;;  %7804 = vmatpush.bf16.msra.mxu1 %v11204_v60  ;;  %v11652_v48 = vor.u32 %v13379_v54, %v11651_v53  ;;  %v13195_v32 = vld [vmem:[#allocation8 + $0x324] sm:$0xf] }
 0x406   : > { %v13507_v59 = vld [vmem:[#allocation8 + $0xcdc] sm:$0xf0]  ;;  %v10952_v42 = vor.u32 %v13195_v32, %v10949_v17  ;;  %v13179_v60 = vld [vmem:[#allocation8 + $0x2a4] sm:$0xf] }
 0x407   : > { %v10563_v3 = vld [vmem:[#allocation8 + $0x20] sm:$0xf]  ;;  %7817 = vmatpush.bf16.msra.mxu2 %v11716_v49  ;;  %v12164_v33 = vor.u32 %v13507_v59, %v12163_v51  ;;  %7792 = vmatpush.bf16.msra.mxu0 %v10628_v62  ;;  %v13435_v49 = vld [vmem:[#allocation8 + $0xaa4] sm:$0xf]  ;;  %v10888_v54 = vor.u32 %v13179_v60, %v10885_v44 }
 0x408   : > { %v13107_v4 = vld [vmem:[#allocation8 + $0x5c] sm:$0xf0]  ;;  %v12421_v53 = vld [vmem:[#allocation8 + $0xee0] sm:$0xf0] }
 0x409   : > { %v11075_v5 = vld [vmem:[#allocation8 + $0x420] sm:$0xf]  ;;  %7830 = vmatpush.bf16.msra.mxu3 %v12228_v34  ;;  %7805 = vmatpush.bf16.msra.mxu1 %v11140_v0  ;;  %v10564_v16 = vor.u32 %v13107_v4, %v10563_v3  ;;  %v11909_v34 = vld [vmem:[#allocation8 + $0xae0] sm:$0xf0]  ;;  %v12424_v3 = vor.u32 %v13563_v41, %v12421_v53  ;;  %v7600_v11 = vpop.f32.mrf.mxu1 }
 0x40a   : > { %v13235_v7 = vld [vmem:[#allocation8 + $0x45c] sm:$0xf0]  ;;  %v13163_v2 = vld [vmem:[#allocation8 + $0x224] sm:$0xf]  ;;  %v11912_v59 = vor.u32 %v13435_v49, %v11909_v34 }
 0x40b   : > { %v11587_v8 = vld [vmem:[#allocation8 + $0x820] sm:$0xf]  ;;  %v11076_v57 = vor.u32 %v13235_v7, %v11075_v5  ;;  %7818 = vmatpush.bf16.msra.mxu2 %v11652_v48  ;;  %7793 = vmatpush.bf16.msra.mxu0 %v10564_v16  ;;  %v10821_v51 = vld [vmem:[#allocation8 + $0x260] sm:$0xf0] }
 0x40c   : > { %v13363_v63 = vld [vmem:[#allocation8 + $0x85c] sm:$0xf0]  ;;  %v13291_v61 = vld [vmem:[#allocation8 + $0x624] sm:$0xf]  ;;  %v10824_v48 = vor.u32 %v13163_v2, %v10821_v51 }
 0x40d   : > { %v12099_v9 = vld [vmem:[#allocation8 + $0xc20] sm:$0xf]  ;;  %7831 = vmatpush.bf16.msra.mxu3 %v12164_v33  ;;  %v11588_v27 = vor.u32 %v13363_v63, %v11587_v8  ;;  %7806 = vmatpush.bf16.msra.mxu1 %v11076_v57  ;;  %v11333_v62 = vld [vmem:[#allocation8 + $0x660] sm:$0xf0] }
 0x40e   : > { %v13491_v13 = vld [vmem:[#allocation8 + $0xc5c] sm:$0xf0]  ;;  %7794 = vmatmul.bf16.vlgmr.msra.gmra.mxu0 %v14005_v43  ;;  %v13419_v0 = vld [vmem:[#allocation8 + $0xa24] sm:$0xf]  ;;  %v11336_v33 = vor.u32 %v13291_v61, %v11333_v62 }
 0x40f   : > { %v12100_v28 = vor.u32 %v13491_v13, %v12099_v9  ;;  %7819 = vmatpush.bf16.msra.mxu2 %v11588_v27  ;;  %7838 = vmatpush.bf16.msrb.mxu0 %v11016_v31  ;;  %v11845_v4 = vld [vmem:[#allocation8 + $0xa60] sm:$0xf0]  ;;  %v7587_v9 = vpop.f32.mrf.mxu0 }
 0x410   : > { %7807 = vmatmul.bf16.vlgmr.msra.gmra.mxu1 %v14007_v30  ;;  %v13547_v5 = vld [vmem:[#allocation8 + $0xe24] sm:$0xf]  ;;  %v11848_v12 = vor.u32 %v13419_v0, %v11845_v4  ;;  %v7601_v20 = vadd.f32 %v7600_v11, %v7587_v9  ;;  %v13220_v9 = vld [vmem:[#allocation8 + $0x3e4] sm:$0xf0] }
 0x411   : > { %7832 = vmatpush.bf16.msra.mxu3 %v12100_v28  ;;  %7851 = vmatpush.bf16.msrb.mxu1 %v11528_v29  ;;  %v12357_v7 = vld [vmem:[#allocation8 + $0xe60] sm:$0xf0]  ;;  %v11531_v11 = vld [vmem:[#allocation8 + $0x7a8] sm:$0xf] }
 0x412   : > { %7820 = vmatmul.bf16.vlgmr.msra.gmra.mxu2 %v14009_v22  ;;  %v13147_v8 = vld [vmem:[#allocation8 + $0x1a4] sm:$0xf]  ;;  %v12360_v13 = vor.u32 %v13547_v5, %v12357_v7 }
 0x413   : > { %7864 = vmatpush.bf16.msrb.mxu2 %v12040_v35  ;;  %7839 = vmatpush.bf16.msrb.mxu0 %v10952_v42  ;;  %v10757_v63 = vld [vmem:[#allocation8 + $0x1e0] sm:$0xf0]  ;;  %v7613_v35 = vpop.f32.mrf.mxu2 }
 0x414   : > { %7833 = vmatmul.bf16.vlgmr.msra.gmra.mxu3 %v14011_v46  ;;  %v13275_v58 = vld [vmem:[#allocation8 + $0x5a4] sm:$0xf]  ;;  %v10760_v24 = vor.u32 %v13147_v8, %v10757_v63  ;;  %v7614_v38 = vadd.f32 %v7613_v35, %v7601_v20  ;;  %v11019_v63 = vld [vmem:[#allocation8 + $0x3a8] sm:$0xf] }
 0x415   : > { %7877 = vmatpush.bf16.msrb.mxu3 %v12552_v14  ;;  %7852 = vmatpush.bf16.msrb.mxu1 %v11464_v52  ;;  %v11269_v18 = vld [vmem:[#allocation8 + $0x5e0] sm:$0xf0]  ;;  %v7626_v14 = vpop.f32.mrf.mxu3  ;;  %v12555_v20 = vld [vmem:[#allocation8 + $0xfa8] sm:$0xf] }
 0x416   : > { %v13403_v19 = vld [vmem:[#allocation8 + $0x9a4] sm:$0xf]  ;;  %v11272_v25 = vor.u32 %v13275_v58, %v11269_v18  ;;  %v14063_v60 = vadd.f32 %v7626_v14, %v7614_v38  ;;  %v13460_v35 = vld [vmem:[#allocation8 + $0xb64] sm:$0xf0] }
 0x417   : > { %7865 = vmatpush.bf16.msrb.mxu2 %v11976_v10  ;;  %7840 = vmatpush.bf16.msrb.mxu0 %v10888_v54  ;;  %v11781_v23 = vld [vmem:[#allocation8 + $0x9e0] sm:$0xf0]  ;;  %v7589_v44 = vpop.f32.mrf.mxu0  ;;  %v7602_v10 = vpop.f32.mrf.mxu1  ;;  %v12491_v14 = vld [vmem:[#allocation8 + $0xf28] sm:$0xf] }
 0x418   : > { %v13531_v16 = vld [vmem:[#allocation8 + $0xda4] sm:$0xf]  ;;  %v11784_v28 = vor.u32 %v13403_v19, %v11781_v23  ;;  %v13476_v19 = vld [vmem:[#allocation8 + $0xbe4] sm:$0xf0] }
 0x419   : > { %7878 = vmatpush.bf16.msrb.mxu3 %v12488_v21  ;;  %7853 = vmatpush.bf16.msrb.mxu1 %v11400_v56  ;;  %v12293_v57 = vld [vmem:[#allocation8 + $0xde0] sm:$0xf0]  ;;  %v13604_v23 = vld [vmem:[#allocation8 + $0xfe4] sm:$0xf0] }
 0x41a   : > { %v13131_v26 = vld [vmem:[#allocation8 + $0x124] sm:$0xf]  ;;  %v12296_v31 = vor.u32 %v13531_v16, %v12293_v57  ;;  %v10891_v38 = vld [vmem:[#allocation8 + $0x2a8] sm:$0xf] }
 0x41b   : > { %7866 = vmatpush.bf16.msrb.mxu2 %v11912_v59  ;;  %7841 = vmatpush.bf16.msrb.mxu0 %v10824_v48  ;;  %v10693_v27 = vld [vmem:[#allocation8 + $0x160] sm:$0xf0]  ;;  %v7615_v48 = vpop.f32.mrf.mxu2  ;;  %v13316_v44 = vld [vmem:[#allocation8 + $0x6e4] sm:$0xf0] }
 0x41c   : > { %v13259_v29 = vld [vmem:[#allocation8 + $0x524] sm:$0xf]  ;;  %v10696_v39 = vor.u32 %v13131_v26, %v10693_v27  ;;  %v10955_v26 = vld [vmem:[#allocation8 + $0x328] sm:$0xf] }
 0x41d   : > { %7879 = vmatpush.bf16.msrb.mxu3 %v12424_v3  ;;  %7854 = vmatpush.bf16.msrb.mxu1 %v11336_v33  ;;  %v11205_v32 = vld [vmem:[#allocation8 + $0x560] sm:$0xf0]  ;;  %v7628_v33 = vpop.f32.mrf.mxu3  ;;  %v13204_v27 = vld [vmem:[#allocation8 + $0x364] sm:$0xf0] }
 0x41e   : > { %v13387_v17 = vld [vmem:[#allocation8 + $0x924] sm:$0xf]  ;;  %v11208_v40 = vor.u32 %v13259_v29, %v11205_v32  ;;  %v11467_v29 = vld [vmem:[#allocation8 + $0x728] sm:$0xf] }
 0x41f   : > { %7867 = vmatpush.bf16.msrb.mxu2 %v11848_v12  ;;  %v11717_v6 = vld [vmem:[#allocation8 + $0x960] sm:$0xf0]  ;;  %7842 = vmatpush.bf16.msrb.mxu0 %v10760_v24  ;;  %v13348_v12 = vld [vmem:[#allocation8 + $0x7e4] sm:$0xf0]  ;;  %v11020_v24 = vor.u32 %v13220_v9, %v11019_v63 }
 0x420   : > { %v13515_v36 = vld [vmem:[#allocation8 + $0xd24] sm:$0xf]  ;;  %v11720_v21 = vor.u32 %v13387_v17, %v11717_v6  ;;  %v13332_v32 = vld [vmem:[#allocation8 + $0x764] sm:$0xf0] }
 0x421   : > { %7880 = vmatpush.bf16.msrb.mxu3 %v12360_v13  ;;  %v12229_v37 = vld [vmem:[#allocation8 + $0xd60] sm:$0xf0]  ;;  %7855 = vmatpush.bf16.msrb.mxu1 %v11272_v25  ;;  %v12043_v13 = vld [vmem:[#allocation8 + $0xba8] sm:$0xf]  ;;  %v11532_v25 = vor.u32 %v13348_v12, %v11531_v11 }
 0x422   : > { %v13115_v42 = vld [vmem:[#allocation8 + $0xa4] sm:$0xf]  ;;  %v12232_v45 = vor.u32 %v13515_v36, %v12229_v37  ;;  %v11979_v17 = vld [vmem:[#allocation8 + $0xb28] sm:$0xf]  ;;  %v10956_v36 = vor.u32 %v13204_v27, %v10955_v26  ;;  %v11468_v37 = vor.u32 %v13332_v32, %v11467_v29 }
 0x423   : > { %v10629_v52 = vld [vmem:[#allocation8 + $0xe0] sm:$0xf0]  ;;  %7868 = vmatpush.bf16.msrb.mxu2 %v11784_v28  ;;  %7843 = vmatpush.bf16.msrb.mxu0 %v10696_v39  ;;  %v12044_v28 = vor.u32 %v13476_v19, %v12043_v13  ;;  %v13588_v6 = vld [vmem:[#allocation8 + $0xf64] sm:$0xf0] }
 0x424   : > { %v13243_v47 = vld [vmem:[#allocation8 + $0x4a4] sm:$0xf]  ;;  %v10632_v2 = vor.u32 %v13115_v42, %v10629_v52  ;;  %v13188_v39 = vld [vmem:[#allocation8 + $0x2e4] sm:$0xf0]  ;;  %v12492_v42 = vor.u32 %v13588_v6, %v12491_v14 }
 0x425   : > { %7881 = vmatpush.bf16.msrb.mxu3 %v12296_v31  ;;  %v11141_v49 = vld [vmem:[#allocation8 + $0x4e0] sm:$0xf0]  ;;  %7856 = vmatpush.bf16.msrb.mxu1 %v11208_v40  ;;  %v12556_v31 = vor.u32 %v13604_v23, %v12555_v20  ;;  %v11980_v40 = vor.u32 %v13460_v35, %v11979_v17  ;;  %v11403_v52 = vld [vmem:[#allocation8 + $0x6a8] sm:$0xf] }
 0x426   : > { %v13371_v34 = vld [vmem:[#allocation8 + $0x8a4] sm:$0xf]  ;;  %v11144_v51 = vor.u32 %v13243_v47, %v11141_v49  ;;  %v11915_v10 = vld [vmem:[#allocation8 + $0xaa8] sm:$0xf]  ;;  %v10892_v49 = vor.u32 %v13188_v39, %v10891_v38 }
 0x427   : > { %v11653_v41 = vld [vmem:[#allocation8 + $0x8e0] sm:$0xf0]  ;;  %7869 = vmatpush.bf16.msrb.mxu2 %v11720_v21  ;;  %7844 = vmatpush.bf16.msrb.mxu0 %v10632_v2  ;;  %v13444_v21 = vld [vmem:[#allocation8 + $0xae4] sm:$0xf0] }
 0x428   : > { %v13499_v53 = vld [vmem:[#allocation8 + $0xca4] sm:$0xf]  ;;  %v11656_v62 = vor.u32 %v13371_v34, %v11653_v41  ;;  %v13572_v47 = vld [vmem:[#allocation8 + $0xee4] sm:$0xf0]  ;;  %v11404_v34 = vor.u32 %v13316_v44, %v11403_v52 }
 0x429   : > { %v12165_v54 = vld [vmem:[#allocation8 + $0xce0] sm:$0xf0]  ;;  %7882 = vmatpush.bf16.msrb.mxu3 %v12232_v45  ;;  %7857 = vmatpush.bf16.msrb.mxu1 %v11144_v51  ;;  %v12427_v45 = vld [vmem:[#allocation8 + $0xea8] sm:$0xf] }
 0x42a   : > { %v13099_v56 = vld [vmem:[#allocation8 + $0x24] sm:$0xf]  ;;  %v12168_v0 = vor.u32 %v13499_v53, %v12165_v54  ;;  %v10827_v41 = vld [vmem:[#allocation8 + $0x228] sm:$0xf]  ;;  %v11916_v54 = vor.u32 %v13444_v21, %v11915_v10 }
 0x42b   : > { %v10565_v59 = vld [vmem:[#allocation8 + $0x60] sm:$0xf0]  ;;  %7870 = vmatpush.bf16.msrb.mxu2 %v11656_v62  ;;  %v13172_v53 = vld [vmem:[#allocation8 + $0x264] sm:$0xf0] }
 0x42c   : > { %v13227_v3 = vld [vmem:[#allocation8 + $0x424] sm:$0xf]  ;;  %v10568_v58 = vor.u32 %v13099_v56, %v10565_v59  ;;  %v12428_v56 = vor.u32 %v13572_v47, %v12427_v45  ;;  %v11339_v2 = vld [vmem:[#allocation8 + $0x628] sm:$0xf] }
 0x42d   : > { %v11077_v61 = vld [vmem:[#allocation8 + $0x460] sm:$0xf0]  ;;  %7883 = vmatpush.bf16.msrb.mxu3 %v12168_v0  ;;  %v13300_v51 = vld [vmem:[#allocation8 + $0x664] sm:$0xf0]  ;;  %v10828_v0 = vor.u32 %v13172_v53, %v10827_v41 }
 0x42e   : > { %v13355_v4 = vld [vmem:[#allocation8 + $0x824] sm:$0xf]  ;;  %v11080_v18 = vor.u32 %v13227_v3, %v11077_v61  ;;  %7845 = vmatpush.bf16.msrb.mxu0 %v10568_v58  ;;  %v11851_v59 = vld [vmem:[#allocation8 + $0xa28] sm:$0xf] }
 0x42f   : > { %v11589_v5 = vld [vmem:[#allocation8 + $0x860] sm:$0xf0]  ;;  %v13428_v3 = vld [vmem:[#allocation8 + $0xa64] sm:$0xf0] }
 0x430   : > { %v13483_v7 = vld [vmem:[#allocation8 + $0xc24] sm:$0xf]  ;;  %v11592_v16 = vor.u32 %v13355_v4, %v11589_v5  ;;  %7858 = vmatpush.bf16.msrb.mxu1 %v11080_v18  ;;  %v12363_v61 = vld [vmem:[#allocation8 + $0xe28] sm:$0xf]  ;;  %v11340_v4 = vor.u32 %v13300_v51, %v11339_v2  ;;  %v7639_v5 = vpop.f32.mrf.mxu0 }
 0x431   : > { %v12101_v8 = vld [vmem:[#allocation8 + $0xc60] sm:$0xf0]  ;;  %7846 = vmatmul.bf16.vlgmr.msrb.gmra.mxu0 %v14005_v43  ;;  %v13556_v62 = vld [vmem:[#allocation8 + $0xe64] sm:$0xf0] }
 0x432   : > { %v12104_v57 = vor.u32 %v13483_v7, %v12101_v8  ;;  %7871 = vmatpush.bf16.msrb.mxu2 %v11592_v16  ;;  %7890 = vmatpush.bf16.msra.mxu0 %v11020_v24  ;;  %v7652_v7 = vpop.f32.mrf.mxu1  ;;  %v10763_v48 = vld [vmem:[#allocation8 + $0x1a8] sm:$0xf]  ;;  %v11852_v8 = vor.u32 %v13428_v3, %v11851_v59  ;;  %v12364_v63 = vor.u32 %v13556_v62, %v12363_v61  ;;  %v7665_v26 = vpop.f32.mrf.mxu2 }
 0x433   : > { %7859 = vmatmul.bf16.vlgmr.msrb.gmra.mxu1 %v14007_v30  ;;  %v13156_v33 = vld [vmem:[#allocation8 + $0x1e4] sm:$0xf0]  ;;  %v7653_v9 = vadd.f32 %v7652_v7, %v7639_v5 }
 0x434   : > { %7884 = vmatpush.bf16.msrb.mxu3 %v12104_v57  ;;  %7903 = vmatpush.bf16.msra.mxu1 %v11532_v25  ;;  %v11275_v11 = vld [vmem:[#allocation8 + $0x5a8] sm:$0xf]  ;;  %v10764_v20 = vor.u32 %v13156_v33, %v10763_v48  ;;  %v7678_v27 = vpop.f32.mrf.mxu3 }
 0x435   : > { %7872 = vmatmul.bf16.vlgmr.msrb.gmra.mxu2 %v14009_v22  ;;  %v13284_v12 = vld [vmem:[#allocation8 + $0x5e4] sm:$0xf0]  ;;  %v7666_v32 = vadd.f32 %v7665_v26, %v7653_v9  ;;  %v11533_v9 = vld [vmem:[#allocation8 + $0x7e8] sm:$0xf0] }
 0x436   : > { %7916 = vmatpush.bf16.msra.mxu2 %v12044_v28  ;;  %7891 = vmatpush.bf16.msra.mxu0 %v10956_v36  ;;  %v11787_v13 = vld [vmem:[#allocation8 + $0x9a8] sm:$0xf]  ;;  %v11276_v23 = vor.u32 %v13284_v12, %v11275_v11  ;;  %v13468_v11 = vld [vmem:[#allocation8 + $0xbac] sm:$0xf] }
 0x437   : > { %7885 = vmatmul.bf16.vlgmr.msrb.gmra.mxu3 %v14011_v46  ;;  %v13412_v58 = vld [vmem:[#allocation8 + $0x9e4] sm:$0xf0]  ;;  %v7679_v6 = vadd.f32 %v7678_v27, %v7666_v32  ;;  %v11981_v32 = vld [vmem:[#allocation8 + $0xb68] sm:$0xf0] }
 0x438   : > { %7929 = vmatpush.bf16.msra.mxu3 %v12556_v31  ;;  %7904 = vmatpush.bf16.msra.mxu1 %v11468_v37  ;;  %v12299_v18 = vld [vmem:[#allocation8 + $0xda8] sm:$0xf]  ;;  %v11788_v24 = vor.u32 %v13412_v58, %v11787_v13  ;;  %v12045_v58 = vld [vmem:[#allocation8 + $0xbe8] sm:$0xf0] }
 0x439   : > { %v13540_v19 = vld [vmem:[#allocation8 + $0xde4] sm:$0xf0]  ;;  %v12048_v26 = vor.u32 %v13468_v11, %v12045_v58  ;;  %v12301_v58 = vld [vmem:[#allocation8 + $0xde8] sm:$0xf0] }
 0x43a   : > { %7917 = vmatpush.bf16.msra.mxu2 %v11980_v40  ;;  %7892 = vmatpush.bf16.msra.mxu0 %v10892_v49  ;;  %v10699_v16 = vld [vmem:[#allocation8 + $0x128] sm:$0xf]  ;;  %v12300_v25 = vor.u32 %v13540_v19, %v12299_v18  ;;  %v7654_v52 = vpop.f32.mrf.mxu1  ;;  %v8221_v49 = vrot.slane %v7679_v6, 6  ;;  %v7667_v7 = vpop.f32.mrf.mxu2  ;;  %v13596_v18 = vld [vmem:[#allocation8 + $0xfac] sm:$0xf] }
 0x43b   : > { %v13140_v57 = vld [vmem:[#allocation8 + $0x164] sm:$0xf0]  ;;  %v12557_v19 = vld [vmem:[#allocation8 + $0xfe8] sm:$0xf0] }
 0x43c   : > { %7930 = vmatpush.bf16.msra.mxu3 %v12492_v42  ;;  %7905 = vmatpush.bf16.msra.mxu1 %v11404_v34  ;;  %v11211_v28 = vld [vmem:[#allocation8 + $0x528] sm:$0xf]  ;;  %v10700_v36 = vor.u32 %v13140_v57, %v10699_v16  ;;  %v7641_v42 = vpop.f32.mrf.mxu0  ;;  %v7680_v48 = vpop.f32.mrf.mxu3  ;;  %v12560_v27 = vor.u32 %v13596_v18, %v12557_v19  ;;  %v13436_v52 = vld [vmem:[#allocation8 + $0xaac] sm:$0xf] }
 0x43d   : > { %v13268_v31 = vld [vmem:[#allocation8 + $0x564] sm:$0xf0]  ;;  %v11405_v42 = vld [vmem:[#allocation8 + $0x6e8] sm:$0xf0] }
 0x43e   : > { %7918 = vmatpush.bf16.msra.mxu2 %v11916_v54  ;;  %7893 = vmatpush.bf16.msra.mxu0 %v10828_v0  ;;  %v11723_v29 = vld [vmem:[#allocation8 + $0x928] sm:$0xf]  ;;  %v11212_v37 = vor.u32 %v13268_v31, %v11211_v28  ;;  %v14071_v54 = vsel %vm4077_vm0, %v14063_v60, %v8221_v49  ;;  %v11021_v60 = vld [vmem:[#allocation8 + $0x3e8] sm:$0xf0] }
 0x43f   : > { %v13396_v17 = vld [vmem:[#allocation8 + $0x964] sm:$0xf0]  ;;  %v13324_v28 = vld [vmem:[#allocation8 + $0x72c] sm:$0xf] }
 0x440   : > { %7931 = vmatpush.bf16.msra.mxu3 %v12428_v56  ;;  %7906 = vmatpush.bf16.msra.mxu1 %v11340_v4  ;;  %v12235_v35 = vld [vmem:[#allocation8 + $0xd28] sm:$0xf]  ;;  %v11724_v44 = vor.u32 %v13396_v17, %v11723_v29  ;;  %v11469_v31 = vld [vmem:[#allocation8 + $0x768] sm:$0xf0] }
 0x441   : > { %v13524_v14 = vld [vmem:[#allocation8 + $0xd64] sm:$0xf0]  ;;  %v13452_v29 = vld [vmem:[#allocation8 + $0xb2c] sm:$0xf]  ;;  %v11472_v6 = vor.u32 %v13324_v28, %v11469_v31 }
 0x442   : > { %7919 = vmatpush.bf16.msra.mxu2 %v11852_v8  ;;  %7894 = vmatpush.bf16.msra.mxu0 %v10764_v20  ;;  %v10635_v38 = vld [vmem:[#allocation8 + $0xa8] sm:$0xf]  ;;  %v12236_v10 = vor.u32 %v13524_v14, %v12235_v35  ;;  %v13212_v8 = vld [vmem:[#allocation8 + $0x3ac] sm:$0xf] }
 0x443   : > { %v13124_v39 = vld [vmem:[#allocation8 + $0xe4] sm:$0xf0]  ;;  %v11024_v16 = vor.u32 %v13212_v8, %v11021_v60  ;;  %v13580_v17 = vld [vmem:[#allocation8 + $0xf2c] sm:$0xf] }
 0x444   : > { %7932 = vmatpush.bf16.msra.mxu3 %v12364_v63  ;;  %7907 = vmatpush.bf16.msra.mxu1 %v11276_v23  ;;  %v11147_v40 = vld [vmem:[#allocation8 + $0x4a8] sm:$0xf]  ;;  %v10636_v56 = vor.u32 %v13124_v39, %v10635_v38  ;;  %v13340_v63 = vld [vmem:[#allocation8 + $0x7ac] sm:$0xf]  ;;  %v11984_v38 = vor.u32 %v13452_v29, %v11981_v32 }
 0x445   : > { %v13252_v21 = vld [vmem:[#allocation8 + $0x4e4] sm:$0xf0]  ;;  %v11536_v57 = vor.u32 %v13340_v63, %v11533_v9  ;;  %v12493_v35 = vld [vmem:[#allocation8 + $0xf68] sm:$0xf0] }
 0x446   : > { %7920 = vmatpush.bf16.msra.mxu2 %v11788_v24  ;;  %v11659_v45 = vld [vmem:[#allocation8 + $0x8a8] sm:$0xf]  ;;  %7895 = vmatpush.bf16.msra.mxu0 %v10700_v36  ;;  %v11148_v2 = vor.u32 %v13252_v21, %v11147_v40  ;;  %v13196_v24 = vld [vmem:[#allocation8 + $0x32c] sm:$0xf]  ;;  %v12496_v39 = vor.u32 %v13580_v17, %v12493_v35 }
 0x447   : > { %v13380_v47 = vld [vmem:[#allocation8 + $0x8e4] sm:$0xf0]  ;;  %v13180_v36 = vld [vmem:[#allocation8 + $0x2ac] sm:$0xf] }
 0x448   : > { %7933 = vmatpush.bf16.msra.mxu3 %v12300_v25  ;;  %v12171_v34 = vld [vmem:[#allocation8 + $0xca8] sm:$0xf]  ;;  %7908 = vmatpush.bf16.msra.mxu1 %v11212_v37  ;;  %v11660_v61 = vor.u32 %v13380_v47, %v11659_v45  ;;  %v10957_v25 = vld [vmem:[#allocation8 + $0x368] sm:$0xf0]  ;;  %v7691_v7 = vpop.f32.mrf.mxu0 }
 0x449   : > { %v13508_v41 = vld [vmem:[#allocation8 + $0xce4] sm:$0xf0]  ;;  %v10960_v14 = vor.u32 %v13196_v24, %v10957_v25  ;;  %v10893_v37 = vld [vmem:[#allocation8 + $0x2e8] sm:$0xf0] }
 0x44a   : > { %v10571_v53 = vld [vmem:[#allocation8 + $0x28] sm:$0xf]  ;;  %7921 = vmatpush.bf16.msra.mxu2 %v11724_v44  ;;  %v12172_v62 = vor.u32 %v13508_v41, %v12171_v34  ;;  %7896 = vmatpush.bf16.msra.mxu0 %v10636_v56  ;;  %v13308_v40 = vld [vmem:[#allocation8 + $0x6ac] sm:$0xf]  ;;  %v10896_v45 = vor.u32 %v13180_v36, %v10893_v37  ;;  %v7704_v48 = vpop.f32.mrf.mxu1 }
 0x44b   : > { %v13108_v51 = vld [vmem:[#allocation8 + $0x64] sm:$0xf0]  ;;  %v11917_v44 = vld [vmem:[#allocation8 + $0xae8] sm:$0xf0]  ;;  %v11408_v47 = vor.u32 %v13308_v40, %v11405_v42  ;;  %v7705_v11 = vadd.f32 %v7704_v48, %v7691_v7  ;;  %v11027_v7 = vld [vmem:[#allocation8 + $0x3b0] sm:$0xf] }
 0x44c   : > { %v11083_v59 = vld [vmem:[#allocation8 + $0x428] sm:$0xf]  ;;  %7934 = vmatpush.bf16.msra.mxu3 %v12236_v10  ;;  %7909 = vmatpush.bf16.msra.mxu1 %v11148_v2  ;;  %v10572_v12 = vor.u32 %v13108_v51, %v10571_v53  ;;  %v13564_v10 = vld [vmem:[#allocation8 + $0xeac] sm:$0xf]  ;;  %v11920_v41 = vor.u32 %v13436_v52, %v11917_v44  ;;  %v13221_v48 = vld [vmem:[#allocation8 + $0x3ec] sm:$0xf0] }
 0x44d   : > { %v13236_v3 = vld [vmem:[#allocation8 + $0x464] sm:$0xf0]  ;;  %v12429_v21 = vld [vmem:[#allocation8 + $0xee8] sm:$0xf0] }
 0x44e   : > { %v11595_v0 = vld [vmem:[#allocation8 + $0x828] sm:$0xf]  ;;  %v11084_v13 = vor.u32 %v13236_v3, %v11083_v59  ;;  %7922 = vmatpush.bf16.msra.mxu2 %v11660_v61  ;;  %7897 = vmatpush.bf16.msra.mxu0 %v10572_v12  ;;  %v13164_v49 = vld [vmem:[#allocation8 + $0x22c] sm:$0xf]  ;;  %v12432_v53 = vor.u32 %v13564_v10, %v12429_v21 }
 0x44f   : > { %v13364_v4 = vld [vmem:[#allocation8 + $0x864] sm:$0xf0]  ;;  %v10829_v34 = vld [vmem:[#allocation8 + $0x268] sm:$0xf0] }
 0x450   : > { %v12107_v5 = vld [vmem:[#allocation8 + $0xc28] sm:$0xf]  ;;  %7935 = vmatpush.bf16.msra.mxu3 %v12172_v62  ;;  %v11596_v20 = vor.u32 %v13364_v4, %v11595_v0  ;;  %7910 = vmatpush.bf16.msra.mxu1 %v11084_v13  ;;  %v13292_v56 = vld [vmem:[#allocation8 + $0x62c] sm:$0xf]  ;;  %v10832_v62 = vor.u32 %v13164_v49, %v10829_v34 }
 0x451   : > { %v13492_v33 = vld [vmem:[#allocation8 + $0xc64] sm:$0xf0]  ;;  %7898 = vmatmul.bf16.vlgmr.msra.gmra.mxu0 %v14005_v43  ;;  %v11341_v2 = vld [vmem:[#allocation8 + $0x668] sm:$0xf0] }
 0x452   : > { %v12108_v23 = vor.u32 %v13492_v33, %v12107_v5  ;;  %7923 = vmatpush.bf16.msra.mxu2 %v11596_v20  ;;  %7942 = vmatpush.bf16.msrb.mxu0 %v11024_v16  ;;  %v13420_v51 = vld [vmem:[#allocation8 + $0xa2c] sm:$0xf]  ;;  %v11344_v0 = vor.u32 %v13292_v56, %v11341_v2 }
 0x453   : > { %7911 = vmatmul.bf16.vlgmr.msra.gmra.mxu1 %v14007_v30  ;;  %v11853_v59 = vld [vmem:[#allocation8 + $0xa68] sm:$0xf0] }
 0x454   : > { %7936 = vmatpush.bf16.msra.mxu3 %v12108_v23  ;;  %7955 = vmatpush.bf16.msrb.mxu1 %v11536_v57  ;;  %v13548_v3 = vld [vmem:[#allocation8 + $0xe2c] sm:$0xf]  ;;  %v11856_v33 = vor.u32 %v13420_v51, %v11853_v59  ;;  %v7730_v28 = vpop.f32.mrf.mxu3 }
 0x455   : > { %7924 = vmatmul.bf16.vlgmr.msra.gmra.mxu2 %v14009_v22  ;;  %v12365_v61 = vld [vmem:[#allocation8 + $0xe68] sm:$0xf0] }
 0x456   : > { %7968 = vmatpush.bf16.msrb.mxu2 %v12048_v26  ;;  %7943 = vmatpush.bf16.msrb.mxu0 %v10960_v14  ;;  %v13148_v4 = vld [vmem:[#allocation8 + $0x1ac] sm:$0xf]  ;;  %v12368_v8 = vor.u32 %v13548_v3, %v12365_v61 }
 0x457   : > { %7937 = vmatmul.bf16.vlgmr.msra.gmra.mxu3 %v14011_v46  ;;  %v10765_v5 = vld [vmem:[#allocation8 + $0x1e8] sm:$0xf0] }
 0x458   : > { %7981 = vmatpush.bf16.msrb.mxu3 %v12560_v27  ;;  %7956 = vmatpush.bf16.msrb.mxu1 %v11472_v6  ;;  %v13276_v60 = vld [vmem:[#allocation8 + $0x5ac] sm:$0xf]  ;;  %v10768_v18 = vor.u32 %v13148_v4, %v10765_v5  ;;  %v7717_v27 = vpop.f32.mrf.mxu2 }
 0x459   : > { %v11277_v63 = vld [vmem:[#allocation8 + $0x5e8] sm:$0xf0]  ;;  %v7718_v17 = vadd.f32 %v7717_v27, %v7705_v11  ;;  %v13477_v11 = vld [vmem:[#allocation8 + $0xbec] sm:$0xf0] }
 0x45a   : > { %7969 = vmatpush.bf16.msrb.mxu2 %v11984_v38  ;;  %7944 = vmatpush.bf16.msrb.mxu0 %v10896_v45  ;;  %v13404_v9 = vld [vmem:[#allocation8 + $0x9ac] sm:$0xf]  ;;  %v11280_v19 = vor.u32 %v13276_v60, %v11277_v63  ;;  %v7693_v38 = vpop.f32.mrf.mxu0  ;;  %v12051_v60 = vld [vmem:[#allocation8 + $0xbb0] sm:$0xf] }
 0x45b   : > { %v11789_v12 = vld [vmem:[#allocation8 + $0x9e8] sm:$0xf0]  ;;  %v14077_v37 = vadd.f32 %v7730_v28, %v7718_v17  ;;  %v11987_v27 = vld [vmem:[#allocation8 + $0xb30] sm:$0xf] }
 0x45c   : > { %7982 = vmatpush.bf16.msrb.mxu3 %v12496_v39  ;;  %7957 = vmatpush.bf16.msrb.mxu1 %v11408_v47  ;;  %v13532_v13 = vld [vmem:[#allocation8 + $0xdac] sm:$0xf]  ;;  %v11792_v16 = vor.u32 %v13404_v9, %v11789_v12  ;;  %v7706_v39 = vpop.f32.mrf.mxu1  ;;  %v7732_v4 = vpop.f32.mrf.mxu3  ;;  %v12563_v12 = vld [vmem:[#allocation8 + $0xfb0] sm:$0xf] }
 0x45d   : > { %v13132_v20 = vld [vmem:[#allocation8 + $0x12c] sm:$0xf]  ;;  %v12304_v57 = vor.u32 %v13532_v13, %v12301_v58  ;;  %v13605_v13 = vld [vmem:[#allocation8 + $0xfec] sm:$0xf0] }
 0x45e   : > { %7970 = vmatpush.bf16.msrb.mxu2 %v11920_v41  ;;  %7945 = vmatpush.bf16.msrb.mxu0 %v10832_v62  ;;  %v10701_v23 = vld [vmem:[#allocation8 + $0x168] sm:$0xf0]  ;;  %v13461_v28 = vld [vmem:[#allocation8 + $0xb6c] sm:$0xf0] }
 0x45f   : > { %v13260_v24 = vld [vmem:[#allocation8 + $0x52c] sm:$0xf]  ;;  %v10704_v35 = vor.u32 %v13132_v20, %v10701_v23  ;;  %v10963_v23 = vld [vmem:[#allocation8 + $0x330] sm:$0xf] }
 0x460   : > { %7983 = vmatpush.bf16.msrb.mxu3 %v12432_v53  ;;  %7958 = vmatpush.bf16.msrb.mxu1 %v11344_v0  ;;  %v11213_v25 = vld [vmem:[#allocation8 + $0x568] sm:$0xf0]  ;;  %v7719_v0 = vpop.f32.mrf.mxu2  ;;  %v11411_v38 = vld [vmem:[#allocation8 + $0x6b0] sm:$0xf] }
 0x461   : > { %v13388_v26 = vld [vmem:[#allocation8 + $0x92c] sm:$0xf]  ;;  %v11216_v14 = vor.u32 %v13260_v24, %v11213_v25  ;;  %v12564_v24 = vor.u32 %v13605_v13, %v12563_v12  ;;  %v11475_v25 = vld [vmem:[#allocation8 + $0x730] sm:$0xf] }
 0x462   : > { %7971 = vmatpush.bf16.msrb.mxu2 %v11856_v33  ;;  %v11725_v31 = vld [vmem:[#allocation8 + $0x968] sm:$0xf0]  ;;  %7946 = vmatpush.bf16.msrb.mxu0 %v10768_v18  ;;  %v11539_v33 = vld [vmem:[#allocation8 + $0x7b0] sm:$0xf] }
 0x463   : > { %v13516_v29 = vld [vmem:[#allocation8 + $0xd2c] sm:$0xf]  ;;  %v11728_v40 = vor.u32 %v13388_v26, %v11725_v31  ;;  %v13333_v26 = vld [vmem:[#allocation8 + $0x76c] sm:$0xf0] }
 0x464   : > { %7984 = vmatpush.bf16.msrb.mxu3 %v12368_v8  ;;  %v12237_v32 = vld [vmem:[#allocation8 + $0xd68] sm:$0xf0]  ;;  %7959 = vmatpush.bf16.msrb.mxu1 %v11280_v19  ;;  %v13349_v8 = vld [vmem:[#allocation8 + $0x7ec] sm:$0xf0]  ;;  %v11028_v19 = vor.u32 %v13221_v48, %v11027_v7  ;;  %v11476_v17 = vor.u32 %v13333_v26, %v11475_v25 }
 0x465   : > { %v13116_v6 = vld [vmem:[#allocation8 + $0xac] sm:$0xf]  ;;  %v12240_v42 = vor.u32 %v13516_v29, %v12237_v32  ;;  %v11540_v20 = vor.u32 %v13349_v8, %v11539_v33  ;;  %v12499_v31 = vld [vmem:[#allocation8 + $0xf30] sm:$0xf] }
 0x466   : > { %v10637_v36 = vld [vmem:[#allocation8 + $0xe8] sm:$0xf0]  ;;  %7972 = vmatpush.bf16.msrb.mxu2 %v11792_v16  ;;  %7947 = vmatpush.bf16.msrb.mxu0 %v10704_v35  ;;  %v13205_v16 = vld [vmem:[#allocation8 + $0x36c] sm:$0xf0] }
 0x467   : > { %v13244_v52 = vld [vmem:[#allocation8 + $0x4ac] sm:$0xf]  ;;  %v10640_v34 = vor.u32 %v13116_v6, %v10637_v36  ;;  %v13589_v29 = vld [vmem:[#allocation8 + $0xf6c] sm:$0xf0]  ;;  %v10964_v32 = vor.u32 %v13205_v16, %v10963_v23  ;;  %v11988_v6 = vor.u32 %v13461_v28, %v11987_v27 }
 0x468   : > { %7985 = vmatpush.bf16.msrb.mxu3 %v12304_v57  ;;  %v11149_v44 = vld [vmem:[#allocation8 + $0x4e8] sm:$0xf0]  ;;  %7960 = vmatpush.bf16.msrb.mxu1 %v11216_v14  ;;  %v12052_v57 = vor.u32 %v13477_v11, %v12051_v60  ;;  %v10899_v35 = vld [vmem:[#allocation8 + $0x2b0] sm:$0xf]  ;;  %v12500_v36 = vor.u32 %v13589_v29, %v12499_v31 }
 0x469   : > { %v13372_v10 = vld [vmem:[#allocation8 + $0x8ac] sm:$0xf]  ;;  %v11152_v41 = vor.u32 %v13244_v52, %v11149_v44  ;;  %v13189_v14 = vld [vmem:[#allocation8 + $0x2ec] sm:$0xf0] }
 0x46a   : > { %v11661_v21 = vld [vmem:[#allocation8 + $0x8e8] sm:$0xf0]  ;;  %7973 = vmatpush.bf16.msrb.mxu2 %v11728_v40  ;;  %7948 = vmatpush.bf16.msrb.mxu0 %v10640_v34  ;;  %v13317_v39 = vld [vmem:[#allocation8 + $0x6ec] sm:$0xf0] }
 0x46b   : > { %v13500_v45 = vld [vmem:[#allocation8 + $0xcac] sm:$0xf]  ;;  %v11664_v51 = vor.u32 %v13372_v10, %v11661_v21  ;;  %v11923_v40 = vld [vmem:[#allocation8 + $0xab0] sm:$0xf]  ;;  %v10900_v10 = vor.u32 %v13189_v14, %v10899_v35  ;;  %v11412_v21 = vor.u32 %v13317_v39, %v11411_v38 }
 0x46c   : > { %v12173_v47 = vld [vmem:[#allocation8 + $0xce8] sm:$0xf0]  ;;  %7986 = vmatpush.bf16.msrb.mxu3 %v12240_v42  ;;  %7961 = vmatpush.bf16.msrb.mxu1 %v11152_v41  ;;  %v13445_v42 = vld [vmem:[#allocation8 + $0xaec] sm:$0xf0] }
 0x46d   : > { %v13100_v49 = vld [vmem:[#allocation8 + $0x2c] sm:$0xf]  ;;  %v12176_v59 = vor.u32 %v13500_v45, %v12173_v47  ;;  %v12435_v52 = vld [vmem:[#allocation8 + $0xeb0] sm:$0xf]  ;;  %v7756_v0 = vpop.f32.mrf.mxu1 }
 0x46e   : > { %v10573_v53 = vld [vmem:[#allocation8 + $0x68] sm:$0xf0]  ;;  %7974 = vmatpush.bf16.msrb.mxu2 %v11664_v51  ;;  %v13573_v44 = vld [vmem:[#allocation8 + $0xeec] sm:$0xf0] }
 0x46f   : > { %v13228_v56 = vld [vmem:[#allocation8 + $0x42c] sm:$0xf]  ;;  %v10576_v63 = vor.u32 %v13100_v49, %v10573_v53  ;;  %v10835_v45 = vld [vmem:[#allocation8 + $0x230] sm:$0xf]  ;;  %v11924_v49 = vor.u32 %v13445_v42, %v11923_v40  ;;  %v12436_v34 = vor.u32 %v13573_v44, %v12435_v52 }
 0x470   : > { %v11085_v2 = vld [vmem:[#allocation8 + $0x468] sm:$0xf0]  ;;  %7987 = vmatpush.bf16.msrb.mxu3 %v12176_v59  ;;  %v13173_v47 = vld [vmem:[#allocation8 + $0x26c] sm:$0xf0] }
 0x471   : > { %v13356_v3 = vld [vmem:[#allocation8 + $0x82c] sm:$0xf]  ;;  %v11088_v9 = vor.u32 %v13228_v56, %v11085_v2  ;;  %7949 = vmatpush.bf16.msrb.mxu0 %v10576_v63  ;;  %v11347_v41 = vld [vmem:[#allocation8 + $0x630] sm:$0xf] }
 0x472   : > { %v11597_v61 = vld [vmem:[#allocation8 + $0x868] sm:$0xf0]  ;;  %v13301_v53 = vld [vmem:[#allocation8 + $0x66c] sm:$0xf0] }
 0x473   : > { %v13484_v62 = vld [vmem:[#allocation8 + $0xc2c] sm:$0xf]  ;;  %v11600_v58 = vor.u32 %v13356_v3, %v11597_v61  ;;  %7962 = vmatpush.bf16.msrb.mxu1 %v11088_v9  ;;  %v11859_v56 = vld [vmem:[#allocation8 + $0xa30] sm:$0xf]  ;;  %v10836_v3 = vor.u32 %v13173_v47, %v10835_v45  ;;  %v11348_v61 = vor.u32 %v13301_v53, %v11347_v41 }
 0x474   : > { %v12109_v5 = vld [vmem:[#allocation8 + $0xc68] sm:$0xf0]  ;;  %7950 = vmatmul.bf16.vlgmr.msrb.gmra.mxu0 %v14005_v43  ;;  %v13429_v2 = vld [vmem:[#allocation8 + $0xa6c] sm:$0xf0] }
 0x475   : > { %v12112_v18 = vor.u32 %v13484_v62, %v12109_v5  ;;  %7975 = vmatpush.bf16.msrb.mxu2 %v11600_v58  ;;  %7994 = vmatpush.bf16.msra.mxu0 %v11028_v19  ;;  %v12371_v51 = vld [vmem:[#allocation8 + $0xe30] sm:$0xf]  ;;  %v7743_v62 = vpop.f32.mrf.mxu0  ;;  %v11860_v7 = vor.u32 %v13429_v2, %v11859_v56  ;;  %v7769_v16 = vpop.f32.mrf.mxu2 }
 0x476   : > { %7963 = vmatmul.bf16.vlgmr.msrb.gmra.mxu1 %v14007_v30  ;;  %v13557_v59 = vld [vmem:[#allocation8 + $0xe6c] sm:$0xf0]  ;;  %v7757_v33 = vadd.f32 %v7756_v0, %v7743_v62  ;;  %v7758_v39 = vpop.f32.mrf.mxu1 }
 0x477   : > { %7988 = vmatpush.bf16.msrb.mxu3 %v12112_v18  ;;  %8007 = vmatpush.bf16.msra.mxu1 %v11540_v20  ;;  %v10771_v4 = vld [vmem:[#allocation8 + $0x1b0] sm:$0xf]  ;;  %v12372_v48 = vor.u32 %v13557_v59, %v12371_v51  ;;  %v13309_v39 = vld [vmem:[#allocation8 + $0x6b4] sm:$0xf] }
 0x478   : > { %7976 = vmatmul.bf16.vlgmr.msrb.gmra.mxu2 %v14009_v22  ;;  %v13157_v5 = vld [vmem:[#allocation8 + $0x1ec] sm:$0xf0]  ;;  %v7770_v27 = vadd.f32 %v7769_v16, %v7757_v33  ;;  %v13213_v33 = vld [vmem:[#allocation8 + $0x3b4] sm:$0xf] }
 0x479   : > { %8020 = vmatpush.bf16.msra.mxu2 %v12052_v57  ;;  %7995 = vmatpush.bf16.msra.mxu0 %v10964_v32  ;;  %v11283_v8 = vld [vmem:[#allocation8 + $0x5b0] sm:$0xf]  ;;  %v10772_v13 = vor.u32 %v13157_v5, %v10771_v4  ;;  %v7782_v57 = vpop.f32.mrf.mxu3  ;;  %v13197_v16 = vld [vmem:[#allocation8 + $0x334] sm:$0xf] }
 0x47a   : > { %7989 = vmatmul.bf16.vlgmr.msrb.gmra.mxu3 %v14011_v46  ;;  %v13285_v60 = vld [vmem:[#allocation8 + $0x5ec] sm:$0xf0]  ;;  %v7783_v32 = vadd.f32 %v7782_v57, %v7770_v27  ;;  %v10965_v57 = vld [vmem:[#allocation8 + $0x370] sm:$0xf0] }
 0x47b   : > { %8033 = vmatpush.bf16.msra.mxu3 %v12564_v24  ;;  %8008 = vmatpush.bf16.msra.mxu1 %v11476_v17  ;;  %v11795_v63 = vld [vmem:[#allocation8 + $0x9b0] sm:$0xf]  ;;  %v11284_v58 = vor.u32 %v13285_v60, %v11283_v8  ;;  %v11029_v8 = vld [vmem:[#allocation8 + $0x3f0] sm:$0xf0] }
 0x47c   : > { %v13413_v9 = vld [vmem:[#allocation8 + $0x9ec] sm:$0xf0]  ;;  %v8223_v45 = vrot.slane %v7783_v32, 2  ;;  %v13341_v60 = vld [vmem:[#allocation8 + $0x7b4] sm:$0xf] }
 0x47d   : > { %8021 = vmatpush.bf16.msra.mxu2 %v11988_v6  ;;  %7996 = vmatpush.bf16.msra.mxu0 %v10900_v10  ;;  %v12307_v11 = vld [vmem:[#allocation8 + $0xdb0] sm:$0xf]  ;;  %v11796_v20 = vor.u32 %v13413_v9, %v11795_v63  ;;  %v7745_v38 = vpop.f32.mrf.mxu0  ;;  %v7771_v5 = vpop.f32.mrf.mxu2  ;;  %v11541_v63 = vld [vmem:[#allocation8 + $0x7f0] sm:$0xf0] }
 0x47e   : > { %v13541_v12 = vld [vmem:[#allocation8 + $0xdec] sm:$0xf0]  ;;  %v13469_v9 = vld [vmem:[#allocation8 + $0xbb4] sm:$0xf] }
 0x47f   : > { %8034 = vmatpush.bf16.msra.mxu3 %v12500_v36  ;;  %8009 = vmatpush.bf16.msra.mxu1 %v11412_v21  ;;  %v10707_v18 = vld [vmem:[#allocation8 + $0x130] sm:$0xf]  ;;  %v12308_v23 = vor.u32 %v13541_v12, %v12307_v11  ;;  %v8222_v21 = vrot.slane %v14077_v37, 4  ;;  %v12053_v12 = vld [vmem:[#allocation8 + $0xbf0] sm:$0xf0] }
 0x480   : > { %v13141_v19 = vld [vmem:[#allocation8 + $0x16c] sm:$0xf0]  ;;  %v11477_v27 = vld [vmem:[#allocation8 + $0x770] sm:$0xf0] }
 0x481   : > { %8022 = vmatpush.bf16.msra.mxu2 %v11924_v49  ;;  %7997 = vmatpush.bf16.msra.mxu0 %v10836_v3  ;;  %v11219_v24 = vld [vmem:[#allocation8 + $0x530] sm:$0xf]  ;;  %v10708_v17 = vor.u32 %v13141_v19, %v10707_v18  ;;  %v8234_v41 = vsel %vm4079_vm1, %v8222_v21, %v8223_v45  ;;  %v12501_v32 = vld [vmem:[#allocation8 + $0xf70] sm:$0xf0] }
 0x482   : > { %v13269_v25 = vld [vmem:[#allocation8 + $0x56c] sm:$0xf0]  ;;  %v14087_v3 = vsel %vm4081_vm2, %v14071_v54, %v8234_v41 }
 0x483   : > { %8035 = vmatpush.bf16.msra.mxu3 %v12436_v34  ;;  %8010 = vmatpush.bf16.msra.mxu1 %v11348_v61  ;;  %v11731_v26 = vld [vmem:[#allocation8 + $0x930] sm:$0xf]  ;;  %v11220_v35 = vor.u32 %v13269_v25, %v11219_v24  ;;  %v12056_v24 = vor.u32 %v13469_v9, %v12053_v12  ;;  %v12309_v12 = vld [vmem:[#allocation8 + $0xdf0] sm:$0xf0] }
 0x484   : > { %v13397_v28 = vld [vmem:[#allocation8 + $0x96c] sm:$0xf0] }
 0x485   : > { %8023 = vmatpush.bf16.msra.mxu2 %v11860_v7  ;;  %v12243_v31 = vld [vmem:[#allocation8 + $0xd30] sm:$0xf]  ;;  %7998 = vmatpush.bf16.msra.mxu0 %v10772_v13  ;;  %v11732_v40 = vor.u32 %v13397_v28, %v11731_v26  ;;  %v7784_v7 = vpop.f32.mrf.mxu3  ;;  %v13597_v13 = vld [vmem:[#allocation8 + $0xfb4] sm:$0xf] }
 0x486   : > { %v13525_v29 = vld [vmem:[#allocation8 + $0xd6c] sm:$0xf0]  ;;  %v13325_v26 = vld [vmem:[#allocation8 + $0x734] sm:$0xf] }
 0x487   : > { %8036 = vmatpush.bf16.msra.mxu3 %v12372_v48  ;;  %8011 = vmatpush.bf16.msra.mxu1 %v11284_v58  ;;  %v10643_v14 = vld [vmem:[#allocation8 + $0xb0] sm:$0xf]  ;;  %v12244_v42 = vor.u32 %v13525_v29, %v12243_v31  ;;  %v12565_v58 = vld [vmem:[#allocation8 + $0xff0] sm:$0xf0] }
 0x488   : > { %v13125_v6 = vld [vmem:[#allocation8 + $0xec] sm:$0xf0]  ;;  %v12568_v25 = vor.u32 %v13597_v13, %v12565_v58  ;;  %v13453_v28 = vld [vmem:[#allocation8 + $0xb34] sm:$0xf] }
 0x489   : > { %v11155_v36 = vld [vmem:[#allocation8 + $0x4b0] sm:$0xf]  ;;  %8024 = vmatpush.bf16.msra.mxu2 %v11796_v20  ;;  %7999 = vmatpush.bf16.msra.mxu0 %v10708_v17  ;;  %v10644_v53 = vor.u32 %v13125_v6, %v10643_v14  ;;  %v11032_v20 = vor.u32 %v13213_v33, %v11029_v8  ;;  %v11989_v31 = vld [vmem:[#allocation8 + $0xb70] sm:$0xf0]  ;;  %v10968_v17 = vor.u32 %v13197_v16, %v10965_v57 }
 0x48a   : > { %v13253_v52 = vld [vmem:[#allocation8 + $0x4ec] sm:$0xf0]  ;;  %v13581_v29 = vld [vmem:[#allocation8 + $0xf34] sm:$0xf] }
 0x48b   : > { %8037 = vmatpush.bf16.msra.mxu3 %v12308_v23  ;;  %v11667_v44 = vld [vmem:[#allocation8 + $0x8b0] sm:$0xf]  ;;  %8012 = vmatpush.bf16.msra.mxu1 %v11220_v35  ;;  %v11156_v56 = vor.u32 %v13253_v52, %v11155_v36  ;;  %v11544_v23 = vor.u32 %v13341_v60, %v11541_v63  ;;  %v11480_v35 = vor.u32 %v13325_v26, %v11477_v27  ;;  %v13181_v14 = vld [vmem:[#allocation8 + $0x2b4] sm:$0xf]  ;;  %v7795_v5 = vpop.f32.mrf.mxu0 }
 0x48c   : > { %v13381_v10 = vld [vmem:[#allocation8 + $0x8ec] sm:$0xf0]  ;;  %v10901_v6 = vld [vmem:[#allocation8 + $0x2f0] sm:$0xf0]  ;;  %v11992_v36 = vor.u32 %v13453_v28, %v11989_v31  ;;  %v12504_v38 = vor.u32 %v13581_v29, %v12501_v32 }
 0x48d   : > { %v12179_v47 = vld [vmem:[#allocation8 + $0xcb0] sm:$0xf]  ;;  %8025 = vmatpush.bf16.msra.mxu2 %v11732_v40  ;;  %v11668_v37 = vor.u32 %v13381_v10, %v11667_v44  ;;  %8000 = vmatpush.bf16.msra.mxu0 %v10644_v53  ;;  %v11413_v40 = vld [vmem:[#allocation8 + $0x6f0] sm:$0xf0]  ;;  %v10904_v21 = vor.u32 %v13181_v14, %v10901_v6  ;;  %v7808_v7 = vpop.f32.mrf.mxu1 }
 0x48e   : > { %v13509_v49 = vld [vmem:[#allocation8 + $0xcec] sm:$0xf0]  ;;  %v11925_v52 = vld [vmem:[#allocation8 + $0xaf0] sm:$0xf0]  ;;  %v11416_v45 = vor.u32 %v13309_v39, %v11413_v40  ;;  %v7809_v9 = vadd.f32 %v7808_v7, %v7795_v5  ;;  %v11035_v5 = vld [vmem:[#allocation8 + $0x3b8] sm:$0xf] }
 0x48f   : > { %v10579_v34 = vld [vmem:[#allocation8 + $0x30] sm:$0xf]  ;;  %8038 = vmatpush.bf16.msra.mxu3 %v12244_v42  ;;  %v12180_v61 = vor.u32 %v13509_v49, %v12179_v47  ;;  %8013 = vmatpush.bf16.msra.mxu1 %v11156_v56  ;;  %v13437_v42 = vld [vmem:[#allocation8 + $0xab4] sm:$0xf]  ;;  %v13222_v7 = vld [vmem:[#allocation8 + $0x3f4] sm:$0xf0] }
 0x490   : > { %v13109_v2 = vld [vmem:[#allocation8 + $0x6c] sm:$0xf0]  ;;  %v13565_v44 = vld [vmem:[#allocation8 + $0xeb4] sm:$0xf] }
 0x491   : > { %v11091_v51 = vld [vmem:[#allocation8 + $0x430] sm:$0xf]  ;;  %v10580_v11 = vor.u32 %v13109_v2, %v10579_v34  ;;  %8026 = vmatpush.bf16.msra.mxu2 %v11668_v37  ;;  %v12437_v10 = vld [vmem:[#allocation8 + $0xef0] sm:$0xf0]  ;;  %v11928_v34 = vor.u32 %v13437_v42, %v11925_v52 }
 0x492   : > { %v13237_v59 = vld [vmem:[#allocation8 + $0x46c] sm:$0xf0]  ;;  %v13165_v47 = vld [vmem:[#allocation8 + $0x234] sm:$0xf]  ;;  %v12440_v41 = vor.u32 %v13565_v44, %v12437_v10 }
 0x493   : > { %v11603_v62 = vld [vmem:[#allocation8 + $0x830] sm:$0xf]  ;;  %v11092_v54 = vor.u32 %v13237_v59, %v11091_v51  ;;  %8039 = vmatpush.bf16.msra.mxu3 %v12180_v61  ;;  %8001 = vmatpush.bf16.msra.mxu0 %v10580_v11  ;;  %v10837_v49 = vld [vmem:[#allocation8 + $0x270] sm:$0xf0] }
 0x494   : > { %v13365_v0 = vld [vmem:[#allocation8 + $0x86c] sm:$0xf0]  ;;  %v13293_v53 = vld [vmem:[#allocation8 + $0x634] sm:$0xf]  ;;  %v10840_v61 = vor.u32 %v13165_v47, %v10837_v49 }
 0x495   : > { %v12115_v4 = vld [vmem:[#allocation8 + $0xc30] sm:$0xf]  ;;  %v11604_v18 = vor.u32 %v13365_v0, %v11603_v62  ;;  %8014 = vmatpush.bf16.msra.mxu1 %v11092_v54  ;;  %v11349_v56 = vld [vmem:[#allocation8 + $0x670] sm:$0xf0] }
 0x496   : > { %v13493_v48 = vld [vmem:[#allocation8 + $0xc6c] sm:$0xf0]  ;;  %8002 = vmatmul.bf16.vlgmr.msra.gmra.mxu0 %v14005_v43  ;;  %v13421_v2 = vld [vmem:[#allocation8 + $0xa34] sm:$0xf]  ;;  %v11352_v62 = vor.u32 %v13293_v53, %v11349_v56 }
 0x497   : > { %v12116_v19 = vor.u32 %v13493_v48, %v12115_v4  ;;  %8027 = vmatpush.bf16.msra.mxu2 %v11604_v18  ;;  %8046 = vmatpush.bf16.msrb.mxu0 %v11032_v20  ;;  %v11861_v51 = vld [vmem:[#allocation8 + $0xa70] sm:$0xf0]  ;;  %v7834_v26 = vpop.f32.mrf.mxu3 }
 0x498   : > { %8015 = vmatmul.bf16.vlgmr.msra.gmra.mxu1 %v14007_v30  ;;  %v13549_v59 = vld [vmem:[#allocation8 + $0xe34] sm:$0xf]  ;;  %v11864_v48 = vor.u32 %v13421_v2, %v11861_v51 }
 0x499   : > { %8040 = vmatpush.bf16.msra.mxu3 %v12116_v19  ;;  %8059 = vmatpush.bf16.msrb.mxu1 %v11544_v23  ;;  %v12373_v37 = vld [vmem:[#allocation8 + $0xe70] sm:$0xf0] }
 0x49a   : > { %8028 = vmatmul.bf16.vlgmr.msra.gmra.mxu2 %v14009_v22  ;;  %v13149_v0 = vld [vmem:[#allocation8 + $0x1b4] sm:$0xf]  ;;  %v12376_v33 = vor.u32 %v13549_v59, %v12373_v37 }
 0x49b   : > { %8072 = vmatpush.bf16.msrb.mxu2 %v12056_v24  ;;  %8047 = vmatpush.bf16.msrb.mxu0 %v10968_v17  ;;  %v10773_v4 = vld [vmem:[#allocation8 + $0x1f0] sm:$0xf0] }
 0x49c   : > { %8041 = vmatmul.bf16.vlgmr.msra.gmra.mxu3 %v14011_v46  ;;  %v13277_v8 = vld [vmem:[#allocation8 + $0x5b4] sm:$0xf]  ;;  %v10776_v13 = vor.u32 %v13149_v0, %v10773_v4 }
 0x49d   : > { %8085 = vmatpush.bf16.msrb.mxu3 %v12568_v25  ;;  %8060 = vmatpush.bf16.msrb.mxu1 %v11480_v35  ;;  %v11285_v60 = vld [vmem:[#allocation8 + $0x5f0] sm:$0xf0]  ;;  %v7821_v25 = vpop.f32.mrf.mxu2 }
 0x49e   : > { %v13405_v63 = vld [vmem:[#allocation8 + $0x9b4] sm:$0xf]  ;;  %v11288_v58 = vor.u32 %v13277_v8, %v11285_v60  ;;  %v7822_v29 = vadd.f32 %v7821_v25, %v7809_v9  ;;  %v12059_v8 = vld [vmem:[#allocation8 + $0xbb8] sm:$0xf] }
 0x49f   : > { %8073 = vmatpush.bf16.msrb.mxu2 %v11992_v36  ;;  %8048 = vmatpush.bf16.msrb.mxu0 %v10904_v21  ;;  %v11797_v11 = vld [vmem:[#allocation8 + $0x9f0] sm:$0xf0]  ;;  %v7797_v36 = vpop.f32.mrf.mxu0  ;;  %v7836_v0 = vpop.f32.mrf.mxu3  ;;  %v13478_v9 = vld [vmem:[#allocation8 + $0xbf4] sm:$0xf0] }
 0x4a0   : > { %v13533_v54 = vld [vmem:[#allocation8 + $0xdb4] sm:$0xf]  ;;  %v11800_v20 = vor.u32 %v13405_v63, %v11797_v11  ;;  %v14093_v6 = vadd.f32 %v7834_v26, %v7822_v29  ;;  %v12571_v11 = vld [vmem:[#allocation8 + $0xfb8] sm:$0xf] }
 0x4a1   : > { %8086 = vmatpush.bf16.msrb.mxu3 %v12504_v38  ;;  %8061 = vmatpush.bf16.msrb.mxu1 %v11416_v45  ;;  %v13133_v18 = vld [vmem:[#allocation8 + $0x134] sm:$0xf]  ;;  %v12312_v23 = vor.u32 %v13533_v54, %v12309_v12  ;;  %v7810_v38 = vpop.f32.mrf.mxu1  ;;  %v13606_v54 = vld [vmem:[#allocation8 + $0xff4] sm:$0xf0] }
 0x4a2   : > { %v10709_v19 = vld [vmem:[#allocation8 + $0x170] sm:$0xf0]  ;;  %v11995_v25 = vld [vmem:[#allocation8 + $0xb38] sm:$0xf] }
 0x4a3   : > { %8074 = vmatpush.bf16.msrb.mxu2 %v11928_v34  ;;  %8049 = vmatpush.bf16.msrb.mxu0 %v10840_v61  ;;  %v13261_v16 = vld [vmem:[#allocation8 + $0x534] sm:$0xf]  ;;  %v10712_v32 = vor.u32 %v13133_v18, %v10709_v19  ;;  %v10971_v19 = vld [vmem:[#allocation8 + $0x338] sm:$0xf] }
 0x4a4   : > { %v11221_v57 = vld [vmem:[#allocation8 + $0x570] sm:$0xf0]  ;;  %v13462_v26 = vld [vmem:[#allocation8 + $0xb74] sm:$0xf0] }
 0x4a5   : > { %8087 = vmatpush.bf16.msrb.mxu3 %v12440_v41  ;;  %8062 = vmatpush.bf16.msrb.mxu1 %v11352_v62  ;;  %v13389_v24 = vld [vmem:[#allocation8 + $0x934] sm:$0xf]  ;;  %v11224_v17 = vor.u32 %v13261_v16, %v11221_v57  ;;  %v7823_v62 = vpop.f32.mrf.mxu2  ;;  %v12572_v16 = vor.u32 %v13606_v54, %v12571_v11  ;;  %v11483_v57 = vld [vmem:[#allocation8 + $0x738] sm:$0xf] }
 0x4a6   : > { %v11733_v27 = vld [vmem:[#allocation8 + $0x970] sm:$0xf0]  ;;  %v11419_v36 = vld [vmem:[#allocation8 + $0x6b8] sm:$0xf] }
 0x4a7   : > { %8075 = vmatpush.bf16.msrb.mxu2 %v11864_v48  ;;  %v13517_v28 = vld [vmem:[#allocation8 + $0xd34] sm:$0xf]  ;;  %8050 = vmatpush.bf16.msrb.mxu0 %v10776_v13  ;;  %v11736_v39 = vor.u32 %v13389_v24, %v11733_v27  ;;  %v11547_v48 = vld [vmem:[#allocation8 + $0x7b8] sm:$0xf] }
 0x4a8   : > { %v12245_v31 = vld [vmem:[#allocation8 + $0xd70] sm:$0xf0]  ;;  %v13334_v24 = vld [vmem:[#allocation8 + $0x774] sm:$0xf0] }
 0x4a9   : > { %8088 = vmatpush.bf16.msrb.mxu3 %v12376_v33  ;;  %8063 = vmatpush.bf16.msrb.mxu1 %v11288_v58  ;;  %v13117_v35 = vld [vmem:[#allocation8 + $0xb4] sm:$0xf]  ;;  %v12248_v40 = vor.u32 %v13517_v28, %v12245_v31  ;;  %v13350_v33 = vld [vmem:[#allocation8 + $0x7f4] sm:$0xf0]  ;;  %v11036_v58 = vor.u32 %v13222_v7, %v11035_v5  ;;  %v11484_v29 = vor.u32 %v13334_v24, %v11483_v57 }
 0x4aa   : > { %v10645_v14 = vld [vmem:[#allocation8 + $0xf0] sm:$0xf0]  ;;  %v11548_v18 = vor.u32 %v13350_v33, %v11547_v48  ;;  %v12507_v27 = vld [vmem:[#allocation8 + $0xf38] sm:$0xf] }
 0x4ab   : > { %8076 = vmatpush.bf16.msrb.mxu2 %v11800_v20  ;;  %v13245_v42 = vld [vmem:[#allocation8 + $0x4b4] sm:$0xf]  ;;  %8051 = vmatpush.bf16.msrb.mxu0 %v10712_v32  ;;  %v10648_v49 = vor.u32 %v13117_v35, %v10645_v14  ;;  %v13206_v20 = vld [vmem:[#allocation8 + $0x374] sm:$0xf0]  ;;  %v11996_v35 = vor.u32 %v13462_v26, %v11995_v25 }
 0x4ac   : > { %v11157_v52 = vld [vmem:[#allocation8 + $0x4f0] sm:$0xf0]  ;;  %v13590_v28 = vld [vmem:[#allocation8 + $0xf74] sm:$0xf0]  ;;  %v10972_v31 = vor.u32 %v13206_v20, %v10971_v19 }
 0x4ad   : > { %8089 = vmatpush.bf16.msrb.mxu3 %v12312_v23  ;;  %v13373_v44 = vld [vmem:[#allocation8 + $0x8b4] sm:$0xf]  ;;  %8064 = vmatpush.bf16.msrb.mxu1 %v11224_v17  ;;  %v11160_v34 = vor.u32 %v13245_v42, %v11157_v52  ;;  %v12060_v23 = vor.u32 %v13478_v9, %v12059_v8  ;;  %v10907_v32 = vld [vmem:[#allocation8 + $0x2b8] sm:$0xf]  ;;  %v12508_v14 = vor.u32 %v13590_v28, %v12507_v27 }
 0x4ae   : > { %v11669_v10 = vld [vmem:[#allocation8 + $0x8f0] sm:$0xf0]  ;;  %v13190_v17 = vld [vmem:[#allocation8 + $0x2f4] sm:$0xf0] }
 0x4af   : > { %v13501_v21 = vld [vmem:[#allocation8 + $0xcb4] sm:$0xf]  ;;  %8077 = vmatpush.bf16.msrb.mxu2 %v11736_v39  ;;  %v11672_v2 = vor.u32 %v13373_v44, %v11669_v10  ;;  %8052 = vmatpush.bf16.msrb.mxu0 %v10648_v49  ;;  %v13318_v38 = vld [vmem:[#allocation8 + $0x6f4] sm:$0xf0]  ;;  %v10908_v44 = vor.u32 %v13190_v17, %v10907_v32 }
 0x4b0   : > { %v12181_v45 = vld [vmem:[#allocation8 + $0xcf0] sm:$0xf0]  ;;  %v11931_v39 = vld [vmem:[#allocation8 + $0xab8] sm:$0xf]  ;;  %v11420_v10 = vor.u32 %v13318_v38, %v11419_v36  ;;  %v7860_v62 = vpop.f32.mrf.mxu1 }
 0x4b1   : > { %v13101_v47 = vld [vmem:[#allocation8 + $0x34] sm:$0xf]  ;;  %8090 = vmatpush.bf16.msrb.mxu3 %v12248_v40  ;;  %v12184_v51 = vor.u32 %v13501_v21, %v12181_v45  ;;  %8065 = vmatpush.bf16.msrb.mxu1 %v11160_v34  ;;  %v13446_v40 = vld [vmem:[#allocation8 + $0xaf4] sm:$0xf0] }
 0x4b2   : > { %v10581_v41 = vld [vmem:[#allocation8 + $0x70] sm:$0xf0]  ;;  %v12443_v42 = vld [vmem:[#allocation8 + $0xeb8] sm:$0xf] }
 0x4b3   : > { %v13229_v53 = vld [vmem:[#allocation8 + $0x434] sm:$0xf]  ;;  %v10584_v60 = vor.u32 %v13101_v47, %v10581_v41  ;;  %8078 = vmatpush.bf16.msrb.mxu2 %v11672_v2  ;;  %v13574_v52 = vld [vmem:[#allocation8 + $0xef4] sm:$0xf0]  ;;  %v11932_v47 = vor.u32 %v13446_v40, %v11931_v39 }
 0x4b4   : > { %v11093_v56 = vld [vmem:[#allocation8 + $0x470] sm:$0xf0]  ;;  %v10843_v21 = vld [vmem:[#allocation8 + $0x238] sm:$0xf]  ;;  %v12444_v49 = vor.u32 %v13574_v52, %v12443_v42 }
 0x4b5   : > { %v13357_v59 = vld [vmem:[#allocation8 + $0x834] sm:$0xf]  ;;  %v11096_v63 = vor.u32 %v13229_v53, %v11093_v56  ;;  %8091 = vmatpush.bf16.msrb.mxu3 %v12184_v51  ;;  %8053 = vmatpush.bf16.msrb.mxu0 %v10584_v60  ;;  %v13174_v45 = vld [vmem:[#allocation8 + $0x274] sm:$0xf0] }
 0x4b6   : > { %v11605_v37 = vld [vmem:[#allocation8 + $0x870] sm:$0xf0]  ;;  %v11355_v34 = vld [vmem:[#allocation8 + $0x638] sm:$0xf] }
 0x4b7   : > { %v13485_v61 = vld [vmem:[#allocation8 + $0xc34] sm:$0xf]  ;;  %v11608_v12 = vor.u32 %v13357_v59, %v11605_v37  ;;  %8066 = vmatpush.bf16.msrb.mxu1 %v11096_v63  ;;  %v13302_v41 = vld [vmem:[#allocation8 + $0x674] sm:$0xf0]  ;;  %v10844_v59 = vor.u32 %v13174_v45, %v10843_v21 }
 0x4b8   : > { %v12117_v4 = vld [vmem:[#allocation8 + $0xc70] sm:$0xf0]  ;;  %8054 = vmatmul.bf16.vlgmr.msrb.gmra.mxu0 %v14005_v43  ;;  %v11867_v53 = vld [vmem:[#allocation8 + $0xa38] sm:$0xf]  ;;  %v11356_v37 = vor.u32 %v13302_v41, %v11355_v34  ;;  %v7873_v20 = vpop.f32.mrf.mxu2  ;;  %v7862_v38 = vpop.f32.mrf.mxu1 }
 0x4b9   : > { %v12120_v13 = vor.u32 %v13485_v61, %v12117_v4  ;;  %8079 = vmatpush.bf16.msrb.mxu2 %v11608_v12  ;;  %8098 = vmatpush.bf16.msra.mxu0 %v11036_v58  ;;  %v13430_v56 = vld [vmem:[#allocation8 + $0xa74] sm:$0xf0]  ;;  %v7847_v61 = vpop.f32.mrf.mxu0  ;;  %v11421_v38 = vld [vmem:[#allocation8 + $0x6f8] sm:$0xf0] }
 0x4ba   : > { %8067 = vmatmul.bf16.vlgmr.msrb.gmra.mxu1 %v14007_v30  ;;  %v12379_v2 = vld [vmem:[#allocation8 + $0xe38] sm:$0xf]  ;;  %v11868_v5 = vor.u32 %v13430_v56, %v11867_v53  ;;  %v7861_v48 = vadd.f32 %v7860_v62, %v7847_v61 }
 0x4bb   : > { %8092 = vmatpush.bf16.msrb.mxu3 %v12120_v13  ;;  %8111 = vmatpush.bf16.msra.mxu1 %v11548_v18  ;;  %v13558_v51 = vld [vmem:[#allocation8 + $0xe74] sm:$0xf0] }
 0x4bc   : > { %8080 = vmatmul.bf16.vlgmr.msrb.gmra.mxu2 %v14009_v22  ;;  %v10779_v0 = vld [vmem:[#allocation8 + $0x1b8] sm:$0xf]  ;;  %v12380_v7 = vor.u32 %v13558_v51, %v12379_v2  ;;  %v7874_v25 = vadd.f32 %v7873_v20, %v7861_v48  ;;  %v13342_v48 = vld [vmem:[#allocation8 + $0x7bc] sm:$0xf] }
 0x4bd   : > { %8124 = vmatpush.bf16.msra.mxu2 %v12060_v23  ;;  %8099 = vmatpush.bf16.msra.mxu0 %v10972_v31  ;;  %v13158_v4 = vld [vmem:[#allocation8 + $0x1f4] sm:$0xf0]  ;;  %v7886_v23 = vpop.f32.mrf.mxu3  ;;  %v10973_v20 = vld [vmem:[#allocation8 + $0x378] sm:$0xf0] }
 0x4be   : > { %8093 = vmatmul.bf16.vlgmr.msrb.gmra.mxu3 %v14011_v46  ;;  %v11291_v33 = vld [vmem:[#allocation8 + $0x5b8] sm:$0xf]  ;;  %v10780_v54 = vor.u32 %v13158_v4, %v10779_v0  ;;  %v7887_v31 = vadd.f32 %v7886_v23, %v7874_v25  ;;  %v13454_v25 = vld [vmem:[#allocation8 + $0xb3c] sm:$0xf] }
 0x4bf   : > { %8137 = vmatpush.bf16.msra.mxu3 %v12572_v16  ;;  %8112 = vmatpush.bf16.msra.mxu1 %v11484_v29  ;;  %v13286_v8 = vld [vmem:[#allocation8 + $0x5f4] sm:$0xf0] }
 0x4c0   : > { %v11803_v60 = vld [vmem:[#allocation8 + $0x9b8] sm:$0xf]  ;;  %v11292_v12 = vor.u32 %v13286_v8, %v11291_v33  ;;  %v7875_v0 = vpop.f32.mrf.mxu2  ;;  %v11549_v33 = vld [vmem:[#allocation8 + $0x7f8] sm:$0xf0] }
 0x4c1   : > { %8125 = vmatpush.bf16.msra.mxu2 %v11996_v35  ;;  %8100 = vmatpush.bf16.msra.mxu0 %v10908_v44  ;;  %v13414_v63 = vld [vmem:[#allocation8 + $0x9f4] sm:$0xf0]  ;;  %v7849_v36 = vpop.f32.mrf.mxu0  ;;  %v13470_v8 = vld [vmem:[#allocation8 + $0xbbc] sm:$0xf] }
 0x4c2   : > { %v12315_v9 = vld [vmem:[#allocation8 + $0xdb8] sm:$0xf]  ;;  %v11804_v18 = vor.u32 %v13414_v63, %v11803_v60  ;;  %v13310_v36 = vld [vmem:[#allocation8 + $0x6bc] sm:$0xf] }
 0x4c3   : > { %8138 = vmatpush.bf16.msra.mxu3 %v12508_v14  ;;  %8113 = vmatpush.bf16.msra.mxu1 %v11420_v10  ;;  %v13542_v11 = vld [vmem:[#allocation8 + $0xdf4] sm:$0xf0]  ;;  %v8224_v10 = vrot.slane %v7887_v31, 6 }
 0x4c4   : > { %v10715_v13 = vld [vmem:[#allocation8 + $0x138] sm:$0xf]  ;;  %v12316_v19 = vor.u32 %v13542_v11, %v12315_v9  ;;  %v12061_v9 = vld [vmem:[#allocation8 + $0xbf8] sm:$0xf0] }
 0x4c5   : > { %8126 = vmatpush.bf16.msra.mxu2 %v11932_v47  ;;  %8101 = vmatpush.bf16.msra.mxu0 %v10844_v59  ;;  %v13142_v58 = vld [vmem:[#allocation8 + $0x174] sm:$0xf0]  ;;  %v7888_v4 = vpop.f32.mrf.mxu3  ;;  %v13598_v11 = vld [vmem:[#allocation8 + $0xfbc] sm:$0xf]  ;;  %v12064_v23 = vor.u32 %v13470_v8, %v12061_v9 }
 0x4c6   : > { %v11227_v16 = vld [vmem:[#allocation8 + $0x538] sm:$0xf]  ;;  %v10716_v29 = vor.u32 %v13142_v58, %v10715_v13  ;;  %v11293_v9 = vld [vmem:[#allocation8 + $0x5f8] sm:$0xf0] }
 0x4c7   : > { %8139 = vmatpush.bf16.msra.mxu3 %v12444_v49  ;;  %8114 = vmatpush.bf16.msra.mxu1 %v11356_v37  ;;  %v13270_v57 = vld [vmem:[#allocation8 + $0x574] sm:$0xf0]  ;;  %v14104_v49 = vsel %vm4077_vm0, %v14093_v6, %v8224_v10  ;;  %v11037_v6 = vld [vmem:[#allocation8 + $0x3f8] sm:$0xf0] }
 0x4c8   : > { %v11739_v24 = vld [vmem:[#allocation8 + $0x938] sm:$0xf]  ;;  %v11228_v32 = vor.u32 %v13270_v57, %v11227_v16  ;;  %v13326_v57 = vld [vmem:[#allocation8 + $0x73c] sm:$0xf] }
 0x4c9   : > { %8127 = vmatpush.bf16.msra.mxu2 %v11868_v5  ;;  %v13398_v26 = vld [vmem:[#allocation8 + $0x974] sm:$0xf0]  ;;  %8102 = vmatpush.bf16.msra.mxu0 %v10780_v54  ;;  %v12573_v54 = vld [vmem:[#allocation8 + $0xff8] sm:$0xf0] }
 0x4ca   : > { %v12251_v27 = vld [vmem:[#allocation8 + $0xd38] sm:$0xf]  ;;  %v11740_v39 = vor.u32 %v13398_v26, %v11739_v24  ;;  %v12576_v16 = vor.u32 %v13598_v11, %v12573_v54  ;;  %v11485_v24 = vld [vmem:[#allocation8 + $0x778] sm:$0xf0] }
 0x4cb   : > { %8140 = vmatpush.bf16.msra.mxu3 %v12380_v7  ;;  %v13526_v28 = vld [vmem:[#allocation8 + $0xd74] sm:$0xf0]  ;;  %8115 = vmatpush.bf16.msra.mxu1 %v11292_v12  ;;  %v13214_v7 = vld [vmem:[#allocation8 + $0x3bc] sm:$0xf] }
 0x4cc   : > { %v10651_v17 = vld [vmem:[#allocation8 + $0xb8] sm:$0xf]  ;;  %v12252_v40 = vor.u32 %v13526_v28, %v12251_v27  ;;  %v11040_v58 = vor.u32 %v13214_v7, %v11037_v6  ;;  %v11997_v26 = vld [vmem:[#allocation8 + $0xb78] sm:$0xf0] }
 0x4cd   : > { %v13126_v35 = vld [vmem:[#allocation8 + $0xf4] sm:$0xf0]  ;;  %8128 = vmatpush.bf16.msra.mxu2 %v11804_v18  ;;  %8103 = vmatpush.bf16.msra.mxu0 %v10716_v29  ;;  %v11552_v18 = vor.u32 %v13342_v48, %v11549_v33  ;;  %v13582_v27 = vld [vmem:[#allocation8 + $0xf3c] sm:$0xf]  ;;  %v11488_v29 = vor.u32 %v13326_v57, %v11485_v24 }
 0x4ce   : > { %v11163_v14 = vld [vmem:[#allocation8 + $0x4b8] sm:$0xf]  ;;  %v10652_v34 = vor.u32 %v13126_v35, %v10651_v17  ;;  %v12509_v28 = vld [vmem:[#allocation8 + $0xf78] sm:$0xf0]  ;;  %v12000_v35 = vor.u32 %v13454_v25, %v11997_v26  ;;  %v7899_v6 = vpop.f32.mrf.mxu0 }
 0x4cf   : > { %8141 = vmatpush.bf16.msra.mxu3 %v12316_v19  ;;  %v13254_v42 = vld [vmem:[#allocation8 + $0x4f4] sm:$0xf0]  ;;  %8116 = vmatpush.bf16.msra.mxu1 %v11228_v32  ;;  %v13198_v19 = vld [vmem:[#allocation8 + $0x33c] sm:$0xf] }
 0x4d0   : > { %v11675_v52 = vld [vmem:[#allocation8 + $0x8b8] sm:$0xf]  ;;  %v11164_v41 = vor.u32 %v13254_v42, %v11163_v14  ;;  %v10976_v31 = vor.u32 %v13198_v19, %v10973_v20  ;;  %v13182_v32 = vld [vmem:[#allocation8 + $0x2bc] sm:$0xf]  ;;  %v12512_v14 = vor.u32 %v13582_v27, %v12509_v28  ;;  %v7912_v48 = vpop.f32.mrf.mxu1 }
 0x4d1   : > { %v13382_v44 = vld [vmem:[#allocation8 + $0x8f4] sm:$0xf0]  ;;  %8129 = vmatpush.bf16.msra.mxu2 %v11740_v39  ;;  %8104 = vmatpush.bf16.msra.mxu0 %v10652_v34  ;;  %v10909_v17 = vld [vmem:[#allocation8 + $0x2f8] sm:$0xf0]  ;;  %v7913_v54 = vadd.f32 %v7912_v48, %v7899_v6 }
 0x4d2   : > { %v12187_v21 = vld [vmem:[#allocation8 + $0xcb8] sm:$0xf]  ;;  %v11676_v51 = vor.u32 %v13382_v44, %v11675_v52  ;;  %v13438_v39 = vld [vmem:[#allocation8 + $0xabc] sm:$0xf]  ;;  %v10912_v10 = vor.u32 %v13182_v32, %v10909_v17 }
 0x4d3   : > { %v13510_v45 = vld [vmem:[#allocation8 + $0xcf4] sm:$0xf0]  ;;  %8142 = vmatpush.bf16.msra.mxu3 %v12252_v40  ;;  %8117 = vmatpush.bf16.msra.mxu1 %v11164_v41  ;;  %v11933_v40 = vld [vmem:[#allocation8 + $0xaf8] sm:$0xf0] }
 0x4d4   : > { %v10587_v47 = vld [vmem:[#allocation8 + $0x38] sm:$0xf]  ;;  %v12188_v59 = vor.u32 %v13510_v45, %v12187_v21  ;;  %v13566_v42 = vld [vmem:[#allocation8 + $0xebc] sm:$0xf]  ;;  %v11424_v21 = vor.u32 %v13310_v36, %v11421_v38  ;;  %v11936_v41 = vor.u32 %v13438_v39, %v11933_v40 }
 0x4d5   : > { %v13110_v53 = vld [vmem:[#allocation8 + $0x74] sm:$0xf0]  ;;  %8130 = vmatpush.bf16.msra.mxu2 %v11676_v51  ;;  %v12445_v52 = vld [vmem:[#allocation8 + $0xef8] sm:$0xf0] }
 0x4d6   : > { %v11099_v56 = vld [vmem:[#allocation8 + $0x438] sm:$0xf]  ;;  %v10588_v60 = vor.u32 %v13110_v53, %v10587_v47  ;;  %v13166_v45 = vld [vmem:[#allocation8 + $0x23c] sm:$0xf]  ;;  %v12448_v53 = vor.u32 %v13566_v42, %v12445_v52  ;;  %v7901_v42 = vpop.f32.mrf.mxu0 }
 0x4d7   : > { %v13238_v2 = vld [vmem:[#allocation8 + $0x474] sm:$0xf0]  ;;  %8143 = vmatpush.bf16.msra.mxu3 %v12188_v59  ;;  %v10845_v47 = vld [vmem:[#allocation8 + $0x278] sm:$0xf0] }
 0x4d8   : > { %v11611_v37 = vld [vmem:[#allocation8 + $0x838] sm:$0xf]  ;;  %v11100_v63 = vor.u32 %v13238_v2, %v11099_v56  ;;  %8105 = vmatpush.bf16.msra.mxu0 %v10588_v60  ;;  %v13294_v56 = vld [vmem:[#allocation8 + $0x63c] sm:$0xf]  ;;  %v10848_v0 = vor.u32 %v13166_v45, %v10845_v47  ;;  %v7925_v28 = vpop.f32.mrf.mxu2  ;;  %v7914_v52 = vpop.f32.mrf.mxu1 }
 0x4d9   : > { %v13366_v61 = vld [vmem:[#allocation8 + $0x874] sm:$0xf0]  ;;  %v11357_v2 = vld [vmem:[#allocation8 + $0x678] sm:$0xf0] }
 0x4da   : > { %v12123_v62 = vld [vmem:[#allocation8 + $0xc38] sm:$0xf]  ;;  %v11612_v12 = vor.u32 %v13366_v61, %v11611_v37  ;;  %8118 = vmatpush.bf16.msra.mxu1 %v11100_v63  ;;  %v13422_v51 = vld [vmem:[#allocation8 + $0xa3c] sm:$0xf]  ;;  %v11360_v4 = vor.u32 %v13294_v56, %v11357_v2 }
 0x4db   : > { %v13494_v5 = vld [vmem:[#allocation8 + $0xc74] sm:$0xf0]  ;;  %8106 = vmatmul.bf16.vlgmr.msra.gmra.mxu0 %v14005_v43  ;;  %v11869_v59 = vld [vmem:[#allocation8 + $0xa78] sm:$0xf0] }
 0x4dc   : > { %v12124_v13 = vor.u32 %v13494_v5, %v12123_v62  ;;  %8131 = vmatpush.bf16.msra.mxu2 %v11612_v12  ;;  %8150 = vmatpush.bf16.msrb.mxu0 %v11040_v58  ;;  %v4277_v44 = vld [vmem:[%s14110_s24] sm:$0xff]  ;;  %v11872_v8 = vor.u32 %v13422_v51, %v11869_v59 }
 0x4dd   : > { %8119 = vmatmul.bf16.vlgmr.msra.gmra.mxu1 %v14007_v30  ;;  %v4280_v34 = vunpack.c.h.bf16 %v4277_v44  ;;  %v13550_v37 = vld [vmem:[#allocation8 + $0xe3c] sm:$0xf]  ;;  %v4279_v62 = vunpack.c.l.bf16 %v4277_v44 }
 0x4de   : > { %8144 = vmatpush.bf16.msra.mxu3 %v12124_v13  ;;  %8163 = vmatpush.bf16.msrb.mxu1 %v11552_v18  ;;  %v12381_v61 = vld [vmem:[#allocation8 + $0xe78] sm:$0xf0] }
 0x4df   : > { %8132 = vmatmul.bf16.vlgmr.msra.gmra.mxu2 %v14009_v22  ;;  %v13150_v5 = vld [vmem:[#allocation8 + $0x1bc] sm:$0xf]  ;;  %v8247_v33 = vadd.f32 %v14087_v3, %v4280_v34  ;;  %v12384_v60 = vor.u32 %v13550_v37, %v12381_v61  ;;  %v8246_v18 = vadd.f32 %v14057_v55, %v4279_v62  ;;  %v7926_v55 = vadd.f32 %v7925_v28, %v7913_v54 }
 0x4e0   : > { %8176 = vmatpush.bf16.msrb.mxu2 %v12064_v23  ;;  %8151 = vmatpush.bf16.msrb.mxu0 %v10976_v31  ;;  %v10781_v7 = vld [vmem:[#allocation8 + $0x1f8] sm:$0xf0]  ;;  %v7938_v31 = vpop.f32.mrf.mxu3 }
 0x4e1   : > { %8145 = vmatmul.bf16.vlgmr.msra.gmra.mxu3 %v14011_v46  ;;  %v13278_v63 = vld [vmem:[#allocation8 + $0x5bc] sm:$0xf]  ;;  %v10784_v19 = vor.u32 %v13150_v5, %v10781_v7  ;;  %v12578_v3 = vmul.f32 -1.442695, %v8247_v33  ;;  %v14119_v40 = vadd.f32 %v7938_v31, %v7926_v55  ;;  %v7927_v5 = vpop.f32.mrf.mxu2 }
 0x4e2   : > { %8189 = vmatpush.bf16.msrb.mxu3 %v12576_v16  ;;  %8164 = vmatpush.bf16.msrb.mxu1 %v11488_v29  ;;  %v13406_v11 = vld [vmem:[#allocation8 + $0x9bc] sm:$0xf]  ;;  %v11296_v20 = vor.u32 %v13278_v63, %v11293_v9 }
 0x4e3   : > { %v11805_v12 = vld [vmem:[#allocation8 + $0x9f8] sm:$0xf0]  ;;  %13640 = vpow2.f32 %v12578_v3 }
 0x4e4   : > { %8177 = vmatpush.bf16.msrb.mxu2 %v12000_v35  ;;  %8152 = vmatpush.bf16.msrb.mxu0 %v10912_v10  ;;  %v13534_v13 = vld [vmem:[#allocation8 + $0xdbc] sm:$0xf]  ;;  %v11808_v57 = vor.u32 %v13406_v11, %v11805_v12  ;;  %v12577_v35 = vmul.f32 -1.442695, %v8246_v18 }
 0x4e5   : > { %v12317_v58 = vld [vmem:[#allocation8 + $0xdf8] sm:$0xf0] }
 0x4e6   : > { %8190 = vmatpush.bf16.msrb.mxu3 %v12512_v14  ;;  %8165 = vmatpush.bf16.msrb.mxu1 %v11424_v21  ;;  %v13134_v23 = vld [vmem:[#allocation8 + $0x13c] sm:$0xf]  ;;  %v12320_v24 = vor.u32 %v13534_v13, %v12317_v58  ;;  %13642 = vpow2.f32 %v12577_v35 }
 0x4e7   : > { %v10717_v16 = vld [vmem:[#allocation8 + $0x178] sm:$0xf0] }
 0x4e8   : > { %8178 = vmatpush.bf16.msrb.mxu2 %v11936_v41  ;;  %8153 = vmatpush.bf16.msrb.mxu0 %v10848_v0  ;;  %v13262_v25 = vld [vmem:[#allocation8 + $0x53c] sm:$0xf]  ;;  %v10720_v14 = vor.u32 %v13134_v23, %v10717_v16  ;;  %v7940_v7 = vpop.f32.mrf.mxu3 }
 0x4e9   : > { %v11229_v26 = vld [vmem:[#allocation8 + $0x578] sm:$0xf0] }
 0x4ea   : > { %8191 = vmatpush.bf16.msrb.mxu3 %v12448_v53  ;;  %8166 = vmatpush.bf16.msrb.mxu1 %v11360_v4  ;;  %v13390_v27 = vld [vmem:[#allocation8 + $0x93c] sm:$0xf]  ;;  %v11232_v36 = vor.u32 %v13262_v25, %v11229_v26 }
 0x4eb   : > { %v11741_v29 = vld [vmem:[#allocation8 + $0x978] sm:$0xf0] }
 0x4ec   : > { %8179 = vmatpush.bf16.msrb.mxu2 %v11872_v8  ;;  %v13518_v32 = vld [vmem:[#allocation8 + $0xd3c] sm:$0xf]  ;;  %8154 = vmatpush.bf16.msrb.mxu0 %v10784_v19  ;;  %v11744_v44 = vor.u32 %v13390_v27, %v11741_v29  ;;  %v13641_v8 = vpop.eup %13640 }
 0x4ed   : > { %v12253_v17 = vld [vmem:[#allocation8 + $0xd78] sm:$0xf0]  ;;  %v13643_v9 = vpop.eup %13642  ;;  %v8272_v12 = vadd.f32 1.0, %v13641_v8 }
 0x4ee   : > { %8192 = vmatpush.bf16.msrb.mxu3 %v12384_v60  ;;  %8167 = vmatpush.bf16.msrb.mxu1 %v11296_v20  ;;  %v13118_v38 = vld [vmem:[#allocation8 + $0xbc] sm:$0xf]  ;;  %v12256_v10 = vor.u32 %v13518_v32, %v12253_v17  ;;  %v8253_v13 = vadd.f32 1.0, %v13643_v9 }
 0x4ef   : > { %v10653_v39 = vld [vmem:[#allocation8 + $0xf8] sm:$0xf0]  ;;  %13644 = vrcp.f32 %v8272_v12  ;;  %v8284_v42 = vand.u32 2147483648, %v8272_v12  ;;  %vm8278_vm6 = vweird.f32 %v8272_v12 }
 0x4f0   : > { %8180 = vmatpush.bf16.msrb.mxu2 %v11808_v57  ;;  %v13246_v21 = vld [vmem:[#allocation8 + $0x4bc] sm:$0xf]  ;;  %8155 = vmatpush.bf16.msrb.mxu0 %v10720_v14  ;;  %v10656_v56 = vor.u32 %v13118_v38, %v10653_v39  ;;  %13646 = vrcp.f32 %v8253_v13  ;;  %vm8259_vm8 = vweird.f32 %v8253_v13 }
 0x4f1   : > { %v11165_v45 = vld [vmem:[#allocation8 + $0x4f8] sm:$0xf0]  ;;  %v7951_v19 = vpop.f32.mrf.mxu0 }
 0x4f2   : > { %8193 = vmatpush.bf16.msrb.mxu3 %v12320_v24  ;;  %v13374_v47 = vld [vmem:[#allocation8 + $0x8bc] sm:$0xf]  ;;  %8168 = vmatpush.bf16.msrb.mxu1 %v11232_v36  ;;  %v11168_v2 = vor.u32 %v13246_v21, %v11165_v45  ;;  %v8285_v45 = vor.u32 1.1754944e-38, %v8284_v42 }
 0x4f3   : > { %v11677_v34 = vld [vmem:[#allocation8 + $0x8f8] sm:$0xf0]  ;;  %v7964_v20 = vpop.f32.mrf.mxu1 }
 0x4f4   : > { %v13502_v41 = vld [vmem:[#allocation8 + $0xcbc] sm:$0xf]  ;;  %8181 = vmatpush.bf16.msrb.mxu2 %v11744_v44  ;;  %v11680_v37 = vor.u32 %v13374_v47, %v11677_v34  ;;  %8156 = vmatpush.bf16.msrb.mxu0 %v10656_v56  ;;  %v7965_v23 = vadd.f32 %v7964_v20, %v7951_v19  ;;  %v8282_v44 = vand.u32 2147483647, %v8272_v12 }
 0x4f5   : > { %v12189_v53 = vld [vmem:[#allocation8 + $0xcf8] sm:$0xf0]  ;;  %v13645_v58 = vpop.eup %13644 }
 0x4f6   : > { %v13102_v51 = vld [vmem:[#allocation8 + $0x3c] sm:$0xf]  ;;  %8194 = vmatpush.bf16.msrb.mxu3 %v12256_v10  ;;  %v12192_v61 = vor.u32 %v13502_v41, %v12189_v53  ;;  %8169 = vmatpush.bf16.msrb.mxu1 %v11168_v2  ;;  %v13647_v18 = vpop.eup %13646  ;;  %v8274_v16 = vmul.f32 %v13645_v58, %v8272_v12  ;;  %vm8279_vm4 = vweird.f32 %v13645_v58  ;;  %v8263_v10 = vand.u32 2147483647, %v8253_v13 }
 0x4f7   : > { %v10589_v59 = vld [vmem:[#allocation8 + $0x78] sm:$0xf0]  ;;  %v8255_v3 = vmul.f32 %v13647_v18, %v8253_v13  ;;  %vm8260_vm5 = vweird.f32 %v13647_v18  ;;  %vm8280_vm7 = vmor %vm8278_vm6, %vm8279_vm4  ;;  %vm8283_vm10 = vcmp.eq.f32.partialorder %v8282_v44, 8.507059e+37 }
 0x4f8   : > { %v13230_v62 = vld [vmem:[#allocation8 + $0x43c] sm:$0xf]  ;;  %v10592_v60 = vor.u32 %v13102_v51, %v10589_v59  ;;  %8182 = vmatpush.bf16.msrb.mxu2 %v11680_v37  ;;  %v8275_v25 = vsub.f32 1.0, %v8274_v16  ;;  %vm8261_vm9 = vmor %vm8259_vm8, %vm8260_vm5  ;;  %vm8264_vm11 = vcmp.eq.f32.partialorder %v8263_v10, 8.507059e+37  ;;  %v8314_v37 = vstv %s14100_s20 }
 0x4f9   : > { %v11101_v0 = vld [vmem:[#allocation8 + $0x478] sm:$0xf0]  ;;  %v8256_v27 = vsub.f32 1.0, %v8255_v3  ;;  %v7953_v28 = vpop.f32.mrf.mxu0  ;;  %vm8315_vm12 = vcmp.gt.s32.totalorder %v13791_v1, %v8314_v37 }
 0x4fa   : > { %v13358_v4 = vld [vmem:[#allocation8 + $0x83c] sm:$0xf]  ;;  %v11104_v63 = vor.u32 %v13230_v62, %v11101_v0  ;;  %8195 = vmatpush.bf16.msrb.mxu3 %v12192_v61  ;;  %8157 = vmatpush.bf16.msrb.mxu0 %v10592_v60  ;;  %v8276_v31 = vmul.f32 %v13645_v58, %v8275_v25 }
 0x4fb   : > { %v11613_v6 = vld [vmem:[#allocation8 + $0x878] sm:$0xf0]  ;;  %v7977_v57 = vpop.f32.mrf.mxu2  ;;  %v8257_v17 = vmul.f32 %v13647_v18, %v8256_v27 }
 0x4fc   : > { %v13486_v48 = vld [vmem:[#allocation8 + $0xc3c] sm:$0xf]  ;;  %v11616_v11 = vor.u32 %v13358_v4, %v11613_v6  ;;  %8170 = vmatpush.bf16.msrb.mxu1 %v11104_v63  ;;  %v7978_v26 = vadd.f32 %v7977_v57, %v7965_v23  ;;  %v8277_v38 = vadd.f32 %v13645_v58, %v8276_v31  ;;  %v8316_v4 = vsel %vm8315_vm12, 1, %v13746_v50 }
 0x4fd   : > { %v12125_v33 = vld [vmem:[#allocation8 + $0xc78] sm:$0xf0]  ;;  %8158 = vmatmul.bf16.vlgmr.msrb.gmra.mxu0 %v14005_v43  ;;  %v7990_v24 = vpop.f32.mrf.mxu3  ;;  %v14126_v43 = vld [vmem:[%s14110_s24 + $0x8] sm:$0xff]  ;;  %v8258_v52 = vadd.f32 %v13647_v18, %v8257_v17  ;;  %8318 = vperm.xlu0 %13623, %v8316_v4  }
 0x4fe   : > { %v12128_v54 = vor.u32 %v13486_v48, %v12125_v33  ;;  %8183 = vmatpush.bf16.msrb.mxu2 %v11616_v11  ;;  %v4281_v32 = vunpack.c.l.bf16 %v14126_v43  ;;  %v8281_v21 = vsel %vm8280_vm7, %v13645_v58, %v8277_v38  ;;  %v14133_v47 = vld [vmem:[#allocation5] sm:$0xff]  ;;  %v4282_v42 = vunpack.c.h.bf16 %v14126_v43 }
 0x4ff   : > { %8171 = vmatmul.bf16.vlgmr.msrb.gmra.mxu1 %v14007_v30  ;;  %v7991_v30 = vadd.f32 %v7990_v24, %v7978_v26  ;;  %v8286_v41 = vsel %vm8283_vm10, %v8285_v45, %v8281_v21 }
 0x500   : > { %8196 = vmatpush.bf16.msrb.mxu3 %v12128_v54  ;;  %v8309_v2 = vmul.f32 %v14133_v47, %v8286_v41 }
 0x501   : > { %8184 = vmatmul.bf16.vlgmr.msrb.gmra.mxu2 %v14009_v22  ;;  %v7966_v22 = vpop.f32.mrf.mxu1  ;;  %v8226_v29 = vrot.slane %v7991_v30, 2 }
 0x503   : > { %8197 = vmatmul.bf16.vlgmr.msrb.gmra.mxu3 %v14011_v46  ;;  %v8225_v46 = vrot.slane %v14119_v40, 4  ;;  %v7979_v14 = vpop.f32.mrf.mxu2  ;;  %v8265_v40 = vand.u32 2147483648, %v8253_v13 }
 0x505   : > { %v8237_v55 = vsel %vm4079_vm1, %v8225_v46, %v8226_v29  ;;  %v7992_v36 = vpop.f32.mrf.mxu3  ;;  %v8266_v34 = vor.u32 1.1754944e-38, %v8265_v40 }
 0x506   : > { %v8238_v35 = vsel %vm4081_vm2, %v14104_v49, %v8237_v55  ;;  %v8262_v49 = vsel %vm8261_vm9, %v13647_v18, %v8258_v52 }
 0x507   : > { %v8248_v39 = vadd.f32 %v8238_v35, %v4281_v32  ;;  %v8267_v56 = vsel %vm8264_vm11, %v8266_v34, %v8262_v49 }
 0x509   : > { %13648 = vtanh.f32 %v8248_v39 }
 0x50f   : > { %v13649_v53 = vpop.eup %13648 }
 0x510   : > { %v8310_v51 = vmul.f32 %v13649_v53, %v8267_v56 }
 0x512   : > { %v14136_v59 = vadd.f32 %v8310_v51, %v8309_v2 }
 0x513   : > { %v8003_v61 = vpop.f32.mrf.mxu0 }
 0x515   : > { %v8016_v62 = vpop.f32.mrf.mxu1 }
 0x516   : > { %v8017_v0 = vadd.f32 %v8016_v62, %v8003_v61 }
 0x51b   : > { %v8005_v33 = vpop.f32.mrf.mxu0 }
 0x51d   : > { %v8029_v5 = vpop.f32.mrf.mxu2  ;;  %v8018_v8 = vpop.f32.mrf.mxu1 }
 0x51e   : > { %v8030_v6 = vadd.f32 %v8029_v5, %v8017_v0 }
 0x51f   : > { %v8042_v7 = vpop.f32.mrf.mxu3 }
 0x520   : > { %v8043_v48 = vadd.f32 %v8042_v7, %v8030_v6 }
 0x525   : > { %v8031_v60 = vpop.f32.mrf.mxu2 }
 0x527   : > { %v8044_v63 = vpop.f32.mrf.mxu3 }
 0x535   : > { %v8055_v9 = vpop.f32.mrf.mxu0 }
 0x537   : > { %v8068_v11 = vpop.f32.mrf.mxu1 }
 0x538   : > { %v8069_v26 = vadd.f32 %v8068_v11, %v8055_v9 }
 0x53d   : > { %v8057_v13 = vpop.f32.mrf.mxu0 }
 0x53f   : > { %v8081_v54 = vpop.f32.mrf.mxu2  ;;  %v8070_v58 = vpop.f32.mrf.mxu1 }
 0x540   : > { %v8082_v22 = vadd.f32 %v8081_v54, %v8069_v26 }
 0x541   : > { %v8094_v12 = vpop.f32.mrf.mxu3 }
 0x542   : > { %v8095_v29 = vadd.f32 %v8094_v12, %v8082_v22 }
 0x544   : > { %v8227_v38 = vrot.slane %v8095_v29, 6 }
 0x546   : > { %v8239_v40 = vsel %vm4077_vm0, %v8043_v48, %v8227_v38 }
 0x547   : > { %v8083_v18 = vpop.f32.mrf.mxu2 }
 0x549   : > { %v8096_v19 = vpop.f32.mrf.mxu3 }
 0x558   : > { %v8107_v20 = vpop.f32.mrf.mxu0 }
 0x55a   : > { %v8120_v23 = vpop.f32.mrf.mxu1 }
 0x55b   : > { %v8121_v27 = vadd.f32 %v8120_v23, %v8107_v20 }
 0x560   : > { %v8109_v3 = vpop.f32.mrf.mxu0 }
 0x562   : > { %v8133_v50 = vpop.f32.mrf.mxu2  ;;  %v8122_v57 = vpop.f32.mrf.mxu1 }
 0x563   : > { %v8134_v31 = vadd.f32 %v8133_v50, %v8121_v27 }
 0x564   : > { %v8146_v16 = vpop.f32.mrf.mxu3 }
 0x565   : > { %v8147_v55 = vadd.f32 %v8146_v16, %v8134_v31 }
 0x567   : > { %v8228_v52 = vrot.slane %v8147_v55, 4 }
 0x56a   : > { %v8135_v24 = vpop.f32.mrf.mxu2 }
 0x56c   : > { %v8148_v25 = vpop.f32.mrf.mxu3 }
 0x56f   : > { %v8319_v9 = vpop.permute.xlu0 %8318 }
 0x570   : > { %vm8320_vm4 = vcmp.eq.s32.totalorder %v8319_v9, 1 }
 0x57a   : > { %v8159_v30 = vpop.f32.mrf.mxu0 }
 0x57c   : > { %v8172_v28 = vpop.f32.mrf.mxu1 }
 0x57d   : > { %v8173_v46 = vadd.f32 %v8172_v28, %v8159_v30 }
 0x582   : > { %v8161_v14 = vpop.f32.mrf.mxu0 }
 0x584   : > { %v8185_v32 = vpop.f32.mrf.mxu2  ;;  %v8174_v36 = vpop.f32.mrf.mxu1 }
 0x585   : > { %v8186_v35 = vadd.f32 %v8185_v32, %v8173_v46 }
 0x586   : > { %v8198_v17 = vpop.f32.mrf.mxu3 }
 0x587   : > { %v8199_v39 = vadd.f32 %v8198_v17, %v8186_v35 }
 0x589   : > { %v8229_v44 = vrot.slane %v8199_v39, 2 }
 0x58b   : > { %v8240_v10 = vsel %vm4079_vm1, %v8228_v52, %v8229_v44 }
 0x58c   : > { %v8241_v21 = vsel %vm4081_vm2, %v8239_v40, %v8240_v10  ;;  %v8187_v45 = vpop.f32.mrf.mxu2 }
 0x58d   : > { %v8249_v34 = vadd.f32 %v8241_v21, %v4282_v42 }
 0x58e   : > { %v8200_v49 = vpop.f32.mrf.mxu3 }
 0x58f   : > { %v12579_v41 = vmul.f32 -1.442695, %v8249_v34 }
 0x591   : > { %13650 = vpow2.f32 %v12579_v41 }
 0x597   : > { %v13651_v53 = vpop.eup %13650 }
 0x598   : > { %v8292_v56 = vadd.f32 1.0, %v13651_v53 }
 0x59a   : > { %13652 = vrcp.f32 %v8292_v56  ;;  %v8304_v43 = vand.u32 2147483648, %v8292_v56  ;;  %v8302_v62 = vand.u32 2147483647, %v8292_v56  ;;  %vm8298_vm14 = vweird.f32 %v8292_v56 }
 0x59b   : > { %13654 = vtanh.f32 %v14136_v59 }
 0x59c   : > { %v8305_v4 = vor.u32 1.1754944e-38, %v8304_v43  ;;  %vm8303_vm3 = vcmp.eq.f32.partialorder %v8302_v62, 8.507059e+37 }
 0x5a0   : > { %v13653_v2 = vpop.eup %13652 }
 0x5a1   : > { %v8294_v51 = vmul.f32 %v13653_v2, %v8292_v56  ;;  %vm8299_vm13 = vweird.f32 %v13653_v2  ;;  %v13655_v7 = vpop.eup %13654 }
 0x5a2   : > { %vm8300_vm15 = vmor %vm8298_vm14, %vm8299_vm13 }
 0x5a3   : > { %v8295_v37 = vsub.f32 1.0, %v8294_v51 }
 0x5a5   : > { %v8296_v61 = vmul.f32 %v13653_v2, %v8295_v37 }
 0x5a7   : > { %v8297_v0 = vadd.f32 %v13653_v2, %v8296_v61 }
 0x5a9   : > { %v8301_v5 = vsel %vm8300_vm15, %v13653_v2, %v8297_v0 }
 0x5aa   : > { %v8306_v6 = vsel %vm8303_vm3, %v8305_v4, %v8301_v5 }
 0x5ab   : > { %v8313_v48 = vmul.f32 %v13655_v7, %v8306_v6 }
 0x5ad   : > { %8322 = vst [vmem:[#allocation1] ss:$4 sm:$0xff] %v8313_v48 }
 0x5b4   : > { %v8323_v33 = vld.sshfl [vmem:[#allocation1] sm:$0xff pattern:$0x73625140]  ;;  %v8324_v8 = vld.sshfl [vmem:[#allocation1 + $0x8] sm:$0xff pattern:$0x73625140] }
 0x5b5   : > { %v8325_v60 = vld.sshfl [vmem:[#allocation1 + $0x10] sm:$0xff pattern:$0x73625140]  ;;  %v8326_v63 = vld.sshfl [vmem:[#allocation1 + $0x18] sm:$0xff pattern:$0x73625140] }
 0x5b6   : > { %8331 = vst [vmem:[#allocation1] ss:$4 sm:$0xff] %v13988_v15 }
 0x5bd   : > { %v8332_v11 = vld.sshfl [vmem:[#allocation1] sm:$0xff pattern:$0x73625140]  ;;  %v8333_v54 = vld.sshfl [vmem:[#allocation1 + $0x8] sm:$0xff pattern:$0x73625140] }
 0x5be   : > { %v8334_v12 = vld.sshfl [vmem:[#allocation1 + $0x10] sm:$0xff pattern:$0x73625140]  ;;  %v8335_v13 = vld.sshfl [vmem:[#allocation1 + $0x18] sm:$0xff pattern:$0x73625140]  ;;  %v8341_v58 = vsel %vm8320_vm4, %v8324_v8, %v8333_v54  ;;  %v8340_v23 = vsel %vm8320_vm4, %v8323_v33, %v8332_v11 }
 0x5bf   : > { %v8342_v18 = vsel %vm8320_vm4, %v8325_v60, %v8334_v12  ;;  %v8343_v19 = vsel %vm8320_vm4, %v8326_v63, %v8335_v13  ;;  %v8348_v20 = vrot.slane %v8341_v58, 6  ;;  %8358 = vst [vmem:[#allocation1] ss:$4 sm:$0xff] %v14136_v59 }
 0x5c0   : > { %v8349_v50 = vrot.slane %v8342_v18, 4  ;;  %v8350_v16 = vrot.slane %v8343_v19, 2 }
 0x5c1   : > { %v8351_v15 = vsel %vm4077_vm0, %v8340_v23, %v8348_v20 }
 0x5c2   : > { %v8352_v3 = vsel %vm4079_vm1, %v8349_v50, %v8350_v16 }
 0x5c3   : > { %v8353_v57 = vsel %vm4081_vm2, %v8351_v15, %v8352_v3 }
 0x5c4   : > { %8355 = vst [vmem:[#allocation4] sm:$0xff] %v8353_v57 }
 0x5c6   : > { %v8359_v24 = vld.sshfl [vmem:[#allocation1] sm:$0xff pattern:$0x73625140]  ;;  %v8360_v25 = vld.sshfl [vmem:[#allocation1 + $0x8] sm:$0xff pattern:$0x73625140] }
 0x5c7   : > { %v8361_v26 = vld.sshfl [vmem:[#allocation1 + $0x10] sm:$0xff pattern:$0x73625140]  ;;  %v8362_v27 = vld.sshfl [vmem:[#allocation1 + $0x18] sm:$0xff pattern:$0x73625140] }
 0x5c8   : > { %8368 = vst [vmem:[#allocation1] ss:$4 sm:$0xff] %v14133_v47 }
 0x5cf   : > { %v8369_v30 = vld.sshfl [vmem:[#allocation1] sm:$0xff pattern:$0x73625140]  ;;  %v8370_v59 = vld.sshfl [vmem:[#allocation1 + $0x8] sm:$0xff pattern:$0x73625140] }
 0x5d0   : > { %v8371_v28 = vld.sshfl [vmem:[#allocation1 + $0x10] sm:$0xff pattern:$0x73625140]  ;;  %v8372_v22 = vld.sshfl [vmem:[#allocation1 + $0x18] sm:$0xff pattern:$0x73625140]  ;;  %v8378_v31 = vsel %vm8320_vm4, %v8360_v25, %v8370_v59  ;;  %v8377_v17 = vsel %vm8320_vm4, %v8359_v24, %v8369_v30 }
 0x5d1   : > { %v8379_v46 = vsel %vm8320_vm4, %v8361_v26, %v8371_v28  ;;  %v8380_v29 = vsel %vm8320_vm4, %v8362_v27, %v8372_v22  ;;  %v8385_v32 = vrot.slane %v8378_v31, 6  ;;  %8393 = vst [vmem:[#allocation1] ss:$4 sm:$0xff] %v8313_v48 }
 0x5d2   : > { %v8386_v55 = vrot.slane %v8379_v46, 4  ;;  %v8387_v35 = vrot.slane %v8380_v29, 2 }
 0x5d3   : > { %v8388_v14 = vsel %vm4077_vm0, %v8377_v17, %v8385_v32 }
 0x5d4   : > { %v8389_v47 = vsel %vm4079_vm1, %v8386_v55, %v8387_v35 }
 0x5d5   : > { %v8390_v36 = vsel %vm4081_vm2, %v8388_v14, %v8389_v47 }
 0x5d6   : > { %8392 = vst [vmem:[#allocation5] sm:$0xff] %v8390_v36 }
 0x5d8   : > { %v8394_v38 = vld.sshfl [vmem:[#allocation1] sm:$0xff pattern:$0x73625140]  ;;  %v8395_v39 = vld.sshfl [vmem:[#allocation1 + $0x8] sm:$0xff pattern:$0x73625140] }
 0x5d9   : > { %v8396_v42 = vld.sshfl [vmem:[#allocation1 + $0x10] sm:$0xff pattern:$0x73625140]  ;;  %v8397_v52 = vld.sshfl [vmem:[#allocation1 + $0x18] sm:$0xff pattern:$0x73625140] }
 0x5da   : > { %v8403_v44 = vsel %vm8320_vm4, %v8395_v39, 0.0  ;;  %v8404_v40 = vsel %vm8320_vm4, %v8396_v42, 0.0  ;;  %v8405_v10 = vsel %vm8320_vm4, %v8397_v52, 0.0  ;;  %v8402_v34 = vsel %vm8320_vm4, %v8394_v38, 0.0 }
 0x5db   : > { %v8410_v21 = vrot.slane %v8403_v44, 6  ;;  %v8411_v45 = vrot.slane %v8404_v40, 4  ;;  %v8412_v49 = vrot.slane %v8405_v10, 2  ;;  %118 = sbr.rel (!%p116_p0) target bundleno = 18 (0x12), region = 82 }
 0x5dd   : > { %v8413_v41 = vsel %vm4077_vm0, %v8402_v34, %v8410_v21  ;;  %v8414_v53 = vsel %vm4079_vm1, %v8411_v45, %v8412_v49 }
 0x5de   : > { %v8415_v56 = vsel %vm4081_vm2, %v8413_v41, %v8414_v53 }
 0x5df   : > { %8420 = vst [vmem:[%s8419_s28] sm:$0xff] %v8415_v56 }
 0x5e0   :  { %8445 = vsyncpa [#allocation7], 1 }
 0x5e1   :  { %8446 = vsyncpa [#allocation9], 1 }

</bundles_post_ra>
